<compile_context>
chip_gen: v5e
topology: v5e:2x2
jax: 0.10.0
libtpu: 0.0.40
codegen_flags: <defaults>
</compile_context>

<pallas_src>
import numpy as np
import jax
import jax.numpy as jnp
from jax import lax
from jax.experimental import pallas as pl
from jax.experimental.pallas import tpu as pltpu

N_TILE = 128        # nodes per scatter output tile (lane/sublane friendly)
E_TILE_MLP = 256    # edges per message-MLP tile (matches 256-wide MXU)
E_TILE_SC = 128     # edges per scatter tile (keeps per-row where-temp in vregs)
F_PAD = 128         # every layer's output feature dim padded to this
VMEM_LIMIT = 32 * 1024 * 1024   # safe on v5e / v6e / v7x


def _round_up(x, m):
    return (x + m - 1) // m * m


# ----------------------------------------------------------------------------
# Pass 1: edge MLP -> messages  (grid over edge tiles only)
# ----------------------------------------------------------------------------
def _make_msg_kernel(n_lin):
    def kernel(*refs):
        xi_ref, xj_ref = refs[0], refs[1]
        wa_ref, wb_ref, b0_ref = refs[2], refs[3], refs[4]
        rest = refs[5:5 + 2 * (n_lin - 1)]
        out_ref = refs[5 + 2 * (n_lin - 1)]

        xi = xi_ref[...]
        xj = xj_ref[...]
        # sigmoid(concat([x_i, x_j - x_i]) @ W0 + b0) with W0 split as [Wa; Wb]
        h = jax.nn.sigmoid(
            jnp.dot(xi, wa_ref[...], preferred_element_type=jnp.float32)
            + jnp.dot(xj - xi, wb_ref[...], preferred_element_type=jnp.float32)
            + b0_ref[...])
        for l in range(n_lin - 1):
            w = rest[2 * l][...]
            b = rest[2 * l + 1][...]
            h = jax.nn.sigmoid(
                jnp.dot(h, w, preferred_element_type=jnp.float32) + b)
        out_ref[...] = h
    return kernel


# ----------------------------------------------------------------------------
# Pass 2: scatter-max of messages into node tiles
#   grid = (node_tiles 'parallel', edge_tiles 'arbitrary')
# ----------------------------------------------------------------------------
def _scatter_max_kernel(msg_ref, dst_ref, out_ref):
    ni = pl.program_id(0)
    ei = pl.program_id(1)

    @pl.when(ei == 0)
    def _init():
        out_ref[...] = jnp.zeros_like(out_ref)

    msgs = msg_ref[...]          # (E_TILE_SC, F_PAD), strictly in (0, 1)
    dst = dst_ref[...]           # (E_TILE_SC, 1) int32, padded edges carry -1
    base = ni * N_TILE

    # Per-row masked max: 2-D (E_TILE_SC, F_PAD) where+reduce fits in vregs
    # (no 3-D temp -> no VMEM spill).  Messages > 0, so 0 is a safe identity
    # and isolated / padded nodes stay at 0 (matches the reference).
    def body(r, carry):
        node = base + r
        contrib = jnp.max(jnp.where(dst == node, msgs, 0.0),
                          axis=0, keepdims=True)            # (1, F_PAD)
        row = out_ref[pl.ds(r, 1), :]
        out_ref[pl.ds(r, 1), :] = jnp.maximum(row, contrib)
        return carry

    lax.fori_loop(0, N_TILE, body, 0)


def edgeconv_pallas(x, src, dst, layers):
    """One EdgeConv(nn=MLP(layers), aggr='max') layer.

    x: (n or n_pad, f) float32 -- columns beyond the layer's real input dim are
    ignored via zero rows in the split weights.  Returns (n_pad, F_PAD).
    """
    e = src.shape[0]
    n_pad = _round_up(x.shape[0], N_TILE)
    e_pad = _round_up(e, E_TILE_MLP)          # multiple of E_TILE_SC too

    n_lin = len(layers)
    w0, b0 = layers[0]
    f_in_real = w0.shape[0] // 2
    f_in_pad = _round_up(x.shape[1], 8)
    f_out_real = layers[-1][0].shape[1]
    f_out_pad = _round_up(f_out_real, F_PAD)

    # Edge-endpoint gather stays in XLA glue (see TODO at top of file).
    x_i = x[dst]                              # target node features
    x_j = x[src]                              # source node features
    x_i = jnp.pad(x_i, ((0, e_pad - e), (0, f_in_pad - x.shape[1])))
    x_j = jnp.pad(x_j, ((0, e_pad - e), (0, f_in_pad - x.shape[1])))

    # Split + pad weights: W0 = [Wa; Wb]; zero rows beyond f_in_real nullify
    # padded / junk input columns, zero output columns pad Fout to 128.
    wa = jnp.pad(w0[:f_in_real], ((0, f_in_pad - f_in_real), (0, 0)))
    wb = jnp.pad(w0[f_in_real:2 * f_in_real],
                 ((0, f_in_pad - f_in_real), (0, 0)))
    bb0 = b0.reshape(1, -1)
    if n_lin == 1:
        wa = jnp.pad(wa, ((0, 0), (0, f_out_pad - f_out_real)))
        wb = jnp.pad(wb, ((0, 0), (0, f_out_pad - f_out_real)))
        bb0 = jnp.pad(bb0, ((0, 0), (0, f_out_pad - f_out_real)))
    rest = []
    for li in range(1, n_lin):
        w, b = layers[li]
        bb = b.reshape(1, -1)
        if li == n_lin - 1:
            w = jnp.pad(w, ((0, 0), (0, f_out_pad - f_out_real)))
            bb = jnp.pad(bb, ((0, 0), (0, f_out_pad - f_out_real)))
        rest += [w, bb]

    # ---- Pass 1: edge MLP (edge tiles only; no per-node-tile recompute) ----
    msg_in_specs = [
        pl.BlockSpec((E_TILE_MLP, f_in_pad), lambda ei: (ei, 0)),
        pl.BlockSpec((E_TILE_MLP, f_in_pad), lambda ei: (ei, 0)),
        pl.BlockSpec(wa.shape, lambda ei: (0, 0)),
        pl.BlockSpec(wb.shape, lambda ei: (0, 0)),
        pl.BlockSpec(bb0.shape, lambda ei: (0, 0)),
    ]
    for arr in rest:
        msg_in_specs.append(pl.BlockSpec(arr.shape, lambda ei: (0, 0)))

    messages = pl.pallas_call(
        _make_msg_kernel(n_lin),
        out_shape=jax.ShapeDtypeStruct((e_pad, f_out_pad), jnp.float32),
        grid=(e_pad // E_TILE_MLP,),
        in_specs=msg_in_specs,
        out_specs=pl.BlockSpec((E_TILE_MLP, f_out_pad), lambda ei: (ei, 0)),
        compiler_params=pltpu.CompilerParams(
            dimension_semantics=("parallel",),
            vmem_limit_bytes=VMEM_LIMIT),
    )(x_i, x_j, wa, wb, bb0, *rest)

    # ---- Pass 2: scatter-max into node tiles ----
    dst_col = jnp.pad(dst.astype(jnp.int32), (0, e_pad - e),
                      constant_values=-1).reshape(e_pad, 1)

    out = pl.pallas_call(
        _scatter_max_kernel,
        out_shape=jax.ShapeDtypeStruct((n_pad, f_out_pad), jnp.float32),
        grid=(n_pad // N_TILE, e_pad // E_TILE_SC),
        in_specs=[
            pl.BlockSpec((E_TILE_SC, f_out_pad), lambda ni, ei: (ei, 0)),
            pl.BlockSpec((E_TILE_SC, 1), lambda ni, ei: (ei, 0)),
        ],
        out_specs=pl.BlockSpec((N_TILE, f_out_pad), lambda ni, ei: (ni, 0)),
        compiler_params=pltpu.CompilerParams(
            dimension_semantics=("parallel", "arbitrary"),
            vmem_limit_bytes=VMEM_LIMIT),
    )(messages, dst_col)
    return out


# ----------------------------------------------------------------------------
# Graph max pooling + output MLP head, gridded over node tiles with a
# resident (g_pad, F) running-max scratch; head matmuls only on the last tile.
# ----------------------------------------------------------------------------
def _make_pool_head_kernel(g_pad):
    def kernel(x_ref, batch_ref, w1_ref, b1_ref, w2_ref, b2_ref,
               out_ref, pooled_ref):
        t = pl.program_id(0)

        @pl.when(t == 0)
        def _init():
            pooled_ref[...] = jnp.zeros_like(pooled_ref)
            out_ref[...] = jnp.zeros_like(out_ref)

        x = x_ref[...]          # (N_TILE, F), all >= 0 (sigmoid outputs / 0 pad)
        b = batch_ref[...]      # (N_TILE, 1) int32, padded nodes carry -1

        def body(g, carry):
            contrib = jnp.max(jnp.where(b == g, x, 0.0),
                              axis=0, keepdims=True)         # (1, F)
            row = pooled_ref[pl.ds(g, 1), :]
            pooled_ref[pl.ds(g, 1), :] = jnp.maximum(row, contrib)
            return carry

        lax.fori_loop(0, g_pad, body, 0)

        @pl.when(t == pl.num_programs(0) - 1)
        def _finalize():
            hid = jax.nn.sigmoid(
                jnp.dot(pooled_ref[...], w1_ref[...],
                        preferred_element_type=jnp.float32) + b1_ref[...])
            out_ref[...] = (
                jnp.dot(hid, w2_ref[...], preferred_element_type=jnp.float32)
                + b2_ref[...])
    return kernel


def pool_head_pallas(x, batch, n_graphs, head_layers):
    (w1, b1), (w2, b2) = head_layers
    n = batch.shape[0]
    n_pad = x.shape[0]                      # already a multiple of N_TILE
    f = x.shape[1]
    g_pad = _round_up(max(n_graphs, 1), 8)
    c_real = w2.shape[1]
    c_pad = _round_up(c_real, 128)          # lane-dense output block

    bcol = jnp.pad(batch.astype(jnp.int32), (0, n_pad - n),
                   constant_values=-1).reshape(n_pad, 1)
    b1p = b1.reshape(1, -1)
    w2p = jnp.pad(w2, ((0, 0), (0, c_pad - c_real)))
    b2p = jnp.pad(b2.reshape(1, -1), ((0, 0), (0, c_pad - c_real)))

    out = pl.pallas_call(
        _make_pool_head_kernel(g_pad),
        out_shape=jax.ShapeDtypeStruct((g_pad, c_pad), jnp.float32),
        grid=(n_pad // N_TILE,),
        in_specs=[
            pl.BlockSpec((N_TILE, f), lambda t: (t, 0)),
            pl.BlockSpec((N_TILE, 1), lambda t: (t, 0)),
            pl.BlockSpec(w1.shape, lambda t: (0, 0)),
            pl.BlockSpec(b1p.shape, lambda t: (0, 0)),
            pl.BlockSpec(w2p.shape, lambda t: (0, 0)),
            pl.BlockSpec(b2p.shape, lambda t: (0, 0)),
        ],
        out_specs=pl.BlockSpec((g_pad, c_pad), lambda t: (0, 0)),
        scratch_shapes=[pltpu.VMEM((g_pad, f), jnp.float32)],
        compiler_params=pltpu.CompilerParams(
            dimension_semantics=("arbitrary",),
            vmem_limit_bytes=VMEM_LIMIT),
    )(x, bcol, w1, b1p, w2p, b2p)
    return out[:n_graphs, :c_real]


# ----------------------------------------------------------------------------
# Full forward pass
# ----------------------------------------------------------------------------
def gnn_forward(params, x, src, dst, batch, n_graphs):
    h = edgeconv_pallas(x, src, dst, params["ec1"])   # (n_pad, 128), real :32
    h = edgeconv_pallas(h, src, dst, params["ec2"])   # real :64
    h = edgeconv_pallas(h, src, dst, params["ec3"])   # real :64
    h = edgeconv_pallas(h, src, dst, params["ec4"])   # real :128
    return pool_head_pallas(h, batch, n_graphs, params["head"])


# ----------------------------------------------------------------------------
# Pure-JAX reference for validation
# ----------------------------------------------------------------------------
def reference_forward(params, x, src, dst, batch, n_graphs):
    n = x.shape[0]

    def edgeconv_ref(feat, layers):
        h = jnp.concatenate([feat[dst], feat[src] - feat[dst]], axis=-1)
        for w, b in layers:
            h = jax.nn.sigmoid(h @ w + b)
        agg = jax.ops.segment_max(h, dst, num_segments=n)
        return jnp.where(jnp.isfinite(agg), agg, 0.0)

    h = edgeconv_ref(x, params["ec1"])
    h = edgeconv_ref(h, params["ec2"])
    h = edgeconv_ref(h, params["ec3"])
    h = edgeconv_ref(h, params["ec4"])
    pooled = jax.ops.segment_max(h, batch, num_segments=n_graphs)
    pooled = jnp.where(jnp.isfinite(pooled), pooled, 0.0)
    (w1, b1), (w2, b2) = params["head"]
    hid = jax.nn.sigmoid(pooled @ w1 + b1)
    return hid @ w2 + b2


# ----------------------------------------------------------------------------
def init_params(key, output_classes=10):
    def linear(k, fi, fo):
        k1, k2 = jax.random.split(k)
        bound = 1.0 / np.sqrt(fi)
        return (jax.random.uniform(k1, (fi, fo), jnp.float32, -bound, bound),
                jax.random.uniform(k2, (fo,), jnp.float32, -bound, bound))

    ks = jax.random.split(key, 8)
    return dict(
        ec1=(linear(ks[0], 2 * 3, 64), linear(ks[1], 64, 32)),
        ec2=(linear(ks[2], 2 * 32, 128), linear(ks[3], 128, 64)),
        ec3=(linear(ks[4], 2 * 64, 64),),
        ec4=(linear(ks[5], 2 * 64, 128),),
        head=(linear(ks[6], 128, 256), linear(ks[7], 256, output_classes)),
    )


if __name__ == "__main__":
    key = jax.random.PRNGKey(0)
    k_x, k_p = jax.random.split(key)

    # 2 graphs x 16 nodes, 3-d point features, ring connectivity with 8
    # incoming edges per node  ->  N = 32, E = 256.
    n_graphs, n_per = 2, 16
    n_nodes = n_graphs * n_per
    offs = (1, 2, 3, 4, n_per - 1, n_per - 2, n_per - 3, n_per - 4)
    src_l, dst_l = [], []
    for g in range(n_graphs):
        base = g * n_per
        for i in range(n_per):
            for off in offs:
                src_l.append(base + (i + off) % n_per)
                dst_l.append(base + i)
    src = jnp.array(src_l, dtype=jnp.int32)
    dst = jnp.array(dst_l, dtype=jnp.int32)
    batch = jnp.repeat(jnp.arange(n_graphs, dtype=jnp.int32), n_per)

    x = jax.random.normal(k_x, (n_nodes, 3), dtype=jnp.float32)
    params = init_params(k_p, output_classes=10)

    fwd = jax.jit(gnn_forward, static_argnames=("n_graphs",))
    out = fwd(params, x, src, dst, batch, n_graphs=n_graphs)
    out = jax.block_until_ready(out)

    ref = reference_forward(params, x, src, dst, batch, n_graphs)
    np.testing.assert_allclose(np.asarray(out), np.asarray(ref),
                               rtol=1e-4, atol=1e-4)
    print("KERNEL_OK")
</pallas_src>

<mosaic_0001>
module attributes {stable_mosaic.version = 11 : i64} {
  func.func @kernel(%arg0: i32, %arg1: memref<256x8xf32, #tpu.memory_space<vmem>>, %arg2: memref<256x8xf32, #tpu.memory_space<vmem>>, %arg3: memref<8x64xf32, #tpu.memory_space<vmem>>, %arg4: memref<8x64xf32, #tpu.memory_space<vmem>>, %arg5: memref<1x64xf32, #tpu.memory_space<vmem>>, %arg6: memref<64x128xf32, #tpu.memory_space<vmem>>, %arg7: memref<1x128xf32, #tpu.memory_space<vmem>>, %arg8: memref<256x128xf32, #tpu.memory_space<vmem>>) attributes {dimension_semantics = [#tpu.dimension_semantics<parallel>], iteration_bounds = array<i64: 1>, scalar_prefetch = 0 : i64, scratch_operands = 0 : i64, tpu.core_type = #tpu.core_type<tc>, window_params = [{transform_indices = @transform_0, window_bounds = array<i64: 256, 8>}, {transform_indices = @transform_1, window_bounds = array<i64: 256, 8>}, {pipeline_mode = #tpu.pipeline_mode<synchronous>, transform_indices = @transform_2, window_bounds = array<i64: 8, 64>}, {pipeline_mode = #tpu.pipeline_mode<synchronous>, transform_indices = @transform_3, window_bounds = array<i64: 8, 64>}, {pipeline_mode = #tpu.pipeline_mode<synchronous>, transform_indices = @transform_4, window_bounds = array<i64: 1, 64>}, {pipeline_mode = #tpu.pipeline_mode<synchronous>, transform_indices = @transform_5, window_bounds = array<i64: 64, 128>}, {pipeline_mode = #tpu.pipeline_mode<synchronous>, transform_indices = @transform_6, window_bounds = array<i64: 1, 128>}, {transform_indices = @transform_7, window_bounds = array<i64: 256, 128>}]} {
    %c0 = arith.constant 0 : index
    %c0_0 = arith.constant 0 : index
    %0 = vector.load %arg1[%c0, %c0_0] : memref<256x8xf32, #tpu.memory_space<vmem>>, vector<256x8xf32>
    %c0_1 = arith.constant 0 : index
    %c0_2 = arith.constant 0 : index
    %1 = vector.load %arg2[%c0_1, %c0_2] : memref<256x8xf32, #tpu.memory_space<vmem>>, vector<256x8xf32>
    %c0_3 = arith.constant 0 : index
    %c0_4 = arith.constant 0 : index
    %2 = vector.load %arg3[%c0_3, %c0_4] : memref<8x64xf32, #tpu.memory_space<vmem>>, vector<8x64xf32>
    %cst = arith.constant dense<0.000000e+00> : vector<256x64xf32>
    %3 = tpu.matmul %0, %2, %cst {dimension_numbers = #tpu.dot_dimension_numbers<[1], [0], [0], [1], [0, 0, 1, 1], [], []>} : vector<256x8xf32>, vector<8x64xf32>, vector<256x64xf32> -> vector<256x64xf32>
    %4 = arith.subf %1, %0 : vector<256x8xf32>
    %c0_5 = arith.constant 0 : index
    %c0_6 = arith.constant 0 : index
    %5 = vector.load %arg4[%c0_5, %c0_6] : memref<8x64xf32, #tpu.memory_space<vmem>>, vector<8x64xf32>
    %cst_7 = arith.constant dense<0.000000e+00> : vector<256x64xf32>
    %6 = tpu.matmul %4, %5, %cst_7 {dimension_numbers = #tpu.dot_dimension_numbers<[1], [0], [0], [1], [0, 0, 1, 1], [], []>} : vector<256x8xf32>, vector<8x64xf32>, vector<256x64xf32> -> vector<256x64xf32>
    %7 = arith.addf %3, %6 : vector<256x64xf32>
    %c0_8 = arith.constant 0 : index
    %c0_9 = arith.constant 0 : index
    %8 = vector.load %arg5[%c0_8, %c0_9] : memref<1x64xf32, #tpu.memory_space<vmem>>, vector<1x64xf32>
    %9 = vector.broadcast %8 : vector<1x64xf32> to vector<256x64xf32>
    %10 = arith.addf %7, %9 : vector<256x64xf32>
    %11 = arith.negf %10 : vector<256x64xf32>
    %12 = math.exp %11 : vector<256x64xf32>
    %cst_10 = arith.constant 1.000000e+00 : f32
    %13 = vector.broadcast %cst_10 : f32 to vector<256x64xf32>
    %14 = arith.addf %13, %12 : vector<256x64xf32>
    %15 = arith.divf %13, %14 : vector<256x64xf32>
    %c0_11 = arith.constant 0 : index
    %c0_12 = arith.constant 0 : index
    %16 = vector.load %arg6[%c0_11, %c0_12] : memref<64x128xf32, #tpu.memory_space<vmem>>, vector<64x128xf32>
    %c0_13 = arith.constant 0 : index
    %c0_14 = arith.constant 0 : index
    %17 = vector.load %arg7[%c0_13, %c0_14] : memref<1x128xf32, #tpu.memory_space<vmem>>, vector<1x128xf32>
    %cst_15 = arith.constant dense<0.000000e+00> : vector<256x128xf32>
    %18 = tpu.matmul %15, %16, %cst_15 {dimension_numbers = #tpu.dot_dimension_numbers<[1], [0], [0], [1], [0, 0, 1, 1], [], []>} : vector<256x64xf32>, vector<64x128xf32>, vector<256x128xf32> -> vector<256x128xf32>
    %19 = vector.broadcast %17 : vector<1x128xf32> to vector<256x128xf32>
    %20 = arith.addf %18, %19 : vector<256x128xf32>
    %21 = arith.negf %20 : vector<256x128xf32>
    %22 = math.exp %21 : vector<256x128xf32>
    %cst_16 = arith.constant 1.000000e+00 : f32
    %23 = vector.broadcast %cst_16 : f32 to vector<256x128xf32>
    %24 = arith.addf %23, %22 : vector<256x128xf32>
    %25 = arith.divf %23, %24 : vector<256x128xf32>
    %c0_17 = arith.constant 0 : index
    %c0_18 = arith.constant 0 : index
    %26 = vector.load %arg8[%c0_17, %c0_18] : memref<256x128xf32, #tpu.memory_space<vmem>>, vector<256x128xf32>
    tpu.vector_store %arg8[%c0_17, %c0_18], %25 {strides = array<i32>} : memref<256x128xf32, #tpu.memory_space<vmem>>, vector<256x128xf32>,
    return
  }
  func.func @transform_0(%arg0: i32) -> (i32, i32) {
    %c0_i32 = arith.constant 0 : i32
    %c0_i32_0 = arith.constant 0 : i32
    return %arg0, %c0_i32 : i32, i32
  }
  func.func @transform_1(%arg0: i32) -> (i32, i32) {
    %c0_i32 = arith.constant 0 : i32
    %c0_i32_0 = arith.constant 0 : i32
    return %arg0, %c0_i32 : i32, i32
  }
  func.func @transform_2(%arg0: i32) -> (i32, i32) {
    %c0_i32 = arith.constant 0 : i32
    %c0_i32_0 = arith.constant 0 : i32
    %c0_i32_1 = arith.constant 0 : i32
    return %c0_i32, %c0_i32_0 : i32, i32
  }
  func.func @transform_3(%arg0: i32) -> (i32, i32) {
    %c0_i32 = arith.constant 0 : i32
    %c0_i32_0 = arith.constant 0 : i32
    %c0_i32_1 = arith.constant 0 : i32
    return %c0_i32, %c0_i32_0 : i32, i32
  }
  func.func @transform_4(%arg0: i32) -> (i32, i32) {
    %c0_i32 = arith.constant 0 : i32
    %c0_i32_0 = arith.constant 0 : i32
    %c0_i32_1 = arith.constant 0 : i32
    return %c0_i32, %c0_i32_0 : i32, i32
  }
  func.func @transform_5(%arg0: i32) -> (i32, i32) {
    %c0_i32 = arith.constant 0 : i32
    %c0_i32_0 = arith.constant 0 : i32
    %c0_i32_1 = arith.constant 0 : i32
    return %c0_i32, %c0_i32_0 : i32, i32
  }
  func.func @transform_6(%arg0: i32) -> (i32, i32) {
    %c0_i32 = arith.constant 0 : i32
    %c0_i32_0 = arith.constant 0 : i32
    %c0_i32_1 = arith.constant 0 : i32
    return %c0_i32, %c0_i32_0 : i32, i32
  }
  func.func @transform_7(%arg0: i32) -> (i32, i32) {
    %c0_i32 = arith.constant 0 : i32
    %c0_i32_0 = arith.constant 0 : i32
    return %arg0, %c0_i32 : i32, i32
  }
}

module attributes {stable_mosaic.version = 11 : i64} {
  func.func @_scatter_max_kernel(%arg0: i32, %arg1: i32, %arg2: memref<128x128xf32, #tpu.memory_space<vmem>>, %arg3: memref<128x1xi32, #tpu.memory_space<vmem>>, %arg4: memref<128x128xf32, #tpu.memory_space<vmem>>) attributes {dimension_semantics = [#tpu.dimension_semantics<parallel>, #tpu.dimension_semantics<arbitrary>], iteration_bounds = array<i64: 1, 2>, scalar_prefetch = 0 : i64, scratch_operands = 0 : i64, tpu.core_type = #tpu.core_type<tc>, window_params = [{transform_indices = @transform_0, window_bounds = array<i64: 128, 128>}, {transform_indices = @transform_1, window_bounds = array<i64: 128, 1>}, {transform_indices = @transform_2, window_bounds = array<i64: 128, 128>}]} {
    %c0_i32 = arith.constant 0 : i32
    %0 = arith.cmpi eq, %arg1, %c0_i32 : i32
    %1 = arith.extui %0 : i1 to i32
    %c0_i32_0 = arith.constant 0 : i32
    %2 = arith.cmpi ne, %1, %c0_i32_0 : i32
    scf.if %2 {
      %cst = arith.constant 0.000000e+00 : f32
      %7 = vector.broadcast %cst : f32 to vector<128x128xf32>
      %c0_7 = arith.constant 0 : index
      %c0_8 = arith.constant 0 : index
      %8 = vector.load %arg4[%c0_7, %c0_8] : memref<128x128xf32, #tpu.memory_space<vmem>>, vector<128x128xf32>
      tpu.vector_store %arg4[%c0_7, %c0_8], %7 {strides = array<i32>} : memref<128x128xf32, #tpu.memory_space<vmem>>, vector<128x128xf32>,
    } else {
    }
    %c0 = arith.constant 0 : index
    %c0_1 = arith.constant 0 : index
    %3 = vector.load %arg2[%c0, %c0_1] : memref<128x128xf32, #tpu.memory_space<vmem>>, vector<128x128xf32>
    %c0_2 = arith.constant 0 : index
    %c0_3 = arith.constant 0 : index
    %4 = vector.load %arg3[%c0_2, %c0_3] : memref<128x1xi32, #tpu.memory_space<vmem>>, vector<128x1xi32>
    %c128_i32 = arith.constant 128 : i32
    %5 = arith.muli %arg0, %c128_i32 : i32
    %c0_i32_4 = arith.constant 0 : i32
    %c128_i32_5 = arith.constant 128 : i32
    %6 = arith.addi %c0_i32_4, %c128_i32_5 : i32
    %c1_i32 = arith.constant 1 : i32
    scf.for %arg5 = %c0_i32_4 to %6 step %c1_i32  : i32 {
      %7 = arith.addi %5, %arg5 : i32
      %8 = vector.broadcast %7 : i32 to vector<128x1xi32>
      %9 = arith.cmpi eq, %4, %8 : vector<128x1xi32>
      %cst = arith.constant 0.000000e+00 : f32
      %10 = vector.shape_cast %9 : vector<128x1xi1> to vector<128x1xi1>
      %11 = vector.broadcast %10 : vector<128x1xi1> to vector<128x128xi1>
      %12 = vector.broadcast %cst : f32 to vector<128x128xf32>
      %13 = arith.select %11, %3, %12 : vector<128x128xi1>, vector<128x128xf32>
      %cst_7 = arith.constant dense<0xFF800000> : vector<128xf32>
      %14 = vector.multi_reduction <maximumf>, %13, %cst_7 [0] : vector<128x128xf32> to vector<128xf32>
      %15 = vector.shape_cast %14 : vector<128xf32> to vector<1x128xf32>
      %16 = arith.index_cast %arg5 : i32 to index
      %c0_8 = arith.constant 0 : index
      %17 = vector.load %arg4[%16, %c0_8] : memref<128x128xf32, #tpu.memory_space<vmem>>, vector<1x128xf32>
      %18 = arith.maximumf %17, %15 : vector<1x128xf32>
      %19 = arith.index_cast %arg5 : i32 to index
      %c0_9 = arith.constant 0 : index
      %20 = vector.load %arg4[%19, %c0_9] : memref<128x128xf32, #tpu.memory_space<vmem>>, vector<1x128xf32>
      tpu.vector_store %arg4[%19, %c0_9], %18 {strides = array<i32>} : memref<128x128xf32, #tpu.memory_space<vmem>>, vector<1x128xf32>,
    }
    %c128_i32_6 = arith.constant 128 : i32
    return
  }
  func.func @transform_0(%arg0: i32, %arg1: i32) -> (i32, i32) {
    %c0_i32 = arith.constant 0 : i32
    %c0_i32_0 = arith.constant 0 : i32
    return %arg1, %c0_i32 : i32, i32
  }
  func.func @transform_1(%arg0: i32, %arg1: i32) -> (i32, i32) {
    %c0_i32 = arith.constant 0 : i32
    %c0_i32_0 = arith.constant 0 : i32
    return %arg1, %c0_i32 : i32, i32
  }
  func.func @transform_2(%arg0: i32, %arg1: i32) -> (i32, i32) {
    %c0_i32 = arith.constant 0 : i32
    %c0_i32_0 = arith.constant 0 : i32
    return %arg0, %c0_i32 : i32, i32
  }
}

module attributes {stable_mosaic.version = 11 : i64} {
  func.func @kernel(%arg0: i32, %arg1: memref<256x128xf32, #tpu.memory_space<vmem>>, %arg2: memref<256x128xf32, #tpu.memory_space<vmem>>, %arg3: memref<128x128xf32, #tpu.memory_space<vmem>>, %arg4: memref<128x128xf32, #tpu.memory_space<vmem>>, %arg5: memref<1x128xf32, #tpu.memory_space<vmem>>, %arg6: memref<128x128xf32, #tpu.memory_space<vmem>>, %arg7: memref<1x128xf32, #tpu.memory_space<vmem>>, %arg8: memref<256x128xf32, #tpu.memory_space<vmem>>) attributes {dimension_semantics = [#tpu.dimension_semantics<parallel>], iteration_bounds = array<i64: 1>, scalar_prefetch = 0 : i64, scratch_operands = 0 : i64, tpu.core_type = #tpu.core_type<tc>, window_params = [{transform_indices = @transform_0, window_bounds = array<i64: 256, 128>}, {transform_indices = @transform_1, window_bounds = array<i64: 256, 128>}, {pipeline_mode = #tpu.pipeline_mode<synchronous>, transform_indices = @transform_2, window_bounds = array<i64: 128, 128>}, {pipeline_mode = #tpu.pipeline_mode<synchronous>, transform_indices = @transform_3, window_bounds = array<i64: 128, 128>}, {pipeline_mode = #tpu.pipeline_mode<synchronous>, transform_indices = @transform_4, window_bounds = array<i64: 1, 128>}, {pipeline_mode = #tpu.pipeline_mode<synchronous>, transform_indices = @transform_5, window_bounds = array<i64: 128, 128>}, {pipeline_mode = #tpu.pipeline_mode<synchronous>, transform_indices = @transform_6, window_bounds = array<i64: 1, 128>}, {transform_indices = @transform_7, window_bounds = array<i64: 256, 128>}]} {
    %c0 = arith.constant 0 : index
    %c0_0 = arith.constant 0 : index
    %0 = vector.load %arg1[%c0, %c0_0] : memref<256x128xf32, #tpu.memory_space<vmem>>, vector<256x128xf32>
    %c0_1 = arith.constant 0 : index
    %c0_2 = arith.constant 0 : index
    %1 = vector.load %arg2[%c0_1, %c0_2] : memref<256x128xf32, #tpu.memory_space<vmem>>, vector<256x128xf32>
    %c0_3 = arith.constant 0 : index
    %c0_4 = arith.constant 0 : index
    %2 = vector.load %arg3[%c0_3, %c0_4] : memref<128x128xf32, #tpu.memory_space<vmem>>, vector<128x128xf32>
    %cst = arith.constant dense<0.000000e+00> : vector<256x128xf32>
    %3 = tpu.matmul %0, %2, %cst {dimension_numbers = #tpu.dot_dimension_numbers<[1], [0], [0], [1], [0, 0, 1, 1], [], []>} : vector<256x128xf32>, vector<128x128xf32>, vector<256x128xf32> -> vector<256x128xf32>
    %4 = arith.subf %1, %0 : vector<256x128xf32>
    %c0_5 = arith.constant 0 : index
    %c0_6 = arith.constant 0 : index
    %5 = vector.load %arg4[%c0_5, %c0_6] : memref<128x128xf32, #tpu.memory_space<vmem>>, vector<128x128xf32>
    %cst_7 = arith.constant dense<0.000000e+00> : vector<256x128xf32>
    %6 = tpu.matmul %4, %5, %cst_7 {dimension_numbers = #tpu.dot_dimension_numbers<[1], [0], [0], [1], [0, 0, 1, 1], [], []>} : vector<256x128xf32>, vector<128x128xf32>, vector<256x128xf32> -> vector<256x128xf32>
    %7 = arith.addf %3, %6 : vector<256x128xf32>
    %c0_8 = arith.constant 0 : index
    %c0_9 = arith.constant 0 : index
    %8 = vector.load %arg5[%c0_8, %c0_9] : memref<1x128xf32, #tpu.memory_space<vmem>>, vector<1x128xf32>
    %9 = vector.broadcast %8 : vector<1x128xf32> to vector<256x128xf32>
    %10 = arith.addf %7, %9 : vector<256x128xf32>
    %11 = arith.negf %10 : vector<256x128xf32>
    %12 = math.exp %11 : vector<256x128xf32>
    %cst_10 = arith.constant 1.000000e+00 : f32
    %13 = vector.broadcast %cst_10 : f32 to vector<256x128xf32>
    %14 = arith.addf %13, %12 : vector<256x128xf32>
    %15 = arith.divf %13, %14 : vector<256x128xf32>
    %c0_11 = arith.constant 0 : index
    %c0_12 = arith.constant 0 : index
    %16 = vector.load %arg6[%c0_11, %c0_12] : memref<128x128xf32, #tpu.memory_space<vmem>>, vector<128x128xf32>
    %c0_13 = arith.constant 0 : index
    %c0_14 = arith.constant 0 : index
    %17 = vector.load %arg7[%c0_13, %c0_14] : memref<1x128xf32, #tpu.memory_space<vmem>>, vector<1x128xf32>
    %cst_15 = arith.constant dense<0.000000e+00> : vector<256x128xf32>
    %18 = tpu.matmul %15, %16, %cst_15 {dimension_numbers = #tpu.dot_dimension_numbers<[1], [0], [0], [1], [0, 0, 1, 1], [], []>} : vector<256x128xf32>, vector<128x128xf32>, vector<256x128xf32> -> vector<256x128xf32>
    %19 = vector.broadcast %17 : vector<1x128xf32> to vector<256x128xf32>
    %20 = arith.addf %18, %19 : vector<256x128xf32>
    %21 = arith.negf %20 : vector<256x128xf32>
    %22 = math.exp %21 : vector<256x128xf32>
    %cst_16 = arith.constant 1.000000e+00 : f32
    %23 = vector.broadcast %cst_16 : f32 to vector<256x128xf32>
    %24 = arith.addf %23, %22 : vector<256x128xf32>
    %25 = arith.divf %23, %24 : vector<256x128xf32>
    %c0_17 = arith.constant 0 : index
    %c0_18 = arith.constant 0 : index
    %26 = vector.load %arg8[%c0_17, %c0_18] : memref<256x128xf32, #tpu.memory_space<vmem>>, vector<256x128xf32>
    tpu.vector_store %arg8[%c0_17, %c0_18], %25 {strides = array<i32>} : memref<256x128xf32, #tpu.memory_space<vmem>>, vector<256x128xf32>,
    return
  }
  func.func @transform_0(%arg0: i32) -> (i32, i32) {
    %c0_i32 = arith.constant 0 : i32
    %c0_i32_0 = arith.constant 0 : i32
    return %arg0, %c0_i32 : i32, i32
  }
  func.func @transform_1(%arg0: i32) -> (i32, i32) {
    %c0_i32 = arith.constant 0 : i32
    %c0_i32_0 = arith.constant 0 : i32
    return %arg0, %c0_i32 : i32, i32
  }
  func.func @transform_2(%arg0: i32) -> (i32, i32) {
    %c0_i32 = arith.constant 0 : i32
    %c0_i32_0 = arith.constant 0 : i32
    %c0_i32_1 = arith.constant 0 : i32
    return %c0_i32, %c0_i32_0 : i32, i32
  }
  func.func @transform_3(%arg0: i32) -> (i32, i32) {
    %c0_i32 = arith.constant 0 : i32
    %c0_i32_0 = arith.constant 0 : i32
    %c0_i32_1 = arith.constant 0 : i32
    return %c0_i32, %c0_i32_0 : i32, i32
  }
  func.func @transform_4(%arg0: i32) -> (i32, i32) {
    %c0_i32 = arith.constant 0 : i32
    %c0_i32_0 = arith.constant 0 : i32
    %c0_i32_1 = arith.constant 0 : i32
    return %c0_i32, %c0_i32_0 : i32, i32
  }
  func.func @transform_5(%arg0: i32) -> (i32, i32) {
    %c0_i32 = arith.constant 0 : i32
    %c0_i32_0 = arith.constant 0 : i32
    %c0_i32_1 = arith.constant 0 : i32
    return %c0_i32, %c0_i32_0 : i32, i32
  }
  func.func @transform_6(%arg0: i32) -> (i32, i32) {
    %c0_i32 = arith.constant 0 : i32
    %c0_i32_0 = arith.constant 0 : i32
    %c0_i32_1 = arith.constant 0 : i32
    return %c0_i32, %c0_i32_0 : i32, i32
  }
  func.func @transform_7(%arg0: i32) -> (i32, i32) {
    %c0_i32 = arith.constant 0 : i32
    %c0_i32_0 = arith.constant 0 : i32
    return %arg0, %c0_i32 : i32, i32
  }
}

module attributes {stable_mosaic.version = 11 : i64} {
  func.func @kernel(%arg0: i32, %arg1: memref<256x128xf32, #tpu.memory_space<vmem>>, %arg2: memref<256x128xf32, #tpu.memory_space<vmem>>, %arg3: memref<128x128xf32, #tpu.memory_space<vmem>>, %arg4: memref<128x128xf32, #tpu.memory_space<vmem>>, %arg5: memref<1x128xf32, #tpu.memory_space<vmem>>, %arg6: memref<256x128xf32, #tpu.memory_space<vmem>>) attributes {dimension_semantics = [#tpu.dimension_semantics<parallel>], iteration_bounds = array<i64: 1>, scalar_prefetch = 0 : i64, scratch_operands = 0 : i64, tpu.core_type = #tpu.core_type<tc>, window_params = [{transform_indices = @transform_0, window_bounds = array<i64: 256, 128>}, {transform_indices = @transform_1, window_bounds = array<i64: 256, 128>}, {pipeline_mode = #tpu.pipeline_mode<synchronous>, transform_indices = @transform_2, window_bounds = array<i64: 128, 128>}, {pipeline_mode = #tpu.pipeline_mode<synchronous>, transform_indices = @transform_3, window_bounds = array<i64: 128, 128>}, {pipeline_mode = #tpu.pipeline_mode<synchronous>, transform_indices = @transform_4, window_bounds = array<i64: 1, 128>}, {transform_indices = @transform_5, window_bounds = array<i64: 256, 128>}]} {
    %c0 = arith.constant 0 : index
    %c0_0 = arith.constant 0 : index
    %0 = vector.load %arg1[%c0, %c0_0] : memref<256x128xf32, #tpu.memory_space<vmem>>, vector<256x128xf32>
    %c0_1 = arith.constant 0 : index
    %c0_2 = arith.constant 0 : index
    %1 = vector.load %arg2[%c0_1, %c0_2] : memref<256x128xf32, #tpu.memory_space<vmem>>, vector<256x128xf32>
    %c0_3 = arith.constant 0 : index
    %c0_4 = arith.constant 0 : index
    %2 = vector.load %arg3[%c0_3, %c0_4] : memref<128x128xf32, #tpu.memory_space<vmem>>, vector<128x128xf32>
    %cst = arith.constant dense<0.000000e+00> : vector<256x128xf32>
    %3 = tpu.matmul %0, %2, %cst {dimension_numbers = #tpu.dot_dimension_numbers<[1], [0], [0], [1], [0, 0, 1, 1], [], []>} : vector<256x128xf32>, vector<128x128xf32>, vector<256x128xf32> -> vector<256x128xf32>
    %4 = arith.subf %1, %0 : vector<256x128xf32>
    %c0_5 = arith.constant 0 : index
    %c0_6 = arith.constant 0 : index
    %5 = vector.load %arg4[%c0_5, %c0_6] : memref<128x128xf32, #tpu.memory_space<vmem>>, vector<128x128xf32>
    %cst_7 = arith.constant dense<0.000000e+00> : vector<256x128xf32>
    %6 = tpu.matmul %4, %5, %cst_7 {dimension_numbers = #tpu.dot_dimension_numbers<[1], [0], [0], [1], [0, 0, 1, 1], [], []>} : vector<256x128xf32>, vector<128x128xf32>, vector<256x128xf32> -> vector<256x128xf32>
    %7 = arith.addf %3, %6 : vector<256x128xf32>
    %c0_8 = arith.constant 0 : index
    %c0_9 = arith.constant 0 : index
    %8 = vector.load %arg5[%c0_8, %c0_9] : memref<1x128xf32, #tpu.memory_space<vmem>>, vector<1x128xf32>
    %9 = vector.broadcast %8 : vector<1x128xf32> to vector<256x128xf32>
    %10 = arith.addf %7, %9 : vector<256x128xf32>
    %11 = arith.negf %10 : vector<256x128xf32>
    %12 = math.exp %11 : vector<256x128xf32>
    %cst_10 = arith.constant 1.000000e+00 : f32
    %13 = vector.broadcast %cst_10 : f32 to vector<256x128xf32>
    %14 = arith.addf %13, %12 : vector<256x128xf32>
    %15 = arith.divf %13, %14 : vector<256x128xf32>
    %c0_11 = arith.constant 0 : index
    %c0_12 = arith.constant 0 : index
    %16 = vector.load %arg6[%c0_11, %c0_12] : memref<256x128xf32, #tpu.memory_space<vmem>>, vector<256x128xf32>
    tpu.vector_store %arg6[%c0_11, %c0_12], %15 {strides = array<i32>} : memref<256x128xf32, #tpu.memory_space<vmem>>, vector<256x128xf32>,
    return
  }
  func.func @transform_0(%arg0: i32) -> (i32, i32) {
    %c0_i32 = arith.constant 0 : i32
    %c0_i32_0 = arith.constant 0 : i32
    return %arg0, %c0_i32 : i32, i32
  }
  func.func @transform_1(%arg0: i32) -> (i32, i32) {
    %c0_i32 = arith.constant 0 : i32
    %c0_i32_0 = arith.constant 0 : i32
    return %arg0, %c0_i32 : i32, i32
  }
  func.func @transform_2(%arg0: i32) -> (i32, i32) {
    %c0_i32 = arith.constant 0 : i32
    %c0_i32_0 = arith.constant 0 : i32
    %c0_i32_1 = arith.constant 0 : i32
    return %c0_i32, %c0_i32_0 : i32, i32
  }
  func.func @transform_3(%arg0: i32) -> (i32, i32) {
    %c0_i32 = arith.constant 0 : i32
    %c0_i32_0 = arith.constant 0 : i32
    %c0_i32_1 = arith.constant 0 : i32
    return %c0_i32, %c0_i32_0 : i32, i32
  }
  func.func @transform_4(%arg0: i32) -> (i32, i32) {
    %c0_i32 = arith.constant 0 : i32
    %c0_i32_0 = arith.constant 0 : i32
    %c0_i32_1 = arith.constant 0 : i32
    return %c0_i32, %c0_i32_0 : i32, i32
  }
  func.func @transform_5(%arg0: i32) -> (i32, i32) {
    %c0_i32 = arith.constant 0 : i32
    %c0_i32_0 = arith.constant 0 : i32
    return %arg0, %c0_i32 : i32, i32
  }
}

module attributes {stable_mosaic.version = 11 : i64} {
  func.func @kernel(%arg0: i32, %arg1: memref<128x128xf32, #tpu.memory_space<vmem>>, %arg2: memref<128x1xi32, #tpu.memory_space<vmem>>, %arg3: memref<128x256xf32, #tpu.memory_space<vmem>>, %arg4: memref<1x256xf32, #tpu.memory_space<vmem>>, %arg5: memref<256x128xf32, #tpu.memory_space<vmem>>, %arg6: memref<1x128xf32, #tpu.memory_space<vmem>>, %arg7: memref<8x128xf32, #tpu.memory_space<vmem>>, %arg8: memref<8x128xf32, #tpu.memory_space<vmem>>) attributes {dimension_semantics = [#tpu.dimension_semantics<arbitrary>], iteration_bounds = array<i64: 1>, scalar_prefetch = 0 : i64, scratch_operands = 1 : i64, tpu.core_type = #tpu.core_type<tc>, window_params = [{transform_indices = @transform_0, window_bounds = array<i64: 128, 128>}, {transform_indices = @transform_1, window_bounds = array<i64: 128, 1>}, {pipeline_mode = #tpu.pipeline_mode<synchronous>, transform_indices = @transform_2, window_bounds = array<i64: 128, 256>}, {pipeline_mode = #tpu.pipeline_mode<synchronous>, transform_indices = @transform_3, window_bounds = array<i64: 1, 256>}, {pipeline_mode = #tpu.pipeline_mode<synchronous>, transform_indices = @transform_4, window_bounds = array<i64: 256, 128>}, {pipeline_mode = #tpu.pipeline_mode<synchronous>, transform_indices = @transform_5, window_bounds = array<i64: 1, 128>}, {pipeline_mode = #tpu.pipeline_mode<synchronous>, transform_indices = @transform_6, window_bounds = array<i64: 8, 128>}]} {
    %c0_i32 = arith.constant 0 : i32
    %0 = arith.cmpi eq, %arg0, %c0_i32 : i32
    %1 = arith.extui %0 : i1 to i32
    %c0_i32_0 = arith.constant 0 : i32
    %2 = arith.cmpi ne, %1, %c0_i32_0 : i32
    scf.if %2 {
      %cst = arith.constant 0.000000e+00 : f32
      %9 = vector.broadcast %cst : f32 to vector<8x128xf32>
      %c0_8 = arith.constant 0 : index
      %c0_9 = arith.constant 0 : index
      %10 = vector.load %arg8[%c0_8, %c0_9] : memref<8x128xf32, #tpu.memory_space<vmem>>, vector<8x128xf32>
      tpu.vector_store %arg8[%c0_8, %c0_9], %9 {strides = array<i32>} : memref<8x128xf32, #tpu.memory_space<vmem>>, vector<8x128xf32>,
      %cst_10 = arith.constant 0.000000e+00 : f32
      %11 = vector.broadcast %cst_10 : f32 to vector<8x128xf32>
      %c0_11 = arith.constant 0 : index
      %c0_12 = arith.constant 0 : index
      %12 = vector.load %arg7[%c0_11, %c0_12] : memref<8x128xf32, #tpu.memory_space<vmem>>, vector<8x128xf32>
      tpu.vector_store %arg7[%c0_11, %c0_12], %11 {strides = array<i32>} : memref<8x128xf32, #tpu.memory_space<vmem>>, vector<8x128xf32>,
    } else {
    }
    %c0 = arith.constant 0 : index
    %c0_1 = arith.constant 0 : index
    %3 = vector.load %arg1[%c0, %c0_1] : memref<128x128xf32, #tpu.memory_space<vmem>>, vector<128x128xf32>
    %c0_2 = arith.constant 0 : index
    %c0_3 = arith.constant 0 : index
    %4 = vector.load %arg2[%c0_2, %c0_3] : memref<128x1xi32, #tpu.memory_space<vmem>>, vector<128x1xi32>
    %c0_i32_4 = arith.constant 0 : i32
    %c8_i32 = arith.constant 8 : i32
    %5 = arith.addi %c0_i32_4, %c8_i32 : i32
    %c1_i32 = arith.constant 1 : i32
    scf.for %arg9 = %c0_i32_4 to %5 step %c1_i32  : i32 {
      %9 = vector.broadcast %arg9 : i32 to vector<128x1xi32>
      %10 = arith.cmpi eq, %4, %9 : vector<128x1xi32>
      %cst = arith.constant 0.000000e+00 : f32
      %11 = vector.shape_cast %10 : vector<128x1xi1> to vector<128x1xi1>
      %12 = vector.broadcast %11 : vector<128x1xi1> to vector<128x128xi1>
      %13 = vector.broadcast %cst : f32 to vector<128x128xf32>
      %14 = arith.select %12, %3, %13 : vector<128x128xi1>, vector<128x128xf32>
      %cst_8 = arith.constant dense<0xFF800000> : vector<128xf32>
      %15 = vector.multi_reduction <maximumf>, %14, %cst_8 [0] : vector<128x128xf32> to vector<128xf32>
      %16 = vector.shape_cast %15 : vector<128xf32> to vector<1x128xf32>
      %17 = arith.index_cast %arg9 : i32 to index
      %c0_9 = arith.constant 0 : index
      %18 = vector.load %arg8[%17, %c0_9] : memref<8x128xf32, #tpu.memory_space<vmem>>, vector<1x128xf32>
      %19 = arith.maximumf %18, %16 : vector<1x128xf32>
      %20 = arith.index_cast %arg9 : i32 to index
      %c0_10 = arith.constant 0 : index
      %21 = vector.load %arg8[%20, %c0_10] : memref<8x128xf32, #tpu.memory_space<vmem>>, vector<1x128xf32>
      tpu.vector_store %arg8[%20, %c0_10], %19 {strides = array<i32>} : memref<8x128xf32, #tpu.memory_space<vmem>>, vector<1x128xf32>,
    }
    %c8_i32_5 = arith.constant 8 : i32
    %c0_i32_6 = arith.constant 0 : i32
    %6 = arith.cmpi eq, %arg0, %c0_i32_6 : i32
    %7 = arith.extui %6 : i1 to i32
    %c0_i32_7 = arith.constant 0 : i32
    %8 = arith.cmpi ne, %7, %c0_i32_7 : i32
    scf.if %8 {
      %c0_8 = arith.constant 0 : index
      %c0_9 = arith.constant 0 : index
      %9 = vector.load %arg8[%c0_8, %c0_9] : memref<8x128xf32, #tpu.memory_space<vmem>>, vector<8x128xf32>
      %c0_10 = arith.constant 0 : index
      %c0_11 = arith.constant 0 : index
      %10 = vector.load %arg3[%c0_10, %c0_11] : memref<128x256xf32, #tpu.memory_space<vmem>>, vector<128x256xf32>
      %cst = arith.constant dense<0.000000e+00> : vector<8x256xf32>
      %11 = tpu.matmul %9, %10, %cst {dimension_numbers = #tpu.dot_dimension_numbers<[1], [0], [0], [1], [0, 0, 1, 1], [], []>} : vector<8x128xf32>, vector<128x256xf32>, vector<8x256xf32> -> vector<8x256xf32>
      %c0_12 = arith.constant 0 : index
      %c0_13 = arith.constant 0 : index
      %12 = vector.load %arg4[%c0_12, %c0_13] : memref<1x256xf32, #tpu.memory_space<vmem>>, vector<1x256xf32>
      %13 = vector.broadcast %12 : vector<1x256xf32> to vector<8x256xf32>
      %14 = arith.addf %11, %13 : vector<8x256xf32>
      %15 = arith.negf %14 : vector<8x256xf32>
      %16 = math.exp %15 : vector<8x256xf32>
      %cst_14 = arith.constant 1.000000e+00 : f32
      %17 = vector.broadcast %cst_14 : f32 to vector<8x256xf32>
      %18 = arith.addf %17, %16 : vector<8x256xf32>
      %19 = arith.divf %17, %18 : vector<8x256xf32>
      %c0_15 = arith.constant 0 : index
      %c0_16 = arith.constant 0 : index
      %20 = vector.load %arg5[%c0_15, %c0_16] : memref<256x128xf32, #tpu.memory_space<vmem>>, vector<256x128xf32>
      %cst_17 = arith.constant dense<0.000000e+00> : vector<8x128xf32>
      %21 = tpu.matmul %19, %20, %cst_17 {dimension_numbers = #tpu.dot_dimension_numbers<[1], [0], [0], [1], [0, 0, 1, 1], [], []>} : vector<8x256xf32>, vector<256x128xf32>, vector<8x128xf32> -> vector<8x128xf32>
      %c0_18 = arith.constant 0 : index
      %c0_19 = arith.constant 0 : index
      %22 = vector.load %arg6[%c0_18, %c0_19] : memref<1x128xf32, #tpu.memory_space<vmem>>, vector<1x128xf32>
      %23 = vector.broadcast %22 : vector<1x128xf32> to vector<8x128xf32>
      %24 = arith.addf %21, %23 : vector<8x128xf32>
      %c0_20 = arith.constant 0 : index
      %c0_21 = arith.constant 0 : index
      %25 = vector.load %arg7[%c0_20, %c0_21] : memref<8x128xf32, #tpu.memory_space<vmem>>, vector<8x128xf32>
      tpu.vector_store %arg7[%c0_20, %c0_21], %24 {strides = array<i32>} : memref<8x128xf32, #tpu.memory_space<vmem>>, vector<8x128xf32>,
    } else {
    }
    return
  }
  func.func @transform_0(%arg0: i32) -> (i32, i32) {
    %c0_i32 = arith.constant 0 : i32
    %c0_i32_0 = arith.constant 0 : i32
    return %arg0, %c0_i32 : i32, i32
  }
  func.func @transform_1(%arg0: i32) -> (i32, i32) {
    %c0_i32 = arith.constant 0 : i32
    %c0_i32_0 = arith.constant 0 : i32
    return %arg0, %c0_i32 : i32, i32
  }
  func.func @transform_2(%arg0: i32) -> (i32, i32) {
    %c0_i32 = arith.constant 0 : i32
    %c0_i32_0 = arith.constant 0 : i32
    %c0_i32_1 = arith.constant 0 : i32
    return %c0_i32, %c0_i32_0 : i32, i32
  }
  func.func @transform_3(%arg0: i32) -> (i32, i32) {
    %c0_i32 = arith.constant 0 : i32
    %c0_i32_0 = arith.constant 0 : i32
    %c0_i32_1 = arith.constant 0 : i32
    return %c0_i32, %c0_i32_0 : i32, i32
  }
  func.func @transform_4(%arg0: i32) -> (i32, i32) {
    %c0_i32 = arith.constant 0 : i32
    %c0_i32_0 = arith.constant 0 : i32
    %c0_i32_1 = arith.constant 0 : i32
    return %c0_i32, %c0_i32_0 : i32, i32
  }
  func.func @transform_5(%arg0: i32) -> (i32, i32) {
    %c0_i32 = arith.constant 0 : i32
    %c0_i32_0 = arith.constant 0 : i32
    %c0_i32_1 = arith.constant 0 : i32
    return %c0_i32, %c0_i32_0 : i32, i32
  }
  func.func @transform_6(%arg0: i32) -> (i32, i32) {
    %c0_i32 = arith.constant 0 : i32
    %c0_i32_0 = arith.constant 0 : i32
    %c0_i32_1 = arith.constant 0 : i32
    return %c0_i32, %c0_i32_0 : i32, i32
  }
}

</mosaic_0001>

<bundles_post_ra>
// kernel: gnn_forward.10
= control target key start
LH: loop header
LB: loop body
LE: loop exit
PB: predicated region body
PF: predicated region fallthrough
CT: control target
= control target key end

     0   :  { %s558_s9 = smov 0   ;;  %s560_s10 = smov 0   ;;  %s784_s0 = inlined_call_operand.vmem [shape: f32[256,128], index: 0, kind: input, shape index: {}]   ;;  %s785_s1 = inlined_call_operand.vmem [shape: s32[256,1], index: 1, kind: input, shape index: {}]   ;;  %s786_s2 = inlined_call_operand.vmem [shape: f32[128,128], index: 2, kind: output, shape index: {}]  }
   0x1   :  { %s562_s11 = smov 0  }
   0x2 LB: > { %s21_s12 = sadd.s32 1, %s531_s10  ;;  %p462_p0 = scmp.ge.s32.totalorder %s535_s11, 1  ;;  %s535_s11 = sphi %s562_s11, %s12_s11   ;;  %s531_s10 = sphi %s560_s10, %s788_s10   ;;  %s527_s9 = sphi %s558_s9, %s787_s9  }
   0x3   : > { %p22_p1 = scmp.ge.s32.totalorder %s21_s12, 2  ;;  %p136_p2 = scmp.lt.s32.totalorder %s535_s11, 3 }
   0x5   : > { %s790_s12 = smov (%p22_p1, %s21_s12), 0  ;;  %p137_p3 = pnand %p462_p0, %p136_p2 }
   0x6   : > { %s463_s13 = sshll.u32 (!%p137_p3), %s527_s9, 4  ;;  %p467_p5 = scmp.ne.s32.totalorder (!%p137_p3), %s527_s9, 0 }
   0x7   : > { %140 = sbr.rel (%p137_p3) target bundleno = 227 (0xe3), region = 28  ;;  %p164_p4 = scmp.lt.s32.totalorder (!%p137_p3), %s463_s13, 31 }
   0xc   : > { %s792_s13 = smov (!%p164_p4, %s463_s13), 31  ;;  %184 = sbr.rel (%p467_p5) target bundleno = 34 (0x22), region = 32 }
   0xd   : > { %s464_s14 = sshll.u32 %s792_s13, 3 }
   0xe   : > { %s579_s17 = scalar_lea.vmem %s784_s0, %s464_s14  ;;  %s584_s20 = scalar_lea.vmem %s785_s1, %s464_s14 }
  0x11   : > { %v541_v0 = vmov 0.0  }
  0x12   : > { %185 = vst [vmem:[%s786_s2] sm:$0xff] %v541_v0 }
  0x13   : > { %186 = vst [vmem:[%s786_s2 + $0x8] sm:$0xff] %v541_v0 }
  0x14   : > { %187 = vst [vmem:[%s786_s2 + $0x10] sm:$0xff] %v541_v0 }
  0x15   : > { %188 = vst [vmem:[%s786_s2 + $0x18] sm:$0xff] %v541_v0 }
  0x16   : > { %189 = vst [vmem:[%s786_s2 + $0x20] sm:$0xff] %v541_v0 }
  0x17   : > { %190 = vst [vmem:[%s786_s2 + $0x28] sm:$0xff] %v541_v0 }
  0x18   : > { %191 = vst [vmem:[%s786_s2 + $0x30] sm:$0xff] %v541_v0 }
  0x19   : > { %192 = vst [vmem:[%s786_s2 + $0x38] sm:$0xff] %v541_v0 }
  0x1a   : > { %193 = vst [vmem:[%s786_s2 + $0x40] sm:$0xff] %v541_v0 }
  0x1b   : > { %194 = vst [vmem:[%s786_s2 + $0x48] sm:$0xff] %v541_v0 }
  0x1c   : > { %195 = vst [vmem:[%s786_s2 + $0x50] sm:$0xff] %v541_v0 }
  0x1d   : > { %196 = vst [vmem:[%s786_s2 + $0x58] sm:$0xff] %v541_v0 }
  0x1e   : > { %197 = vst [vmem:[%s786_s2 + $0x60] sm:$0xff] %v541_v0 }
  0x1f   : > { %198 = vst [vmem:[%s786_s2 + $0x68] sm:$0xff] %v541_v0 }
  0x20   : > { %199 = vst [vmem:[%s786_s2 + $0x70] sm:$0xff] %v541_v0 }
  0x21   : > { %200 = vst [vmem:[%s786_s2 + $0x78] sm:$0xff] %v541_v0 }
  0x22 PF: > { %v635_v1 = vld [vmem:[%s579_s17] sm:$0xff]  ;;  %v638_v2 = vld [vmem:[%s579_s17 + $0x8] sm:$0xff]  ;;  %v641_v3 = vld [vmem:[%s579_s17 + $0x10] sm:$0xff] }
  0x23   : > { %v644_v4 = vld [vmem:[%s579_s17 + $0x18] sm:$0xff]  ;;  %v647_v5 = vld [vmem:[%s579_s17 + $0x20] sm:$0xff]  ;;  %v650_v6 = vld [vmem:[%s579_s17 + $0x28] sm:$0xff] }
  0x24   : > { %v653_v7 = vld [vmem:[%s579_s17 + $0x30] sm:$0xff]  ;;  %v656_v8 = vld [vmem:[%s579_s17 + $0x38] sm:$0xff]  ;;  %v659_v9 = vld [vmem:[%s579_s17 + $0x40] sm:$0xff] }
  0x25   : > { %v662_v10 = vld [vmem:[%s579_s17 + $0x48] sm:$0xff]  ;;  %v665_v11 = vld [vmem:[%s579_s17 + $0x50] sm:$0xff]  ;;  %v668_v12 = vld [vmem:[%s579_s17 + $0x58] sm:$0xff] }
  0x26   : > { %v671_v13 = vld [vmem:[%s579_s17 + $0x60] sm:$0xff]  ;;  %v674_v14 = vld [vmem:[%s579_s17 + $0x68] sm:$0xff]  ;;  %v677_v15 = vld [vmem:[%s579_s17 + $0x70] sm:$0xff] }
  0x27   : > { %v680_v16 = vld [vmem:[%s579_s17 + $0x78] sm:$0xff]  ;;  %v683_v17 = vld [vmem:[%s584_s20] sm:$0xff]  ;;  %v686_v18 = vld [vmem:[%s584_s20 + $0x8] sm:$0xff]  ;;  %s730_s17 = smov 0  }
  0x28   : > { %v689_v19 = vld [vmem:[%s584_s20 + $0x10] sm:$0xff]  ;;  %v692_v20 = vld [vmem:[%s584_s20 + $0x18] sm:$0xff]  ;;  %v695_v21 = vld [vmem:[%s584_s20 + $0x20] sm:$0xff] }
  0x29   : > { %v698_v22 = vld [vmem:[%s584_s20 + $0x28] sm:$0xff]  ;;  %v701_v23 = vld [vmem:[%s584_s20 + $0x30] sm:$0xff]  ;;  %v704_v24 = vld [vmem:[%s584_s20 + $0x38] sm:$0xff] }
  0x2a   : > { %v707_v25 = vld [vmem:[%s584_s20 + $0x40] sm:$0xff]  ;;  %v710_v26 = vld [vmem:[%s584_s20 + $0x48] sm:$0xff]  ;;  %v713_v27 = vld [vmem:[%s584_s20 + $0x50] sm:$0xff] }
  0x2b   : > { %v716_v28 = vld [vmem:[%s584_s20 + $0x58] sm:$0xff]  ;;  %v719_v29 = vld [vmem:[%s584_s20 + $0x60] sm:$0xff]  ;;  %v722_v30 = vld [vmem:[%s584_s20 + $0x68] sm:$0xff] }
  0x2c   : > { %v725_v31 = vld [vmem:[%s584_s20 + $0x70] sm:$0xff]  ;;  %v728_v32 = vld [vmem:[%s584_s20 + $0x78] sm:$0xff] }
  0x2d LB: >> { %v542_v33 = vmov 0   ;;  %v241_v34 = vstv %s539_s17  ;;  %s375_s3 = scalar_lea.vmem %s786_s2, %s539_s17  ;;  %s239_s17 = sadd.s32 1, %s539_s17   ;;  %s539_s17 = sphi %s730_s17, %s239_s17  }
  0x2e   : >> { %508 = vset.pattern.permute.xlu2 %v542_v33  ;;  %507 = vset.pattern.permute.xlu1 %v542_v33  ;;  %vm246_vm0 = vcmp.eq.s32.totalorder %v695_v21, %v241_v34  ;;  %vm244_vm1 = vcmp.eq.s32.totalorder %v689_v19, %v241_v34  ;;  %vm242_vm2 = vcmp.eq.s32.totalorder %v683_v17, %v241_v34  ;;  %p236_p6 = scmp.ge.s32.totalorder %s239_s17, 128  }
  0x2f   : >> { %506 = vset.pattern.permute.xlu0 %v542_v33  ;;  %v262_v35 = vsel %vm246_vm0, 1, %v542_v33  ;;  %v260_v36 = vsel %vm244_vm1, 1, %v542_v33  ;;  %v258_v37 = vsel %vm242_vm2, 1, %v542_v33  ;;  %vm247_vm3 = vcmp.eq.s32.totalorder %v698_v22, %v241_v34 }
  0x30   : >> { %287 = vperm.xlu2 %508, %v262_v35   ;;  %281 = vperm.xlu1 %507, %v260_v36   ;;  %vm245_vm4 = vcmp.eq.s32.totalorder %v692_v20, %v241_v34  ;;  %vm243_vm5 = vcmp.eq.s32.totalorder %v686_v18, %v241_v34  ;;  %v263_v38 = vsel %vm247_vm3, 1, %v542_v33  ;;  %vm250_vm6 = vcmp.eq.s32.totalorder %v707_v25, %v241_v34 }
  0x31   : >> { %275 = vperm.xlu0 %506, %v258_v37   ;;  %v261_v39 = vsel %vm245_vm4, 1, %v542_v33  ;;  %v259_v40 = vsel %vm243_vm5, 1, %v542_v33  ;;  %vm249_vm7 = vcmp.eq.s32.totalorder %v704_v24, %v241_v34  ;;  %vm248_vm8 = vcmp.eq.s32.totalorder %v701_v23, %v241_v34 }
  0x32   : >> { %v266_v41 = vsel %vm250_vm6, 1, %v542_v33  ;;  %v265_v42 = vsel %vm249_vm7, 1, %v542_v33  ;;  %v264_v43 = vsel %vm248_vm8, 1, %v542_v33  ;;  %vm253_vm9 = vcmp.eq.s32.totalorder %v716_v28, %v241_v34 }
  0x33   : >> { %vm252_vm10 = vcmp.eq.s32.totalorder %v713_v27, %v241_v34  ;;  %vm251_vm11 = vcmp.eq.s32.totalorder %v710_v26, %v241_v34  ;;  %v269_v44 = vsel %vm253_vm9, 1, %v542_v33  ;;  %vm256_vm12 = vcmp.eq.s32.totalorder %v725_v31, %v241_v34 }
  0x34   : >> { %v268_v45 = vsel %vm252_vm10, 1, %v542_v33  ;;  %v267_v46 = vsel %vm251_vm11, 1, %v542_v33  ;;  %vm255_vm13 = vcmp.eq.s32.totalorder %v722_v30, %v241_v34  ;;  %vm254_vm14 = vcmp.eq.s32.totalorder %v719_v29, %v241_v34 }
  0x35   : >> { %v272_v47 = vsel %vm256_vm12, 1, %v542_v33  ;;  %v271_v48 = vsel %vm255_vm13, 1, %v542_v33  ;;  %v270_v49 = vsel %vm254_vm14, 1, %v542_v33  ;;  %vm257_vm15 = vcmp.eq.s32.totalorder %v728_v32, %v241_v34 }
  0x36   : >> { %v273_v50 = vsel %vm257_vm15, 1, %v542_v33 }
  0x38   : >> { %290 = vperm.xlu2 %508, %v263_v38   ;;  %284 = vperm.xlu1 %507, %v261_v39  }
  0x39   : >> { %278 = vperm.xlu0 %506, %v259_v40  }
  0x40   : >> { %299 = vperm.xlu2 %508, %v266_v41   ;;  %296 = vperm.xlu1 %507, %v265_v42  }
  0x41   : >> { %293 = vperm.xlu0 %506, %v264_v43  }
  0x48   : >> { %308 = vperm.xlu2 %508, %v269_v44   ;;  %305 = vperm.xlu1 %507, %v268_v45  }
  0x49   : >> { %302 = vperm.xlu0 %506, %v267_v46  }
  0x50   : >> { %317 = vperm.xlu2 %508, %v272_v47   ;;  %314 = vperm.xlu1 %507, %v271_v48  }
  0x51   : >> { %311 = vperm.xlu0 %506, %v270_v49  }
  0x59   : >> { %320 = vperm.xlu0 %506, %v273_v50  }
  0x8a   : >> { %v288_v51 = vpop.permute.xlu2 %287 }
  0x8b   : >> { %vm326_vm0 = vcmp.eq.s32.totalorder %v288_v51, 1 }
  0x8c   : >> { %v342_v63 = vsel %vm326_vm0, %v647_v5, 0.0 }
  0x92   : >> { %v291_v54 = vpop.permute.xlu2 %290 }
  0x93   : >> { %vm327_vm2 = vcmp.eq.s32.totalorder %v291_v54, 1 }
  0x94   : >> { %v343_v35 = vsel %vm327_vm2, %v650_v6, 0.0 }
  0x9a   : >> { %v300_v58 = vpop.permute.xlu2 %299 }
  0x9b   : >> { %vm330_vm6 = vcmp.eq.s32.totalorder %v300_v58, 1 }
  0x9c   : >> { %v346_v39 = vsel %vm330_vm6, %v659_v9, 0.0 }
  0xa2   : >> { %v282_v52 = vpop.permute.xlu1 %281  ;;  %v309_v62 = vpop.permute.xlu2 %308 }
  0xa3   : >> { %v276_v53 = vpop.permute.xlu0 %275  ;;  %vm324_vm7 = vcmp.eq.s32.totalorder %v282_v52, 1  ;;  %vm333_vm13 = vcmp.eq.s32.totalorder %v309_v62, 1 }
  0xa4   : >> { %vm322_vm1 = vcmp.eq.s32.totalorder %v276_v53, 1  ;;  %v340_v41 = vsel %vm324_vm7, %v641_v3, 0.0  ;;  %v349_v54 = vsel %vm333_vm13, %v668_v12, 0.0 }
  0xa5   : >> { %v338_v0 = vsel %vm322_vm1, %v635_v1, 0.0 }
  0xa6   : >> { %v354_v40 = vmax.f32 %v338_v0, %v342_v63 }
  0xa8   : >> { %v358_v53 = vmax.f32 %v354_v40, %v346_v39  ;;  %v376_v39 = vld [vmem:[%s375_s3] sm:$0x1] }
  0xaa   : >> { %v285_v55 = vpop.permute.xlu1 %284  ;;  %v318_v42 = vpop.permute.xlu2 %317 }
  0xab   : >> { %v279_v56 = vpop.permute.xlu0 %278  ;;  %vm325_vm8 = vcmp.eq.s32.totalorder %v285_v55, 1  ;;  %vm336_vm14 = vcmp.eq.s32.totalorder %v318_v42, 1 }
  0xac   : >> { %vm323_vm3 = vcmp.eq.s32.totalorder %v279_v56, 1  ;;  %v341_v43 = vsel %vm325_vm8, %v644_v4, 0.0 }
  0xad   : >> { %v339_v36 = vsel %vm323_vm3, %v638_v2, 0.0 }
  0xae   : >> { %v355_v46 = vmax.f32 %v339_v36, %v343_v35 }
  0xb2   : >> { %v297_v57 = vpop.permute.xlu1 %296 }
  0xb3   : >> { %v294_v59 = vpop.permute.xlu0 %293  ;;  %vm329_vm4 = vcmp.eq.s32.totalorder %v297_v57, 1 }
  0xb4   : >> { %vm328_vm5 = vcmp.eq.s32.totalorder %v294_v59, 1  ;;  %v345_v37 = vsel %vm329_vm4, %v656_v8, 0.0  ;;  %v352_v59 = vsel %vm336_vm14, %v677_v15, 0.0 }
  0xb5   : >> { %v344_v38 = vsel %vm328_vm5, %v653_v7, 0.0  ;;  %v357_v47 = vmax.f32 %v341_v43, %v345_v37 }
  0xb6   : >> { %v356_v48 = vmax.f32 %v340_v41, %v344_v38 }
  0xb7   : >> { %v361_v58 = vmax.f32 %v357_v47, %v349_v54 }
  0xba   : >> { %v306_v60 = vpop.permute.xlu1 %305 }
  0xbb   : >> { %v303_v61 = vpop.permute.xlu0 %302  ;;  %vm332_vm9 = vcmp.eq.s32.totalorder %v306_v60, 1 }
  0xbc   : >> { %vm331_vm10 = vcmp.eq.s32.totalorder %v303_v61, 1  ;;  %v348_v44 = vsel %vm332_vm9, %v665_v11, 0.0 }
  0xbd   : >> { %v347_v45 = vsel %vm331_vm10, %v662_v10, 0.0  ;;  %v360_v51 = vmax.f32 %v356_v48, %v348_v44 }
  0xbe   : >> { %v359_v52 = vmax.f32 %v355_v46, %v347_v45 }
  0xbf   : >> { %v364_v61 = vmax.f32 %v360_v51, %v352_v59 }
  0xc2   : >> { %v315_v33 = vpop.permute.xlu1 %314 }
  0xc3   : >> { %v312_v34 = vpop.permute.xlu0 %311  ;;  %vm335_vm11 = vcmp.eq.s32.totalorder %v315_v33, 1 }
  0xc4   : >> { %vm334_vm12 = vcmp.eq.s32.totalorder %v312_v34, 1  ;;  %v351_v49 = vsel %vm335_vm11, %v674_v14, 0.0 }
  0xc5   : >> { %v350_v50 = vsel %vm334_vm12, %v671_v13, 0.0  ;;  %v363_v56 = vmax.f32 %v359_v52, %v351_v49 }
  0xc6   : >> { %v362_v57 = vmax.f32 %v358_v53, %v350_v50 }
  0xc8   : >> { %v366_v63 = vmax.f32 %v362_v57, %v363_v56 }
  0xcb   : >> { %v321_v55 = vpop.permute.xlu0 %320 }
  0xcc   : >> { %vm337_vm15 = vcmp.eq.s32.totalorder %v321_v55, 1 }
  0xcd   : >> { %v353_v60 = vsel %vm337_vm15, %v680_v16, 0.0 }
  0xce   : >> { %v365_v62 = vmax.f32 %v361_v58, %v353_v60 }
  0xd0   : >> { %v367_v0 = vmax.f32 %v364_v61, %v365_v62 }
  0xd2   : >> { %v368_v33 = vmax.f32 %v366_v63, %v367_v0 }
  0xd4   : >> { %v369_v34 = vrot.slane %v368_v33, 4 }
  0xd6   : >> { %v370_v35 = vmax.f32 %v368_v33, %v369_v34 }
  0xd8   : >> { %v371_v36 = vrot.slane %v370_v35, 2 }
  0xda   : >> { %v372_v37 = vmax.f32 %v370_v35, %v371_v36 }
  0xdc   : >> { %v373_v38 = vrot.slane %v372_v37, 1 }
  0xde   : >> { %v374_v40 = vmax.f32 %v372_v37, %v373_v38  ;;  %238 = sbr.rel (!%p236_p6) target bundleno = 45 (0x2d), region = 73 }
  0xe0   : >> { %v377_v41 = vmax.f32 %v376_v39, %v374_v40 }
  0xe2   : >> { %378 = vst [vmem:[%s375_s3] sm:$0x1] %v377_v41 }
  0xe3 PF: > { %s12_s11 = sadd.s32 1, %s535_s11   ;;  %s787_s9 = smov %s531_s10 }
  0xe4   : > { %p9_p7 = scmp.ge.s32.totalorder %s12_s11, 4   ;;  %s788_s10 = smov %s790_s12 }
  0xe6   :  { %11 = sbr.rel (!%p9_p7) target bundleno = 2 (0x2), region = 84 }

// kernel: gnn_forward.11
= control target key start
LH: loop header
LB: loop body
LE: loop exit
PB: predicated region body
PF: predicated region fallthrough
CT: control target
= control target key end

     0   :  { %s3534_s3 = inlined_call_operand.vmem [shape: f32[128,128], index: 3, kind: input, shape index: {}]   ;;  %s3535_s2 = inlined_call_operand.vmem [shape: f32[128,128], index: 2, kind: input, shape index: {}]   ;;  %s3536_s0 = inlined_call_operand.vmem [shape: f32[256,128], index: 0, kind: input, shape index: {}]   ;;  %s3537_s1 = inlined_call_operand.vmem [shape: f32[256,128], index: 1, kind: input, shape index: {}]   ;;  %s3538_s4 = inlined_call_operand.vmem [shape: f32[1,128], index: 4, kind: input, shape index: {}]   ;;  %s3539_s5 = inlined_call_operand.vmem [shape: f32[128,128], index: 5, kind: input, shape index: {}]   ;;  %s3540_s6 = inlined_call_operand.vmem [shape: f32[1,128], index: 6, kind: input, shape index: {}]   ;;  %s3541_s7 = inlined_call_operand.vmem [shape: f32[256,128], index: 7, kind: output, shape index: {}]  }
   0x1   :  { %v153_v0 = vld [vmem:[%s3534_s3 + $0x78] sm:$0xff]  ;;  %v152_v2 = vld [vmem:[%s3534_s3 + $0x70] sm:$0xff]  ;;  %v151_v4 = vld [vmem:[%s3534_s3 + $0x68] sm:$0xff] }
   0x2   :  { %v2219_v1 = vld [vmem:[%s3535_s2 + $0x78] sm:$0xff]  ;;  %154 = vmatpush.msra.mxu0 %v153_v0  ;;  %1865 = vmatpush.msra.mxu3 %v153_v0  ;;  %v2227_v3 = vld [vmem:[%s3535_s2 + $0x70] sm:$0xff]  ;;  %v2236_v5 = vld [vmem:[%s3535_s2 + $0x68] sm:$0xff] }
   0x3   :  { %267 = vmatpush.msra.mxu1 %v2219_v1  ;;  %v150_v6 = vld [vmem:[%s3534_s3 + $0x60] sm:$0xff]  ;;  %v149_v8 = vld [vmem:[%s3534_s3 + $0x58] sm:$0xff]  ;;  %v148_v10 = vld [vmem:[%s3534_s3 + $0x50] sm:$0xff] }
   0x4   :  { %155 = vmatpush.msra.mxu0 %v152_v2  ;;  %1866 = vmatpush.msra.mxu3 %v152_v2  ;;  %v2245_v7 = vld [vmem:[%s3535_s2 + $0x60] sm:$0xff]  ;;  %v2254_v9 = vld [vmem:[%s3535_s2 + $0x58] sm:$0xff]  ;;  %v2263_v11 = vld [vmem:[%s3535_s2 + $0x50] sm:$0xff] }
   0x5   :  { %268 = vmatpush.msra.mxu1 %v2227_v3  ;;  %v147_v12 = vld [vmem:[%s3534_s3 + $0x48] sm:$0xff]  ;;  %v146_v14 = vld [vmem:[%s3534_s3 + $0x40] sm:$0xff]  ;;  %v145_v16 = vld [vmem:[%s3534_s3 + $0x38] sm:$0xff] }
   0x6   :  { %156 = vmatpush.msra.mxu0 %v151_v4  ;;  %1867 = vmatpush.msra.mxu3 %v151_v4  ;;  %v2272_v13 = vld [vmem:[%s3535_s2 + $0x48] sm:$0xff]  ;;  %v2281_v15 = vld [vmem:[%s3535_s2 + $0x40] sm:$0xff]  ;;  %v2290_v17 = vld [vmem:[%s3535_s2 + $0x38] sm:$0xff] }
   0x7   :  { %269 = vmatpush.msra.mxu1 %v2236_v5  ;;  %v144_v18 = vld [vmem:[%s3534_s3 + $0x30] sm:$0xff]  ;;  %v143_v20 = vld [vmem:[%s3534_s3 + $0x28] sm:$0xff]  ;;  %v142_v22 = vld [vmem:[%s3534_s3 + $0x20] sm:$0xff] }
   0x8   :  { %157 = vmatpush.msra.mxu0 %v150_v6  ;;  %1868 = vmatpush.msra.mxu3 %v150_v6  ;;  %v2299_v19 = vld [vmem:[%s3535_s2 + $0x30] sm:$0xff]  ;;  %v2308_v21 = vld [vmem:[%s3535_s2 + $0x28] sm:$0xff]  ;;  %v2317_v23 = vld [vmem:[%s3535_s2 + $0x20] sm:$0xff] }
   0x9   :  { %270 = vmatpush.msra.mxu1 %v2245_v7  ;;  %v141_v24 = vld [vmem:[%s3534_s3 + $0x18] sm:$0xff]  ;;  %v140_v26 = vld [vmem:[%s3534_s3 + $0x10] sm:$0xff]  ;;  %v26_v28 = vld [vmem:[%s3536_s0] sm:$0xff] }
   0xa   :  { %158 = vmatpush.msra.mxu0 %v149_v8  ;;  %1869 = vmatpush.msra.mxu3 %v149_v8  ;;  %v2326_v25 = vld [vmem:[%s3535_s2 + $0x18] sm:$0xff]  ;;  %v2335_v27 = vld [vmem:[%s3535_s2 + $0x10] sm:$0xff]  ;;  %v58_v29 = vld [vmem:[%s3537_s1] sm:$0xff] }
   0xb   :  { %271 = vmatpush.msra.mxu1 %v2254_v9  ;;  %v139_v30 = vld [vmem:[%s3534_s3 + $0x8] sm:$0xff]  ;;  %v2350_v31 = vld [vmem:[%s3536_s0 + $0xc0] sm:$0xff]  ;;  %v106_v35 = vsub.f32 %v58_v29, %v26_v28  ;;  %v28_v44 = vld [vmem:[%s3536_s0 + $0x10] sm:$0xff] }
   0xc   :  { %159 = vmatpush.msra.mxu0 %v148_v10  ;;  %1870 = vmatpush.msra.mxu3 %v148_v10  ;;  %v82_v32 = vld [vmem:[%s3537_s1 + $0xc0] sm:$0xff]  ;;  %v2358_v33 = vld [vmem:[%s3535_s2 + $0x8] sm:$0xff]  ;;  %v60_v45 = vld [vmem:[%s3537_s1 + $0x10] sm:$0xff] }
   0xd   :  { %272 = vmatpush.msra.mxu1 %v2263_v11  ;;  %v138_v34 = vld [vmem:[%s3534_s3] sm:$0xff]  ;;  %v130_v37 = vsub.f32 %v82_v32, %v2350_v31  ;;  %v27_v38 = vld [vmem:[%s3536_s0 + $0x8] sm:$0xff]  ;;  %v2397_v46 = vld [vmem:[%s3536_s0 + $0xd0] sm:$0xff]  ;;  %v108_v48 = vsub.f32 %v60_v45, %v28_v44 }
   0xe   :  { %160 = vmatpush.msra.mxu0 %v147_v12  ;;  %1871 = vmatpush.msra.mxu3 %v147_v12  ;;  %v90_v36 = vld [vmem:[%s3535_s2] sm:$0xff]  ;;  %v59_v39 = vld [vmem:[%s3537_s1 + $0x8] sm:$0xff]  ;;  %v84_v47 = vld [vmem:[%s3537_s1 + $0xd0] sm:$0xff] }
   0xf   :  { %273 = vmatpush.msra.mxu1 %v2272_v13  ;;  %v2378_v40 = vld [vmem:[%s3536_s0 + $0xc8] sm:$0xff]  ;;  %v107_v42 = vsub.f32 %v59_v39, %v27_v38  ;;  %v132_v49 = vsub.f32 %v84_v47, %v2397_v46  ;;  %v29_v50 = vld [vmem:[%s3536_s0 + $0x18] sm:$0xff]  ;;  %v30_v56 = vld [vmem:[%s3536_s0 + $0x20] sm:$0xff] }
  0x10   :  { %161 = vmatpush.msra.mxu0 %v146_v14  ;;  %1872 = vmatpush.msra.mxu3 %v146_v14  ;;  %v83_v41 = vld [vmem:[%s3537_s1 + $0xc8] sm:$0xff]  ;;  %v61_v51 = vld [vmem:[%s3537_s1 + $0x18] sm:$0xff]  ;;  %v62_v57 = vld [vmem:[%s3537_s1 + $0x20] sm:$0xff] }
  0x11   :  { %274 = vmatpush.msra.mxu1 %v2281_v15  ;;  %v131_v43 = vsub.f32 %v83_v41, %v2378_v40  ;;  %v2416_v52 = vld [vmem:[%s3536_s0 + $0xd8] sm:$0xff]  ;;  %v109_v54 = vsub.f32 %v61_v51, %v29_v50  ;;  %v2435_v58 = vld [vmem:[%s3536_s0 + $0xe0] sm:$0xff]  ;;  %v110_v60 = vsub.f32 %v62_v57, %v30_v56  ;;  %v31_v62 = vld [vmem:[%s3536_s0 + $0x28] sm:$0xff] }
  0x12   :  { %162 = vmatpush.msra.mxu0 %v145_v16  ;;  %1873 = vmatpush.msra.mxu3 %v145_v16  ;;  %v85_v53 = vld [vmem:[%s3537_s1 + $0xd8] sm:$0xff]  ;;  %v86_v59 = vld [vmem:[%s3537_s1 + $0xe0] sm:$0xff]  ;;  %v63_v63 = vld [vmem:[%s3537_s1 + $0x28] sm:$0xff] }
  0x13   :  { %275 = vmatpush.msra.mxu1 %v2290_v17  ;;  %v133_v55 = vsub.f32 %v85_v53, %v2416_v52  ;;  %v134_v61 = vsub.f32 %v86_v59, %v2435_v58  ;;  %v2453_v0 = vld [vmem:[%s3536_s0 + $0xe8] sm:$0xff]  ;;  %v111_v2 = vsub.f32 %v63_v63, %v31_v62  ;;  %v32_v4 = vld [vmem:[%s3536_s0 + $0x30] sm:$0xff]  ;;  %v33_v10 = vld [vmem:[%s3536_s0 + $0x38] sm:$0xff] }
  0x14   :  { %163 = vmatpush.msra.mxu0 %v144_v18  ;;  %1874 = vmatpush.msra.mxu3 %v144_v18  ;;  %v2468_v6 = vld [vmem:[%s3536_s0 + $0xf0] sm:$0xff]  ;;  %v2483_v12 = vld [vmem:[%s3536_s0 + $0xf8] sm:$0xff]  ;;  %v34_v16 = vld [vmem:[%s3536_s0 + $0x40] sm:$0xff] }
  0x15   :  { %276 = vmatpush.msra.mxu1 %v2299_v19  ;;  %v70_v29 = vld [vmem:[%s3537_s1 + $0x60] sm:$0xff]  ;;  %v39_v32 = vld [vmem:[%s3536_s0 + $0x68] sm:$0xff]  ;;  %v40_v39 = vld [vmem:[%s3536_s0 + $0x70] sm:$0xff] }
  0x16   :  { %164 = vmatpush.msra.mxu0 %v143_v20  ;;  %1875 = vmatpush.msra.mxu3 %v143_v20  ;;  %v67_v20 = vld [vmem:[%s3537_s1 + $0x48] sm:$0xff]  ;;  %v1034_v41 = vld [vmem:[%s3539_s5 + $0x50] sm:$0xff]  ;;  %v1031_v45 = vld [vmem:[%s3539_s5 + $0x38] sm:$0xff] }
  0x17   :  { %277 = vmatpush.msra.mxu1 %v2308_v21  ;;  %v73_v47 = vld [vmem:[%s3537_s1 + $0x78] sm:$0xff]  ;;  %v1028_v51 = vld [vmem:[%s3539_s5 + $0x20] sm:$0xff] }
  0x18   :  { %165 = vmatpush.msra.mxu0 %v142_v22  ;;  %1876 = vmatpush.msra.mxu3 %v142_v22  ;;  %v36_v22 = vld [vmem:[%s3536_s0 + $0x50] sm:$0xff]  ;;  %v42_v53 = vld [vmem:[%s3536_s0 + $0x80] sm:$0xff] }
  0x19   :  { %278 = vmatpush.msra.mxu1 %v2317_v23  ;;  %v2599_v59 = vld [vmem:[%s3538_s4] ss:$0 sm:$0xff] }
  0x1a   :  { %166 = vmatpush.msra.mxu0 %v141_v24  ;;  %1877 = vmatpush.msra.mxu3 %v141_v24 }
  0x1b   :  { %279 = vmatpush.msra.mxu1 %v2326_v25 }
  0x1c   :  { %167 = vmatpush.msra.mxu0 %v140_v26  ;;  %1878 = vmatpush.msra.mxu3 %v140_v26  ;;  %v69_v26 = vld [vmem:[%s3537_s1 + $0x58] sm:$0xff] }
  0x1d   :  { %280 = vmatpush.msra.mxu1 %v2335_v27 }
  0x1e   :  { %168 = vmatpush.msra.mxu0 %v139_v30  ;;  %1879 = vmatpush.msra.mxu3 %v139_v30 }
  0x1f   :  { %281 = vmatpush.msra.mxu1 %v2358_v33 }
  0x20   :  { %169 = vmatpush.msra.mxu0 %v138_v34  ;;  %1880 = vmatpush.msra.mxu3 %v138_v34  ;;  %v1038_v34 = vld [vmem:[%s3539_s5 + $0x70] sm:$0xff] }
  0x21   :  { %282 = vmatpush.msra.mxu1 %v90_v36  ;;  %170 = vmatmul.f32.vlgmr.msra.gmra.mxu0 %v106_v35  ;;  %v1037_v35 = vld [vmem:[%s3539_s5 + $0x68] sm:$0xff] }
  0x22   :  { %242 = vmatmul.f32.vlgmr.msra.gmra.mxu3 %v130_v37  ;;  %283 = vmatmul.f32.vlgmr.msra.gmra.mxu1 %v26_v28  ;;  %v38_v28 = vld [vmem:[%s3536_s0 + $0x60] sm:$0xff] }
  0x23   :  { %1881 = vmatpush.msrb.mxu3 %v2219_v1  ;;  %v87_v1 = vld [vmem:[%s3537_s1 + $0xe8] sm:$0xff]  ;;  %v118_v30 = vsub.f32 %v70_v29, %v38_v28  ;;  %v1036_v37 = vld [vmem:[%s3539_s5 + $0x60] sm:$0xff] }
  0x25   :  { %1882 = vmatpush.msrb.mxu3 %v2227_v3  ;;  %v135_v3 = vsub.f32 %v87_v1, %v2453_v0  ;;  %v75_v1 = vld [vmem:[%s3537_s1 + $0x88] sm:$0xff] }
  0x27   :  { %1883 = vmatpush.msrb.mxu3 %v2236_v5  ;;  %v64_v5 = vld [vmem:[%s3537_s1 + $0x30] sm:$0xff] }
  0x28   :  { %v112_v8 = vsub.f32 %v64_v5, %v32_v4 }
  0x29   :  { %173 = vmatmul.f32.gmra.mxu0 %v107_v42  ;;  %1884 = vmatpush.msrb.mxu3 %v2245_v7  ;;  %v88_v7 = vld [vmem:[%s3537_s1 + $0xf0] sm:$0xff]  ;;  %v1033_v42 = vld [vmem:[%s3539_s5 + $0x48] sm:$0xff] }
  0x2a   :  { %245 = vmatmul.f32.gmra.mxu3 %v131_v43  ;;  %286 = vmatmul.f32.gmra.mxu1 %v27_v38  ;;  %v1035_v38 = vld [vmem:[%s3539_s5 + $0x58] sm:$0xff] }
  0x2b   :  { %1885 = vmatpush.msrb.mxu3 %v2254_v9  ;;  %v136_v9 = vsub.f32 %v88_v7, %v2468_v6 }
  0x2d   :  { %1886 = vmatpush.msrb.mxu3 %v2263_v11  ;;  %v65_v11 = vld [vmem:[%s3537_s1 + $0x38] sm:$0xff] }
  0x2e   :  { %v113_v14 = vsub.f32 %v65_v11, %v33_v10 }
  0x2f   :  { %1887 = vmatpush.msrb.mxu3 %v2272_v13  ;;  %v89_v13 = vld [vmem:[%s3537_s1 + $0xf8] sm:$0xff] }
  0x31   :  { %176 = vmatmul.f32.gmra.mxu0 %v108_v48  ;;  %1888 = vmatpush.msrb.mxu3 %v2281_v15  ;;  %v137_v15 = vsub.f32 %v89_v13, %v2483_v12  ;;  %v1030_v48 = vld [vmem:[%s3539_s5 + $0x30] sm:$0xff] }
  0x32   :  { %248 = vmatmul.f32.gmra.mxu3 %v132_v49  ;;  %289 = vmatmul.f32.gmra.mxu1 %v28_v44  ;;  %v1032_v44 = vld [vmem:[%s3539_s5 + $0x40] sm:$0xff]  ;;  %v1029_v49 = vld [vmem:[%s3539_s5 + $0x28] sm:$0xff] }
  0x33   :  { %1889 = vmatpush.msrb.mxu3 %v2290_v17  ;;  %v66_v17 = vld [vmem:[%s3537_s1 + $0x40] sm:$0xff] }
  0x34   :  { %v114_v18 = vsub.f32 %v66_v17, %v34_v16 }
  0x35   :  { %1890 = vmatpush.msrb.mxu3 %v2299_v19  ;;  %v35_v19 = vld [vmem:[%s3536_s0 + $0x48] sm:$0xff] }
  0x37   :  { %1891 = vmatpush.msrb.mxu3 %v2308_v21  ;;  %v115_v21 = vsub.f32 %v67_v20, %v35_v19  ;;  %v45_v20 = vld [vmem:[%s3536_s0 + $0x98] sm:$0xff] }
  0x39   :  { %179 = vmatmul.f32.gmra.mxu0 %v109_v54  ;;  %1892 = vmatpush.msrb.mxu3 %v2317_v23  ;;  %v68_v23 = vld [vmem:[%s3537_s1 + $0x50] sm:$0xff]  ;;  %v74_v54 = vld [vmem:[%s3537_s1 + $0x80] sm:$0xff] }
  0x3a   :  { %251 = vmatmul.f32.gmra.mxu3 %v133_v55  ;;  %292 = vmatmul.f32.gmra.mxu1 %v29_v50  ;;  %v116_v24 = vsub.f32 %v68_v23, %v36_v22  ;;  %v1026_v55 = vld [vmem:[%s3539_s5 + $0x10] sm:$0xff]  ;;  %v122_v57 = vsub.f32 %v74_v54, %v42_v53 }
  0x3b   :  { %1893 = vmatpush.msrb.mxu3 %v2326_v25  ;;  %v37_v25 = vld [vmem:[%s3536_s0 + $0x58] sm:$0xff] }
  0x3d   :  { %1894 = vmatpush.msrb.mxu3 %v2335_v27  ;;  %v117_v27 = vsub.f32 %v69_v26, %v37_v25 }
  0x3f   :  { %1895 = vmatpush.msrb.mxu3 %v2358_v33  ;;  %v71_v33 = vld [vmem:[%s3537_s1 + $0x68] sm:$0xff] }
  0x41   :  { %182 = vmatmul.f32.gmra.mxu0 %v110_v60  ;;  %1896 = vmatpush.msrb.mxu3 %v90_v36  ;;  %v119_v36 = vsub.f32 %v71_v33, %v39_v32  ;;  %v1024_v60 = vld [vmem:[%s3539_s5] sm:$0xff] }
  0x42   :  { %254 = vmatmul.f32.gmra.mxu3 %v134_v61  ;;  %295 = vmatmul.f32.gmra.mxu1 %v30_v56  ;;  %v1025_v56 = vld [vmem:[%s3539_s5 + $0x8] sm:$0xff] }
  0x49   :  { %185 = vmatmul.f32.gmra.mxu0 %v111_v2 }
  0x4a   :  { %257 = vmatmul.f32.gmra.mxu3 %v135_v3  ;;  %298 = vmatmul.f32.gmra.mxu1 %v31_v62 }
  0x51   :  { %188 = vmatmul.f32.gmra.mxu0 %v112_v8 }
  0x52   :  { %260 = vmatmul.f32.gmra.mxu3 %v136_v9  ;;  %301 = vmatmul.f32.gmra.mxu1 %v32_v4  ;;  %v44_v9 = vld [vmem:[%s3536_s0 + $0x90] sm:$0xff] }
  0x59   :  { %191 = vmatmul.f32.gmra.mxu0 %v113_v14 }
  0x5a   :  { %263 = vmatmul.f32.gmra.mxu3 %v137_v15  ;;  %304 = vmatmul.f32.gmra.mxu1 %v33_v10  ;;  %v76_v10 = vld [vmem:[%s3537_s1 + $0x90] sm:$0xff] }
  0x5b   :  { %v124_v15 = vsub.f32 %v76_v10, %v44_v9 }
  0x61   :  { %194 = vmatmul.f32.gmra.mxu0 %v114_v18 }
  0x62   :  { %307 = vmatmul.f32.gmra.mxu1 %v34_v16  ;;  %355 = vmatmul.f32.vlgmr.msrb.gmra.mxu3 %v2350_v31  ;;  %v1039_v31 = vld [vmem:[%s3539_s5 + $0x78] sm:$0xff] }
  0x63   :  { %1044 = vmatpush.msra.mxu2 %v1039_v31  ;;  %1897 = vmatpush.msra.mxu3 %v1039_v31 }
  0x65   :  { %1045 = vmatpush.msra.mxu2 %v1038_v34  ;;  %1898 = vmatpush.msra.mxu3 %v1038_v34 }
  0x67   :  { %1046 = vmatpush.msra.mxu2 %v1037_v35  ;;  %1899 = vmatpush.msra.mxu3 %v1037_v35 }
  0x69   :  { %197 = vmatmul.f32.gmra.mxu0 %v115_v21  ;;  %1047 = vmatpush.msra.mxu2 %v1036_v37  ;;  %v77_v21 = vld [vmem:[%s3537_s1 + $0x98] sm:$0xff] }
  0x6a   :  { %310 = vmatmul.f32.gmra.mxu1 %v35_v19  ;;  %358 = vmatmul.f32.gmra.mxu3 %v2378_v40  ;;  %v72_v40 = vld [vmem:[%s3537_s1 + $0x70] sm:$0xff] }
  0x6b   :  { %1048 = vmatpush.msra.mxu2 %v1035_v38  ;;  %1900 = vmatpush.msra.mxu3 %v1036_v37  ;;  %v120_v43 = vsub.f32 %v72_v40, %v40_v39  ;;  %v46_v37 = vld [vmem:[%s3536_s0 + $0xa0] sm:$0xff] }
  0x6d   :  { %1049 = vmatpush.msra.mxu2 %v1034_v41  ;;  %1901 = vmatpush.msra.mxu3 %v1035_v38  ;;  %v78_v38 = vld [vmem:[%s3537_s1 + $0xa0] sm:$0xff] }
  0x6f   :  { %1050 = vmatpush.msra.mxu2 %v1033_v42  ;;  %1902 = vmatpush.msra.mxu3 %v1034_v41 }
  0x71   :  { %200 = vmatmul.f32.gmra.mxu0 %v116_v24  ;;  %1051 = vmatpush.msra.mxu2 %v1032_v44 }
  0x72   :  { %313 = vmatmul.f32.gmra.mxu1 %v36_v22  ;;  %361 = vmatmul.f32.gmra.mxu3 %v2397_v46  ;;  %v41_v46 = vld [vmem:[%s3536_s0 + $0x78] sm:$0xff] }
  0x73   :  { %1052 = vmatpush.msra.mxu2 %v1031_v45  ;;  %1903 = vmatpush.msra.mxu3 %v1033_v42  ;;  %v121_v50 = vsub.f32 %v73_v47, %v41_v46 }
  0x75   :  { %1053 = vmatpush.msra.mxu2 %v1030_v48  ;;  %1904 = vmatpush.msra.mxu3 %v1032_v44 }
  0x77   :  { %1054 = vmatpush.msra.mxu2 %v1029_v49  ;;  %1905 = vmatpush.msra.mxu3 %v1031_v45 }
  0x79   :  { %203 = vmatmul.f32.gmra.mxu0 %v117_v27  ;;  %1055 = vmatpush.msra.mxu2 %v1028_v51  ;;  %v125_v27 = vsub.f32 %v77_v21, %v45_v20 }
  0x7a   :  { %316 = vmatmul.f32.gmra.mxu1 %v37_v25  ;;  %364 = vmatmul.f32.gmra.mxu3 %v2416_v52  ;;  %v1027_v52 = vld [vmem:[%s3539_s5 + $0x18] sm:$0xff] }
  0x7b   :  { %1056 = vmatpush.msra.mxu2 %v1027_v52  ;;  %1906 = vmatpush.msra.mxu3 %v1030_v48 }
  0x7d   :  { %1057 = vmatpush.msra.mxu2 %v1026_v55  ;;  %1907 = vmatpush.msra.mxu3 %v1029_v49 }
  0x7f   :  { %1058 = vmatpush.msra.mxu2 %v1025_v56  ;;  %1908 = vmatpush.msra.mxu3 %v1028_v51 }
  0x81   :  { %206 = vmatmul.f32.gmra.mxu0 %v118_v30  ;;  %1059 = vmatpush.msra.mxu2 %v1024_v60 }
  0x82   :  { %319 = vmatmul.f32.gmra.mxu1 %v38_v28  ;;  %367 = vmatmul.f32.gmra.mxu3 %v2435_v58 }
  0x83   :  { %1909 = vmatpush.msra.mxu3 %v1027_v52 }
  0x85   :  { %1910 = vmatpush.msra.mxu3 %v1026_v55 }
  0x87   :  { %1911 = vmatpush.msra.mxu3 %v1025_v56 }
  0x89   :  { %209 = vmatmul.f32.gmra.mxu0 %v119_v36  ;;  %1912 = vmatpush.msra.mxu3 %v1024_v60  ;;  %v79_v60 = vld [vmem:[%s3537_s1 + $0xa8] sm:$0xff] }
  0x8a   :  { %322 = vmatmul.f32.gmra.mxu1 %v39_v32  ;;  %370 = vmatmul.f32.gmra.mxu3 %v2453_v0  ;;  %v43_v0 = vld [vmem:[%s3536_s0 + $0x88] sm:$0xff] }
  0x8b   :  { %v123_v4 = vsub.f32 %v75_v1, %v43_v0 }
  0x91   :  { %212 = vmatmul.f32.gmra.mxu0 %v120_v43 }
  0x92   :  { %325 = vmatmul.f32.gmra.mxu1 %v40_v39  ;;  %373 = vmatmul.f32.gmra.mxu3 %v2468_v6 }
  0x99   :  { %215 = vmatmul.f32.gmra.mxu0 %v121_v50 }
  0x9a   :  { %328 = vmatmul.f32.gmra.mxu1 %v41_v46  ;;  %376 = vmatmul.f32.gmra.mxu3 %v2483_v12  ;;  %v126_v46 = vsub.f32 %v78_v38, %v46_v37 }
  0x9e   :  { %v171_v58 = vpop.f32.mrf.mxu0 }
  0x9f   :  { %v284_v61 = vpop.f32.mrf.mxu1 }
  0xa0   :  { %v285_v62 = vadd.f32 %v284_v61, %v171_v58  ;;  %v47_v58 = vld [vmem:[%s3536_s0 + $0xa8] sm:$0xff] }
  0xa1   :  { %218 = vmatmul.f32.gmra.mxu0 %v122_v57 }
  0xa2   :  { %v384_v63 = vadd.f32 %v2599_v59, %v285_v62  ;;  %331 = vmatmul.f32.gmra.mxu1 %v42_v53 }
  0xa4   :  { %v1801_v2 = vmul.f32 -1.442695, %v384_v63 }
  0xa5   :  { %v2611_v3 = vpop.f32.mrf.mxu3 }
  0xa6   :  { %1915 = vpow2.f32 %v1801_v2  ;;  %v174_v5 = vpop.f32.mrf.mxu0 }
  0xa7   :  { %v287_v6 = vpop.f32.mrf.mxu1 }
  0xa8   :  { %v288_v7 = vadd.f32 %v287_v6, %v174_v5  ;;  %v127_v5 = vsub.f32 %v79_v60, %v47_v58 }
  0xa9   :  { %221 = vmatmul.f32.gmra.mxu0 %v123_v4 }
  0xaa   :  { %v385_v8 = vadd.f32 %v2599_v59, %v288_v7  ;;  %334 = vmatmul.f32.gmra.mxu1 %v43_v0 }
  0xac   :  { %v1916_v11 = vpop.eup %1915  ;;  %v1802_v12 = vmul.f32 -1.442695, %v385_v8 }
  0xad   :  { %v512_v13 = vadd.f32 1.0, %v1916_v11  ;;  %v2620_v14 = vpop.f32.mrf.mxu3 }
  0xae   :  { %1917 = vpow2.f32 %v1802_v12  ;;  %v177_v16 = vpop.f32.mrf.mxu0 }
  0xaf   :  { %1919 = vrcp.f32 %v512_v13  ;;  %v290_v17 = vpop.f32.mrf.mxu1  ;;  %v555_v33 = vand.u32 2147483648, %v512_v13  ;;  %v553_v36 = vand.u32 2147483647, %v512_v13  ;;  %vm549_vm1 = vweird.f32 %v512_v13 }
  0xb0   :  { %v291_v18 = vadd.f32 %v290_v17, %v177_v16 }
  0xb1   :  { %224 = vmatmul.f32.gmra.mxu0 %v124_v15  ;;  %v556_v45 = vor.u32 1.1754944e-38, %v555_v33  ;;  %vm554_vm3 = vcmp.eq.f32.partialorder %v553_v36, 8.507059e+37 }
  0xb2   :  { %v386_v19 = vadd.f32 %v2599_v59, %v291_v18  ;;  %337 = vmatmul.f32.gmra.mxu1 %v44_v9  ;;  %v48_v18 = vld [vmem:[%s3536_s0 + $0xb0] sm:$0xff] }
  0xb4   :  { %v1918_v22 = vpop.eup %1917  ;;  %v1803_v23 = vmul.f32 -1.442695, %v386_v19  ;;  %v80_v19 = vld [vmem:[%s3537_s1 + $0xb0] sm:$0xff] }
  0xb5   :  { %v1920_v24 = vpop.eup %1919  ;;  %v2629_v25 = vadd.f32 1.0, %v1918_v22  ;;  %v2631_v26 = vpop.f32.mrf.mxu3 }
  0xb6   :  { %1921 = vpow2.f32 %v1803_v23  ;;  %v180_v28 = vpop.f32.mrf.mxu0  ;;  %v545_v29 = vmul.f32 %v1920_v24, %v512_v13  ;;  %vm550_vm0 = vweird.f32 %v1920_v24 }
  0xb7   :  { %1923 = vrcp.f32 %v2629_v25  ;;  %v293_v30 = vpop.f32.mrf.mxu1  ;;  %vm551_vm2 = vmor %vm549_vm1, %vm550_vm0  ;;  %v570_v54 = vand.u32 2147483648, %v2629_v25  ;;  %v568_v57 = vand.u32 2147483647, %v2629_v25  ;;  %vm564_vm5 = vweird.f32 %v2629_v25 }
  0xb8   :  { %v294_v31 = vadd.f32 %v293_v30, %v180_v28  ;;  %v546_v32 = vsub.f32 1.0, %v545_v29  ;;  %v128_v28 = vsub.f32 %v80_v19, %v48_v18 }
  0xb9   :  { %227 = vmatmul.f32.gmra.mxu0 %v125_v27  ;;  %v571_v4 = vor.u32 1.1754944e-38, %v570_v54  ;;  %vm569_vm7 = vcmp.eq.f32.partialorder %v568_v57, 8.507059e+37 }
  0xba   :  { %v387_v34 = vadd.f32 %v2599_v59, %v294_v31  ;;  %340 = vmatmul.f32.gmra.mxu1 %v45_v20  ;;  %v547_v35 = vmul.f32 %v1920_v24, %v546_v32 }
  0xbc   :  { %v1922_v39 = vpop.eup %1921  ;;  %v1804_v40 = vmul.f32 -1.442695, %v387_v34  ;;  %v548_v41 = vadd.f32 %v1920_v24, %v547_v35 }
  0xbd   :  { %v1924_v42 = vpop.eup %1923  ;;  %v2641_v43 = vadd.f32 1.0, %v1922_v39  ;;  %v2643_v44 = vpop.f32.mrf.mxu3 }
  0xbe   :  { %1925 = vpow2.f32 %v1804_v40  ;;  %v183_v47 = vpop.f32.mrf.mxu0  ;;  %v552_v48 = vsel %vm551_vm2, %v1920_v24, %v548_v41  ;;  %v560_v49 = vmul.f32 %v1924_v42, %v2629_v25  ;;  %vm565_vm4 = vweird.f32 %v1924_v42  ;;  %v49_v40 = vld [vmem:[%s3536_s0 + $0xb8] sm:$0xff] }
  0xbf   :  { %1927 = vrcp.f32 %v2641_v43  ;;  %v296_v50 = vpop.f32.mrf.mxu1  ;;  %v557_v51 = vsel %vm554_vm3, %v556_v45, %v552_v48  ;;  %vm566_vm6 = vmor %vm564_vm5, %vm565_vm4  ;;  %v585_v13 = vand.u32 2147483648, %v2641_v43  ;;  %v583_v17 = vand.u32 2147483647, %v2641_v43  ;;  %v81_v41 = vld [vmem:[%s3537_s1 + $0xb8] sm:$0xff] }
  0xc0   :  { %v297_v52 = vadd.f32 %v296_v50, %v183_v47  ;;  %1060 = vmatmul.f32.vlgmr.msra.gmra.mxu2 %v557_v51  ;;  %v561_v53 = vsub.f32 1.0, %v560_v49  ;;  %vm579_vm9 = vweird.f32 %v2641_v43  ;;  %v129_v50 = vsub.f32 %v81_v41, %v49_v40 }
  0xc1   :  { %230 = vmatmul.f32.gmra.mxu0 %v126_v46  ;;  %v586_v27 = vor.u32 1.1754944e-38, %v585_v13  ;;  %vm584_vm11 = vcmp.eq.f32.partialorder %v583_v17, 8.507059e+37 }
  0xc2   :  { %v388_v55 = vadd.f32 %v2599_v59, %v297_v52  ;;  %343 = vmatmul.f32.gmra.mxu1 %v46_v37  ;;  %v562_v56 = vmul.f32 %v1924_v42, %v561_v53 }
  0xc4   :  { %v1926_v61 = vpop.eup %1925  ;;  %v1805_v62 = vmul.f32 -1.442695, %v388_v55  ;;  %v563_v63 = vadd.f32 %v1924_v42, %v562_v56 }
  0xc5   :  { %v1928_v0 = vpop.eup %1927  ;;  %v2657_v1 = vadd.f32 1.0, %v1926_v61  ;;  %v2659_v2 = vpop.f32.mrf.mxu3 }
  0xc6   :  { %1929 = vpow2.f32 %v1805_v62  ;;  %v186_v6 = vpop.f32.mrf.mxu0  ;;  %v567_v7 = vsel %vm566_vm6, %v1924_v42, %v563_v63  ;;  %v575_v8 = vmul.f32 %v1928_v0, %v2641_v43  ;;  %vm580_vm8 = vweird.f32 %v1928_v0 }
  0xc7   :  { %1931 = vrcp.f32 %v2657_v1  ;;  %v299_v9 = vpop.f32.mrf.mxu1  ;;  %v572_v10 = vsel %vm569_vm7, %v571_v4, %v567_v7  ;;  %vm581_vm10 = vmor %vm579_vm9, %vm580_vm8  ;;  %v600_v36 = vand.u32 2147483648, %v2657_v1  ;;  %v598_v39 = vand.u32 2147483647, %v2657_v1 }
  0xc8   :  { %v300_v11 = vadd.f32 %v299_v9, %v186_v6  ;;  %1063 = vmatmul.f32.gmra.mxu2 %v572_v10  ;;  %v576_v12 = vsub.f32 1.0, %v575_v8  ;;  %vm594_vm13 = vweird.f32 %v2657_v1 }
  0xc9   :  { %233 = vmatmul.f32.gmra.mxu0 %v127_v5  ;;  %v601_v49 = vor.u32 1.1754944e-38, %v600_v36  ;;  %vm599_vm15 = vcmp.eq.f32.partialorder %v598_v39, 8.507059e+37 }
  0xca   :  { %v389_v15 = vadd.f32 %v2599_v59, %v300_v11  ;;  %346 = vmatmul.f32.gmra.mxu1 %v47_v58  ;;  %v577_v16 = vmul.f32 %v1928_v0, %v576_v12 }
  0xcc   :  { %v1930_v20 = vpop.eup %1929  ;;  %v1806_v21 = vmul.f32 -1.442695, %v389_v15  ;;  %v578_v22 = vadd.f32 %v1928_v0, %v577_v16 }
  0xcd   :  { %v1932_v23 = vpop.eup %1931  ;;  %v2673_v24 = vadd.f32 1.0, %v1930_v20  ;;  %v2675_v25 = vpop.f32.mrf.mxu3 }
  0xce   :  { %1933 = vpow2.f32 %v1806_v21  ;;  %v189_v29 = vpop.f32.mrf.mxu0  ;;  %v582_v30 = vsel %vm581_vm10, %v1928_v0, %v578_v22  ;;  %v590_v31 = vmul.f32 %v1932_v23, %v2657_v1  ;;  %vm595_vm12 = vweird.f32 %v1932_v23 }
  0xcf   :  { %1935 = vrcp.f32 %v2673_v24  ;;  %v302_v32 = vpop.f32.mrf.mxu1  ;;  %v587_v33 = vsel %vm584_vm11, %v586_v27, %v582_v30  ;;  %vm596_vm14 = vmor %vm594_vm13, %vm595_vm12  ;;  %v615_v58 = vand.u32 2147483648, %v2673_v24  ;;  %v613_v62 = vand.u32 2147483647, %v2673_v24 }
  0xd0   :  { %v303_v34 = vadd.f32 %v302_v32, %v189_v29  ;;  %1066 = vmatmul.f32.gmra.mxu2 %v587_v33  ;;  %v591_v35 = vsub.f32 1.0, %v590_v31  ;;  %vm609_vm1 = vweird.f32 %v2673_v24 }
  0xd1   :  { %236 = vmatmul.f32.gmra.mxu0 %v128_v28  ;;  %v616_v7 = vor.u32 1.1754944e-38, %v615_v58  ;;  %vm614_vm3 = vcmp.eq.f32.partialorder %v613_v62, 8.507059e+37 }
  0xd2   :  { %v390_v37 = vadd.f32 %v2599_v59, %v303_v34  ;;  %349 = vmatmul.f32.gmra.mxu1 %v48_v18  ;;  %v592_v38 = vmul.f32 %v1932_v23, %v591_v35 }
  0xd4   :  { %v1934_v42 = vpop.eup %1933  ;;  %v1807_v43 = vmul.f32 -1.442695, %v390_v37  ;;  %v593_v45 = vadd.f32 %v1932_v23, %v592_v38 }
  0xd5   :  { %v1936_v46 = vpop.eup %1935  ;;  %v517_v47 = vadd.f32 1.0, %v1934_v42  ;;  %v2689_v48 = vpop.f32.mrf.mxu3 }
  0xd6   :  { %1937 = vpow2.f32 %v1807_v43  ;;  %v192_v51 = vpop.f32.mrf.mxu0  ;;  %v597_v52 = vsel %vm596_vm14, %v1932_v23, %v593_v45  ;;  %v605_v53 = vmul.f32 %v1936_v46, %v2673_v24  ;;  %vm610_vm0 = vweird.f32 %v1936_v46 }
  0xd7   :  { %1939 = vrcp.f32 %v517_v47  ;;  %v305_v54 = vpop.f32.mrf.mxu1  ;;  %v602_v55 = vsel %vm599_vm15, %v601_v49, %v597_v52  ;;  %vm611_vm2 = vmor %vm609_vm1, %vm610_vm0  ;;  %v628_v16 = vand.u32 2147483647, %v517_v47  ;;  %v630_v17 = vand.u32 2147483648, %v517_v47 }
  0xd8   :  { %v306_v56 = vadd.f32 %v305_v54, %v192_v51  ;;  %1069 = vmatmul.f32.gmra.mxu2 %v602_v55  ;;  %v606_v57 = vsub.f32 1.0, %v605_v53  ;;  %vm624_vm5 = vweird.f32 %v517_v47 }
  0xd9   :  { %239 = vmatmul.f32.gmra.mxu0 %v129_v50  ;;  %vm629_vm7 = vcmp.eq.f32.partialorder %v628_v16, 8.507059e+37  ;;  %v631_v28 = vor.u32 1.1754944e-38, %v630_v17 }
  0xda   :  { %v391_v60 = vadd.f32 %v2599_v59, %v306_v56  ;;  %352 = vmatmul.f32.gmra.mxu1 %v49_v40  ;;  %v607_v61 = vmul.f32 %v1936_v46, %v606_v57 }
  0xdc   :  { %v1938_v63 = vpop.eup %1937  ;;  %v1808_v0 = vmul.f32 -1.442695, %v391_v60  ;;  %v608_v1 = vadd.f32 %v1936_v46, %v607_v61 }
  0xdd   :  { %v1940_v4 = vpop.eup %1939  ;;  %v518_v5 = vadd.f32 1.0, %v1938_v63  ;;  %v2696_v6 = vpop.f32.mrf.mxu3 }
  0xde   :  { %1941 = vpow2.f32 %v1808_v0  ;;  %v195_v8 = vpop.f32.mrf.mxu0  ;;  %v612_v9 = vsel %vm611_vm2, %v1936_v46, %v608_v1  ;;  %v620_v10 = vmul.f32 %v1940_v4, %v517_v47  ;;  %vm625_vm4 = vweird.f32 %v1940_v4 }
  0xdf   :  { %1943 = vrcp.f32 %v518_v5  ;;  %v308_v11 = vpop.f32.mrf.mxu1  ;;  %v617_v12 = vsel %vm614_vm3, %v616_v7, %v612_v9  ;;  %vm626_vm6 = vmor %vm624_vm5, %vm625_vm4  ;;  %v643_v38 = vand.u32 2147483647, %v518_v5  ;;  %v645_v39 = vand.u32 2147483648, %v518_v5 }
  0xe0   :  { %v309_v13 = vadd.f32 %v308_v11, %v195_v8  ;;  %1072 = vmatmul.f32.gmra.mxu2 %v617_v12  ;;  %v621_v15 = vsub.f32 1.0, %v620_v10  ;;  %vm639_vm9 = vweird.f32 %v518_v5 }
  0xe1   :  { %vm644_vm11 = vcmp.eq.f32.partialorder %v643_v38, 8.507059e+37  ;;  %v646_v50 = vor.u32 1.1754944e-38, %v645_v39 }
  0xe2   :  { %v392_v18 = vadd.f32 %v2599_v59, %v309_v13  ;;  %v622_v19 = vmul.f32 %v1940_v4, %v621_v15 }
  0xe4   :  { %v1942_v20 = vpop.eup %1941  ;;  %v1809_v21 = vmul.f32 -1.442695, %v392_v18  ;;  %v623_v22 = vadd.f32 %v1940_v4, %v622_v19 }
  0xe5   :  { %v1944_v23 = vpop.eup %1943  ;;  %v2699_v24 = vadd.f32 1.0, %v1942_v20  ;;  %v356_v27 = vpop.f32.mrf.mxu3 }
  0xe6   :  { %1945 = vpow2.f32 %v1809_v21  ;;  %v357_v29 = vadd.f32 %v356_v27, %v2611_v3  ;;  %v198_v30 = vpop.f32.mrf.mxu0  ;;  %v627_v31 = vsel %vm626_vm6, %v1940_v4, %v623_v22  ;;  %v635_v32 = vmul.f32 %v1944_v23, %v518_v5 }
  0xe7   :  { %1947 = vrcp.f32 %v2699_v24  ;;  %v311_v33 = vpop.f32.mrf.mxu1  ;;  %v632_v34 = vsel %vm629_vm7, %v631_v28, %v627_v31  ;;  %vm640_vm8 = vweird.f32 %v1944_v23  ;;  %v658_v61 = vand.u32 2147483647, %v2699_v24 }
  0xe8   :  { %v408_v35 = vadd.f32 %v2599_v59, %v357_v29  ;;  %v312_v36 = vadd.f32 %v311_v33, %v198_v30  ;;  %1075 = vmatmul.f32.gmra.mxu2 %v632_v34  ;;  %v636_v37 = vsub.f32 1.0, %v635_v32  ;;  %vm641_vm10 = vmor %vm639_vm9, %vm640_vm8  ;;  %v660_v62 = vand.u32 2147483648, %v2699_v24 }
  0xe9   :  { %vm654_vm13 = vweird.f32 %v2699_v24  ;;  %vm659_vm14 = vcmp.eq.f32.partialorder %v658_v61, 8.507059e+37 }
  0xea   :  { %v1825_v40 = vmul.f32 -1.442695, %v408_v35  ;;  %v393_v41 = vadd.f32 %v2599_v59, %v312_v36  ;;  %v637_v42 = vmul.f32 %v1944_v23, %v636_v37  ;;  %v661_v12 = vor.u32 1.1754944e-38, %v660_v62 }
  0xec   :  { %v1946_v3 = vpop.eup %1945  ;;  %1949 = vpow2.f32 %v1825_v40  ;;  %v1810_v43 = vmul.f32 -1.442695, %v393_v41  ;;  %v638_v45 = vadd.f32 %v1944_v23, %v637_v42 }
  0xed   :  { %v1948_v46 = vpop.eup %1947  ;;  %v2705_v47 = vadd.f32 1.0, %v1946_v3  ;;  %v359_v49 = vpop.f32.mrf.mxu3 }
  0xee   :  { %1951 = vpow2.f32 %v1810_v43  ;;  %v360_v51 = vadd.f32 %v359_v49, %v2620_v14  ;;  %v201_v52 = vpop.f32.mrf.mxu0  ;;  %v642_v53 = vsel %vm641_vm10, %v1944_v23, %v638_v45  ;;  %v650_v54 = vmul.f32 %v1948_v46, %v2699_v24 }
  0xef   :  { %1953 = vrcp.f32 %v2705_v47  ;;  %v314_v55 = vpop.f32.mrf.mxu1  ;;  %v647_v56 = vsel %vm644_vm11, %v646_v50, %v642_v53  ;;  %vm655_vm12 = vweird.f32 %v1948_v46  ;;  %v673_v13 = vand.u32 2147483647, %v2705_v47 }
  0xf0   :  { %v409_v57 = vadd.f32 %v2599_v59, %v360_v51  ;;  %v315_v58 = vadd.f32 %v314_v55, %v201_v52  ;;  %1078 = vmatmul.f32.gmra.mxu2 %v647_v56  ;;  %v651_v60 = vsub.f32 1.0, %v650_v54  ;;  %vm656_vm15 = vmor %vm654_vm13, %vm655_vm12  ;;  %v675_v21 = vand.u32 2147483648, %v2705_v47 }
  0xf1   :  { %vm669_vm0 = vweird.f32 %v2705_v47  ;;  %vm2728_vm1 = vcmp.eq.f32.partialorder %v673_v13, 8.507059e+37 }
  0xf2   :  { %v1950_v63 = vpop.eup %1949  ;;  %v1826_v0 = vmul.f32 -1.442695, %v409_v57  ;;  %v394_v14 = vadd.f32 %v2599_v59, %v315_v58  ;;  %v652_v1 = vmul.f32 %v1948_v46, %v651_v60  ;;  %v676_v34 = vor.u32 1.1754944e-38, %v675_v21 }
  0xf3   :  { %v2714_v4 = vadd.f32 1.0, %v1950_v63 }
  0xf4   :  { %v1952_v5 = vpop.eup %1951  ;;  %1955 = vpow2.f32 %v1826_v0  ;;  %v1811_v7 = vmul.f32 -1.442695, %v394_v14  ;;  %v653_v8 = vadd.f32 %v1948_v46, %v652_v1 }
  0xf5   :  { %v1954_v9 = vpop.eup %1953  ;;  %1957 = vrcp.f32 %v2714_v4  ;;  %v2718_v10 = vadd.f32 1.0, %v1952_v5  ;;  %v362_v11 = vpop.f32.mrf.mxu3  ;;  %v913_v27 = vand.u32 2147483647, %v2714_v4  ;;  %vm909_vm3 = vweird.f32 %v2714_v4 }
  0xf6   :  { %1959 = vpow2.f32 %v1811_v7  ;;  %v363_v15 = vadd.f32 %v362_v11, %v2631_v26  ;;  %v204_v16 = vpop.f32.mrf.mxu0  ;;  %v657_v17 = vsel %vm656_vm15, %v1948_v46, %v653_v8  ;;  %v665_v18 = vmul.f32 %v1954_v9, %v2705_v47 }
  0xf7   :  { %1961 = vrcp.f32 %v2718_v10  ;;  %v317_v19 = vpop.f32.mrf.mxu1  ;;  %v662_v20 = vsel %vm659_vm14, %v661_v12, %v657_v17  ;;  %vm670_vm2 = vweird.f32 %v1954_v9  ;;  %v915_v35 = vand.u32 2147483648, %v2714_v4 }
  0xf8   :  { %v410_v22 = vadd.f32 %v2599_v59, %v363_v15  ;;  %v318_v23 = vadd.f32 %v317_v19, %v204_v16  ;;  %1081 = vmatmul.f32.gmra.mxu2 %v662_v20  ;;  %v666_v24 = vsub.f32 1.0, %v665_v18  ;;  %vm2738_vm4 = vcmp.eq.f32.partialorder %v913_v27, 8.507059e+37  ;;  %vm671_vm5 = vmor %vm669_vm0, %vm670_vm2 }
  0xf9   :  { %vm684_vm6 = vweird.f32 %v2718_v10  ;;  %v688_v43 = vand.u32 2147483647, %v2718_v10  ;;  %v690_v45 = vand.u32 2147483648, %v2718_v10  ;;  %v916_v57 = vor.u32 1.1754944e-38, %v915_v35 }
  0xfa   :  { %v1956_v28 = vpop.eup %1955  ;;  %v1827_v29 = vmul.f32 -1.442695, %v410_v22  ;;  %v395_v30 = vadd.f32 %v2599_v59, %v318_v23  ;;  %v667_v31 = vmul.f32 %v1954_v9, %v666_v24 }
  0xfb   :  { %v1958_v32 = vpop.eup %1957  ;;  %v2733_v33 = vadd.f32 1.0, %v1956_v28  ;;  %vm2761_vm8 = vcmp.eq.f32.partialorder %v688_v43, 8.507059e+37  ;;  %v691_v61 = vor.u32 1.1754944e-38, %v690_v45 }
  0xfc   :  { %v1960_v36 = vpop.eup %1959  ;;  %1963 = vpow2.f32 %v1827_v29  ;;  %v1812_v37 = vmul.f32 -1.442695, %v395_v30  ;;  %v668_v38 = vadd.f32 %v1954_v9, %v667_v31  ;;  %v905_v39 = vmul.f32 %v1958_v32, %v2714_v4 }
  0xfd   :  { %v2742_v41 = vpop.eup %1961  ;;  %1965 = vrcp.f32 %v2733_v33  ;;  %v2745_v42 = vadd.f32 1.0, %v1960_v36  ;;  %v365_v3 = vpop.f32.mrf.mxu3  ;;  %vm910_vm7 = vweird.f32 %v1958_v32  ;;  %vm924_vm9 = vweird.f32 %v2733_v33 }
  0xfe   :  { %1967 = vpow2.f32 %v1812_v37  ;;  %v366_v46 = vadd.f32 %v365_v3, %v2643_v44  ;;  %v207_v49 = vpop.f32.mrf.mxu0  ;;  %v672_v50 = vsel %vm671_vm5, %v1954_v9, %v668_v38  ;;  %v906_v51 = vsub.f32 1.0, %v905_v39  ;;  %vm911_vm10 = vmor %vm909_vm3, %vm910_vm7 }
  0xff   :  { %1969 = vrcp.f32 %v2745_v42  ;;  %v320_v52 = vpop.f32.mrf.mxu1  ;;  %v677_v53 = vsel %vm2728_vm1, %v676_v34, %v672_v50  ;;  %v680_v47 = vmul.f32 %v2742_v41, %v2718_v10  ;;  %v928_v44 = vand.u32 2147483647, %v2733_v33 }
 0x100   :  { %v411_v54 = vadd.f32 %v2599_v59, %v366_v46  ;;  %v321_v55 = vadd.f32 %v320_v52, %v207_v49  ;;  %1084 = vmatmul.f32.gmra.mxu2 %v677_v53  ;;  %v907_v56 = vmul.f32 %v1958_v32, %v906_v51  ;;  %v930_v1 = vand.u32 2147483648, %v2733_v33 }
 0x101   :  { %v681_v58 = vsub.f32 1.0, %v680_v47  ;;  %vm685_vm11 = vweird.f32 %v2742_v41  ;;  %v703_v9 = vand.u32 2147483647, %v2745_v42  ;;  %vm2780_vm12 = vcmp.eq.f32.partialorder %v928_v44, 8.507059e+37 }
 0x102   :  { %v1964_v62 = vpop.eup %1963  ;;  %v1828_v63 = vmul.f32 -1.442695, %v411_v54  ;;  %v396_v0 = vadd.f32 %v2599_v59, %v321_v55  ;;  %v908_v14 = vadd.f32 %v1958_v32, %v907_v56  ;;  %vm699_vm13 = vweird.f32 %v2745_v42  ;;  %vm686_vm14 = vmor %vm684_vm6, %vm685_vm11 }
 0x103   :  { %v2768_v5 = vpop.eup %1965  ;;  %v2770_v7 = vadd.f32 1.0, %v1964_v62  ;;  %v682_v8 = vmul.f32 %v2742_v41, %v681_v58  ;;  %v931_v24 = vor.u32 1.1754944e-38, %v930_v1  ;;  %vm2808_vm1 = vcmp.eq.f32.partialorder %v703_v9, 8.507059e+37 }
 0x104   :  { %v1968_v11 = vpop.eup %1967  ;;  %1971 = vpow2.f32 %v1828_v63  ;;  %v1813_v12 = vmul.f32 -1.442695, %v396_v0  ;;  %v912_v13 = vsel %vm911_vm10, %v1958_v32, %v908_v14  ;;  %v920_v15 = vmul.f32 %v2768_v5, %v2733_v33 }
 0x105   :  { %v2784_v17 = vpop.eup %1969  ;;  %1973 = vrcp.f32 %v2770_v7  ;;  %v2787_v4 = vadd.f32 1.0, %v1968_v11  ;;  %v368_v18 = vpop.f32.mrf.mxu3  ;;  %v917_v19 = vsel %vm2738_vm4, %v916_v57, %v912_v13  ;;  %v683_v20 = vadd.f32 %v2742_v41, %v682_v8 }
 0x106   :  { %1975 = vpow2.f32 %v1813_v12  ;;  %v369_v21 = vadd.f32 %v368_v18, %v2659_v2  ;;  %1132 = vmatmul.f32.vlgmr.msra.gmra.mxu3 %v917_v19  ;;  %v210_v22 = vpop.f32.mrf.mxu0  ;;  %v921_v23 = vsub.f32 1.0, %v920_v15  ;;  %vm925_vm15 = vweird.f32 %v2768_v5 }
 0x107   :  { %1977 = vrcp.f32 %v2787_v4  ;;  %v323_v27 = vpop.f32.mrf.mxu1  ;;  %v687_v26 = vsel %vm686_vm14, %v2742_v41, %v683_v20  ;;  %v695_v28 = vmul.f32 %v2784_v17, %v2745_v42  ;;  %vm700_vm0 = vweird.f32 %v2784_v17  ;;  %vm926_vm3 = vmor %vm924_vm9, %vm925_vm15 }
 0x108   :  { %v412_v2 = vadd.f32 %v2599_v59, %v369_v21  ;;  %v324_v29 = vadd.f32 %v323_v27, %v210_v22  ;;  %v692_v30 = vsel %vm2761_vm8, %v691_v61, %v687_v26  ;;  %v922_v10 = vmul.f32 %v2768_v5, %v921_v23  ;;  %vm701_vm4 = vmor %vm699_vm13, %vm700_vm0 }
 0x109   :  { %1087 = vmatmul.f32.gmra.mxu2 %v692_v30  ;;  %v696_v31 = vsub.f32 1.0, %v695_v28  ;;  %v705_v34 = vand.u32 2147483648, %v2745_v42  ;;  %vm939_vm2 = vweird.f32 %v2770_v7  ;;  %v943_v39 = vand.u32 2147483647, %v2770_v7 }
 0x10a   :  { %v1972_v35 = vpop.eup %1971  ;;  %v1829_v36 = vmul.f32 -1.442695, %v412_v2  ;;  %v397_v37 = vadd.f32 %v2599_v59, %v324_v29  ;;  %v923_v38 = vadd.f32 %v2768_v5, %v922_v10  ;;  %v945_v45 = vand.u32 2147483648, %v2770_v7 }
 0x10b   :  { %v1974_v40 = vpop.eup %1973  ;;  %v2817_v41 = vadd.f32 1.0, %v1972_v35  ;;  %v697_v3 = vmul.f32 %v2784_v17, %v696_v31  ;;  %v706_v43 = vor.u32 1.1754944e-38, %v705_v34  ;;  %vm2840_vm5 = vcmp.eq.f32.partialorder %v943_v39, 8.507059e+37 }
 0x10c   :  { %v1976_v46 = vpop.eup %1975  ;;  %1979 = vpow2.f32 %v1829_v36  ;;  %v1814_v49 = vmul.f32 -1.442695, %v397_v37  ;;  %v927_v50 = vsel %vm926_vm3, %v2768_v5, %v923_v38  ;;  %v935_v51 = vmul.f32 %v1974_v40, %v2770_v7 }
 0x10d   :  { %v2827_v52 = vpop.eup %1977  ;;  %1981 = vrcp.f32 %v2817_v41  ;;  %v2830_v53 = vadd.f32 1.0, %v1976_v46  ;;  %v371_v33 = vpop.f32.mrf.mxu3  ;;  %v932_v47 = vsel %vm2780_vm12, %v931_v24, %v927_v50  ;;  %v698_v54 = vadd.f32 %v2784_v17, %v697_v3 }
 0x10e   :  { %1983 = vpow2.f32 %v1814_v49  ;;  %v372_v55 = vadd.f32 %v371_v33, %v2675_v25  ;;  %1135 = vmatmul.f32.gmra.mxu3 %v932_v47  ;;  %v213_v56 = vpop.f32.mrf.mxu0  ;;  %v936_v44 = vsub.f32 1.0, %v935_v51  ;;  %vm940_vm6 = vweird.f32 %v1974_v40 }
 0x10f   :  { %1985 = vrcp.f32 %v2830_v53  ;;  %v326_v58 = vpop.f32.mrf.mxu1  ;;  %v702_v60 = vsel %vm701_vm4, %v2784_v17, %v698_v54  ;;  %v710_v25 = vmul.f32 %v2827_v52, %v2787_v4  ;;  %v946_v0 = vor.u32 1.1754944e-38, %v945_v45  ;;  %vm941_vm8 = vmor %vm939_vm2, %vm940_vm6 }
 0x110   :  { %v413_v61 = vadd.f32 %v2599_v59, %v372_v55  ;;  %v327_v62 = vadd.f32 %v326_v58, %v213_v56  ;;  %v707_v42 = vsel %vm2808_vm1, %v706_v43, %v702_v60  ;;  %v937_v63 = vmul.f32 %v1974_v40, %v936_v44 }
 0x111   :  { %1090 = vmatmul.f32.gmra.mxu2 %v707_v42  ;;  %v711_v14 = vsub.f32 1.0, %v710_v25  ;;  %vm714_vm7 = vweird.f32 %v2787_v4  ;;  %v718_v1 = vand.u32 2147483647, %v2787_v4  ;;  %v720_v12 = vand.u32 2147483648, %v2787_v4 }
 0x112   :  { %v1980_v5 = vpop.eup %1979  ;;  %v1830_v8 = vmul.f32 -1.442695, %v413_v61  ;;  %v398_v9 = vadd.f32 %v2599_v59, %v327_v62  ;;  %v938_v11 = vadd.f32 %v1974_v40, %v937_v63  ;;  %vm715_vm9 = vweird.f32 %v2827_v52 }
 0x113   :  { %v2855_v13 = vpop.eup %1981  ;;  %v2857_v15 = vadd.f32 1.0, %v1980_v5  ;;  %v712_v16 = vmul.f32 %v2827_v52, %v711_v14  ;;  %vm2864_vm10 = vcmp.eq.f32.partialorder %v718_v1, 8.507059e+37  ;;  %vm954_vm11 = vweird.f32 %v2817_v41  ;;  %vm716_vm12 = vmor %vm714_vm7, %vm715_vm9 }
 0x114   :  { %v1984_v18 = vpop.eup %1983  ;;  %1987 = vpow2.f32 %v1830_v8  ;;  %v1815_v19 = vmul.f32 -1.442695, %v398_v9  ;;  %v942_v20 = vsel %vm941_vm8, %v1974_v40, %v938_v11  ;;  %v721_v28 = vor.u32 1.1754944e-38, %v720_v12 }
 0x115   :  { %v2869_v21 = vpop.eup %1985  ;;  %1989 = vrcp.f32 %v2857_v15  ;;  %v2872_v7 = vadd.f32 1.0, %v1984_v18  ;;  %v374_v22 = vpop.f32.mrf.mxu3  ;;  %v947_v23 = vsel %vm2840_vm5, %v946_v0, %v942_v20  ;;  %v713_v24 = vadd.f32 %v2827_v52, %v712_v16 }
 0x116   :  { %1991 = vpow2.f32 %v1815_v19  ;;  %v375_v27 = vadd.f32 %v374_v22, %v2689_v48  ;;  %1138 = vmatmul.f32.gmra.mxu3 %v947_v23  ;;  %v216_v26 = vpop.f32.mrf.mxu0  ;;  %v950_v2 = vmul.f32 %v2855_v13, %v2817_v41  ;;  %vm955_vm13 = vweird.f32 %v2855_v13 }
 0x117   :  { %v329_v29 = vpop.f32.mrf.mxu1  ;;  %v717_v30 = vsel %vm716_vm12, %v2827_v52, %v713_v24  ;;  %v958_v10 = vand.u32 2147483647, %v2817_v41  ;;  %v960_v48 = vand.u32 2147483648, %v2817_v41  ;;  %1993 = vrcp.f32 %v2872_v7  ;;  %vm956_vm0 = vmor %vm954_vm11, %vm955_vm13 }
 0x118   :  { %v414_v31 = vadd.f32 %v2599_v59, %v375_v27  ;;  %v330_v32 = vadd.f32 %v329_v29, %v216_v26  ;;  %v722_v4 = vsel %vm2864_vm10, %v721_v28, %v717_v30  ;;  %v951_v34 = vsub.f32 1.0, %v950_v2 }
 0x119   :  { %1093 = vmatmul.f32.gmra.mxu2 %v722_v4  ;;  %vm2892_vm14 = vcmp.eq.f32.partialorder %v958_v10, 8.507059e+37  ;;  %v961_v36 = vor.u32 1.1754944e-38, %v960_v48  ;;  %v725_v37 = vmul.f32 %v2869_v21, %v2830_v53  ;;  %vm729_vm15 = vweird.f32 %v2830_v53 }
 0x11a   :  { %v1988_v38 = vpop.eup %1987  ;;  %v1831_v39 = vmul.f32 -1.442695, %v414_v31  ;;  %v399_v40 = vadd.f32 %v2599_v59, %v330_v32  ;;  %v952_v3 = vmul.f32 %v2855_v13, %v951_v34  ;;  %v733_v49 = vand.u32 2147483647, %v2830_v53 }
 0x11b   :  { %v2901_v43 = vpop.eup %1989  ;;  %v2903_v45 = vadd.f32 1.0, %v1988_v38  ;;  %v726_v46 = vsub.f32 1.0, %v725_v37  ;;  %v735_v50 = vand.u32 2147483648, %v2830_v53  ;;  %vm730_vm1 = vweird.f32 %v2869_v21 }
 0x11c   :  { %v1992_v51 = vpop.eup %1991  ;;  %1995 = vpow2.f32 %v1831_v39  ;;  %v1816_v52 = vmul.f32 -1.442695, %v399_v40  ;;  %v953_v33 = vadd.f32 %v2855_v13, %v952_v3  ;;  %v965_v47 = vmul.f32 %v2901_v43, %v2857_v15  ;;  %vm731_vm3 = vmor %vm729_vm15, %vm730_vm1 }
 0x11d   :  { %1997 = vrcp.f32 %v2903_v45  ;;  %v2911_v54 = vadd.f32 1.0, %v1992_v51  ;;  %v377_v55 = vpop.f32.mrf.mxu3  ;;  %v727_v56 = vmul.f32 %v2869_v21, %v726_v46  ;;  %vm2921_vm2 = vcmp.eq.f32.partialorder %v733_v49, 8.507059e+37  ;;  %v2925_v25 = vpop.eup %1993 }
 0x11e   :  { %1999 = vpow2.f32 %v1816_v52  ;;  %v378_v44 = vadd.f32 %v377_v55, %v2696_v6  ;;  %v957_v57 = vsel %vm956_vm0, %v2855_v13, %v953_v33  ;;  %v219_v58 = vpop.f32.mrf.mxu0  ;;  %v736_v42 = vor.u32 1.1754944e-38, %v735_v50 }
 0x11f   :  { %v962_v41 = vsel %vm2892_vm14, %v961_v36, %v957_v57  ;;  %v332_v61 = vpop.f32.mrf.mxu1  ;;  %v728_v62 = vadd.f32 %v2869_v21, %v727_v56  ;;  %v966_v63 = vsub.f32 1.0, %v965_v47  ;;  %2001 = vrcp.f32 %v2911_v54 }
 0x120   :  { %v415_v6 = vadd.f32 %v2599_v59, %v378_v44  ;;  %1141 = vmatmul.f32.gmra.mxu3 %v962_v41  ;;  %v333_v0 = vadd.f32 %v332_v61, %v219_v58  ;;  %vm970_vm4 = vweird.f32 %v2901_v43  ;;  %v973_v5 = vand.u32 2147483647, %v2857_v15  ;;  %v2944_v59 = vld [vmem:[%s3538_s4] ss:$0 sm:$0xff] }
 0x121   :  { %v732_v14 = vsel %vm731_vm3, %v2869_v21, %v728_v62  ;;  %v967_v1 = vmul.f32 %v2901_v43, %v966_v63  ;;  %v975_v8 = vand.u32 2147483648, %v2857_v15  ;;  %v740_v13 = vmul.f32 %v2925_v25, %v2872_v7 }
 0x122   :  { %v1996_v9 = vpop.eup %1995  ;;  %v1832_v11 = vmul.f32 -1.442695, %v415_v6  ;;  %v400_v53 = vadd.f32 %v2944_v59, %v333_v0  ;;  %v737_v12 = vsel %vm2921_vm2, %v736_v42, %v732_v14  ;;  %vm969_vm5 = vweird.f32 %v2857_v15 }
 0x123   :  { %v2951_v16 = vpop.eup %1997  ;;  %v2953_v17 = vadd.f32 1.0, %v1996_v9  ;;  %1096 = vmatmul.f32.gmra.mxu2 %v737_v12  ;;  %v968_v18 = vadd.f32 %v2901_v43, %v967_v1  ;;  %vm974_vm6 = vcmp.eq.f32.partialorder %v973_v5, 8.507059e+37  ;;  %vm971_vm7 = vmor %vm969_vm5, %vm970_vm4  ;;  %v976_v21 = vor.u32 1.1754944e-38, %v975_v8 }
 0x124   :  { %v2000_v19 = vpop.eup %1999  ;;  %2003 = vpow2.f32 %v1832_v11  ;;  %v1817_v20 = vmul.f32 -1.442695, %v400_v53  ;;  %v741_v22 = vsub.f32 1.0, %v740_v13  ;;  %vm745_vm8 = vweird.f32 %v2925_v25 }
 0x125   :  { %2005 = vrcp.f32 %v2953_v17  ;;  %v2960_v23 = vadd.f32 1.0, %v2000_v19  ;;  %v972_v24 = vsel %vm971_vm7, %v2901_v43, %v968_v18  ;;  %v2964_v27 = vpop.eup %2001  ;;  %v748_v2 = vand.u32 2147483647, %v2872_v7 }
 0x126   :  { %2007 = vpow2.f32 %v1817_v20  ;;  %v977_v15 = vsel %vm974_vm6, %v976_v21, %v972_v24  ;;  %v222_v26 = vpop.f32.mrf.mxu0  ;;  %v742_v28 = vmul.f32 %v2925_v25, %v741_v22  ;;  %vm744_vm9 = vweird.f32 %v2872_v7 }
 0x127   :  { %v335_v29 = vpop.f32.mrf.mxu1  ;;  %v750_v30 = vand.u32 2147483648, %v2872_v7  ;;  %v980_v10 = vmul.f32 %v2951_v16, %v2903_v45  ;;  %2009 = vrcp.f32 %v2960_v23  ;;  %vm984_vm10 = vweird.f32 %v2903_v45  ;;  %vm746_vm11 = vmor %vm744_vm9, %vm745_vm8 }
 0x128   :  { %1144 = vmatmul.f32.gmra.mxu3 %v977_v15  ;;  %v336_v48 = vadd.f32 %v335_v29, %v222_v26  ;;  %v743_v31 = vadd.f32 %v2925_v25, %v742_v28  ;;  %vm749_vm12 = vcmp.eq.f32.partialorder %v748_v2, 8.507059e+37  ;;  %v990_v34 = vand.u32 2147483648, %v2903_v45 }
 0x129   :  { %v751_v32 = vor.u32 1.1754944e-38, %v750_v30  ;;  %v981_v4 = vsub.f32 1.0, %v980_v10  ;;  %vm985_vm13 = vweird.f32 %v2951_v16  ;;  %v755_v37 = vmul.f32 %v2964_v27, %v2911_v54 }
 0x12a   :  { %v2004_v7 = vpop.eup %2003  ;;  %v401_v35 = vadd.f32 %v2944_v59, %v336_v48  ;;  %v747_v36 = vsel %vm746_vm11, %v2925_v25, %v743_v31  ;;  %v988_v43 = vand.u32 2147483647, %v2903_v45  ;;  %v991_v50 = vor.u32 1.1754944e-38, %v990_v34  ;;  %vm986_vm15 = vmor %vm984_vm10, %vm985_vm13 }
 0x12b   :  { %v2983_v38 = vpop.eup %2005  ;;  %v2985_v39 = vadd.f32 1.0, %v2004_v7  ;;  %v752_v40 = vsel %vm749_vm12, %v751_v32, %v747_v36  ;;  %v982_v3 = vmul.f32 %v2951_v16, %v981_v4  ;;  %v756_v51 = vsub.f32 1.0, %v755_v37 }
 0x12c   :  { %v2008_v46 = vpop.eup %2007  ;;  %v1818_v49 = vmul.f32 -1.442695, %v401_v35  ;;  %1099 = vmatmul.f32.gmra.mxu2 %v752_v40  ;;  %vm760_vm14 = vweird.f32 %v2964_v27  ;;  %v763_v47 = vand.u32 2147483647, %v2911_v54  ;;  %v765_v57 = vand.u32 2147483648, %v2911_v54 }
 0x12d   :  { %2011 = vrcp.f32 %v2985_v39  ;;  %v2991_v52 = vadd.f32 1.0, %v2008_v46  ;;  %v983_v33 = vadd.f32 %v2951_v16, %v982_v3  ;;  %v2995_v55 = vpop.eup %2009  ;;  %v757_v44 = vmul.f32 %v2964_v27, %v756_v51 }
 0x12e   :  { %2013 = vpow2.f32 %v1818_v49  ;;  %v225_v56 = vpop.f32.mrf.mxu0  ;;  %v995_v58 = vmul.f32 %v2983_v38, %v2953_v17  ;;  %vm989_vm0 = vcmp.eq.f32.partialorder %v988_v43, 8.507059e+37  ;;  %vm759_vm1 = vweird.f32 %v2911_v54 }
 0x12f   :  { %2015 = vrcp.f32 %v2991_v52  ;;  %v987_v60 = vsel %vm986_vm15, %v2951_v16, %v983_v33  ;;  %v338_v25 = vpop.f32.mrf.mxu1  ;;  %v758_v45 = vadd.f32 %v2964_v27, %v757_v44  ;;  %vm764_vm2 = vcmp.eq.f32.partialorder %v763_v47, 8.507059e+37  ;;  %vm761_vm3 = vmor %vm759_vm1, %vm760_vm14  ;;  %v3065_v44 = vld [vmem:[%s3540_s6] ss:$0 sm:$0xff] }
 0x130   :  { %v992_v41 = vsel %vm989_vm0, %v991_v50, %v987_v60  ;;  %v339_v61 = vadd.f32 %v338_v25, %v225_v56  ;;  %v766_v62 = vor.u32 1.1754944e-38, %v765_v57  ;;  %v996_v42 = vsub.f32 1.0, %v995_v58 }
 0x131   :  { %1147 = vmatmul.f32.gmra.mxu3 %v992_v41  ;;  %v1003_v63 = vand.u32 2147483647, %v2953_v17  ;;  %v1005_v6 = vand.u32 2147483648, %v2953_v17  ;;  %v762_v14 = vsel %vm761_vm3, %v2964_v27, %v758_v45  ;;  %vm999_vm4 = vweird.f32 %v2953_v17 }
 0x132   :  { %v402_v0 = vadd.f32 %v2944_v59, %v339_v61  ;;  %v770_v54 = vmul.f32 %v2995_v55, %v2960_v23  ;;  %v767_v5 = vsel %vm764_vm2, %v766_v62, %v762_v14  ;;  %v997_v8 = vmul.f32 %v2983_v38, %v996_v42 }
 0x133   :  { %v2012_v1 = vpop.eup %2011  ;;  %vm1000_vm5 = vweird.f32 %v2983_v38  ;;  %vm774_vm6 = vweird.f32 %v2960_v23  ;;  %vm3021_vm7 = vcmp.eq.f32.partialorder %v1003_v63, 8.507059e+37  ;;  %v1006_v12 = vor.u32 1.1754944e-38, %v1005_v6 }
 0x134   :  { %v2014_v9 = vpop.eup %2013  ;;  %v1819_v11 = vmul.f32 -1.442695, %v402_v0  ;;  %1102 = vmatmul.f32.gmra.mxu2 %v767_v5  ;;  %v771_v13 = vsub.f32 1.0, %v770_v54  ;;  %v998_v19 = vadd.f32 %v2983_v38, %v997_v8  ;;  %v780_v20 = vand.u32 2147483648, %v2960_v23  ;;  %vm1001_vm8 = vmor %vm999_vm4, %vm1000_vm5 }
 0x135   :  { %v3025_v16 = vpop.eup %2015  ;;  %v3027_v18 = vadd.f32 1.0, %v2014_v9  ;;  %v1010_v21 = vmul.f32 %v2012_v1, %v2985_v39  ;;  %vm775_vm9 = vweird.f32 %v2995_v55  ;;  %v778_v27 = vand.u32 2147483647, %v2960_v23 }
 0x136   :  { %2017 = vpow2.f32 %v1819_v11  ;;  %v228_v22 = vpop.f32.mrf.mxu0  ;;  %v772_v24 = vmul.f32 %v2995_v55, %v771_v13  ;;  %v1002_v15 = vsel %vm1001_vm8, %v2983_v38, %v998_v19  ;;  %v781_v28 = vor.u32 1.1754944e-38, %v780_v20  ;;  %vm776_vm11 = vmor %vm774_vm6, %vm775_vm9 }
 0x137   :  { %2019 = vrcp.f32 %v3027_v18  ;;  %v341_v26 = vpop.f32.mrf.mxu1  ;;  %v1011_v2 = vsub.f32 1.0, %v1010_v21  ;;  %v1007_v29 = vsel %vm3021_vm7, %v1006_v12, %v1002_v15  ;;  %vm1015_vm10 = vweird.f32 %v2012_v1 }
 0x138   :  { %v342_v30 = vadd.f32 %v341_v26, %v228_v22  ;;  %v773_v17 = vadd.f32 %v2995_v55, %v772_v24  ;;  %v1018_v48 = vand.u32 2147483647, %v2985_v39  ;;  %v1020_v31 = vand.u32 2147483648, %v2985_v39 }
 0x139   :  { %1150 = vmatmul.f32.gmra.mxu3 %v1007_v29  ;;  %v1012_v10 = vmul.f32 %v2012_v1, %v1011_v2  ;;  %v785_v32 = vmul.f32 %v3025_v16, %v2991_v52  ;;  %vm779_vm12 = vcmp.eq.f32.partialorder %v778_v27, 8.507059e+37  ;;  %vm1014_vm13 = vweird.f32 %v2985_v39 }
 0x13a   :  { %v403_v4 = vadd.f32 %v2944_v59, %v342_v30  ;;  %v777_v34 = vsel %vm776_vm11, %v2995_v55, %v773_v17  ;;  %vm1016_vm14 = vmor %vm1014_vm13, %vm1015_vm10  ;;  %v1021_v37 = vor.u32 1.1754944e-38, %v1020_v31  ;;  %vm790_vm15 = vweird.f32 %v3025_v16 }
 0x13b   :  { %v782_v7 = vsel %vm779_vm12, %v781_v28, %v777_v34  ;;  %v1013_v35 = vadd.f32 %v2012_v1, %v1012_v10  ;;  %v786_v38 = vsub.f32 1.0, %v785_v32  ;;  %vm1019_vm0 = vcmp.eq.f32.partialorder %v1018_v48, 8.507059e+37 }
 0x13c   :  { %v2018_v36 = vpop.eup %2017  ;;  %v1820_v23 = vmul.f32 -1.442695, %v403_v4  ;;  %1105 = vmatmul.f32.gmra.mxu2 %v782_v7  ;;  %v795_v46 = vand.u32 2147483648, %v2991_v52  ;;  %v793_v51 = vand.u32 2147483647, %v2991_v52  ;;  %vm789_vm1 = vweird.f32 %v2991_v52 }
 0x13d   :  { %v2020_v40 = vpop.eup %2019  ;;  %v3053_v3 = vadd.f32 1.0, %v2018_v36  ;;  %v1017_v43 = vsel %vm1016_vm14, %v2012_v1, %v1013_v35  ;;  %v787_v39 = vmul.f32 %v3025_v16, %v786_v38  ;;  %vm791_vm2 = vmor %vm789_vm1, %vm790_vm15  ;;  %v810_v52 = vand.u32 2147483648, %v3027_v18 }
 0x13e   :  { %2021 = vpow2.f32 %v1820_v23  ;;  %v1022_v49 = vsel %vm1019_vm0, %v1021_v37, %v1017_v43  ;;  %v231_v50 = vpop.f32.mrf.mxu0  ;;  %v800_v47 = vmul.f32 %v2020_v40, %v3027_v18  ;;  %v796_v57 = vor.u32 1.1754944e-38, %v795_v46 }
 0x13f   :  { %2023 = vrcp.f32 %v3053_v3  ;;  %v344_v33 = vpop.f32.mrf.mxu1  ;;  %v788_v56 = vadd.f32 %v3025_v16, %v787_v39  ;;  %vm794_vm3 = vcmp.eq.f32.partialorder %v793_v51, 8.507059e+37  ;;  %vm805_vm4 = vweird.f32 %v2020_v40 }
 0x140   :  { %v345_v55 = vadd.f32 %v344_v33, %v231_v50  ;;  %v801_v58 = vsub.f32 1.0, %v800_v47  ;;  %v808_v6 = vand.u32 2147483647, %v3027_v18  ;;  %vm804_vm5 = vweird.f32 %v3027_v18 }
 0x141   :  { %1153 = vmatmul.f32.gmra.mxu3 %v1022_v49  ;;  %v792_v25 = vsel %vm791_vm2, %v3025_v16, %v788_v56  ;;  %vm806_vm6 = vmor %vm804_vm5, %vm805_vm4  ;;  %v811_v53 = vor.u32 1.1754944e-38, %v810_v52  ;;  %vm819_vm9 = vweird.f32 %v3053_v3  ;;  %v825_v21 = vand.u32 2147483648, %v3053_v3 }
 0x142   :  { %v404_v60 = vadd.f32 %v2944_v59, %v345_v55  ;;  %v797_v41 = vsel %vm794_vm3, %v796_v57, %v792_v25  ;;  %v802_v45 = vmul.f32 %v2020_v40, %v801_v58  ;;  %vm809_vm7 = vcmp.eq.f32.partialorder %v808_v6, 8.507059e+37 }
 0x143   :  { %v1061_v61 = vpop.f32.mrf.mxu2  ;;  %v823_v26 = vand.u32 2147483647, %v3053_v3  ;;  %v826_v34 = vor.u32 1.1754944e-38, %v825_v21 }
 0x144   :  { %v2022_v62 = vpop.eup %2021  ;;  %v1821_v42 = vmul.f32 -1.442695, %v404_v60  ;;  %1108 = vmatmul.f32.gmra.mxu2 %v797_v41  ;;  %v1062_v63 = vadd.f32 %v3065_v44, %v1061_v61  ;;  %v803_v54 = vadd.f32 %v2020_v40, %v802_v45 }
 0x145   :  { %v2024_v0 = vpop.eup %2023  ;;  %v3074_v14 = vadd.f32 1.0, %v2022_v62  ;;  %vm824_vm11 = vcmp.eq.f32.partialorder %v823_v26, 8.507059e+37 }
 0x146   :  { %2025 = vpow2.f32 %v1821_v42  ;;  %v1833_v1 = vmul.f32 -1.442695, %v1062_v63  ;;  %v234_v5 = vpop.f32.mrf.mxu0  ;;  %v815_v8 = vmul.f32 %v2024_v0, %v3053_v3  ;;  %v807_v11 = vsel %vm806_vm6, %v2020_v40, %v803_v54 }
 0x147   :  { %2027 = vrcp.f32 %v3074_v14  ;;  %v347_v9 = vpop.f32.mrf.mxu1  ;;  %v812_v16 = vsel %vm809_vm7, %v811_v53, %v807_v11  ;;  %vm820_vm8 = vweird.f32 %v2024_v0  ;;  %vm834_vm13 = vweird.f32 %v3074_v14 }
 0x148   :  { %2029 = vpow2.f32 %v1833_v1  ;;  %v348_v12 = vadd.f32 %v347_v9, %v234_v5  ;;  %v816_v13 = vsub.f32 1.0, %v815_v8  ;;  %vm3086_vm10 = vmor %vm819_vm9, %vm820_vm8  ;;  %v840_v40 = vand.u32 2147483648, %v3074_v14 }
 0x149   :  { %v838_v50 = vand.u32 2147483647, %v3074_v14 }
 0x14a   :  { %v405_v19 = vadd.f32 %v2944_v59, %v348_v12  ;;  %v817_v20 = vmul.f32 %v2024_v0, %v816_v13  ;;  %v841_v61 = vor.u32 1.1754944e-38, %v840_v40 }
 0x14b   :  { %v1064_v18 = vpop.f32.mrf.mxu2  ;;  %vm839_vm15 = vcmp.eq.f32.partialorder %v838_v50, 8.507059e+37 }
 0x14c   :  { %v2026_v22 = vpop.eup %2025  ;;  %v1822_v24 = vmul.f32 -1.442695, %v405_v19  ;;  %1111 = vmatmul.f32.gmra.mxu2 %v812_v16  ;;  %v1065_v27 = vadd.f32 %v3065_v44, %v1064_v18  ;;  %v818_v15 = vadd.f32 %v2024_v0, %v817_v20 }
 0x14d   :  { %v2028_v28 = vpop.eup %2027  ;;  %v3084_v2 = vadd.f32 1.0, %v2026_v22 }
 0x14e   :  { %v2030_v30 = vpop.eup %2029  ;;  %2031 = vpow2.f32 %v1822_v24  ;;  %v1834_v17 = vmul.f32 -1.442695, %v1065_v27  ;;  %v237_v10 = vpop.f32.mrf.mxu0  ;;  %v822_v48 = vsel %vm3086_vm10, %v2024_v0, %v818_v15  ;;  %v830_v31 = vmul.f32 %v2028_v28, %v3074_v14 }
 0x14f   :  { %2033 = vrcp.f32 %v3084_v2  ;;  %v3094_v32 = vadd.f32 1.0, %v2030_v30  ;;  %v350_v4 = vpop.f32.mrf.mxu1  ;;  %v827_v36 = vsel %vm824_vm11, %v826_v34, %v822_v48  ;;  %vm835_vm12 = vweird.f32 %v2028_v28 }
 0x150   :  { %2035 = vpow2.f32 %v1834_v17  ;;  %v351_v7 = vadd.f32 %v350_v4, %v237_v10  ;;  %v831_v35 = vsub.f32 1.0, %v830_v31  ;;  %vm3106_vm14 = vmor %vm834_vm13, %vm835_vm12  ;;  %vm849_vm0 = vweird.f32 %v3084_v2 }
 0x151   :  { %2037 = vrcp.f32 %v3094_v32  ;;  %vm1290_vm1 = vweird.f32 %v3094_v32  ;;  %v1294_v0 = vand.u32 2147483647, %v3094_v32  ;;  %v1296_v14 = vand.u32 2147483648, %v3094_v32 }
 0x152   :  { %v406_v23 = vadd.f32 %v2944_v59, %v351_v7  ;;  %v832_v37 = vmul.f32 %v2028_v28, %v831_v35  ;;  %v853_v12 = vand.u32 2147483647, %v3084_v2  ;;  %v855_v13 = vand.u32 2147483648, %v3084_v2 }
 0x153   :  { %v1067_v38 = vpop.f32.mrf.mxu2  ;;  %v1297_v22 = vor.u32 1.1754944e-38, %v1296_v14  ;;  %vm1295_vm5 = vcmp.eq.f32.partialorder %v1294_v0, 8.507059e+37 }
 0x154   :  { %v2032_v3 = vpop.eup %2031  ;;  %v1823_v43 = vmul.f32 -1.442695, %v406_v23  ;;  %1114 = vmatmul.f32.gmra.mxu2 %v827_v36  ;;  %v1068_v46 = vadd.f32 %v3065_v44, %v1067_v38  ;;  %v833_v49 = vadd.f32 %v2028_v28, %v832_v37  ;;  %v856_v29 = vor.u32 1.1754944e-38, %v855_v13 }
 0x155   :  { %v3102_v39 = vpop.eup %2033  ;;  %v3104_v51 = vadd.f32 1.0, %v2032_v3  ;;  %vm854_vm7 = vcmp.eq.f32.partialorder %v853_v12, 8.507059e+37 }
 0x156   :  { %v2036_v47 = vpop.eup %2035  ;;  %2039 = vpow2.f32 %v1823_v43  ;;  %v1835_v55 = vmul.f32 -1.442695, %v1068_v46  ;;  %v240_v56 = vpop.f32.mrf.mxu0  ;;  %v837_v57 = vsel %vm3106_vm14, %v2028_v28, %v833_v49  ;;  %v845_v58 = vmul.f32 %v3102_v39, %v3084_v2 }
 0x157   :  { %v2038_v60 = vpop.eup %2037  ;;  %2041 = vrcp.f32 %v3104_v51  ;;  %v3115_v25 = vadd.f32 1.0, %v2036_v47  ;;  %v353_v41 = vpop.f32.mrf.mxu1  ;;  %v842_v62 = vsel %vm839_vm15, %v841_v61, %v837_v57  ;;  %vm850_vm3 = vweird.f32 %v3102_v39 }
 0x158   :  { %v1286_v45 = vmul.f32 %v2038_v60, %v3094_v32  ;;  %2043 = vpow2.f32 %v1835_v55  ;;  %v354_v52 = vadd.f32 %v353_v41, %v240_v56  ;;  %v846_v6 = vsub.f32 1.0, %v845_v58  ;;  %vm851_vm6 = vmor %vm849_vm0, %vm850_vm3 }
 0x159   :  { %2045 = vrcp.f32 %v3115_v25  ;;  %vm1291_vm2 = vweird.f32 %v2038_v60  ;;  %vm1305_vm8 = vweird.f32 %v3115_v25  ;;  %v1309_v48 = vand.u32 2147483647, %v3115_v25 }
 0x15a   :  { %v1287_v42 = vsub.f32 1.0, %v1286_v45  ;;  %v407_v63 = vadd.f32 %v2944_v59, %v354_v52  ;;  %v847_v11 = vmul.f32 %v3102_v39, %v846_v6  ;;  %vm1292_vm4 = vmor %vm1290_vm1, %vm1291_vm2  ;;  %v1311_v31 = vand.u32 2147483648, %v3115_v25 }
 0x15b   :  { %v1070_v54 = vpop.f32.mrf.mxu2  ;;  %v868_v37 = vand.u32 2147483647, %v3104_v51  ;;  %v870_v38 = vand.u32 2147483648, %v3104_v51  ;;  %vm864_vm12 = vweird.f32 %v3104_v51  ;;  %vm1310_vm13 = vcmp.eq.f32.partialorder %v1309_v48, 8.507059e+37 }
 0x15c   :  { %v2040_v1 = vpop.eup %2039  ;;  %v1288_v5 = vmul.f32 %v2038_v60, %v1287_v42  ;;  %v1824_v8 = vmul.f32 -1.442695, %v407_v63  ;;  %1117 = vmatmul.f32.gmra.mxu2 %v842_v62  ;;  %v1071_v9 = vadd.f32 %v3065_v44, %v1070_v54  ;;  %v848_v18 = vadd.f32 %v3102_v39, %v847_v11 }
 0x15d   :  { %v3126_v59 = vpop.eup %2041  ;;  %v3128_v53 = vadd.f32 1.0, %v2040_v1  ;;  %v871_v57 = vor.u32 1.1754944e-38, %v870_v38  ;;  %vm869_vm15 = vcmp.eq.f32.partialorder %v868_v37, 8.507059e+37 }
 0x15e   :  { %v2044_v16 = vpop.eup %2043  ;;  %v1289_v19 = vadd.f32 %v2038_v60, %v1288_v5  ;;  %2047 = vpow2.f32 %v1824_v8  ;;  %v1836_v20 = vmul.f32 -1.442695, %v1071_v9  ;;  %v860_v27 = vmul.f32 %v3126_v59, %v3104_v51 }
 0x15f   :  { %v2046_v21 = vpop.eup %2045  ;;  %2049 = vrcp.f32 %v3128_v53  ;;  %v3138_v24 = vadd.f32 1.0, %v2044_v16  ;;  %v852_v17 = vsel %vm851_vm6, %v3102_v39, %v848_v18  ;;  %vm865_vm10 = vweird.f32 %v3126_v59 }
 0x160   :  { %v1293_v15 = vsel %vm1292_vm4, %v2038_v60, %v1289_v19  ;;  %v1301_v26 = vmul.f32 %v2046_v21, %v3115_v25  ;;  %2051 = vpow2.f32 %v1836_v20  ;;  %v861_v10 = vsub.f32 1.0, %v860_v27  ;;  %vm866_vm14 = vmor %vm864_vm12, %vm865_vm10 }
 0x161   :  { %v1298_v28 = vsel %vm1295_vm5, %v1297_v22, %v1293_v15  ;;  %2053 = vrcp.f32 %v3138_v24  ;;  %v857_v32 = vsel %vm854_vm7, %v856_v29, %v852_v17  ;;  %vm1306_vm9 = vweird.f32 %v2046_v21 }
 0x162   :  { %1765 = vst [vmem:[%s3541_s7] sm:$0xff] %v1298_v28  ;;  %v1302_v30 = vsub.f32 1.0, %v1301_v26  ;;  %v862_v35 = vmul.f32 %v3126_v59, %v861_v10  ;;  %vm1307_vm11 = vmor %vm1305_vm8, %vm1306_vm9  ;;  %v1312_v39 = vor.u32 1.1754944e-38, %v1311_v31  ;;  %v1324_v25 = vand.u32 2147483647, %v3138_v24 }
 0x163   :  { %v1073_v4 = vpop.f32.mrf.mxu2  ;;  %v1326_v41 = vand.u32 2147483648, %v3138_v24  ;;  %vm1320_vm1 = vweird.f32 %v3138_v24  ;;  %v883_v6 = vand.u32 2147483647, %v3128_v53  ;;  %v885_v0 = vand.u32 2147483648, %v3128_v53 }
 0x164   :  { %v2048_v2 = vpop.eup %2047  ;;  %v1303_v34 = vmul.f32 %v2046_v21, %v1302_v30  ;;  %1120 = vmatmul.f32.gmra.mxu2 %v857_v32  ;;  %v1074_v7 = vadd.f32 %v3065_v44, %v1073_v4  ;;  %v863_v46 = vadd.f32 %v3126_v59, %v862_v35  ;;  %vm1325_vm4 = vcmp.eq.f32.partialorder %v1324_v25, 8.507059e+37 }
 0x165   :  { %v3157_v36 = vpop.eup %2049  ;;  %v3159_v23 = vadd.f32 1.0, %v2048_v2  ;;  %v1327_v11 = vor.u32 1.1754944e-38, %v1326_v41  ;;  %vm879_vm5 = vweird.f32 %v3128_v53  ;;  %v886_v19 = vor.u32 1.1754944e-38, %v885_v0 }
 0x166   :  { %v2052_v40 = vpop.eup %2051  ;;  %v1304_v3 = vadd.f32 %v2046_v21, %v1303_v34  ;;  %v1837_v43 = vmul.f32 -1.442695, %v1074_v7  ;;  %v875_v49 = vmul.f32 %v3157_v36, %v3128_v53  ;;  %v867_v60 = vsel %vm866_vm14, %v3126_v59, %v863_v46 }
 0x167   :  { %v2054_v50 = vpop.eup %2053  ;;  %2055 = vrcp.f32 %v3159_v23  ;;  %v3171_v33 = vadd.f32 1.0, %v2052_v40  ;;  %v872_v61 = vsel %vm869_vm15, %v871_v57, %v867_v60  ;;  %vm880_vm2 = vweird.f32 %v3157_v36 }
 0x168   :  { %v1308_v47 = vsel %vm1307_vm11, %v2046_v21, %v1304_v3  ;;  %v1316_v55 = vmul.f32 %v2054_v50, %v3138_v24  ;;  %2057 = vpow2.f32 %v1837_v43  ;;  %v876_v51 = vsub.f32 1.0, %v875_v49  ;;  %vm881_vm6 = vmor %vm879_vm5, %vm880_vm2 }
 0x169   :  { %v1313_v56 = vsel %vm1310_vm13, %v1312_v39, %v1308_v47  ;;  %2059 = vrcp.f32 %v3171_v33  ;;  %vm1321_vm0 = vweird.f32 %v2054_v50  ;;  %vm884_vm7 = vcmp.eq.f32.partialorder %v883_v6, 8.507059e+37 }
 0x16a   :  { %1766 = vst [vmem:[%s3541_s7 + $0x8] sm:$0xff] %v1313_v56  ;;  %v1317_v58 = vsub.f32 1.0, %v1316_v55  ;;  %v877_v42 = vmul.f32 %v3157_v36, %v876_v51  ;;  %vm1322_vm3 = vmor %vm1320_vm1, %vm1321_vm0  ;;  %v1339_v22 = vand.u32 2147483647, %v3171_v33  ;;  %v1341_v53 = vand.u32 2147483648, %v3171_v33 }
 0x16b   :  { %v1076_v45 = vpop.f32.mrf.mxu2  ;;  %vm1335_vm9 = vweird.f32 %v3171_v33  ;;  %v898_v29 = vand.u32 2147483647, %v3159_v23  ;;  %v900_v30 = vand.u32 2147483648, %v3159_v23  ;;  %vm894_vm13 = vweird.f32 %v3159_v23 }
 0x16c   :  { %v1318_v52 = vmul.f32 %v2054_v50, %v1317_v58  ;;  %1123 = vmatmul.f32.gmra.mxu2 %v872_v61  ;;  %v1077_v62 = vadd.f32 %v3065_v44, %v1076_v45  ;;  %v878_v5 = vadd.f32 %v3157_v36, %v877_v42  ;;  %vm1340_vm12 = vcmp.eq.f32.partialorder %v1339_v22, 8.507059e+37 }
 0x16d   :  { %v3186_v63 = vpop.eup %2055  ;;  %v1342_v4 = vor.u32 1.1754944e-38, %v1341_v53  ;;  %vm899_vm15 = vcmp.eq.f32.partialorder %v898_v29, 8.507059e+37 }
 0x16e   :  { %v2058_v14 = vpop.eup %2057  ;;  %v1319_v54 = vadd.f32 %v2054_v50, %v1318_v52  ;;  %v1838_v1 = vmul.f32 -1.442695, %v1077_v62  ;;  %v890_v8 = vmul.f32 %v3186_v63, %v3159_v23  ;;  %v882_v18 = vsel %vm881_vm6, %v3157_v36, %v878_v5 }
 0x16f   :  { %v2060_v9 = vpop.eup %2059  ;;  %v3196_v59 = vadd.f32 1.0, %v2058_v14  ;;  %v887_v24 = vsel %vm884_vm7, %v886_v19, %v882_v18  ;;  %vm895_vm10 = vweird.f32 %v3186_v63  ;;  %v901_v36 = vor.u32 1.1754944e-38, %v900_v30 }
 0x170   :  { %v1323_v12 = vsel %vm1322_vm3, %v2054_v50, %v1319_v54  ;;  %v1331_v13 = vmul.f32 %v2060_v9, %v3171_v33  ;;  %2061 = vpow2.f32 %v1838_v1  ;;  %v891_v21 = vsub.f32 1.0, %v890_v8  ;;  %vm896_vm14 = vmor %vm894_vm13, %vm895_vm10 }
 0x171   :  { %v1328_v16 = vsel %vm1325_vm4, %v1327_v11, %v1323_v12  ;;  %2063 = vrcp.f32 %v3196_v59  ;;  %vm1336_vm8 = vweird.f32 %v2060_v9  ;;  %v1356_v40 = vand.u32 2147483648, %v3196_v59 }
 0x172   :  { %1767 = vst [vmem:[%s3541_s7 + $0x10] sm:$0xff] %v1328_v16  ;;  %v1332_v20 = vsub.f32 1.0, %v1331_v13  ;;  %v892_v28 = vmul.f32 %v3186_v63, %v891_v21  ;;  %vm1337_vm11 = vmor %vm1335_vm9, %vm1336_vm8  ;;  %v1354_v23 = vand.u32 2147483647, %v3196_v59  ;;  %vm1350_vm1 = vweird.f32 %v3196_v59 }
 0x173   :  { %v1079_v27 = vpop.f32.mrf.mxu2  ;;  %v1357_v55 = vor.u32 1.1754944e-38, %v1356_v40 }
 0x174   :  { %v1333_v15 = vmul.f32 %v2060_v9, %v1332_v20  ;;  %1126 = vmatmul.f32.gmra.mxu2 %v887_v24  ;;  %v1080_v26 = vadd.f32 %v3065_v44, %v1079_v27  ;;  %v893_v31 = vadd.f32 %v3186_v63, %v892_v28  ;;  %vm1355_vm3 = vcmp.eq.f32.partialorder %v1354_v23, 8.507059e+37 }
 0x176   :  { %v2062_v17 = vpop.eup %2061  ;;  %v1334_v10 = vadd.f32 %v2060_v9, %v1333_v15  ;;  %v1839_v48 = vmul.f32 -1.442695, %v1080_v26  ;;  %v897_v38 = vsel %vm896_vm14, %v3186_v63, %v893_v31 }
 0x177   :  { %v2064_v32 = vpop.eup %2063  ;;  %v1258_v2 = vadd.f32 1.0, %v2062_v17  ;;  %v902_v3 = vsel %vm899_vm15, %v901_v36, %v897_v38 }
 0x178   :  { %v1338_v34 = vsel %vm1337_vm11, %v2060_v9, %v1334_v10  ;;  %v1346_v7 = vmul.f32 %v2064_v32, %v3196_v59  ;;  %2065 = vpow2.f32 %v1839_v48  ;;  %vm1351_vm0 = vweird.f32 %v2064_v32 }
 0x179   :  { %v1343_v35 = vsel %vm1340_vm12, %v1342_v4, %v1338_v34  ;;  %2067 = vrcp.f32 %v1258_v2  ;;  %vm1352_vm2 = vmor %vm1350_vm1, %vm1351_vm0  ;;  %v1371_v25 = vand.u32 2147483648, %v1258_v2  ;;  %v1369_v45 = vand.u32 2147483647, %v1258_v2 }
 0x17a   :  { %1768 = vst [vmem:[%s3541_s7 + $0x18] sm:$0xff] %v1343_v35  ;;  %v1347_v37 = vsub.f32 1.0, %v1346_v7  ;;  %vm1365_vm5 = vweird.f32 %v1258_v2 }
 0x17b   :  { %v1082_v43 = vpop.f32.mrf.mxu2  ;;  %v1372_v0 = vor.u32 1.1754944e-38, %v1371_v25  ;;  %vm1370_vm7 = vcmp.eq.f32.partialorder %v1369_v45, 8.507059e+37 }
 0x17c   :  { %v1348_v46 = vmul.f32 %v2064_v32, %v1347_v37  ;;  %1129 = vmatmul.f32.gmra.mxu2 %v902_v3  ;;  %v1083_v49 = vadd.f32 %v3065_v44, %v1082_v43 }
 0x17e   :  { %v2066_v50 = vpop.eup %2065  ;;  %v1349_v39 = vadd.f32 %v2064_v32, %v1348_v46  ;;  %v1840_v33 = vmul.f32 -1.442695, %v1083_v49 }
 0x17f   :  { %v2068_v47 = vpop.eup %2067  ;;  %v1259_v56 = vadd.f32 1.0, %v2066_v50 }
 0x180   :  { %v1353_v57 = vsel %vm1352_vm2, %v2064_v32, %v1349_v39  ;;  %v1361_v58 = vmul.f32 %v2068_v47, %v1258_v2  ;;  %2069 = vpow2.f32 %v1840_v33  ;;  %vm1366_vm4 = vweird.f32 %v2068_v47 }
 0x181   :  { %v1358_v60 = vsel %vm1355_vm3, %v1357_v55, %v1353_v57  ;;  %2071 = vrcp.f32 %v1259_v56  ;;  %vm1367_vm6 = vmor %vm1365_vm5, %vm1366_vm4  ;;  %v1386_v59 = vand.u32 2147483648, %v1259_v56  ;;  %v1384_v13 = vand.u32 2147483647, %v1259_v56 }
 0x182   :  { %1769 = vst [vmem:[%s3541_s7 + $0x20] sm:$0xff] %v1358_v60  ;;  %v1362_v51 = vsub.f32 1.0, %v1361_v58  ;;  %vm1380_vm9 = vweird.f32 %v1259_v56 }
 0x183   :  { %v1085_v41 = vpop.f32.mrf.mxu2  ;;  %v1387_v53 = vor.u32 1.1754944e-38, %v1386_v59  ;;  %vm1385_vm11 = vcmp.eq.f32.partialorder %v1384_v13, 8.507059e+37 }
 0x184   :  { %v1363_v61 = vmul.f32 %v2068_v47, %v1362_v51  ;;  %v1086_v52 = vadd.f32 %v3065_v44, %v1085_v41 }
 0x186   :  { %v2070_v62 = vpop.eup %2069  ;;  %v1364_v42 = vadd.f32 %v2068_v47, %v1363_v61  ;;  %v1841_v63 = vmul.f32 -1.442695, %v1086_v52 }
 0x187   :  { %v2072_v6 = vpop.eup %2071  ;;  %v1260_v14 = vadd.f32 1.0, %v2070_v62 }
 0x188   :  { %v1368_v54 = vsel %vm1367_vm6, %v2068_v47, %v1364_v42  ;;  %v1376_v1 = vmul.f32 %v2072_v6, %v1259_v56  ;;  %2073 = vpow2.f32 %v1841_v63  ;;  %vm1381_vm8 = vweird.f32 %v2072_v6 }
 0x189   :  { %v1373_v5 = vsel %vm1370_vm7, %v1372_v0, %v1368_v54  ;;  %2075 = vrcp.f32 %v1260_v14  ;;  %v1133_v8 = vpop.f32.mrf.mxu3  ;;  %vm1382_vm10 = vmor %vm1380_vm9, %vm1381_vm8  ;;  %v1401_v10 = vand.u32 2147483648, %v1260_v14  ;;  %v1399_v32 = vand.u32 2147483647, %v1260_v14 }
 0x18a   :  { %1770 = vst [vmem:[%s3541_s7 + $0x28] sm:$0xff] %v1373_v5  ;;  %v1377_v9 = vsub.f32 1.0, %v1376_v1  ;;  %v1134_v11 = vadd.f32 %v3065_v44, %v1133_v8  ;;  %vm1395_vm13 = vweird.f32 %v1260_v14 }
 0x18b   :  { %v1402_v37 = vor.u32 1.1754944e-38, %v1401_v10  ;;  %vm1400_vm15 = vcmp.eq.f32.partialorder %v1399_v32, 8.507059e+37 }
 0x18c   :  { %v1378_v12 = vmul.f32 %v2072_v6, %v1377_v9  ;;  %v1857_v16 = vmul.f32 -1.442695, %v1134_v11  ;;  %v1088_v19 = vpop.f32.mrf.mxu2 }
 0x18d   :  { %v1089_v20 = vadd.f32 %v3065_v44, %v1088_v19 }
 0x18e   :  { %v2074_v18 = vpop.eup %2073  ;;  %v1379_v21 = vadd.f32 %v2072_v6, %v1378_v12  ;;  %2077 = vpow2.f32 %v1857_v16 }
 0x18f   :  { %v2076_v22 = vpop.eup %2075  ;;  %v1261_v24 = vadd.f32 1.0, %v2074_v18  ;;  %v1842_v27 = vmul.f32 -1.442695, %v1089_v20 }
 0x190   :  { %v1383_v15 = vsel %vm1382_vm10, %v2072_v6, %v1379_v21  ;;  %v1391_v26 = vmul.f32 %v2076_v22, %v1260_v14  ;;  %vm1396_vm12 = vweird.f32 %v2076_v22 }
 0x191   :  { %v1388_v28 = vsel %vm1385_vm11, %v1387_v53, %v1383_v15  ;;  %2079 = vrcp.f32 %v1261_v24  ;;  %v1136_v29 = vpop.f32.mrf.mxu3  ;;  %vm1397_vm14 = vmor %vm1395_vm13, %vm1396_vm12  ;;  %v1416_v33 = vand.u32 2147483648, %v1261_v24  ;;  %v1414_v56 = vand.u32 2147483647, %v1261_v24 }
 0x192   :  { %1771 = vst [vmem:[%s3541_s7 + $0x30] sm:$0xff] %v1388_v28  ;;  %v1392_v30 = vsub.f32 1.0, %v1391_v26  ;;  %2081 = vpow2.f32 %v1842_v27  ;;  %v1137_v17 = vadd.f32 %v3065_v44, %v1136_v29  ;;  %vm1410_vm1 = vweird.f32 %v1261_v24 }
 0x193   :  { %v1417_v45 = vor.u32 1.1754944e-38, %v1416_v33  ;;  %vm1415_vm3 = vcmp.eq.f32.partialorder %v1414_v56, 8.507059e+37 }
 0x194   :  { %v2078_v48 = vpop.eup %2077  ;;  %v1393_v31 = vmul.f32 %v2076_v22, %v1392_v30  ;;  %v1858_v4 = vmul.f32 -1.442695, %v1137_v17  ;;  %v1091_v2 = vpop.f32.mrf.mxu2 }
 0x195   :  { %v3239_v34 = vadd.f32 1.0, %v2078_v48  ;;  %v1092_v7 = vadd.f32 %v3065_v44, %v1091_v2 }
 0x196   :  { %v1394_v35 = vadd.f32 %v2076_v22, %v1393_v31  ;;  %2083 = vpow2.f32 %v1858_v4 }
 0x197   :  { %v2080_v36 = vpop.eup %2079  ;;  %2085 = vrcp.f32 %v3239_v34  ;;  %v1843_v43 = vmul.f32 -1.442695, %v1092_v7  ;;  %v1654_v52 = vand.u32 2147483647, %v3239_v34  ;;  %v1656_v54 = vand.u32 2147483648, %v3239_v34 }
 0x198   :  { %v2082_v38 = vpop.eup %2081  ;;  %v1398_v40 = vsel %vm1397_vm14, %v2076_v22, %v1394_v35  ;;  %v1406_v3 = vmul.f32 %v2080_v36, %v1261_v24  ;;  %vm1411_vm0 = vweird.f32 %v2080_v36  ;;  %vm1650_vm5 = vweird.f32 %v3239_v34 }
 0x199   :  { %v1403_v46 = vsel %vm1400_vm15, %v1402_v37, %v1398_v40  ;;  %v3243_v23 = vadd.f32 1.0, %v2082_v38  ;;  %v1139_v49 = vpop.f32.mrf.mxu3  ;;  %2087 = vpow2.f32 %v1843_v43  ;;  %vm1412_vm2 = vmor %vm1410_vm1, %vm1411_vm0  ;;  %vm3264_vm6 = vcmp.eq.f32.partialorder %v1654_v52, 8.507059e+37 }
 0x19a   :  { %1772 = vst [vmem:[%s3541_s7 + $0x38] sm:$0xff] %v1403_v46  ;;  %v1407_v50 = vsub.f32 1.0, %v1406_v3  ;;  %v1140_v39 = vadd.f32 %v3065_v44, %v1139_v49  ;;  %v1657_v18 = vor.u32 1.1754944e-38, %v1656_v54 }
 0x19b   :  { %2089 = vrcp.f32 %v3243_v23  ;;  %v1429_v16 = vand.u32 2147483647, %v3243_v23  ;;  %v1431_v19 = vand.u32 2147483648, %v3243_v23  ;;  %vm1425_vm8 = vweird.f32 %v3243_v23 }
 0x19c   :  { %v2084_v47 = vpop.eup %2083  ;;  %v1408_v55 = vmul.f32 %v2080_v36, %v1407_v50  ;;  %v1859_v57 = vmul.f32 -1.442695, %v1140_v39  ;;  %v1094_v58 = vpop.f32.mrf.mxu2 }
 0x19d   :  { %v2086_v60 = vpop.eup %2085  ;;  %v3250_v51 = vadd.f32 1.0, %v2084_v47  ;;  %v1095_v25 = vadd.f32 %v3065_v44, %v1094_v58  ;;  %vm1430_vm10 = vcmp.eq.f32.partialorder %v1429_v16, 8.507059e+37  ;;  %v1432_v10 = vor.u32 1.1754944e-38, %v1431_v19 }
 0x19e   :  { %v1409_v41 = vadd.f32 %v2080_v36, %v1408_v55  ;;  %v1646_v61 = vmul.f32 %v2086_v60, %v3239_v34  ;;  %2091 = vpow2.f32 %v1859_v57  ;;  %vm1651_vm4 = vweird.f32 %v2086_v60 }
 0x19f   :  { %2093 = vrcp.f32 %v3250_v51  ;;  %v2088_v62 = vpop.eup %2087  ;;  %v1844_v6 = vmul.f32 -1.442695, %v1095_v25  ;;  %vm1652_vm7 = vmor %vm1650_vm5, %vm1651_vm4  ;;  %v1669_v28 = vand.u32 2147483647, %v3250_v51  ;;  %v1671_v29 = vand.u32 2147483648, %v3250_v51 }
 0x1a0   :  { %v1413_v42 = vsel %vm1412_vm2, %v2080_v36, %v1409_v41  ;;  %v1647_v63 = vsub.f32 1.0, %v1646_v61  ;;  %v3257_v1 = vadd.f32 1.0, %v2088_v62  ;;  %vm1665_vm12 = vweird.f32 %v3250_v51 }
 0x1a1   :  { %v2090_v0 = vpop.eup %2089  ;;  %v1418_v14 = vsel %vm1415_vm3, %v1417_v45, %v1413_v42  ;;  %2095 = vpow2.f32 %v1844_v6  ;;  %vm3291_vm14 = vcmp.eq.f32.partialorder %v1669_v28, 8.507059e+37  ;;  %v1672_v38 = vor.u32 1.1754944e-38, %v1671_v29 }
 0x1a2   :  { %1773 = vst [vmem:[%s3541_s7 + $0x40] sm:$0xff] %v1418_v14  ;;  %v1648_v5 = vmul.f32 %v2086_v60, %v1647_v63  ;;  %v1421_v8 = vmul.f32 %v2090_v0, %v3243_v23  ;;  %2097 = vrcp.f32 %v3257_v1  ;;  %vm1426_vm9 = vweird.f32 %v2090_v0 }
 0x1a3   :  { %v1142_v11 = vpop.f32.mrf.mxu3  ;;  %vm1427_vm11 = vmor %vm1425_vm8, %vm1426_vm9  ;;  %vm1440_vm15 = vweird.f32 %v3257_v1  ;;  %v1444_v46 = vand.u32 2147483647, %v3257_v1  ;;  %v1446_v49 = vand.u32 2147483648, %v3257_v1 }
 0x1a4   :  { %v2092_v59 = vpop.eup %2091  ;;  %v1649_v12 = vadd.f32 %v2086_v60, %v1648_v5  ;;  %v1422_v13 = vsub.f32 1.0, %v1421_v8  ;;  %v1143_v22 = vadd.f32 %v3065_v44, %v1142_v11 }
 0x1a5   :  { %v2094_v20 = vpop.eup %2093  ;;  %v3272_v21 = vadd.f32 1.0, %v2092_v59  ;;  %vm1445_vm3 = vcmp.eq.f32.partialorder %v1444_v46, 8.507059e+37  ;;  %v1447_v52 = vor.u32 1.1754944e-38, %v1446_v49 }
 0x1a6   :  { %v1653_v53 = vsel %vm1652_vm7, %v2086_v60, %v1649_v12  ;;  %v1423_v24 = vmul.f32 %v2090_v0, %v1422_v13  ;;  %v1661_v27 = vmul.f32 %v2094_v20, %v3250_v51  ;;  %v1097_v15 = vpop.f32.mrf.mxu2  ;;  %v1860_v4 = vmul.f32 -1.442695, %v1143_v22 }
 0x1a7   :  { %v1658_v26 = vsel %vm3264_vm6, %v1657_v18, %v1653_v53  ;;  %2099 = vrcp.f32 %v3272_v21  ;;  %v2096_v30 = vpop.eup %2095  ;;  %v1098_v2 = vadd.f32 %v3065_v44, %v1097_v15  ;;  %vm1666_vm13 = vweird.f32 %v2094_v20 }
 0x1a8   :  { %1789 = vst [vmem:[%s3541_s7 + $0xc0] sm:$0xff] %v1658_v26  ;;  %v1424_v17 = vadd.f32 %v2090_v0, %v1423_v24  ;;  %v1662_v48 = vsub.f32 1.0, %v1661_v27  ;;  %v2098_v31 = vpop.eup %2097  ;;  %v3287_v32 = vadd.f32 1.0, %v2096_v30  ;;  %vm1667_vm0 = vmor %vm1665_vm12, %vm1666_vm13  ;;  %v1684_v57 = vand.u32 2147483647, %v3272_v21 }
 0x1a9   :  { %v1436_v35 = vmul.f32 %v2098_v31, %v3257_v1  ;;  %v1845_v50 = vmul.f32 -1.442695, %v1098_v2  ;;  %vm1441_vm1 = vweird.f32 %v2098_v31  ;;  %v1686_v58 = vand.u32 2147483648, %v3272_v21 }
 0x1aa   :  { %v1428_v34 = vsel %vm1427_vm11, %v2090_v0, %v1424_v17  ;;  %v1663_v7 = vmul.f32 %v2094_v20, %v1662_v48  ;;  %2101 = vrcp.f32 %v3287_v32  ;;  %vm1442_vm2 = vmor %vm1440_vm15, %vm1441_vm1  ;;  %vm1680_vm4 = vweird.f32 %v3272_v21 }
 0x1ab   :  { %v1433_v36 = vsel %vm1430_vm10, %v1432_v10, %v1428_v34  ;;  %v1145_v40 = vpop.f32.mrf.mxu3  ;;  %v1437_v43 = vsub.f32 1.0, %v1436_v35  ;;  %2103 = vpow2.f32 %v1860_v4  ;;  %vm3318_vm6 = vcmp.eq.f32.partialorder %v1684_v57, 8.507059e+37 }
 0x1ac   :  { %1774 = vst [vmem:[%s3541_s7 + $0x48] sm:$0xff] %v1433_v36  ;;  %v1664_v3 = vadd.f32 %v2094_v20, %v1663_v7  ;;  %v1146_v39 = vadd.f32 %v3065_v44, %v1145_v40  ;;  %2105 = vpow2.f32 %v1845_v50  ;;  %v1687_v5 = vor.u32 1.1754944e-38, %v1686_v58  ;;  %v3358_v7 = vld [vmem:[%s3540_s6] ss:$0 sm:$0xff] }
 0x1ad   :  { %v2100_v23 = vpop.eup %2099  ;;  %v1438_v47 = vmul.f32 %v2098_v31, %v1437_v43  ;;  %v1459_v12 = vand.u32 2147483647, %v3287_v32  ;;  %v1461_v13 = vand.u32 2147483648, %v3287_v32  ;;  %vm1455_vm9 = vweird.f32 %v3287_v32 }
 0x1ae   :  { %v1668_v33 = vsel %vm1667_vm0, %v2094_v20, %v1664_v3  ;;  %v1676_v55 = vmul.f32 %v2100_v23, %v3272_v21  ;;  %v1861_v41 = vmul.f32 -1.442695, %v1146_v39  ;;  %vm1681_vm5 = vweird.f32 %v2100_v23 }
 0x1af   :  { %v1673_v56 = vsel %vm3291_vm14, %v1672_v38, %v1668_v33  ;;  %v1100_v60 = vpop.f32.mrf.mxu2  ;;  %v1439_v51 = vadd.f32 %v2098_v31, %v1438_v47  ;;  %vm1682_vm7 = vmor %vm1680_vm4, %vm1681_vm5  ;;  %v1462_v26 = vor.u32 1.1754944e-38, %v1461_v13  ;;  %vm1460_vm11 = vcmp.eq.f32.partialorder %v1459_v12, 8.507059e+37 }
 0x1b0   :  { %1790 = vst [vmem:[%s3541_s7 + $0xc8] sm:$0xff] %v1673_v56  ;;  %v1677_v25 = vsub.f32 1.0, %v1676_v55  ;;  %v1101_v61 = vadd.f32 %v3065_v44, %v1100_v60  ;;  %v2102_v45 = vpop.eup %2101  ;;  %2107 = vpow2.f32 %v1861_v41 }
 0x1b1   :  { %v1443_v62 = vsel %vm1442_vm2, %v2098_v31, %v1439_v51  ;;  %v1451_v63 = vmul.f32 %v2102_v45, %v3287_v32  ;;  %v2104_v6 = vpop.eup %2103  ;;  %vm1456_vm8 = vweird.f32 %v2102_v45 }
 0x1b2   :  { %v1678_v42 = vmul.f32 %v2100_v23, %v1677_v25  ;;  %v1448_v0 = vsel %vm1445_vm3, %v1447_v52, %v1443_v62  ;;  %v1846_v54 = vmul.f32 -1.442695, %v1101_v61  ;;  %v3325_v9 = vadd.f32 1.0, %v2104_v6  ;;  %v2106_v59 = vpop.eup %2105  ;;  %vm1457_vm10 = vmor %vm1455_vm9, %vm1456_vm8 }
 0x1b3   :  { %1775 = vst [vmem:[%s3541_s7 + $0x50] sm:$0xff] %v1448_v0  ;;  %v1452_v8 = vsub.f32 1.0, %v1451_v63  ;;  %v3335_v22 = vadd.f32 1.0, %v2106_v59 }
 0x1b4   :  { %v1679_v1 = vadd.f32 %v2100_v23, %v1678_v42  ;;  %v1148_v11 = vpop.f32.mrf.mxu3  ;;  %2109 = vpow2.f32 %v1846_v54  ;;  %v1701_v4 = vand.u32 2147483648, %v3325_v9  ;;  %vm1695_vm12 = vweird.f32 %v3325_v9 }
 0x1b5   :  { %v1149_v16 = vadd.f32 %v3065_v44, %v1148_v11  ;;  %v1453_v20 = vmul.f32 %v2102_v45, %v1452_v8  ;;  %2111 = vrcp.f32 %v3325_v9  ;;  %v1474_v2 = vand.u32 2147483647, %v3335_v22 }
 0x1b6   :  { %v1683_v19 = vsel %vm1682_vm7, %v2100_v23, %v1679_v1  ;;  %v2108_v15 = vpop.eup %2107  ;;  %2113 = vrcp.f32 %v3335_v22  ;;  %v1476_v38 = vand.u32 2147483648, %v3335_v22  ;;  %v1702_v49 = vor.u32 1.1754944e-38, %v1701_v4 }
 0x1b7   :  { %v1688_v18 = vsel %vm3318_vm6, %v1687_v5, %v1683_v19  ;;  %v1103_v53 = vpop.f32.mrf.mxu2  ;;  %v1454_v21 = vadd.f32 %v2102_v45, %v1453_v20  ;;  %v1862_v24 = vmul.f32 -1.442695, %v1149_v16  ;;  %v3343_v29 = vadd.f32 1.0, %v2108_v15 }
 0x1b8   :  { %1791 = vst [vmem:[%s3541_s7 + $0xd0] sm:$0xff] %v1688_v18  ;;  %v1104_v27 = vadd.f32 %v3065_v44, %v1103_v53  ;;  %v1699_v44 = vand.u32 2147483647, %v3325_v9  ;;  %vm1470_vm15 = vweird.f32 %v3335_v22  ;;  %vm3370_vm0 = vcmp.eq.f32.partialorder %v1474_v2, 8.507059e+37 }
 0x1b9   :  { %v1458_v28 = vsel %vm1457_vm10, %v2102_v45, %v1454_v21  ;;  %2115 = vpow2.f32 %v1862_v24  ;;  %v1477_v57 = vor.u32 1.1754944e-38, %v1476_v38  ;;  %v1714_v60 = vand.u32 2147483647, %v3343_v29 }
 0x1ba   :  { %v2110_v30 = vpop.eup %2109  ;;  %v1463_v17 = vsel %vm1460_vm11, %v1462_v26, %v1458_v28  ;;  %v1847_v10 = vmul.f32 -1.442695, %v1104_v27  ;;  %2117 = vrcp.f32 %v3343_v29  ;;  %vm3363_vm13 = vcmp.eq.f32.partialorder %v1699_v44, 8.507059e+37 }
 0x1bb   :  { %v2112_v48 = vpop.eup %2111  ;;  %1776 = vst [vmem:[%s3541_s7 + $0x58] sm:$0xff] %v1463_v17  ;;  %v3353_v34 = vadd.f32 1.0, %v2110_v30  ;;  %v1716_v41 = vand.u32 2147483648, %v3343_v29  ;;  %vm1710_vm3 = vweird.f32 %v3343_v29  ;;  %vm3393_vm6 = vcmp.eq.f32.partialorder %v1714_v60, 8.507059e+37 }
 0x1bc   :  { %v1151_v31 = vpop.f32.mrf.mxu3  ;;  %v1691_v32 = vmul.f32 %v2112_v48, %v3325_v9  ;;  %2119 = vpow2.f32 %v1847_v10  ;;  %v2114_v36 = vpop.eup %2113  ;;  %vm1696_vm14 = vweird.f32 %v2112_v48 }
 0x1bd   :  { %v1152_v35 = vadd.f32 %v3358_v7, %v1151_v31  ;;  %v1466_v43 = vmul.f32 %v2114_v36, %v3335_v22  ;;  %2121 = vrcp.f32 %v3353_v34  ;;  %vm1697_vm1 = vmor %vm1695_vm12, %vm1696_vm14  ;;  %vm1471_vm2 = vweird.f32 %v2114_v36 }
 0x1be   :  { %v1692_v37 = vsub.f32 1.0, %v1691_v32  ;;  %vm1472_vm4 = vmor %vm1470_vm15, %vm1471_vm2  ;;  %v1717_v9 = vor.u32 1.1754944e-38, %v1716_v41  ;;  %vm1485_vm7 = vweird.f32 %v3353_v34  ;;  %v1489_v13 = vand.u32 2147483647, %v3353_v34 }
 0x1bf   :  { %v1106_v40 = vpop.f32.mrf.mxu2  ;;  %v2116_v46 = vpop.eup %2115  ;;  %v1467_v39 = vsub.f32 1.0, %v1466_v43  ;;  %v1863_v55 = vmul.f32 -1.442695, %v1152_v35  ;;  %v1491_v19 = vand.u32 2147483648, %v3353_v34 }
 0x1c0   :  { %v1693_v23 = vmul.f32 %v2112_v48, %v1692_v37  ;;  %v2118_v50 = vpop.eup %2117  ;;  %v3374_v47 = vadd.f32 1.0, %v2116_v46  ;;  %v1107_v52 = vadd.f32 %v3358_v7, %v1106_v40  ;;  %vm1490_vm11 = vcmp.eq.f32.partialorder %v1489_v13, 8.507059e+37 }
 0x1c1   :  { %v1706_v58 = vmul.f32 %v2118_v50, %v3343_v29  ;;  %v1468_v25 = vmul.f32 %v2114_v36, %v1467_v39  ;;  %vm1711_vm5 = vweird.f32 %v2118_v50  ;;  %v1492_v44 = vor.u32 1.1754944e-38, %v1491_v19 }
 0x1c2   :  { %v1694_v56 = vadd.f32 %v2112_v48, %v1693_v23  ;;  %v2120_v51 = vpop.eup %2119  ;;  %2123 = vrcp.f32 %v3374_v47  ;;  %vm1712_vm8 = vmor %vm1710_vm3, %vm1711_vm5  ;;  %v1848_v20 = vmul.f32 -1.442695, %v1107_v52  ;;  %v1729_v26 = vand.u32 2147483647, %v3374_v47 }
 0x1c3   :  { %v1707_v45 = vsub.f32 1.0, %v1706_v58  ;;  %v2122_v62 = vpop.eup %2121  ;;  %v1469_v63 = vadd.f32 %v2114_v36, %v1468_v25  ;;  %v3386_v6 = vadd.f32 1.0, %v2120_v51  ;;  %2125 = vpow2.f32 %v1863_v55 }
 0x1c4   :  { %v1698_v61 = vsel %vm1697_vm1, %v2112_v48, %v1694_v56  ;;  %v1481_v54 = vmul.f32 %v2122_v62, %v3353_v34  ;;  %v1154_v1 = vpop.f32.mrf.mxu3  ;;  %vm1486_vm9 = vweird.f32 %v2122_v62  ;;  %v1731_v28 = vand.u32 2147483648, %v3374_v47 }
 0x1c5   :  { %v1703_v42 = vsel %vm3363_vm13, %v1702_v49, %v1698_v61  ;;  %v1708_v0 = vmul.f32 %v2118_v50, %v1707_v45  ;;  %v1473_v8 = vsel %vm1472_vm4, %v2114_v36, %v1469_v63  ;;  %2127 = vrcp.f32 %v3386_v6  ;;  %vm1487_vm10 = vmor %vm1485_vm7, %vm1486_vm9 }
 0x1c6   :  { %1792 = vst [vmem:[%s3541_s7 + $0xd8] sm:$0xff] %v1703_v42  ;;  %v1478_v11 = vsel %vm3370_vm0, %v1477_v57, %v1473_v8  ;;  %v1482_v12 = vsub.f32 1.0, %v1481_v54  ;;  %v1155_v18 = vadd.f32 %v3358_v7, %v1154_v1  ;;  %2129 = vpow2.f32 %v1848_v20 }
 0x1c7   :  { %v1109_v5 = vpop.f32.mrf.mxu2  ;;  %v1709_v59 = vadd.f32 %v2118_v50, %v1708_v0  ;;  %1777 = vst [vmem:[%s3541_s7 + $0x60] sm:$0xff] %v1478_v11  ;;  %vm1725_vm13 = vweird.f32 %v3374_v47  ;;  %vm3426_vm14 = vcmp.eq.f32.partialorder %v1729_v26, 8.507059e+37  ;;  %v1732_v38 = vor.u32 1.1754944e-38, %v1731_v28 }
 0x1c8   :  { %v2124_v16 = vpop.eup %2123  ;;  %v1110_v22 = vadd.f32 %v3358_v7, %v1109_v5  ;;  %v1483_v21 = vmul.f32 %v2122_v62, %v1482_v12  ;;  %v1864_v10 = vmul.f32 -1.442695, %v1155_v18  ;;  %v1504_v43 = vand.u32 2147483647, %v3386_v6 }
 0x1c9   :  { %v1713_v53 = vsel %vm1712_vm8, %v2118_v50, %v1709_v59  ;;  %v1721_v24 = vmul.f32 %v2124_v16, %v3374_v47  ;;  %v2126_v27 = vpop.eup %2125  ;;  %vm1726_vm12 = vweird.f32 %v2124_v16  ;;  %v1506_v46 = vand.u32 2147483648, %v3386_v6 }
 0x1ca   :  { %v1718_v15 = vsel %vm3393_vm6, %v1717_v9, %v1713_v53  ;;  %v1484_v29 = vadd.f32 %v2122_v62, %v1483_v21  ;;  %v3420_v17 = vadd.f32 1.0, %v2126_v27  ;;  %v1849_v31 = vmul.f32 -1.442695, %v1110_v22  ;;  %vm1727_vm15 = vmor %vm1725_vm13, %vm1726_vm12 }
 0x1cb   :  { %1793 = vst [vmem:[%s3541_s7 + $0xe0] sm:$0xff] %v1718_v15  ;;  %v1722_v30 = vsub.f32 1.0, %v1721_v24  ;;  %v2128_v48 = vpop.eup %2127  ;;  %vm1500_vm1 = vweird.f32 %v3386_v6  ;;  %v1507_v57 = vor.u32 1.1754944e-38, %v1506_v46  ;;  %vm1505_vm3 = vcmp.eq.f32.partialorder %v1504_v43, 8.507059e+37 }
 0x1cc   :  { %v1488_v32 = vsel %vm1487_vm10, %v2122_v62, %v1484_v29  ;;  %v1496_v2 = vmul.f32 %v2128_v48, %v3386_v6  ;;  %2131 = vrcp.f32 %v3420_v17  ;;  %v2130_v3 = vpop.eup %2129  ;;  %vm1501_vm0 = vweird.f32 %v2128_v48 }
 0x1cd   :  { %v1723_v4 = vmul.f32 %v2124_v16, %v1722_v30  ;;  %v1493_v36 = vsel %vm1490_vm11, %v1492_v44, %v1488_v32  ;;  %2133 = vpow2.f32 %v1864_v10  ;;  %v1268_v39 = vadd.f32 1.0, %v2130_v3  ;;  %vm1502_vm2 = vmor %vm1500_vm1, %vm1501_vm0 }
 0x1ce   :  { %1778 = vst [vmem:[%s3541_s7 + $0x68] sm:$0xff] %v1493_v36  ;;  %v1497_v40 = vsub.f32 1.0, %v1496_v2  ;;  %2135 = vpow2.f32 %v1849_v31  ;;  %v1746_v42 = vand.u32 2147483648, %v3420_v17  ;;  %v1744_v14 = vand.u32 2147483647, %v3420_v17 }
 0x1cf   :  { %v1112_v35 = vpop.f32.mrf.mxu2  ;;  %v1724_v34 = vadd.f32 %v2124_v16, %v1723_v4  ;;  %2137 = vrcp.f32 %v1268_v39  ;;  %v1519_v5 = vand.u32 2147483647, %v1268_v39  ;;  %vm1740_vm5 = vweird.f32 %v3420_v17 }
 0x1d0   :  { %v1113_v23 = vadd.f32 %v3358_v7, %v1112_v35  ;;  %v1498_v50 = vmul.f32 %v2128_v48, %v1497_v40  ;;  %v1521_v9 = vand.u32 2147483648, %v1268_v39  ;;  %v1747_v59 = vor.u32 1.1754944e-38, %v1746_v42 }
 0x1d1   :  { %v1728_v49 = vsel %vm1727_vm15, %v2124_v16, %v1724_v34  ;;  %vm1745_vm7 = vcmp.eq.f32.partialorder %v1744_v14, 8.507059e+37  ;;  %vm1515_vm8 = vweird.f32 %v1268_v39  ;;  %vm3460_vm10 = vcmp.eq.f32.partialorder %v1519_v5, 8.507059e+37 }
 0x1d2   :  { %v1733_v33 = vsel %vm3426_vm14, %v1732_v38, %v1728_v49  ;;  %v1850_v47 = vmul.f32 -1.442695, %v1113_v23  ;;  %v1499_v55 = vadd.f32 %v2128_v48, %v1498_v50  ;;  %v2132_v56 = vpop.eup %2131  ;;  %v1522_v24 = vor.u32 1.1754944e-38, %v1521_v9 }
 0x1d3   :  { %1794 = vst [vmem:[%s3541_s7 + $0xe8] sm:$0xff] %v1733_v33  ;;  %v2134_v58 = vpop.eup %2133  ;;  %v1736_v51 = vmul.f32 %v2132_v56, %v3420_v17  ;;  %vm1741_vm4 = vweird.f32 %v2132_v56 }
 0x1d4   :  { %2139 = vpow2.f32 %v1850_v47  ;;  %v1503_v60 = vsel %vm1502_vm2, %v2128_v48, %v1499_v55  ;;  %v2136_v41 = vpop.eup %2135  ;;  %v3444_v45 = vadd.f32 1.0, %v2134_v58  ;;  %vm1742_vm6 = vmor %vm1740_vm5, %vm1741_vm4 }
 0x1d5   :  { %v1508_v61 = vsel %vm1505_vm3, %v1507_v57, %v1503_v60  ;;  %v1737_v52 = vsub.f32 1.0, %v1736_v51  ;;  %v3449_v62 = vadd.f32 1.0, %v2136_v41  ;;  %v2138_v6 = vpop.eup %2137 }
 0x1d6   :  { %1779 = vst [vmem:[%s3541_s7 + $0x70] sm:$0xff] %v1508_v61  ;;  %2141 = vrcp.f32 %v3444_v45  ;;  %v1511_v1 = vmul.f32 %v2138_v6, %v1268_v39  ;;  %vm1516_vm9 = vweird.f32 %v2138_v6  ;;  %v1759_v28 = vand.u32 2147483647, %v3444_v45 }
 0x1d7   :  { %v1115_v25 = vpop.f32.mrf.mxu2  ;;  %v1738_v0 = vmul.f32 %v2132_v56, %v1737_v52  ;;  %2143 = vrcp.f32 %v3449_v62  ;;  %v1761_v29 = vand.u32 2147483648, %v3444_v45  ;;  %vm1517_vm11 = vmor %vm1515_vm8, %vm1516_vm9  ;;  %v1534_v10 = vand.u32 2147483647, %v3449_v62 }
 0x1d8   :  { %v1116_v63 = vadd.f32 %v3358_v7, %v1115_v25  ;;  %v1512_v12 = vsub.f32 1.0, %v1511_v1  ;;  %v1536_v48 = vand.u32 2147483648, %v3449_v62  ;;  %vm1755_vm12 = vweird.f32 %v3444_v45 }
 0x1d9   :  { %v1739_v8 = vadd.f32 %v2132_v56, %v1738_v0  ;;  %vm1530_vm13 = vweird.f32 %v3449_v62  ;;  %vm3482_vm15 = vcmp.eq.f32.partialorder %v1759_v28, 8.507059e+37  ;;  %v1762_v3 = vor.u32 1.1754944e-38, %v1761_v29 }
 0x1da   :  { %v2140_v54 = vpop.eup %2139  ;;  %v1851_v13 = vmul.f32 -1.442695, %v1116_v63  ;;  %v1513_v22 = vmul.f32 %v2138_v6, %v1512_v12  ;;  %vm3487_vm1 = vcmp.eq.f32.partialorder %v1534_v10, 8.507059e+37  ;;  %v1537_v46 = vor.u32 1.1754944e-38, %v1536_v48 }
 0x1db   :  { %v3457_v11 = vadd.f32 1.0, %v2140_v54  ;;  %v1743_v16 = vsel %vm1742_vm6, %v2132_v56, %v1739_v8 }
 0x1dc   :  { %v2142_v20 = vpop.eup %2141  ;;  %v1748_v18 = vsel %vm1745_vm7, %v1747_v59, %v1743_v16  ;;  %v1514_v26 = vadd.f32 %v2138_v6, %v1513_v22 }
 0x1dd   :  { %2145 = vrcp.f32 %v3457_v11  ;;  %v2144_v21 = vpop.eup %2143  ;;  %1795 = vst [vmem:[%s3541_s7 + $0xf0] sm:$0xff] %v1748_v18  ;;  %v1751_v27 = vmul.f32 %v2142_v20, %v3444_v45  ;;  %vm1756_vm14 = vweird.f32 %v2142_v20  ;;  %v1549_v55 = vand.u32 2147483647, %v3457_v11 }
 0x1de   :  { %2147 = vpow2.f32 %v1851_v13  ;;  %v1526_v30 = vmul.f32 %v2144_v21, %v3449_v62  ;;  %v1518_v31 = vsel %vm1517_vm11, %v2138_v6, %v1514_v26  ;;  %vm1531_vm0 = vweird.f32 %v2144_v21  ;;  %vm1757_vm2 = vmor %vm1755_vm12, %vm1756_vm14 }
 0x1df   :  { %v1118_v19 = vpop.f32.mrf.mxu2  ;;  %v1752_v17 = vsub.f32 1.0, %v1751_v27  ;;  %v1523_v2 = vsel %vm3460_vm10, %v1522_v24, %v1518_v31  ;;  %vm1532_vm3 = vmor %vm1530_vm13, %vm1531_vm0  ;;  %v1551_v56 = vand.u32 2147483648, %v3457_v11  ;;  %vm1545_vm5 = vweird.f32 %v3457_v11 }
 0x1e0   :  { %v1119_v15 = vadd.f32 %v3358_v7, %v1118_v19  ;;  %v1527_v32 = vsub.f32 1.0, %v1526_v30  ;;  %1780 = vst [vmem:[%s3541_s7 + $0x78] sm:$0xff] %v1523_v2  ;;  %vm1550_vm7 = vcmp.eq.f32.partialorder %v1549_v55, 8.507059e+37 }
 0x1e1   :  { %v1753_v35 = vmul.f32 %v2142_v20, %v1752_v17  ;;  %v1552_v52 = vor.u32 1.1754944e-38, %v1551_v56 }
 0x1e2   :  { %v1852_v44 = vmul.f32 -1.442695, %v1119_v15  ;;  %v1528_v37 = vmul.f32 %v2144_v21, %v1527_v32 }
 0x1e3   :  { %v2146_v4 = vpop.eup %2145  ;;  %v1754_v40 = vadd.f32 %v2142_v20, %v1753_v35 }
 0x1e4   :  { %2149 = vpow2.f32 %v1852_v44  ;;  %v1541_v34 = vmul.f32 %v2146_v4, %v3457_v11  ;;  %v2148_v38 = vpop.eup %2147  ;;  %v1529_v49 = vadd.f32 %v2144_v21, %v1528_v37  ;;  %vm1546_vm4 = vweird.f32 %v2146_v4 }
 0x1e5   :  { %v1271_v39 = vadd.f32 1.0, %v2148_v38  ;;  %v1758_v47 = vsel %vm1757_vm2, %v2142_v20, %v1754_v40  ;;  %vm1547_vm6 = vmor %vm1545_vm5, %vm1546_vm4 }
 0x1e6   :  { %v1542_v50 = vsub.f32 1.0, %v1541_v34  ;;  %v1763_v57 = vsel %vm3482_vm15, %v1762_v3, %v1758_v47  ;;  %v1533_v58 = vsel %vm1532_vm3, %v2144_v21, %v1529_v49 }
 0x1e7   :  { %v1121_v23 = vpop.f32.mrf.mxu2  ;;  %2151 = vrcp.f32 %v1271_v39  ;;  %1796 = vst [vmem:[%s3541_s7 + $0xf8] sm:$0xff] %v1763_v57  ;;  %v1538_v25 = vsel %vm3487_vm1, %v1537_v46, %v1533_v58  ;;  %v1564_v5 = vand.u32 2147483647, %v1271_v39  ;;  %v1566_v9 = vand.u32 2147483648, %v1271_v39 }
 0x1e8   :  { %v1122_v33 = vadd.f32 %v3358_v7, %v1121_v23  ;;  %v1543_v60 = vmul.f32 %v2146_v4, %v1542_v50  ;;  %1781 = vst [vmem:[%s3541_s7 + $0x80] sm:$0xff] %v1538_v25  ;;  %vm1560_vm9 = vweird.f32 %v1271_v39 }
 0x1e9   :  { %vm1565_vm10 = vcmp.eq.f32.partialorder %v1564_v5, 8.507059e+37  ;;  %v1567_v18 = vor.u32 1.1754944e-38, %v1566_v9 }
 0x1ea   :  { %v2150_v51 = vpop.eup %2149  ;;  %v1544_v41 = vadd.f32 %v2146_v4, %v1543_v60  ;;  %v1853_v45 = vmul.f32 -1.442695, %v1122_v33 }
 0x1eb   :  { %v1272_v61 = vadd.f32 1.0, %v2150_v51 }
 0x1ec   :  { %v1548_v62 = vsel %vm1547_vm6, %v2146_v4, %v1544_v41 }
 0x1ed   :  { %2153 = vrcp.f32 %v1272_v61  ;;  %v1553_v42 = vsel %vm1550_vm7, %v1552_v52, %v1548_v62  ;;  %v2152_v6 = vpop.eup %2151  ;;  %v1579_v22 = vand.u32 2147483647, %v1272_v61  ;;  %v1581_v53 = vand.u32 2147483648, %v1272_v61 }
 0x1ee   :  { %2155 = vpow2.f32 %v1853_v45  ;;  %1782 = vst [vmem:[%s3541_s7 + $0x88] sm:$0xff] %v1553_v42  ;;  %v1556_v14 = vmul.f32 %v2152_v6, %v1271_v39  ;;  %vm1561_vm8 = vweird.f32 %v2152_v6  ;;  %vm1575_vm13 = vweird.f32 %v1272_v61 }
 0x1ef   :  { %v1124_v63 = vpop.f32.mrf.mxu2  ;;  %vm1562_vm11 = vmor %vm1560_vm9, %vm1561_vm8  ;;  %v1582_v17 = vor.u32 1.1754944e-38, %v1581_v53  ;;  %vm1580_vm15 = vcmp.eq.f32.partialorder %v1579_v22, 8.507059e+37 }
 0x1f0   :  { %v1125_v0 = vadd.f32 %v3358_v7, %v1124_v63  ;;  %v1557_v1 = vsub.f32 1.0, %v1556_v14 }
 0x1f2   :  { %v1854_v54 = vmul.f32 -1.442695, %v1125_v0  ;;  %v1558_v59 = vmul.f32 %v2152_v6, %v1557_v1 }
 0x1f3   :  { %v2154_v8 = vpop.eup %2153 }
 0x1f4   :  { %2157 = vpow2.f32 %v1854_v54  ;;  %v2156_v11 = vpop.eup %2155  ;;  %v1571_v12 = vmul.f32 %v2154_v8, %v1272_v61  ;;  %v1559_v16 = vadd.f32 %v2152_v6, %v1558_v59  ;;  %vm1576_vm12 = vweird.f32 %v2154_v8 }
 0x1f5   :  { %v1273_v13 = vadd.f32 1.0, %v2156_v11  ;;  %vm1577_vm14 = vmor %vm1575_vm13, %vm1576_vm12 }
 0x1f6   :  { %v1572_v19 = vsub.f32 1.0, %v1571_v12  ;;  %v1563_v21 = vsel %vm1562_vm11, %v2152_v6, %v1559_v16 }
 0x1f7   :  { %v1127_v20 = vpop.f32.mrf.mxu2  ;;  %2159 = vrcp.f32 %v1273_v13  ;;  %v1568_v26 = vsel %vm1565_vm10, %v1567_v18, %v1563_v21  ;;  %v1596_v35 = vand.u32 2147483648, %v1273_v13  ;;  %v1594_v38 = vand.u32 2147483647, %v1273_v13 }
 0x1f8   :  { %v1573_v24 = vmul.f32 %v2154_v8, %v1572_v19  ;;  %v1128_v27 = vadd.f32 %v3358_v7, %v1127_v20  ;;  %1783 = vst [vmem:[%s3541_s7 + $0x90] sm:$0xff] %v1568_v26  ;;  %vm1590_vm1 = vweird.f32 %v1273_v13 }
 0x1f9   :  { %v1597_v23 = vor.u32 1.1754944e-38, %v1596_v35  ;;  %vm1595_vm3 = vcmp.eq.f32.partialorder %v1594_v38, 8.507059e+37 }
 0x1fa   :  { %v2158_v15 = vpop.eup %2157  ;;  %v1574_v28 = vadd.f32 %v2154_v8, %v1573_v24  ;;  %v1855_v30 = vmul.f32 -1.442695, %v1128_v27 }
 0x1fb   :  { %v1274_v29 = vadd.f32 1.0, %v2158_v15 }
 0x1fc   :  { %v1578_v10 = vsel %vm1577_vm14, %v2154_v8, %v1574_v28 }
 0x1fd   :  { %2161 = vrcp.f32 %v1274_v29  ;;  %v2160_v48 = vpop.eup %2159  ;;  %v1583_v44 = vsel %vm1580_vm15, %v1582_v17, %v1578_v10  ;;  %v1611_v39 = vand.u32 2147483648, %v1274_v29  ;;  %v1609_v47 = vand.u32 2147483647, %v1274_v29 }
 0x1fe   :  { %2163 = vpow2.f32 %v1855_v30  ;;  %1784 = vst [vmem:[%s3541_s7 + $0x98] sm:$0xff] %v1583_v44  ;;  %v1586_v31 = vmul.f32 %v2160_v48, %v1273_v13  ;;  %vm1591_vm0 = vweird.f32 %v2160_v48  ;;  %vm1605_vm5 = vweird.f32 %v1274_v29 }
 0x1ff   :  { %v1130_v32 = vpop.f32.mrf.mxu2  ;;  %vm1592_vm2 = vmor %vm1590_vm1, %vm1591_vm0  ;;  %v1612_v57 = vor.u32 1.1754944e-38, %v1611_v39  ;;  %vm1610_vm7 = vcmp.eq.f32.partialorder %v1609_v47, 8.507059e+37 }
 0x200   :  { %v1131_v4 = vadd.f32 %v3358_v7, %v1130_v32  ;;  %v1587_v2 = vsub.f32 1.0, %v1586_v31 }
 0x202   :  { %v1856_v36 = vmul.f32 -1.442695, %v1131_v4  ;;  %v1588_v34 = vmul.f32 %v2160_v48, %v1587_v2 }
 0x203   :  { %v2162_v37 = vpop.eup %2161 }
 0x204   :  { %v2164_v40 = vpop.eup %2163  ;;  %v1601_v3 = vmul.f32 %v2162_v37, %v1274_v29  ;;  %2165 = vpow2.f32 %v1856_v36  ;;  %v1589_v43 = vadd.f32 %v2160_v48, %v1588_v34  ;;  %vm1606_vm4 = vweird.f32 %v2162_v37 }
 0x205   :  { %v1275_v46 = vadd.f32 1.0, %v2164_v40  ;;  %vm1607_vm6 = vmor %vm1605_vm5, %vm1606_vm4 }
 0x206   :  { %v1602_v49 = vsub.f32 1.0, %v1601_v3  ;;  %v1593_v50 = vsel %vm1592_vm2, %v2160_v48, %v1589_v43 }
 0x207   :  { %2167 = vrcp.f32 %v1275_v46  ;;  %v1598_v7 = vsel %vm1595_vm3, %v1597_v23, %v1593_v50  ;;  %v1626_v45 = vand.u32 2147483648, %v1275_v46  ;;  %v1624_v62 = vand.u32 2147483647, %v1275_v46 }
 0x208   :  { %v1603_v33 = vmul.f32 %v2162_v37, %v1602_v49  ;;  %1785 = vst [vmem:[%s3541_s7 + $0xa0] sm:$0xff] %v1598_v7  ;;  %vm1620_vm9 = vweird.f32 %v1275_v46 }
 0x209   :  { %v1627_v0 = vor.u32 1.1754944e-38, %v1626_v45  ;;  %vm1625_vm11 = vcmp.eq.f32.partialorder %v1624_v62, 8.507059e+37 }
 0x20a   :  { %v2166_v55 = vpop.eup %2165  ;;  %v1604_v56 = vadd.f32 %v2162_v37, %v1603_v33 }
 0x20b   :  { %v1276_v58 = vadd.f32 1.0, %v2166_v55 }
 0x20c   :  { %v1608_v60 = vsel %vm1607_vm6, %v2162_v37, %v1604_v56 }
 0x20d   :  { %v2168_v51 = vpop.eup %2167  ;;  %v1613_v25 = vsel %vm1610_vm7, %v1612_v57, %v1608_v60  ;;  %2169 = vrcp.f32 %v1276_v58  ;;  %v1641_v5 = vand.u32 2147483648, %v1276_v58  ;;  %v1639_v9 = vand.u32 2147483647, %v1276_v58 }
 0x20e   :  { %1786 = vst [vmem:[%s3541_s7 + $0xa8] sm:$0xff] %v1613_v25  ;;  %v1616_v41 = vmul.f32 %v2168_v51, %v1275_v46  ;;  %vm1621_vm8 = vweird.f32 %v2168_v51  ;;  %vm1635_vm13 = vweird.f32 %v1276_v58 }
 0x20f   :  { %vm1622_vm10 = vmor %vm1620_vm9, %vm1621_vm8  ;;  %v1642_v59 = vor.u32 1.1754944e-38, %v1641_v5  ;;  %vm1640_vm15 = vcmp.eq.f32.partialorder %v1639_v9, 8.507059e+37 }
 0x210   :  { %v1617_v61 = vsub.f32 1.0, %v1616_v41 }
 0x212   :  { %v1618_v52 = vmul.f32 %v2168_v51, %v1617_v61 }
 0x213   :  { %v2170_v42 = vpop.eup %2169 }
 0x214   :  { %v1619_v63 = vadd.f32 %v2168_v51, %v1618_v52  ;;  %v1631_v6 = vmul.f32 %v2170_v42, %v1276_v58  ;;  %vm1636_vm12 = vweird.f32 %v2170_v42 }
 0x215   :  { %vm1637_vm14 = vmor %vm1635_vm13, %vm1636_vm12 }
 0x216   :  { %v1623_v14 = vsel %vm1622_vm10, %v2168_v51, %v1619_v63  ;;  %v1632_v54 = vsub.f32 1.0, %v1631_v6 }
 0x217   :  { %v1628_v1 = vsel %vm1625_vm11, %v1627_v0, %v1623_v14 }
 0x218   :  { %1787 = vst [vmem:[%s3541_s7 + $0xb0] sm:$0xff] %v1628_v1  ;;  %v1633_v8 = vmul.f32 %v2170_v42, %v1632_v54 }
 0x21a   :  { %v1634_v11 = vadd.f32 %v2170_v42, %v1633_v8 }
 0x21c   :  { %v1638_v12 = vsel %vm1637_vm14, %v2170_v42, %v1634_v11 }
 0x21d   :  { %v1643_v13 = vsel %vm1640_vm15, %v1642_v59, %v1638_v12 }
 0x21e   :  { %1788 = vst [vmem:[%s3541_s7 + $0xb8] sm:$0xff] %v1643_v13 }

// kernel: gnn_forward.9
= control target key start
LH: loop header
LB: loop body
LE: loop exit
PB: predicated region body
PF: predicated region fallthrough
CT: control target
= control target key end

     0   :  { %vm124_vm0 = vcmask 64512   ;;  %vm1199_vm4 = vcmask 523264   ;;  %s3550_s3 = inlined_call_operand.vmem [shape: f32[8,64], index: 3, kind: input, shape index: {}]   ;;  %s3551_s2 = inlined_call_operand.vmem [shape: f32[8,64], index: 2, kind: input, shape index: {}]   ;;  %s3552_s0 = inlined_call_operand.vmem [shape: f32[256,8], index: 0, kind: input, shape index: {}]   ;;  %s3553_s1 = inlined_call_operand.vmem [shape: f32[256,8], index: 1, kind: input, shape index: {}]   ;;  %s3554_s4 = inlined_call_operand.vmem [shape: f32[1,64], index: 4, kind: input, shape index: {}]   ;;  %s3555_s5 = inlined_call_operand.vmem [shape: f32[64,128], index: 5, kind: input, shape index: {}]   ;;  %s3556_s6 = inlined_call_operand.vmem [shape: f32[1,128], index: 6, kind: input, shape index: {}]   ;;  %s3557_s7 = inlined_call_operand.vmem [shape: f32[256,128], index: 7, kind: output, shape index: {}]  }
   0x1   :  { %v123_v0 = vld [vmem:[%s3550_s3] sm:$0xff]  ;;  %v27_v5 = vld [vmem:[%s3552_s0 + $0x8] sm:$0xff]  ;;  %v28_v8 = vld [vmem:[%s3552_s0 + $0x10] sm:$0xff] }
   0x2   :  { %v90_v1 = vld [vmem:[%s3551_s2] sm:$0xff]  ;;  %236 = vmatpush.msra.mxu0 %v123_v0  ;;  %2213 = vmatpush.msra.mxu3 %v123_v0  ;;  %v59_v6 = vld [vmem:[%s3553_s1 + $0x8] sm:$0xff]  ;;  %v60_v9 = vld [vmem:[%s3553_s1 + $0x10] sm:$0xff] }
   0x3   :  { %v26_v2 = vld [vmem:[%s3552_s0] sm:$0xff]  ;;  %445 = vmatpush.msra.mxu1 %v90_v1  ;;  %v92_v7 = vsub.f32 %v59_v6, %v27_v5  ;;  %v93_v10 = vsub.f32 %v60_v9, %v28_v8  ;;  %v29_v11 = vld [vmem:[%s3552_s0 + $0x18] sm:$0xff]  ;;  %v2572_v17 = vld [vmem:[%s3552_s0 + $0xc8] sm:$0xff] }
   0x4   :  { %v58_v3 = vld [vmem:[%s3553_s1] sm:$0xff]  ;;  %2085 = vmatmul.msk.f32.vlgmr.msra.gmra.mxu1 %vm124_vm0, %v26_v2  ;;  %2214 = vmatpush.msrb.mxu3 %v90_v1  ;;  %v61_v12 = vld [vmem:[%s3553_s1 + $0x18] sm:$0xff]  ;;  %v83_v18 = vld [vmem:[%s3553_s1 + $0xc8] sm:$0xff] }
   0x5   :  { %v91_v4 = vsub.f32 %v58_v3, %v26_v2  ;;  %v94_v13 = vsub.f32 %v61_v12, %v29_v11  ;;  %v30_v14 = vld [vmem:[%s3552_s0 + $0x20] sm:$0xff]  ;;  %v31_v19 = vld [vmem:[%s3552_s0 + $0x28] sm:$0xff]  ;;  %v116_v21 = vsub.f32 %v83_v18, %v2572_v17  ;;  %v52_v23 = vld [vmem:[%s3552_s0 + $0xd0] sm:$0xff] }
   0x6   :  { %v62_v15 = vld [vmem:[%s3553_s1 + $0x20] sm:$0xff]  ;;  %v63_v20 = vld [vmem:[%s3553_s1 + $0x28] sm:$0xff]  ;;  %v84_v24 = vld [vmem:[%s3553_s1 + $0xd0] sm:$0xff] }
   0x7   :  { %2053 = vmatmul.msk.f32.vlgmr.msra.gmra.mxu0 %vm124_vm0, %v91_v4  ;;  %v95_v16 = vsub.f32 %v62_v15, %v30_v14  ;;  %2078 = vmatmul.msk.f32.vlgmr.msra.gmra.mxu3 %vm124_vm0, %v116_v21  ;;  %v96_v22 = vsub.f32 %v63_v20, %v31_v19  ;;  %v32_v25 = vld [vmem:[%s3552_s0 + $0x30] sm:$0xff]  ;;  %v117_v27 = vsub.f32 %v84_v24, %v52_v23  ;;  %v53_v29 = vld [vmem:[%s3552_s0 + $0xd8] sm:$0xff]  ;;  %v2620_v35 = vld [vmem:[%s3552_s0 + $0xe0] sm:$0xff] }
   0x8   :  { %v64_v26 = vld [vmem:[%s3553_s1 + $0x30] sm:$0xff]  ;;  %v85_v30 = vld [vmem:[%s3553_s1 + $0xd8] sm:$0xff]  ;;  %v86_v36 = vld [vmem:[%s3553_s1 + $0xe0] sm:$0xff] }
   0x9   :  { %v97_v28 = vsub.f32 %v64_v26, %v32_v25  ;;  %v33_v31 = vld [vmem:[%s3552_s0 + $0x38] sm:$0xff]  ;;  %v118_v33 = vsub.f32 %v85_v30, %v53_v29  ;;  %v34_v37 = vld [vmem:[%s3552_s0 + $0x40] sm:$0xff]  ;;  %v119_v39 = vsub.f32 %v86_v36, %v2620_v35  ;;  %v2638_v41 = vld [vmem:[%s3552_s0 + $0xe8] sm:$0xff] }
   0xa   :  { %v65_v32 = vld [vmem:[%s3553_s1 + $0x38] sm:$0xff]  ;;  %v66_v38 = vld [vmem:[%s3553_s1 + $0x40] sm:$0xff]  ;;  %v87_v42 = vld [vmem:[%s3553_s1 + $0xe8] sm:$0xff] }
   0xb   :  { %v98_v34 = vsub.f32 %v65_v32, %v33_v31  ;;  %v99_v40 = vsub.f32 %v66_v38, %v34_v37  ;;  %v35_v43 = vld [vmem:[%s3552_s0 + $0x48] sm:$0xff]  ;;  %v120_v45 = vsub.f32 %v87_v42, %v2638_v41  ;;  %v2656_v47 = vld [vmem:[%s3552_s0 + $0xf0] sm:$0xff]  ;;  %v2674_v53 = vld [vmem:[%s3552_s0 + $0xf8] sm:$0xff] }
   0xc   :  { %2086 = vmatmul.msk.f32.gmra.mxu1 %vm124_vm0, %v27_v5  ;;  %v67_v44 = vld [vmem:[%s3553_s1 + $0x48] sm:$0xff]  ;;  %v88_v48 = vld [vmem:[%s3553_s1 + $0xf0] sm:$0xff]  ;;  %v89_v54 = vld [vmem:[%s3553_s1 + $0xf8] sm:$0xff] }
   0xd   :  { %v100_v46 = vsub.f32 %v67_v44, %v35_v43  ;;  %v36_v49 = vld [vmem:[%s3552_s0 + $0x50] sm:$0xff]  ;;  %v121_v51 = vsub.f32 %v88_v48, %v2656_v47  ;;  %v37_v55 = vld [vmem:[%s3552_s0 + $0x58] sm:$0xff]  ;;  %v122_v57 = vsub.f32 %v89_v54, %v2674_v53  ;;  %v38_v59 = vld [vmem:[%s3552_s0 + $0x60] sm:$0xff] }
   0xe   :  { %v68_v50 = vld [vmem:[%s3553_s1 + $0x50] sm:$0xff]  ;;  %v69_v56 = vld [vmem:[%s3553_s1 + $0x58] sm:$0xff]  ;;  %v70_v60 = vld [vmem:[%s3553_s1 + $0x60] sm:$0xff] }
   0xf   :  { %2054 = vmatmul.msk.f32.gmra.mxu0 %vm124_vm0, %v92_v7  ;;  %2079 = vmatmul.msk.f32.gmra.mxu3 %vm124_vm0, %v117_v27  ;;  %v101_v52 = vsub.f32 %v68_v50, %v36_v49  ;;  %v102_v58 = vsub.f32 %v69_v56, %v37_v55  ;;  %v103_v61 = vsub.f32 %v70_v60, %v38_v59  ;;  %v39_v62 = vld [vmem:[%s3552_s0 + $0x68] sm:$0xff]  ;;  %v40_v1 = vld [vmem:[%s3552_s0 + $0x70] sm:$0xff]  ;;  %v1194_v4 = vld [vmem:[%s3555_s5 + $0x38] sm:$0xff] }
  0x10   :  { %v71_v63 = vld [vmem:[%s3553_s1 + $0x68] sm:$0xff]  ;;  %v72_v2 = vld [vmem:[%s3553_s1 + $0x70] sm:$0xff]  ;;  %1304 = vmatpush.msra.mxu2 %v1194_v4  ;;  %2215 = vmatpush.msra.mxu3 %v1194_v4  ;;  %v41_v6 = vld [vmem:[%s3552_s0 + $0x78] sm:$0xff] }
  0x11   :  { %v104_v0 = vsub.f32 %v71_v63, %v39_v62  ;;  %v105_v3 = vsub.f32 %v72_v2, %v40_v1  ;;  %v1193_v5 = vld [vmem:[%s3555_s5 + $0x30] sm:$0xff]  ;;  %v73_v7 = vld [vmem:[%s3553_s1 + $0x78] sm:$0xff]  ;;  %v1188_v15 = vld [vmem:[%s3555_s5 + $0x8] sm:$0xff] }
  0x12   :  { %1305 = vmatpush.msra.mxu2 %v1193_v5  ;;  %2216 = vmatpush.msra.mxu3 %v1193_v5  ;;  %v106_v9 = vsub.f32 %v73_v7, %v41_v6  ;;  %v1189_v12 = vld [vmem:[%s3555_s5 + $0x10] sm:$0xff]  ;;  %v75_v24 = vld [vmem:[%s3553_s1 + $0x88] sm:$0xff]  ;;  %v77_v42 = vld [vmem:[%s3553_s1 + $0x98] sm:$0xff] }
  0x13   :  { %v76_v32 = vld [vmem:[%s3553_s1 + $0x90] sm:$0xff] }
  0x14   :  { %2087 = vmatmul.msk.f32.gmra.mxu1 %vm124_vm0, %v28_v8  ;;  %v1192_v8 = vld [vmem:[%s3555_s5 + $0x28] sm:$0xff] }
  0x15   :  { %1306 = vmatpush.msra.mxu2 %v1192_v8  ;;  %2217 = vmatpush.msra.mxu3 %v1192_v8 }
  0x17   :  { %2055 = vmatmul.msk.f32.gmra.mxu0 %vm124_vm0, %v93_v10  ;;  %2080 = vmatmul.msk.f32.gmra.mxu3 %vm124_vm0, %v118_v33  ;;  %v1191_v10 = vld [vmem:[%s3555_s5 + $0x20] sm:$0xff] }
  0x18   :  { %1307 = vmatpush.msra.mxu2 %v1191_v10  ;;  %2218 = vmatpush.msra.mxu3 %v1191_v10 }
  0x1c   :  { %2088 = vmatmul.msk.f32.gmra.mxu1 %vm124_vm0, %v29_v11  ;;  %v1190_v11 = vld [vmem:[%s3555_s5 + $0x18] sm:$0xff] }
  0x1d   :  { %1308 = vmatpush.msra.mxu2 %v1190_v11  ;;  %2219 = vmatpush.msra.mxu3 %v1190_v11 }
  0x1f   :  { %2056 = vmatmul.msk.f32.gmra.mxu0 %vm124_vm0, %v94_v13  ;;  %2081 = vmatmul.msk.f32.gmra.mxu3 %vm124_vm0, %v119_v39  ;;  %v42_v13 = vld [vmem:[%s3552_s0 + $0x80] sm:$0xff] }
  0x20   :  { %1309 = vmatpush.msra.mxu2 %v1189_v12  ;;  %2220 = vmatpush.msra.mxu3 %v1189_v12 }
  0x22   :  { %1310 = vmatpush.msra.mxu2 %v1188_v15  ;;  %2221 = vmatpush.msra.mxu3 %v1188_v15 }
  0x24   :  { %2089 = vmatmul.msk.f32.gmra.mxu1 %vm124_vm0, %v30_v14  ;;  %v74_v14 = vld [vmem:[%s3553_s1 + $0x80] sm:$0xff] }
  0x25   :  { %v107_v18 = vsub.f32 %v74_v14, %v42_v13  ;;  %v79_v14 = vld [vmem:[%s3553_s1 + $0xa8] sm:$0xff] }
  0x27   :  { %2057 = vmatmul.msk.f32.gmra.mxu0 %vm124_vm0, %v95_v16  ;;  %2082 = vmatmul.msk.f32.gmra.mxu3 %vm124_vm0, %v120_v45 }
  0x2c   :  { %2090 = vmatmul.msk.f32.gmra.mxu1 %vm124_vm0, %v31_v19  ;;  %v1187_v19 = vld [vmem:[%s3555_s5] sm:$0xff] }
  0x2d   :  { %1311 = vmatpush.msra.mxu2 %v1187_v19  ;;  %2222 = vmatpush.msra.mxu3 %v1187_v19 }
  0x2f   :  { %2058 = vmatmul.msk.f32.gmra.mxu0 %vm124_vm0, %v96_v22  ;;  %2083 = vmatmul.msk.f32.gmra.mxu3 %vm124_vm0, %v121_v51 }
  0x34   :  { %2091 = vmatmul.msk.f32.gmra.mxu1 %vm124_vm0, %v32_v25 }
  0x37   :  { %2059 = vmatmul.msk.f32.gmra.mxu0 %vm124_vm0, %v97_v28  ;;  %2084 = vmatmul.msk.f32.gmra.mxu3 %vm124_vm0, %v122_v57  ;;  %v46_v57 = vld [vmem:[%s3552_s0 + $0xa0] sm:$0xff] }
  0x3c   :  { %2092 = vmatmul.msk.f32.gmra.mxu1 %vm124_vm0, %v33_v31  ;;  %v44_v31 = vld [vmem:[%s3552_s0 + $0x90] sm:$0xff] }
  0x3f   :  { %2060 = vmatmul.msk.f32.gmra.mxu0 %vm124_vm0, %v98_v34  ;;  %2110 = vmatmul.msk.f32.vlgmr.msrb.gmra.mxu3 %vm124_vm0, %v2572_v17  ;;  %v2759_v17 = vld [vmem:[%s3554_s4] ss:$0 sm:$0xff] }
  0x44   :  { %2093 = vmatmul.msk.f32.gmra.mxu1 %vm124_vm0, %v34_v37  ;;  %v109_v37 = vsub.f32 %v76_v32, %v44_v31 }
  0x47   :  { %2061 = vmatmul.msk.f32.gmra.mxu0 %vm124_vm0, %v99_v40  ;;  %2111 = vmatmul.msk.f32.gmra.mxu3 %vm124_vm0, %v52_v23  ;;  %v43_v23 = vld [vmem:[%s3552_s0 + $0x88] sm:$0xff] }
  0x48   :  { %v108_v27 = vsub.f32 %v75_v24, %v43_v23 }
  0x4c   :  { %2094 = vmatmul.msk.f32.gmra.mxu1 %vm124_vm0, %v35_v43 }
  0x4f   :  { %2062 = vmatmul.msk.f32.gmra.mxu0 %vm124_vm0, %v100_v46  ;;  %2112 = vmatmul.msk.f32.gmra.mxu3 %vm124_vm0, %v53_v29 }
  0x54   :  { %2095 = vmatmul.msk.f32.gmra.mxu1 %vm124_vm0, %v36_v49 }
  0x57   :  { %2063 = vmatmul.msk.f32.gmra.mxu0 %vm124_vm0, %v101_v52  ;;  %2113 = vmatmul.msk.f32.gmra.mxu3 %vm124_vm0, %v2620_v35 }
  0x5c   :  { %2096 = vmatmul.msk.f32.gmra.mxu1 %vm124_vm0, %v37_v55 }
  0x5f   :  { %2064 = vmatmul.msk.f32.gmra.mxu0 %vm124_vm0, %v102_v58  ;;  %2114 = vmatmul.msk.f32.gmra.mxu3 %vm124_vm0, %v2638_v41  ;;  %v45_v41 = vld [vmem:[%s3552_s0 + $0x98] sm:$0xff]  ;;  %v78_v58 = vld [vmem:[%s3553_s1 + $0xa0] sm:$0xff] }
  0x60   :  { %v110_v48 = vsub.f32 %v77_v42, %v45_v41  ;;  %v111_v2 = vsub.f32 %v78_v58, %v46_v57 }
  0x64   :  { %2097 = vmatmul.msk.f32.gmra.mxu1 %vm124_vm0, %v38_v59 }
  0x67   :  { %2065 = vmatmul.msk.f32.gmra.mxu0 %vm124_vm0, %v103_v61  ;;  %2115 = vmatmul.msk.f32.gmra.mxu3 %vm124_vm0, %v2656_v47 }
  0x6c   :  { %2098 = vmatmul.msk.f32.gmra.mxu1 %vm124_vm0, %v39_v62 }
  0x6f   :  { %2066 = vmatmul.msk.f32.gmra.mxu0 %vm124_vm0, %v104_v0  ;;  %2116 = vmatmul.msk.f32.gmra.mxu3 %vm124_vm0, %v2674_v53 }
  0x74   :  { %2099 = vmatmul.msk.f32.gmra.mxu1 %vm124_vm0, %v40_v1 }
  0x77   :  { %2067 = vmatmul.msk.f32.gmra.mxu0 %vm124_vm0, %v105_v3 }
  0x7c   :  { %2100 = vmatmul.msk.f32.gmra.mxu1 %vm124_vm0, %v41_v6 }
  0x7f   :  { %2068 = vmatmul.msk.f32.gmra.mxu0 %vm124_vm0, %v106_v9 }
  0x81   :  { %v447_v16 = vpop.f32.mrf.mxu1 }
  0x84   :  { %v238_v20 = vpop.f32.mrf.mxu0  ;;  %2101 = vmatmul.msk.f32.gmra.mxu1 %vm124_vm0, %v42_v13  ;;  %v47_v13 = vld [vmem:[%s3552_s0 + $0xa8] sm:$0xff] }
  0x85   :  { %v448_v21 = vadd.f32 %v447_v16, %v238_v20 }
  0x87   :  { %v547_v22 = vadd.f32 %v2759_v17, %v448_v21  ;;  %2069 = vmatmul.msk.f32.gmra.mxu0 %vm124_vm0, %v107_v18 }
  0x89   :  { %v2117_v25 = vmul.f32 -1.442695, %v547_v22  ;;  %v450_v26 = vpop.f32.mrf.mxu1 }
  0x8b   :  { %2225 = vpow2.f32 %v2117_v25 }
  0x8c   :  { %v241_v28 = vpop.f32.mrf.mxu0  ;;  %2102 = vmatmul.msk.f32.gmra.mxu1 %vm124_vm0, %v43_v23  ;;  %v112_v23 = vsub.f32 %v79_v14, %v47_v13 }
  0x8d   :  { %v451_v29 = vadd.f32 %v450_v26, %v241_v28 }
  0x8f   :  { %v548_v30 = vadd.f32 %v2759_v17, %v451_v29  ;;  %2070 = vmatmul.msk.f32.gmra.mxu0 %vm124_vm0, %v108_v27 }
  0x91   :  { %v2226_v33 = vpop.eup %2225  ;;  %v2118_v34 = vmul.f32 -1.442695, %v548_v30  ;;  %v453_v36 = vpop.f32.mrf.mxu1 }
  0x92   :  { %v675_v35 = vadd.f32 1.0, %v2226_v33 }
  0x93   :  { %2227 = vpow2.f32 %v2118_v34  ;;  %v48_v34 = vld [vmem:[%s3552_s0 + $0xb0] sm:$0xff] }
  0x94   :  { %2229 = vrcp.f32 %v675_v35  ;;  %v244_v38 = vpop.f32.mrf.mxu0  ;;  %2103 = vmatmul.msk.f32.gmra.mxu1 %vm124_vm0, %v44_v31  ;;  %v718_v53 = vand.u32 2147483648, %v675_v35  ;;  %v716_v56 = vand.u32 2147483647, %v675_v35  ;;  %vm712_vm2 = vweird.f32 %v675_v35 }
  0x95   :  { %v454_v39 = vadd.f32 %v453_v36, %v244_v38 }
  0x96   :  { %v719_v1 = vor.u32 1.1754944e-38, %v718_v53  ;;  %vm717_vm5 = vcmp.eq.f32.partialorder %v716_v56, 8.507059e+37  ;;  %v2850_v56 = vpop.f32.mrf.mxu3 }
  0x97   :  { %v549_v40 = vadd.f32 %v2759_v17, %v454_v39  ;;  %2071 = vmatmul.msk.f32.gmra.mxu0 %vm124_vm0, %v109_v37 }
  0x99   :  { %v2228_v43 = vpop.eup %2227  ;;  %v2119_v44 = vmul.f32 -1.442695, %v549_v40  ;;  %v456_v47 = vpop.f32.mrf.mxu1 }
  0x9a   :  { %v2230_v45 = vpop.eup %2229  ;;  %v676_v46 = vadd.f32 1.0, %v2228_v43 }
  0x9b   :  { %2231 = vpow2.f32 %v2119_v44  ;;  %v708_v49 = vmul.f32 %v2230_v45, %v675_v35  ;;  %vm713_vm1 = vweird.f32 %v2230_v45  ;;  %v80_v35 = vld [vmem:[%s3553_s1 + $0xb0] sm:$0xff] }
  0x9c   :  { %2233 = vrcp.f32 %v676_v46  ;;  %v247_v50 = vpop.f32.mrf.mxu0  ;;  %2104 = vmatmul.msk.f32.gmra.mxu1 %vm124_vm0, %v45_v41  ;;  %vm714_vm3 = vmor %vm712_vm2, %vm713_vm1  ;;  %v733_v9 = vand.u32 2147483648, %v676_v46  ;;  %v731_v12 = vand.u32 2147483647, %v676_v46  ;;  %vm727_vm7 = vweird.f32 %v676_v46 }
  0x9d   :  { %v457_v51 = vadd.f32 %v456_v47, %v247_v50  ;;  %v709_v52 = vsub.f32 1.0, %v708_v49  ;;  %v113_v43 = vsub.f32 %v80_v35, %v48_v34 }
  0x9e   :  { %v734_v22 = vor.u32 1.1754944e-38, %v733_v9  ;;  %vm732_vm9 = vcmp.eq.f32.partialorder %v731_v12, 8.507059e+37  ;;  %v82_v12 = vld [vmem:[%s3553_s1 + $0xc0] sm:$0xff] }
  0x9f   :  { %v550_v54 = vadd.f32 %v2759_v17, %v457_v51  ;;  %2072 = vmatmul.msk.f32.gmra.mxu0 %vm124_vm0, %v110_v48  ;;  %v710_v55 = vmul.f32 %v2230_v45, %v709_v52 }
  0xa1   :  { %v2232_v59 = vpop.eup %2231  ;;  %v2120_v60 = vmul.f32 -1.442695, %v550_v54  ;;  %v711_v61 = vadd.f32 %v2230_v45, %v710_v55  ;;  %v459_v0 = vpop.f32.mrf.mxu1  ;;  %v49_v54 = vld [vmem:[%s3552_s0 + $0xb8] sm:$0xff] }
  0xa2   :  { %v2234_v62 = vpop.eup %2233  ;;  %v2804_v63 = vadd.f32 1.0, %v2232_v59  ;;  %v81_v55 = vld [vmem:[%s3553_s1 + $0xb8] sm:$0xff] }
  0xa3   :  { %2235 = vpow2.f32 %v2120_v60  ;;  %v715_v3 = vsel %vm714_vm3, %v2230_v45, %v711_v61  ;;  %v723_v4 = vmul.f32 %v2234_v62, %v676_v46  ;;  %vm728_vm6 = vweird.f32 %v2234_v62 }
  0xa4   :  { %2237 = vrcp.f32 %v2804_v63  ;;  %v250_v5 = vpop.f32.mrf.mxu0  ;;  %v720_v6 = vsel %vm717_vm5, %v719_v1, %v715_v3  ;;  %2105 = vmatmul.msk.f32.gmra.mxu1 %vm124_vm0, %v46_v57  ;;  %vm729_vm8 = vmor %vm727_vm7, %vm728_vm6  ;;  %v748_v30 = vand.u32 2147483648, %v2804_v63  ;;  %v746_v33 = vand.u32 2147483647, %v2804_v63 }
  0xa5   :  { %v460_v7 = vadd.f32 %v459_v0, %v250_v5  ;;  %2149 = vmatmul.msk.f32.vlgmr.msra.gmra.mxu2 %vm1199_vm4, %v720_v6  ;;  %v724_v8 = vsub.f32 1.0, %v723_v4  ;;  %vm742_vm11 = vweird.f32 %v2804_v63  ;;  %v114_v0 = vsub.f32 %v81_v55, %v49_v54 }
  0xa6   :  { %v749_v42 = vor.u32 1.1754944e-38, %v748_v30  ;;  %vm747_vm13 = vcmp.eq.f32.partialorder %v746_v33, 8.507059e+37 }
  0xa7   :  { %v551_v10 = vadd.f32 %v2759_v17, %v460_v7  ;;  %2073 = vmatmul.msk.f32.gmra.mxu0 %vm124_vm0, %v111_v2  ;;  %v725_v11 = vmul.f32 %v2234_v62, %v724_v8 }
  0xa9   :  { %v2236_v15 = vpop.eup %2235  ;;  %v2121_v16 = vmul.f32 -1.442695, %v551_v10  ;;  %v726_v18 = vadd.f32 %v2234_v62, %v725_v11  ;;  %v462_v21 = vpop.f32.mrf.mxu1  ;;  %v50_v11 = vld [vmem:[%s3552_s0 + $0xc0] sm:$0xff] }
  0xaa   :  { %v2238_v19 = vpop.eup %2237  ;;  %v2817_v20 = vadd.f32 1.0, %v2236_v15 }
  0xab   :  { %2239 = vpow2.f32 %v2121_v16  ;;  %v730_v24 = vsel %vm729_vm8, %v2234_v62, %v726_v18  ;;  %v738_v25 = vmul.f32 %v2238_v19, %v2804_v63  ;;  %vm743_vm10 = vweird.f32 %v2238_v19  ;;  %v2870_v16 = vpop.f32.mrf.mxu3 }
  0xac   :  { %2241 = vrcp.f32 %v2817_v20  ;;  %v253_v26 = vpop.f32.mrf.mxu0  ;;  %v735_v27 = vsel %vm732_vm9, %v734_v22, %v730_v24  ;;  %2106 = vmatmul.msk.f32.gmra.mxu1 %vm124_vm0, %v47_v13  ;;  %vm744_vm12 = vmor %vm742_vm11, %vm743_vm10  ;;  %v763_v50 = vand.u32 2147483648, %v2817_v20  ;;  %v761_v53 = vand.u32 2147483647, %v2817_v20 }
  0xad   :  { %v463_v28 = vadd.f32 %v462_v21, %v253_v26  ;;  %2150 = vmatmul.msk.f32.gmra.mxu2 %vm1199_vm4, %v735_v27  ;;  %v739_v29 = vsub.f32 1.0, %v738_v25  ;;  %vm757_vm15 = vweird.f32 %v2817_v20  ;;  %v115_v22 = vsub.f32 %v82_v12, %v50_v11 }
  0xae   :  { %v764_v63 = vor.u32 1.1754944e-38, %v763_v50  ;;  %vm762_vm2 = vcmp.eq.f32.partialorder %v761_v53, 8.507059e+37 }
  0xaf   :  { %v552_v31 = vadd.f32 %v2759_v17, %v463_v28  ;;  %2074 = vmatmul.msk.f32.gmra.mxu0 %vm124_vm0, %v112_v23  ;;  %v740_v32 = vmul.f32 %v2238_v19, %v739_v29 }
  0xb1   :  { %v2240_v36 = vpop.eup %2239  ;;  %v2122_v37 = vmul.f32 -1.442695, %v552_v31  ;;  %v741_v38 = vadd.f32 %v2238_v19, %v740_v32  ;;  %v465_v41 = vpop.f32.mrf.mxu1 }
  0xb2   :  { %v2242_v39 = vpop.eup %2241  ;;  %v2834_v40 = vadd.f32 1.0, %v2240_v36 }
  0xb3   :  { %2243 = vpow2.f32 %v2122_v37  ;;  %v745_v44 = vsel %vm744_vm12, %v2238_v19, %v741_v38  ;;  %v753_v45 = vmul.f32 %v2242_v39, %v2817_v20  ;;  %vm758_vm14 = vweird.f32 %v2242_v39 }
  0xb4   :  { %2245 = vrcp.f32 %v2834_v40  ;;  %v256_v46 = vpop.f32.mrf.mxu0  ;;  %v750_v47 = vsel %vm747_vm13, %v749_v42, %v745_v44  ;;  %2107 = vmatmul.msk.f32.gmra.mxu1 %vm124_vm0, %v48_v34  ;;  %vm759_vm1 = vmor %vm757_vm15, %vm758_vm14  ;;  %v778_v7 = vand.u32 2147483648, %v2834_v40  ;;  %v776_v10 = vand.u32 2147483647, %v2834_v40  ;;  %v2880_v42 = vpop.f32.mrf.mxu3 }
  0xb5   :  { %v466_v48 = vadd.f32 %v465_v41, %v256_v46  ;;  %2151 = vmatmul.msk.f32.gmra.mxu2 %vm1199_vm4, %v750_v47  ;;  %v754_v49 = vsub.f32 1.0, %v753_v45  ;;  %vm772_vm5 = vweird.f32 %v2834_v40 }
  0xb6   :  { %v779_v21 = vor.u32 1.1754944e-38, %v778_v7  ;;  %vm777_vm7 = vcmp.eq.f32.partialorder %v776_v10, 8.507059e+37 }
  0xb7   :  { %v553_v51 = vadd.f32 %v2759_v17, %v466_v48  ;;  %2075 = vmatmul.msk.f32.gmra.mxu0 %vm124_vm0, %v113_v43  ;;  %v755_v52 = vmul.f32 %v2242_v39, %v754_v49 }
  0xb9   :  { %v2244_v57 = vpop.eup %2243  ;;  %v2123_v58 = vmul.f32 -1.442695, %v553_v51  ;;  %v756_v59 = vadd.f32 %v2242_v39, %v755_v52  ;;  %v468_v62 = vpop.f32.mrf.mxu1 }
  0xba   :  { %v2246_v60 = vpop.eup %2245  ;;  %v2853_v61 = vadd.f32 1.0, %v2244_v57 }
  0xbb   :  { %2247 = vpow2.f32 %v2123_v58  ;;  %v760_v1 = vsel %vm759_vm1, %v2242_v39, %v756_v59  ;;  %v768_v2 = vmul.f32 %v2246_v60, %v2834_v40  ;;  %vm773_vm3 = vweird.f32 %v2246_v60 }
  0xbc   :  { %2249 = vrcp.f32 %v2853_v61  ;;  %v259_v3 = vpop.f32.mrf.mxu0  ;;  %v765_v4 = vsel %vm762_vm2, %v764_v63, %v760_v1  ;;  %2108 = vmatmul.msk.f32.gmra.mxu1 %vm124_vm0, %v49_v54  ;;  %vm774_vm6 = vmor %vm772_vm5, %vm773_vm3  ;;  %v793_v29 = vand.u32 2147483648, %v2853_v61  ;;  %v791_v32 = vand.u32 2147483647, %v2853_v61  ;;  %v2885_v1 = vpop.f32.mrf.mxu3 }
  0xbd   :  { %v469_v5 = vadd.f32 %v468_v62, %v259_v3  ;;  %2152 = vmatmul.msk.f32.gmra.mxu2 %vm1199_vm4, %v765_v4  ;;  %v769_v6 = vsub.f32 1.0, %v768_v2  ;;  %vm787_vm9 = vweird.f32 %v2853_v61 }
  0xbe   :  { %v794_v39 = vor.u32 1.1754944e-38, %v793_v29  ;;  %vm792_vm11 = vcmp.eq.f32.partialorder %v791_v32, 8.507059e+37 }
  0xbf   :  { %v554_v8 = vadd.f32 %v2759_v17, %v469_v5  ;;  %2076 = vmatmul.msk.f32.gmra.mxu0 %vm124_vm0, %v114_v0  ;;  %v770_v9 = vmul.f32 %v2246_v60, %v769_v6 }
  0xc1   :  { %v2248_v13 = vpop.eup %2247  ;;  %v2124_v14 = vmul.f32 -1.442695, %v554_v8  ;;  %v771_v15 = vadd.f32 %v2246_v60, %v770_v9  ;;  %v471_v20 = vpop.f32.mrf.mxu1 }
  0xc2   :  { %v2250_v18 = vpop.eup %2249  ;;  %v681_v19 = vadd.f32 1.0, %v2248_v13 }
  0xc3   :  { %2251 = vpow2.f32 %v2124_v14  ;;  %v775_v23 = vsel %vm774_vm6, %v2246_v60, %v771_v15  ;;  %v783_v24 = vmul.f32 %v2250_v18, %v2853_v61  ;;  %vm788_vm8 = vweird.f32 %v2250_v18 }
  0xc4   :  { %2253 = vrcp.f32 %v681_v19  ;;  %v262_v25 = vpop.f32.mrf.mxu0  ;;  %v780_v26 = vsel %vm777_vm7, %v779_v21, %v775_v23  ;;  %2109 = vmatmul.msk.f32.gmra.mxu1 %vm124_vm0, %v50_v11  ;;  %vm789_vm10 = vmor %vm787_vm9, %vm788_vm8  ;;  %v808_v47 = vand.u32 2147483648, %v681_v19  ;;  %v806_v50 = vand.u32 2147483647, %v681_v19 }
  0xc5   :  { %v472_v27 = vadd.f32 %v471_v20, %v262_v25  ;;  %2153 = vmatmul.msk.f32.gmra.mxu2 %vm1199_vm4, %v780_v26  ;;  %v784_v28 = vsub.f32 1.0, %v783_v24  ;;  %vm802_vm12 = vweird.f32 %v681_v19  ;;  %v2890_v25 = vpop.f32.mrf.mxu3 }
  0xc6   :  { %v809_v58 = vor.u32 1.1754944e-38, %v808_v47  ;;  %vm807_vm14 = vcmp.eq.f32.partialorder %v806_v50, 8.507059e+37 }
  0xc7   :  { %v555_v30 = vadd.f32 %v2759_v17, %v472_v27  ;;  %2077 = vmatmul.msk.f32.gmra.mxu0 %vm124_vm0, %v115_v22  ;;  %v785_v31 = vmul.f32 %v2250_v18, %v784_v28 }
  0xc9   :  { %v2252_v33 = vpop.eup %2251  ;;  %v2125_v34 = vmul.f32 -1.442695, %v555_v30  ;;  %v786_v35 = vadd.f32 %v2250_v18, %v785_v31  ;;  %v474_v38 = vpop.f32.mrf.mxu1 }
  0xca   :  { %v2254_v36 = vpop.eup %2253  ;;  %v682_v37 = vadd.f32 1.0, %v2252_v33 }
  0xcb   :  { %2255 = vpow2.f32 %v2125_v34  ;;  %v790_v40 = vsel %vm789_vm10, %v2250_v18, %v786_v35  ;;  %v798_v41 = vmul.f32 %v2254_v36, %v681_v19  ;;  %vm803_vm0 = vweird.f32 %v2254_v36 }
  0xcc   :  { %2257 = vrcp.f32 %v682_v37  ;;  %v265_v43 = vpop.f32.mrf.mxu0  ;;  %v795_v44 = vsel %vm792_vm11, %v794_v39, %v790_v40  ;;  %vm804_vm13 = vmor %vm802_vm12, %vm803_vm0  ;;  %v823_v2 = vand.u32 2147483648, %v682_v37  ;;  %v821_v5 = vand.u32 2147483647, %v682_v37 }
  0xcd   :  { %v475_v45 = vadd.f32 %v474_v38, %v265_v43  ;;  %2154 = vmatmul.msk.f32.gmra.mxu2 %vm1199_vm4, %v795_v44  ;;  %v799_v46 = vsub.f32 1.0, %v798_v41  ;;  %vm817_vm1 = vweird.f32 %v682_v37  ;;  %v2894_v47 = vpop.f32.mrf.mxu3 }
  0xce   :  { %v824_v12 = vor.u32 1.1754944e-38, %v823_v2  ;;  %vm822_vm3 = vcmp.eq.f32.partialorder %v821_v5, 8.507059e+37 }
  0xcf   :  { %v556_v48 = vadd.f32 %v2759_v17, %v475_v45  ;;  %v800_v49 = vmul.f32 %v2254_v36, %v799_v46 }
  0xd1   :  { %v2256_v51 = vpop.eup %2255  ;;  %v2126_v52 = vmul.f32 -1.442695, %v556_v48  ;;  %v801_v53 = vadd.f32 %v2254_v36, %v800_v49  ;;  %v477_v57 = vpop.f32.mrf.mxu1 }
  0xd2   :  { %v2258_v54 = vpop.eup %2257  ;;  %v683_v55 = vadd.f32 1.0, %v2256_v51 }
  0xd3   :  { %2259 = vpow2.f32 %v2126_v52  ;;  %v805_v59 = vsel %vm804_vm13, %v2254_v36, %v801_v53  ;;  %v813_v60 = vmul.f32 %v2258_v54, %v682_v37  ;;  %vm818_vm15 = vweird.f32 %v2258_v54 }
  0xd4   :  { %2261 = vrcp.f32 %v683_v55  ;;  %v268_v61 = vpop.f32.mrf.mxu0  ;;  %v810_v62 = vsel %vm807_vm14, %v809_v58, %v805_v59  ;;  %vm819_vm2 = vmor %vm817_vm1, %vm818_vm15  ;;  %v838_v21 = vand.u32 2147483648, %v683_v55  ;;  %v836_v24 = vand.u32 2147483647, %v683_v55 }
  0xd5   :  { %v478_v63 = vadd.f32 %v477_v57, %v268_v61  ;;  %2155 = vmatmul.msk.f32.gmra.mxu2 %vm1199_vm4, %v810_v62  ;;  %v814_v0 = vsub.f32 1.0, %v813_v60  ;;  %vm832_vm6 = vweird.f32 %v683_v55 }
  0xd6   :  { %v839_v32 = vor.u32 1.1754944e-38, %v838_v21  ;;  %vm837_vm8 = vcmp.eq.f32.partialorder %v836_v24, 8.507059e+37 }
  0xd7   :  { %v557_v3 = vadd.f32 %v2759_v17, %v478_v63  ;;  %v815_v4 = vmul.f32 %v2258_v54, %v814_v0 }
  0xd9   :  { %v2260_v6 = vpop.eup %2259  ;;  %v2127_v7 = vmul.f32 -1.442695, %v557_v3  ;;  %v816_v8 = vadd.f32 %v2258_v54, %v815_v4  ;;  %v480_v11 = vpop.f32.mrf.mxu1 }
  0xda   :  { %v2262_v9 = vpop.eup %2261  ;;  %v684_v10 = vadd.f32 1.0, %v2260_v6 }
  0xdb   :  { %2263 = vpow2.f32 %v2127_v7  ;;  %v820_v13 = vsel %vm819_vm2, %v2258_v54, %v816_v8  ;;  %v828_v14 = vmul.f32 %v2262_v9, %v683_v55  ;;  %vm833_vm5 = vweird.f32 %v2262_v9 }
  0xdc   :  { %2265 = vrcp.f32 %v684_v10  ;;  %v271_v15 = vpop.f32.mrf.mxu0  ;;  %v825_v18 = vsel %vm822_vm3, %v824_v12, %v820_v13  ;;  %vm834_vm7 = vmor %vm832_vm6, %vm833_vm5  ;;  %v853_v39 = vand.u32 2147483648, %v684_v10  ;;  %v851_v43 = vand.u32 2147483647, %v684_v10 }
  0xdd   :  { %v481_v19 = vadd.f32 %v480_v11, %v271_v15  ;;  %2156 = vmatmul.msk.f32.gmra.mxu2 %vm1199_vm4, %v825_v18  ;;  %v829_v20 = vsub.f32 1.0, %v828_v14  ;;  %vm847_vm10 = vweird.f32 %v684_v10 }
  0xde   :  { %v854_v51 = vor.u32 1.1754944e-38, %v853_v39  ;;  %vm852_vm0 = vcmp.eq.f32.partialorder %v851_v43, 8.507059e+37 }
  0xdf   :  { %v558_v22 = vadd.f32 %v2759_v17, %v481_v19  ;;  %v830_v23 = vmul.f32 %v2262_v9, %v829_v20 }
  0xe1   :  { %v2264_v26 = vpop.eup %2263  ;;  %v2128_v27 = vmul.f32 -1.442695, %v558_v22  ;;  %v831_v28 = vadd.f32 %v2262_v9, %v830_v23  ;;  %v483_v31 = vpop.f32.mrf.mxu1 }
  0xe2   :  { %v2266_v29 = vpop.eup %2265  ;;  %v685_v30 = vadd.f32 1.0, %v2264_v26 }
  0xe3   :  { %2267 = vpow2.f32 %v2128_v27  ;;  %v835_v33 = vsel %vm834_vm7, %v2262_v9, %v831_v28  ;;  %v843_v34 = vmul.f32 %v2266_v29, %v684_v10  ;;  %vm848_vm9 = vweird.f32 %v2266_v29  ;;  %v2898_v9 = vpop.f32.mrf.mxu3 }
  0xe4   :  { %2269 = vrcp.f32 %v685_v30  ;;  %v274_v35 = vpop.f32.mrf.mxu0  ;;  %v840_v36 = vsel %vm837_vm8, %v839_v32, %v835_v33  ;;  %vm849_vm11 = vmor %vm847_vm10, %vm848_vm9  ;;  %v868_v59 = vand.u32 2147483648, %v685_v30  ;;  %v866_v62 = vand.u32 2147483647, %v685_v30 }
  0xe5   :  { %v484_v37 = vadd.f32 %v483_v31, %v274_v35  ;;  %2157 = vmatmul.msk.f32.gmra.mxu2 %vm1199_vm4, %v840_v36  ;;  %v844_v38 = vsub.f32 1.0, %v843_v34  ;;  %vm862_vm13 = vweird.f32 %v685_v30 }
  0xe6   :  { %v869_v6 = vor.u32 1.1754944e-38, %v868_v59  ;;  %vm867_vm15 = vcmp.eq.f32.partialorder %v866_v62, 8.507059e+37 }
  0xe7   :  { %v559_v40 = vadd.f32 %v2759_v17, %v484_v37  ;;  %v845_v41 = vmul.f32 %v2266_v29, %v844_v38 }
  0xe9   :  { %v2268_v44 = vpop.eup %2267  ;;  %v2129_v45 = vmul.f32 -1.442695, %v559_v40  ;;  %v846_v46 = vadd.f32 %v2266_v29, %v845_v41  ;;  %v486_v50 = vpop.f32.mrf.mxu1 }
  0xea   :  { %v2270_v48 = vpop.eup %2269  ;;  %v686_v49 = vadd.f32 1.0, %v2268_v44 }
  0xeb   :  { %2271 = vpow2.f32 %v2129_v45  ;;  %v850_v52 = vsel %vm849_vm11, %v2266_v29, %v846_v46  ;;  %v858_v53 = vmul.f32 %v2270_v48, %v685_v30  ;;  %vm863_vm12 = vweird.f32 %v2270_v48  ;;  %v522_v34 = vpop.f32.mrf.mxu3 }
  0xec   :  { %2273 = vrcp.f32 %v686_v49  ;;  %v277_v54 = vpop.f32.mrf.mxu0  ;;  %v855_v55 = vsel %vm852_vm0, %v854_v51, %v850_v52  ;;  %vm864_vm14 = vmor %vm862_vm13, %vm863_vm12  ;;  %v883_v14 = vand.u32 2147483648, %v686_v49  ;;  %v881_v19 = vand.u32 2147483647, %v686_v49 }
  0xed   :  { %v487_v57 = vadd.f32 %v486_v50, %v277_v54  ;;  %2158 = vmatmul.msk.f32.gmra.mxu2 %vm1199_vm4, %v855_v55  ;;  %v859_v58 = vsub.f32 1.0, %v858_v53  ;;  %vm877_vm2 = vweird.f32 %v686_v49 }
  0xee   :  { %v884_v27 = vor.u32 1.1754944e-38, %v883_v14  ;;  %vm882_vm5 = vcmp.eq.f32.partialorder %v881_v19, 8.507059e+37 }
  0xef   :  { %v560_v60 = vadd.f32 %v2759_v17, %v487_v57  ;;  %v860_v61 = vmul.f32 %v2270_v48, %v859_v58 }
  0xf1   :  { %v2272_v63 = vpop.eup %2271  ;;  %v2130_v0 = vmul.f32 -1.442695, %v560_v60  ;;  %v861_v2 = vadd.f32 %v2270_v48, %v860_v61  ;;  %v489_v5 = vpop.f32.mrf.mxu1 }
  0xf2   :  { %v2274_v3 = vpop.eup %2273  ;;  %v687_v4 = vadd.f32 1.0, %v2272_v63 }
  0xf3   :  { %2275 = vpow2.f32 %v2130_v0  ;;  %v865_v7 = vsel %vm864_vm14, %v2270_v48, %v861_v2  ;;  %v873_v8 = vmul.f32 %v2274_v3, %v686_v49  ;;  %vm878_vm1 = vweird.f32 %v2274_v3  ;;  %v525_v59 = vpop.f32.mrf.mxu3 }
  0xf4   :  { %2277 = vrcp.f32 %v687_v4  ;;  %v280_v10 = vpop.f32.mrf.mxu0  ;;  %v870_v11 = vsel %vm867_vm15, %v869_v6, %v865_v7  ;;  %vm879_vm3 = vmor %vm877_vm2, %vm878_vm1  ;;  %v898_v35 = vand.u32 2147483648, %v687_v4  ;;  %v896_v38 = vand.u32 2147483647, %v687_v4 }
  0xf5   :  { %v490_v12 = vadd.f32 %v489_v5, %v280_v10  ;;  %2159 = vmatmul.msk.f32.gmra.mxu2 %vm1199_vm4, %v870_v11  ;;  %v874_v13 = vsub.f32 1.0, %v873_v8  ;;  %vm892_vm7 = vweird.f32 %v687_v4  ;;  %v523_v2 = vadd.f32 %v522_v34, %v2850_v56 }
  0xf6   :  { %v899_v46 = vor.u32 1.1754944e-38, %v898_v35  ;;  %vm897_vm9 = vcmp.eq.f32.partialorder %v896_v38, 8.507059e+37 }
  0xf7   :  { %v561_v15 = vadd.f32 %v2759_v17, %v490_v12  ;;  %v875_v18 = vmul.f32 %v2274_v3, %v874_v13  ;;  %v572_v12 = vadd.f32 %v2759_v17, %v523_v2 }
  0xf9   :  { %v2276_v20 = vpop.eup %2275  ;;  %v2131_v21 = vmul.f32 -1.442695, %v561_v15  ;;  %v876_v22 = vadd.f32 %v2274_v3, %v875_v18  ;;  %v492_v26 = vpop.f32.mrf.mxu1 }
  0xfa   :  { %v2278_v23 = vpop.eup %2277  ;;  %v688_v24 = vadd.f32 1.0, %v2276_v20 }
  0xfb   :  { %2279 = vpow2.f32 %v2131_v21  ;;  %v880_v28 = vsel %vm879_vm3, %v2274_v3, %v876_v22  ;;  %v888_v29 = vmul.f32 %v2278_v23, %v687_v4  ;;  %vm893_vm6 = vweird.f32 %v2278_v23  ;;  %v528_v21 = vpop.f32.mrf.mxu3 }
  0xfc   :  { %2281 = vrcp.f32 %v688_v24  ;;  %v283_v30 = vpop.f32.mrf.mxu0  ;;  %v885_v31 = vsel %vm882_vm5, %v884_v27, %v880_v28  ;;  %vm894_vm8 = vmor %vm892_vm7, %vm893_vm6  ;;  %v913_v54 = vand.u32 2147483648, %v688_v24  ;;  %v911_v58 = vand.u32 2147483647, %v688_v24 }
  0xfd   :  { %v493_v32 = vadd.f32 %v492_v26, %v283_v30  ;;  %2160 = vmatmul.msk.f32.gmra.mxu2 %vm1199_vm4, %v885_v31  ;;  %v889_v33 = vsub.f32 1.0, %v888_v29  ;;  %vm907_vm11 = vweird.f32 %v688_v24 }
  0xfe   :  { %v914_v4 = vor.u32 1.1754944e-38, %v913_v54  ;;  %vm912_vm12 = vcmp.eq.f32.partialorder %v911_v58, 8.507059e+37 }
  0xff   :  { %v562_v36 = vadd.f32 %v2759_v17, %v493_v32  ;;  %v890_v37 = vmul.f32 %v2278_v23, %v889_v33  ;;  %v526_v32 = vadd.f32 %v525_v59, %v2870_v16 }
 0x101   :  { %v2280_v39 = vpop.eup %2279  ;;  %v2132_v40 = vmul.f32 -1.442695, %v562_v36  ;;  %v891_v41 = vadd.f32 %v2278_v23, %v890_v37  ;;  %v495_v45 = vpop.f32.mrf.mxu1 }
 0x102   :  { %v2282_v43 = vpop.eup %2281  ;;  %v689_v44 = vadd.f32 1.0, %v2280_v39 }
 0x103   :  { %2283 = vpow2.f32 %v2132_v40  ;;  %v895_v48 = vsel %vm894_vm8, %v2278_v23, %v891_v41  ;;  %v903_v49 = vmul.f32 %v2282_v43, %v688_v24  ;;  %vm908_vm10 = vweird.f32 %v2282_v43 }
 0x104   :  { %2285 = vrcp.f32 %v689_v44  ;;  %v286_v50 = vpop.f32.mrf.mxu0  ;;  %v900_v51 = vsel %vm897_vm9, %v899_v46, %v895_v48  ;;  %vm909_vm0 = vmor %vm907_vm11, %vm908_vm10  ;;  %v928_v13 = vand.u32 2147483648, %v689_v44  ;;  %v926_v15 = vand.u32 2147483647, %v689_v44 }
 0x105   :  { %v496_v52 = vadd.f32 %v495_v45, %v286_v50  ;;  %2161 = vmatmul.msk.f32.gmra.mxu2 %vm1199_vm4, %v900_v51  ;;  %v904_v53 = vsub.f32 1.0, %v903_v49  ;;  %vm922_vm14 = vweird.f32 %v689_v44  ;;  %v2142_v24 = vmul.f32 -1.442695, %v572_v12  ;;  %v531_v50 = vpop.f32.mrf.mxu3 }
 0x106   :  { %v929_v27 = vor.u32 1.1754944e-38, %v928_v13  ;;  %vm927_vm1 = vcmp.eq.f32.partialorder %v926_v15, 8.507059e+37  ;;  %v573_v40 = vadd.f32 %v2759_v17, %v526_v32  ;;  %v529_v45 = vadd.f32 %v528_v21, %v2880_v42 }
 0x107   :  { %v563_v55 = vadd.f32 %v2759_v17, %v496_v52  ;;  %v905_v57 = vmul.f32 %v2282_v43, %v904_v53  ;;  %v532_v59 = vadd.f32 %v531_v50, %v2885_v1 }
 0x108   :  { %v574_v42 = vadd.f32 %v2759_v17, %v529_v45 }
 0x109   :  { %v2284_v60 = vpop.eup %2283  ;;  %v2133_v61 = vmul.f32 -1.442695, %v563_v55  ;;  %v906_v62 = vadd.f32 %v2282_v43, %v905_v57  ;;  %v498_v3 = vpop.f32.mrf.mxu1  ;;  %v2143_v55 = vmul.f32 -1.442695, %v573_v40 }
 0x10a   :  { %v2286_v63 = vpop.eup %2285  ;;  %v2906_v0 = vadd.f32 1.0, %v2284_v60  ;;  %v2144_v1 = vmul.f32 -1.442695, %v574_v42 }
 0x10b   :  { %2287 = vpow2.f32 %v2133_v61  ;;  %v910_v5 = vsel %vm909_vm0, %v2282_v43, %v906_v62  ;;  %v918_v6 = vmul.f32 %v2286_v63, %v689_v44  ;;  %vm923_vm13 = vweird.f32 %v2286_v63 }
 0x10c   :  { %2289 = vrcp.f32 %v2906_v0  ;;  %v289_v7 = vpop.f32.mrf.mxu0  ;;  %v915_v8 = vsel %vm912_vm12, %v914_v4, %v910_v5  ;;  %vm924_vm15 = vmor %vm922_vm14, %vm923_vm13  ;;  %v943_v35 = vand.u32 2147483648, %v2906_v0  ;;  %v941_v38 = vand.u32 2147483647, %v2906_v0 }
 0x10d   :  { %v499_v10 = vadd.f32 %v498_v3, %v289_v7  ;;  %2162 = vmatmul.msk.f32.gmra.mxu2 %vm1199_vm4, %v915_v8  ;;  %v919_v11 = vsub.f32 1.0, %v918_v6  ;;  %vm937_vm3 = vweird.f32 %v2906_v0  ;;  %v575_v7 = vadd.f32 %v2759_v17, %v532_v59 }
 0x10e   :  { %v944_v48 = vor.u32 1.1754944e-38, %v943_v35  ;;  %vm942_vm6 = vcmp.eq.f32.partialorder %v941_v38, 8.507059e+37 }
 0x10f   :  { %v564_v56 = vadd.f32 %v2759_v17, %v499_v10  ;;  %v920_v14 = vmul.f32 %v2286_v63, %v919_v11 }
 0x111   :  { %v2288_v18 = vpop.eup %2287  ;;  %v2134_v19 = vmul.f32 -1.442695, %v564_v56  ;;  %v921_v20 = vadd.f32 %v2286_v63, %v920_v14  ;;  %v501_v26 = vpop.f32.mrf.mxu1 }
 0x112   :  { %v2290_v22 = vpop.eup %2289  ;;  %v2913_v23 = vadd.f32 1.0, %v2288_v18  ;;  %v2145_v18 = vmul.f32 -1.442695, %v575_v7 }
 0x113   :  { %2291 = vpow2.f32 %v2134_v19  ;;  %v925_v28 = vsel %vm924_vm15, %v2286_v63, %v921_v20  ;;  %v933_v29 = vmul.f32 %v2290_v22, %v2906_v0  ;;  %vm938_vm2 = vweird.f32 %v2290_v22 }
 0x114   :  { %2293 = vrcp.f32 %v2913_v23  ;;  %v292_v30 = vpop.f32.mrf.mxu0  ;;  %v930_v31 = vsel %vm927_vm1, %v929_v27, %v925_v28  ;;  %vm939_vm5 = vmor %vm937_vm3, %vm938_vm2  ;;  %v958_v60 = vand.u32 2147483648, %v2913_v23  ;;  %v956_v63 = vand.u32 2147483647, %v2913_v23 }
 0x115   :  { %v502_v33 = vadd.f32 %v501_v26, %v292_v30  ;;  %2163 = vmatmul.msk.f32.gmra.mxu2 %vm1199_vm4, %v930_v31  ;;  %v934_v34 = vsub.f32 1.0, %v933_v29  ;;  %2295 = vpow2.f32 %v2142_v24  ;;  %vm952_vm8 = vweird.f32 %v2913_v23  ;;  %v534_v29 = vpop.f32.mrf.mxu3 }
 0x116   :  { %v959_v10 = vor.u32 1.1754944e-38, %v958_v60  ;;  %vm957_vm10 = vcmp.eq.f32.partialorder %v956_v63, 8.507059e+37 }
 0x117   :  { %v565_v36 = vadd.f32 %v2759_v17, %v502_v33  ;;  %v935_v37 = vmul.f32 %v2290_v22, %v934_v34 }
 0x119   :  { %v2292_v39 = vpop.eup %2291  ;;  %v2135_v41 = vmul.f32 -1.442695, %v565_v36  ;;  %v936_v43 = vadd.f32 %v2290_v22, %v935_v37  ;;  %v504_v46 = vpop.f32.mrf.mxu1 }
 0x11a   :  { %v2294_v16 = vpop.eup %2293  ;;  %v2924_v44 = vadd.f32 1.0, %v2292_v39 }
 0x11b   :  { %2297 = vpow2.f32 %v2135_v41  ;;  %v940_v49 = vsel %vm939_vm5, %v2290_v22, %v936_v43  ;;  %v948_v51 = vmul.f32 %v2294_v16, %v2913_v23  ;;  %v2296_v52 = vpop.eup %2295  ;;  %vm953_vm7 = vweird.f32 %v2294_v16  ;;  %v2955_v22 = vld [vmem:[%s3554_s4] ss:$0 sm:$0xff] }
 0x11c   :  { %2299 = vrcp.f32 %v2924_v44  ;;  %v295_v53 = vpop.f32.mrf.mxu0  ;;  %v945_v54 = vsel %vm942_vm6, %v944_v48, %v940_v49  ;;  %v2935_v0 = vadd.f32 1.0, %v2296_v52  ;;  %vm954_vm9 = vmor %vm952_vm8, %vm953_vm7  ;;  %v971_v19 = vand.u32 2147483647, %v2924_v44 }
 0x11d   :  { %v505_v57 = vadd.f32 %v504_v46, %v295_v53  ;;  %2164 = vmatmul.msk.f32.gmra.mxu2 %vm1199_vm4, %v945_v54  ;;  %v949_v58 = vsub.f32 1.0, %v948_v51  ;;  %2301 = vpow2.f32 %v2143_v55  ;;  %v973_v20 = vand.u32 2147483648, %v2924_v44 }
 0x11e   :  { %vm967_vm0 = vweird.f32 %v2924_v44  ;;  %vm972_vm13 = vcmp.eq.f32.partialorder %v971_v19, 8.507059e+37  ;;  %v535_v41 = vadd.f32 %v534_v29, %v2890_v25 }
 0x11f   :  { %v566_v61 = vadd.f32 %v2759_v17, %v505_v57  ;;  %v950_v62 = vmul.f32 %v2294_v16, %v949_v58  ;;  %v2948_v17 = vld [vmem:[%s3556_s6] ss:$0 sm:$0xff]  ;;  %v974_v35 = vor.u32 1.1754944e-38, %v973_v20 }
 0x120   :  { %v576_v54 = vadd.f32 %v2955_v22, %v535_v41 }
 0x121   :  { %v2298_v2 = vpop.eup %2297  ;;  %v2136_v3 = vmul.f32 -1.442695, %v566_v61  ;;  %v951_v4 = vadd.f32 %v2294_v16, %v950_v62  ;;  %v507_v8 = vpop.f32.mrf.mxu1 }
 0x122   :  { %v2300_v5 = vpop.eup %2299  ;;  %v2938_v6 = vadd.f32 1.0, %v2298_v2  ;;  %v2146_v7 = vmul.f32 -1.442695, %v576_v54 }
 0x123   :  { %2303 = vpow2.f32 %v2136_v3  ;;  %v955_v11 = vsel %vm954_vm9, %v2294_v16, %v951_v4  ;;  %v963_v12 = vmul.f32 %v2300_v5, %v2924_v44  ;;  %v2302_v21 = vpop.eup %2301  ;;  %vm968_vm11 = vweird.f32 %v2300_v5 }
 0x124   :  { %2305 = vrcp.f32 %v2938_v6  ;;  %v298_v13 = vpop.f32.mrf.mxu0  ;;  %v960_v56 = vsel %vm957_vm10, %v959_v10, %v955_v11  ;;  %vm969_vm12 = vmor %vm967_vm0, %vm968_vm11  ;;  %v2965_v40 = vadd.f32 1.0, %v2302_v21  ;;  %v986_v48 = vand.u32 2147483647, %v2938_v6  ;;  %v537_v11 = vpop.f32.mrf.mxu3 }
 0x125   :  { %2307 = vrcp.f32 %v2935_v0  ;;  %v508_v14 = vadd.f32 %v507_v8, %v298_v13  ;;  %2165 = vmatmul.msk.f32.gmra.mxu2 %vm1199_vm4, %v960_v56  ;;  %v964_v15 = vsub.f32 1.0, %v963_v12  ;;  %v988_v49 = vand.u32 2147483648, %v2938_v6 }
 0x126   :  { %2309 = vpow2.f32 %v2144_v1  ;;  %vm982_vm15 = vweird.f32 %v2938_v6  ;;  %vm987_vm2 = vcmp.eq.f32.partialorder %v986_v48, 8.507059e+37  ;;  %v538_v21 = vadd.f32 %v537_v11, %v2894_v47 }
 0x127   :  { %v567_v23 = vadd.f32 %v2955_v22, %v508_v14  ;;  %v965_v24 = vmul.f32 %v2300_v5, %v964_v15  ;;  %2311 = vpow2.f32 %v2145_v18  ;;  %v989_v63 = vor.u32 1.1754944e-38, %v988_v49 }
 0x128   :  { %v1313_v26 = vpop.f32.mrf.mxu2 }
 0x129   :  { %v2304_v27 = vpop.eup %2303  ;;  %v2137_v28 = vmul.f32 -1.442695, %v567_v23  ;;  %v1314_v30 = vadd.f32 %v2948_v17, %v1313_v26  ;;  %v966_v31 = vadd.f32 %v2300_v5, %v965_v24  ;;  %v510_v34 = vpop.f32.mrf.mxu1 }
 0x12a   :  { %v2306_v32 = vpop.eup %2305  ;;  %v2960_v33 = vadd.f32 1.0, %v2304_v27 }
 0x12b   :  { %v2962_v36 = vpop.eup %2307  ;;  %2313 = vpow2.f32 %v2137_v28  ;;  %v2181_v37 = vmul.f32 -1.442695, %v1314_v30  ;;  %v970_v38 = vsel %vm969_vm12, %v2300_v5, %v966_v31  ;;  %v978_v39 = vmul.f32 %v2306_v32, %v2938_v6 }
 0x12c   :  { %2315 = vrcp.f32 %v2960_v33  ;;  %v301_v43 = vpop.f32.mrf.mxu0  ;;  %v975_v16 = vsel %vm972_vm13, %v974_v35, %v970_v38  ;;  %v2310_v44 = vpop.eup %2309  ;;  %v1083_v50 = vmul.f32 %v2962_v36, %v2935_v0  ;;  %vm983_vm14 = vweird.f32 %v2306_v32 }
 0x12d   :  { %2317 = vpow2.f32 %v2181_v37  ;;  %v511_v45 = vadd.f32 %v510_v34, %v301_v43  ;;  %2166 = vmatmul.msk.f32.gmra.mxu2 %vm1199_vm4, %v975_v16  ;;  %v979_v46 = vsub.f32 1.0, %v978_v39  ;;  %v2312_v25 = vpop.eup %2311  ;;  %v2976_v53 = vadd.f32 1.0, %v2310_v44  ;;  %vm984_vm1 = vmor %vm982_vm15, %vm983_vm14 }
 0x12e   :  { %2319 = vrcp.f32 %v2965_v40  ;;  %v1084_v2 = vsub.f32 1.0, %v1083_v50  ;;  %v2990_v14 = vadd.f32 1.0, %v2312_v25  ;;  %v1001_v15 = vand.u32 2147483647, %v2960_v33 }
 0x12f   :  { %v568_v51 = vadd.f32 %v2955_v22, %v511_v45  ;;  %v980_v52 = vmul.f32 %v2306_v32, %v979_v46  ;;  %v1003_v18 = vand.u32 2147483648, %v2960_v33  ;;  %vm997_vm5 = vweird.f32 %v2960_v33 }
 0x130   :  { %v1316_v55 = vpop.f32.mrf.mxu2  ;;  %v1085_v24 = vmul.f32 %v2962_v36, %v1084_v2  ;;  %vm1002_vm7 = vcmp.eq.f32.partialorder %v1001_v15, 8.507059e+37  ;;  %v1093_v16 = vand.u32 2147483648, %v2935_v0 }
 0x131   :  { %v2314_v57 = vpop.eup %2313  ;;  %v2138_v58 = vmul.f32 -1.442695, %v568_v51  ;;  %v1317_v42 = vadd.f32 %v2948_v17, %v1316_v55  ;;  %v981_v59 = vadd.f32 %v2306_v32, %v980_v52  ;;  %v513_v62 = vpop.f32.mrf.mxu1  ;;  %v1004_v47 = vor.u32 1.1754944e-38, %v1003_v18 }
 0x132   :  { %v2316_v60 = vpop.eup %2315  ;;  %v2981_v61 = vadd.f32 1.0, %v2314_v57  ;;  %v3017_v48 = vadd.f32 %v2962_v36, %v1085_v24  ;;  %v3024_v52 = vadd.f32 %v2955_v22, %v538_v21 }
 0x133   :  { %v2318_v3 = vpop.eup %2317  ;;  %2321 = vpow2.f32 %v2138_v58  ;;  %v2182_v4 = vmul.f32 -1.442695, %v1317_v42  ;;  %v985_v5 = vsel %vm984_vm1, %v2306_v32, %v981_v59  ;;  %v993_v1 = vmul.f32 %v2316_v60, %v2960_v33 }
 0x134   :  { %2323 = vrcp.f32 %v2981_v61  ;;  %v2985_v8 = vadd.f32 1.0, %v2318_v3  ;;  %v304_v6 = vpop.f32.mrf.mxu0  ;;  %v990_v10 = vsel %vm987_vm2, %v989_v63, %v985_v5  ;;  %v2988_v56 = vpop.eup %2319  ;;  %vm998_vm3 = vweird.f32 %v2316_v60 }
 0x135   :  { %2325 = vpow2.f32 %v2182_v4  ;;  %v514_v12 = vadd.f32 %v513_v62, %v304_v6  ;;  %2167 = vmatmul.msk.f32.gmra.mxu2 %vm1199_vm4, %v990_v10  ;;  %v994_v13 = vsub.f32 1.0, %v993_v1  ;;  %vm999_vm6 = vmor %vm997_vm5, %vm998_vm3  ;;  %vm1012_vm8 = vweird.f32 %v2981_v61 }
 0x136   :  { %2327 = vrcp.f32 %v2985_v8  ;;  %v1546_v50 = vand.u32 2147483647, %v2985_v8  ;;  %v1548_v51 = vand.u32 2147483648, %v2985_v8  ;;  %vm1542_vm9 = vweird.f32 %v2985_v8 }
 0x137   :  { %2329 = vrcp.f32 %v2976_v53  ;;  %v569_v19 = vadd.f32 %v2955_v22, %v514_v12  ;;  %v995_v20 = vmul.f32 %v2316_v60, %v994_v13  ;;  %v1016_v42 = vand.u32 2147483647, %v2981_v61 }
 0x138   :  { %2331 = vpow2.f32 %v2146_v7  ;;  %v1319_v23 = vpop.f32.mrf.mxu2  ;;  %v1018_v59 = vand.u32 2147483648, %v2981_v61  ;;  %vm3038_vm11 = vcmp.eq.f32.partialorder %v1546_v50, 8.507059e+37  ;;  %v1549_v1 = vor.u32 1.1754944e-38, %v1548_v51 }
 0x139   :  { %v2322_v26 = vpop.eup %2321  ;;  %v2139_v27 = vmul.f32 -1.442695, %v569_v19  ;;  %v1320_v28 = vadd.f32 %v2948_v17, %v1319_v23  ;;  %v996_v29 = vadd.f32 %v2316_v60, %v995_v20  ;;  %2333 = vrcp.f32 %v2990_v14  ;;  %v516_v32 = vpop.f32.mrf.mxu1 }
 0x13a   :  { %v3001_v30 = vpop.eup %2323  ;;  %v3004_v31 = vadd.f32 1.0, %v2322_v26  ;;  %vm1017_vm13 = vcmp.eq.f32.partialorder %v1016_v42, 8.507059e+37  ;;  %v1019_v26 = vor.u32 1.1754944e-38, %v1018_v59 }
 0x13b   :  { %v2326_v34 = vpop.eup %2325  ;;  %2335 = vpow2.f32 %v2139_v27  ;;  %v2183_v35 = vmul.f32 -1.442695, %v1320_v28  ;;  %v1000_v37 = vsel %vm999_vm6, %v2316_v60, %v996_v29  ;;  %v1008_v38 = vmul.f32 %v3001_v30, %v2981_v61 }
 0x13c   :  { %v2328_v39 = vpop.eup %2327  ;;  %2337 = vrcp.f32 %v3004_v31  ;;  %v3009_v33 = vadd.f32 1.0, %v2326_v34  ;;  %v307_v41 = vpop.f32.mrf.mxu0  ;;  %v1005_v43 = vsel %vm1002_vm7, %v1004_v47, %v1000_v37  ;;  %vm1013_vm0 = vweird.f32 %v3001_v30 }
 0x13d   :  { %v3012_v44 = vpop.eup %2329  ;;  %v1538_v45 = vmul.f32 %v2328_v39, %v2985_v8  ;;  %2339 = vpow2.f32 %v2183_v35  ;;  %v517_v46 = vadd.f32 %v516_v32, %v307_v41  ;;  %2168 = vmatmul.msk.f32.gmra.mxu2 %vm1199_vm4, %v1005_v43  ;;  %v1009_v55 = vsub.f32 1.0, %v1008_v38  ;;  %vm1014_vm15 = vmor %vm1012_vm8, %vm1013_vm0 }
 0x13e   :  { %v3019_v49 = vpop.eup %2331  ;;  %2341 = vrcp.f32 %v3009_v33  ;;  %vm1543_vm10 = vweird.f32 %v2328_v39  ;;  %v1563_v15 = vand.u32 2147483648, %v3009_v33  ;;  %vm1557_vm14 = vweird.f32 %v3009_v33 }
 0x13f   :  { %v1539_v25 = vsub.f32 1.0, %v1538_v45  ;;  %v570_v54 = vadd.f32 %v2955_v22, %v517_v46  ;;  %v3029_v57 = vpop.eup %2333  ;;  %v1010_v3 = vmul.f32 %v3001_v30, %v1009_v55  ;;  %vm1544_vm12 = vmor %vm1542_vm9, %vm1543_vm10  ;;  %v1561_v28 = vand.u32 2147483647, %v3009_v33 }
 0x140   :  { %v1322_v58 = vpop.f32.mrf.mxu2  ;;  %v1564_v47 = vor.u32 1.1754944e-38, %v1563_v15  ;;  %vm1027_vm1 = vweird.f32 %v3004_v31  ;;  %v1031_v46 = vand.u32 2147483647, %v3004_v31  ;;  %v1033_v50 = vand.u32 2147483648, %v3004_v31 }
 0x141   :  { %v2336_v60 = vpop.eup %2335  ;;  %v1540_v62 = vmul.f32 %v2328_v39, %v1539_v25  ;;  %v2140_v63 = vmul.f32 -1.442695, %v570_v54  ;;  %v1323_v2 = vadd.f32 %v2948_v17, %v1322_v58  ;;  %v1011_v12 = vadd.f32 %v3001_v30, %v1010_v3  ;;  %v519_v20 = vpop.f32.mrf.mxu1 }
 0x142   :  { %v3036_v4 = vpop.eup %2337  ;;  %v3042_v7 = vadd.f32 1.0, %v2336_v60  ;;  %vm1562_vm6 = vcmp.eq.f32.partialorder %v1561_v28, 8.507059e+37  ;;  %vm1032_vm8 = vcmp.eq.f32.partialorder %v1031_v46, 8.507059e+37  ;;  %vm1087_vm9 = vweird.f32 %v2935_v0 }
 0x143   :  { %v2340_v6 = vpop.eup %2339  ;;  %v1541_v10 = vadd.f32 %v2328_v39, %v1540_v62  ;;  %2343 = vpow2.f32 %v2140_v63  ;;  %v2184_v11 = vmul.f32 -1.442695, %v1323_v2  ;;  %v1023_v21 = vmul.f32 %v3036_v4, %v3004_v31 }
 0x144   :  { %v2342_v13 = vpop.eup %2341  ;;  %2345 = vrcp.f32 %v3042_v7  ;;  %v3051_v18 = vadd.f32 1.0, %v2340_v6  ;;  %v310_v19 = vpop.f32.mrf.mxu0  ;;  %v1015_v32 = vsel %vm1014_vm15, %v3001_v30, %v1011_v12  ;;  %vm1028_vm3 = vweird.f32 %v3036_v4 }
 0x145   :  { %v1545_v23 = vsel %vm1544_vm12, %v2328_v39, %v1541_v10  ;;  %v1553_v24 = vmul.f32 %v2342_v13, %v3009_v33  ;;  %2347 = vpow2.f32 %v2184_v11  ;;  %v520_v29 = vadd.f32 %v519_v20, %v310_v19  ;;  %vm1029_vm7 = vmor %vm1027_vm1, %vm1028_vm3 }
 0x146   :  { %v1550_v8 = vsel %vm3038_vm11, %v1549_v1, %v1545_v23  ;;  %2349 = vrcp.f32 %v3051_v18  ;;  %v1020_v34 = vsel %vm1017_vm13, %v1019_v26, %v1015_v32  ;;  %v1024_v37 = vsub.f32 1.0, %v1023_v21 }
 0x147   :  { %2017 = vst [vmem:[%s3557_s7] sm:$0xff] %v1550_v8  ;;  %v1554_v27 = vsub.f32 1.0, %v1553_v24  ;;  %vm1558_vm2 = vweird.f32 %v2342_v13  ;;  %v571_v39 = vadd.f32 %v2955_v22, %v520_v29  ;;  %2169 = vmatmul.msk.f32.gmra.mxu2 %vm1199_vm4, %v1020_v34  ;;  %v1576_v3 = vand.u32 2147483647, %v3051_v18 }
 0x148   :  { %v1325_v35 = vpop.f32.mrf.mxu2  ;;  %v1025_v30 = vmul.f32 %v3036_v4, %v1024_v37  ;;  %vm1559_vm5 = vmor %vm1557_vm14, %vm1558_vm2  ;;  %v1034_v33 = vor.u32 1.1754944e-38, %v1033_v50  ;;  %vm1088_vm10 = vweird.f32 %v2962_v36  ;;  %v1578_v6 = vand.u32 2147483648, %v3051_v18 }
 0x149   :  { %v2344_v38 = vpop.eup %2343  ;;  %v1555_v61 = vmul.f32 %v2342_v13, %v1554_v27  ;;  %v1326_v41 = vadd.f32 %v2948_v17, %v1325_v35  ;;  %v2141_v54 = vmul.f32 -1.442695, %v571_v39  ;;  %v1046_v12 = vand.u32 2147483647, %v3042_v7 }
 0x14a   :  { %v3073_v43 = vpop.eup %2345  ;;  %v3075_v45 = vadd.f32 1.0, %v2344_v38  ;;  %v1026_v59 = vadd.f32 %v3036_v4, %v1025_v30  ;;  %vm1572_vm0 = vweird.f32 %v3051_v18  ;;  %vm3109_vm12 = vcmp.eq.f32.partialorder %v1576_v3, 8.507059e+37 }
 0x14b   :  { %v2348_v51 = vpop.eup %2347  ;;  %v1556_v25 = vadd.f32 %v2342_v13, %v1555_v61  ;;  %v2185_v55 = vmul.f32 -1.442695, %v1326_v41  ;;  %v1038_v60 = vmul.f32 %v3073_v43, %v3042_v7  ;;  %vm1043_vm13 = vweird.f32 %v3073_v43 }
 0x14c   :  { %v2350_v58 = vpop.eup %2349  ;;  %2351 = vrcp.f32 %v3075_v45  ;;  %v3085_v42 = vadd.f32 1.0, %v2348_v51  ;;  %v1030_v1 = vsel %vm1029_vm7, %v3036_v4, %v1026_v59  ;;  %v1048_v4 = vand.u32 2147483648, %v3042_v7  ;;  %vm3149_vm7 = vmor %vm1087_vm9, %vm1088_vm10 }
 0x14d   :  { %v1560_v62 = vsel %vm1559_vm5, %v2342_v13, %v1556_v25  ;;  %v1568_v63 = vmul.f32 %v2350_v58, %v3051_v18  ;;  %2353 = vpow2.f32 %v2141_v54  ;;  %v1035_v10 = vsel %vm1032_vm8, %v1034_v33, %v1030_v1 }
 0x14e   :  { %v1565_v2 = vsel %vm1562_vm6, %v1564_v47, %v1560_v62  ;;  %2355 = vrcp.f32 %v3085_v42  ;;  %v1039_v31 = vsub.f32 1.0, %v1038_v60  ;;  %vm1573_vm11 = vweird.f32 %v2350_v58 }
 0x14f   :  { %2018 = vst [vmem:[%s3557_s7 + $0x8] sm:$0xff] %v1565_v2  ;;  %v1569_v5 = vsub.f32 1.0, %v1568_v63  ;;  %2357 = vpow2.f32 %v2185_v55  ;;  %2170 = vmatmul.msk.f32.gmra.mxu2 %vm1199_vm4, %v1035_v10  ;;  %vm1042_vm14 = vweird.f32 %v3042_v7  ;;  %vm1574_vm15 = vmor %vm1572_vm0, %vm1573_vm11  ;;  %v1579_v18 = vor.u32 1.1754944e-38, %v1578_v6  ;;  %v540_v6 = vpop.f32.mrf.mxu3 }
 0x150   :  { %v1328_v11 = vpop.f32.mrf.mxu2  ;;  %v1040_v21 = vmul.f32 %v3073_v43, %v1039_v31  ;;  %vm1047_vm1 = vcmp.eq.f32.partialorder %v1046_v12, 8.507059e+37  ;;  %vm1044_vm2 = vmor %vm1042_vm14, %vm1043_vm13  ;;  %v1049_v7 = vor.u32 1.1754944e-38, %v1048_v4  ;;  %v1591_v39 = vand.u32 2147483647, %v3085_v42 }
 0x151   :  { %v1570_v13 = vmul.f32 %v2350_v58, %v1569_v5  ;;  %v1329_v15 = vadd.f32 %v2948_v17, %v1328_v11  ;;  %v1593_v46 = vand.u32 2147483648, %v3085_v42  ;;  %v1063_v51 = vand.u32 2147483648, %v3075_v45 }
 0x152   :  { %v3106_v19 = vpop.eup %2351  ;;  %v1041_v29 = vadd.f32 %v3073_v43, %v1040_v21  ;;  %v2147_v55 = vmul.f32 -1.442695, %v3024_v52  ;;  %vm1057_vm6 = vweird.f32 %v3075_v45  ;;  %v3155_v60 = vmul.f32 %v2988_v56, %v2965_v40 }
 0x153   :  { %v2354_v23 = vpop.eup %2353  ;;  %v1571_v24 = vadd.f32 %v2350_v58, %v1570_v13  ;;  %v2186_v8 = vmul.f32 -1.442695, %v1329_v15  ;;  %v1053_v26 = vmul.f32 %v3106_v19, %v3075_v45  ;;  %vm1058_vm3 = vweird.f32 %v3106_v19 }
 0x154   :  { %v2356_v27 = vpop.eup %2355  ;;  %v3119_v28 = vadd.f32 1.0, %v2354_v23  ;;  %v1045_v38 = vsel %vm1044_vm2, %v3073_v43, %v1041_v29  ;;  %vm1587_vm8 = vweird.f32 %v3085_v42  ;;  %vm3161_vm11 = vmor %vm1057_vm6, %vm1058_vm3  ;;  %vm1592_vm10 = vcmp.eq.f32.partialorder %v1591_v39, 8.507059e+37 }
 0x155   :  { %v2358_v32 = vpop.eup %2357  ;;  %v1575_v47 = vsel %vm1574_vm15, %v2350_v58, %v1571_v24  ;;  %v1583_v34 = vmul.f32 %v2356_v27, %v3085_v42  ;;  %2359 = vpow2.f32 %v2186_v8  ;;  %v1050_v41 = vsel %vm1047_vm1, %v1049_v7, %v1045_v38 }
 0x156   :  { %v1580_v35 = vsel %vm3109_vm12, %v1579_v18, %v1575_v47  ;;  %2361 = vrcp.f32 %v3119_v28  ;;  %v3128_v37 = vadd.f32 1.0, %v2358_v32  ;;  %v1054_v30 = vsub.f32 1.0, %v1053_v26 }
 0x157   :  { %2019 = vst [vmem:[%s3557_s7 + $0x10] sm:$0xff] %v1580_v35  ;;  %v1584_v61 = vsub.f32 1.0, %v1583_v34  ;;  %vm1588_vm5 = vweird.f32 %v2356_v27  ;;  %2171 = vmatmul.msk.f32.gmra.mxu2 %vm1199_vm4, %v1050_v41  ;;  %v1061_v58 = vand.u32 2147483647, %v3075_v45  ;;  %v1594_v33 = vor.u32 1.1754944e-38, %v1593_v46 }
 0x158   :  { %2363 = vrcp.f32 %v3128_v37  ;;  %v1331_v50 = vpop.f32.mrf.mxu2  ;;  %v1055_v54 = vmul.f32 %v3106_v19, %v1054_v30  ;;  %vm1589_vm9 = vmor %vm1587_vm8, %vm1588_vm5  ;;  %v1064_v1 = vor.u32 1.1754944e-38, %v1063_v51  ;;  %v1090_v4 = vsel %vm3149_vm7, %v2962_v36, %v3017_v48 }
 0x159   :  { %v1585_v25 = vmul.f32 %v2356_v27, %v1584_v61  ;;  %v1332_v43 = vadd.f32 %v2948_v17, %v1331_v50  ;;  %vm1062_vm0 = vcmp.eq.f32.partialorder %v1061_v58, 8.507059e+37  ;;  %v541_v20 = vadd.f32 %v540_v6, %v2898_v9 }
 0x15a   :  { %v1056_v2 = vadd.f32 %v3106_v19, %v1055_v54  ;;  %v3189_v24 = vor.u32 1.1754944e-38, %v1093_v16  ;;  %v1606_v26 = vand.u32 2147483647, %v3128_v37  ;;  %v1099_v18 = vsub.f32 1.0, %v3155_v60 }
 0x15b   :  { %v2360_v62 = vpop.eup %2359  ;;  %v1586_v63 = vadd.f32 %v2356_v27, %v1585_v25  ;;  %v2187_v52 = vmul.f32 -1.442695, %v1332_v43  ;;  %v1608_v29 = vand.u32 2147483648, %v3128_v37  ;;  %v1078_v32 = vand.u32 2147483648, %v3119_v28 }
 0x15c   :  { %v3165_v3 = vpop.eup %2361  ;;  %v3168_v5 = vadd.f32 1.0, %v2360_v62  ;;  %v1060_v10 = vsel %vm3161_vm11, %v3106_v19, %v1056_v2  ;;  %v1091_v19 = vand.u32 2147483647, %v2935_v0  ;;  %v1076_v0 = vand.u32 2147483647, %v3119_v28 }
 0x15d   :  { %v1590_v42 = vsel %vm1589_vm9, %v2356_v27, %v1586_v63  ;;  %2365 = vpow2.f32 %v2187_v52  ;;  %v1068_v11 = vmul.f32 %v3165_v3, %v3119_v28  ;;  %v1065_v15 = vsel %vm1062_vm0, %v1064_v1, %v1060_v10 }
 0x15e   :  { %v2364_v31 = vpop.eup %2363  ;;  %v1595_v12 = vsel %vm1592_vm10, %v1594_v33, %v1590_v42  ;;  %2367 = vrcp.f32 %v3168_v5  ;;  %2172 = vmatmul.msk.f32.vlgmr.msra.gmra.mxu3 %vm1199_vm4, %v1065_v15  ;;  %vm1073_vm13 = vweird.f32 %v3165_v3  ;;  %v578_v35 = vadd.f32 %v2955_v22, %v541_v20 }
 0x15f   :  { %2020 = vst [vmem:[%s3557_s7 + $0x18] sm:$0xff] %v1595_v12  ;;  %v1598_v13 = vmul.f32 %v2364_v31, %v3128_v37  ;;  %2369 = vpow2.f32 %v2147_v55  ;;  %v1069_v23 = vsub.f32 1.0, %v1068_v11  ;;  %vm1603_vm12 = vweird.f32 %v2364_v31 }
 0x160   :  { %v1334_v21 = vpop.f32.mrf.mxu2  ;;  %vm1602_vm14 = vweird.f32 %v3128_v37  ;;  %vm3204_vm15 = vcmp.eq.f32.partialorder %v1091_v19, 8.507059e+37  ;;  %vm1072_vm2 = vweird.f32 %v3119_v28  ;;  %vm1607_vm3 = vcmp.eq.f32.partialorder %v1606_v26, 8.507059e+37 }
 0x161   :  { %v1599_v8 = vsub.f32 1.0, %v1598_v13  ;;  %v1335_v27 = vadd.f32 %v2948_v17, %v1334_v21  ;;  %v1070_v9 = vmul.f32 %v3165_v3, %v1069_v23  ;;  %vm3209_vm1 = vmor %vm1602_vm14, %vm1603_vm12  ;;  %v1609_v37 = vor.u32 1.1754944e-38, %v1608_v29 }
 0x162   :  { %vm1074_vm5 = vmor %vm1072_vm2, %vm1073_vm13  ;;  %v1079_v50 = vor.u32 1.1754944e-38, %v1078_v32  ;;  %vm1077_vm6 = vcmp.eq.f32.partialorder %v1076_v0, 8.507059e+37  ;;  %v3222_v54 = vadd.f32 1.0, %v3019_v49  ;;  %v1623_v55 = vand.u32 2147483648, %v3168_v5 }
 0x163   :  { %v2366_v47 = vpop.eup %2365  ;;  %v1600_v34 = vmul.f32 %v2364_v31, %v1599_v8  ;;  %v2188_v7 = vmul.f32 -1.442695, %v1335_v27  ;;  %v1071_v61 = vadd.f32 %v3165_v3, %v1070_v9  ;;  %v1621_v63 = vand.u32 2147483647, %v3168_v5 }
 0x164   :  { %v2368_v16 = vpop.eup %2367  ;;  %v3201_v38 = vadd.f32 1.0, %v2366_v47  ;;  %v1100_v49 = vmul.f32 %v2988_v56, %v1099_v18  ;;  %vm1102_vm11 = vweird.f32 %v2965_v40  ;;  %vm1103_vm9 = vweird.f32 %v2988_v56 }
 0x165   :  { %v1601_v41 = vadd.f32 %v2364_v31, %v1600_v34  ;;  %v1613_v46 = vmul.f32 %v2368_v16, %v3168_v5  ;;  %2371 = vpow2.f32 %v2188_v7  ;;  %v2370_v22 = vpop.eup %2369  ;;  %v1075_v43 = vsel %vm1074_vm5, %v3165_v3, %v1071_v61  ;;  %vm3259_vm13 = vmor %vm1102_vm11, %vm1103_vm9 }
 0x166   :  { %2373 = vrcp.f32 %v3201_v38  ;;  %v1080_v58 = vsel %vm1077_vm6, %v1079_v50, %v1075_v43  ;;  %vm1618_vm8 = vweird.f32 %v2368_v16  ;;  %v1113_v2 = vmul.f32 %v3012_v44, %v2976_v53 }
 0x167   :  { %v1605_v51 = vsel %vm3209_vm1, %v2364_v31, %v1601_v41  ;;  %v1614_v25 = vsub.f32 1.0, %v1613_v46  ;;  %2173 = vmatmul.msk.f32.gmra.mxu3 %vm1199_vm4, %v1080_v58  ;;  %v2148_v3 = vmul.f32 -1.442695, %v578_v35  ;;  %vm1617_vm10 = vweird.f32 %v3168_v5 }
 0x168   :  { %v1610_v28 = vsel %vm1607_vm3, %v1609_v37, %v1605_v51  ;;  %v1337_v60 = vpop.f32.mrf.mxu2  ;;  %vm1619_vm0 = vmor %vm1617_vm10, %vm1618_vm8  ;;  %v1624_v42 = vor.u32 1.1754944e-38, %v1623_v55  ;;  %v1106_v11 = vand.u32 2147483647, %v2965_v40  ;;  %v1108_v31 = vand.u32 2147483648, %v2965_v40 }
 0x169   :  { %2021 = vst [vmem:[%s3557_s7 + $0x20] sm:$0xff] %v1610_v28  ;;  %v1615_v62 = vmul.f32 %v2368_v16, %v1614_v25  ;;  %v1338_v52 = vadd.f32 %v2948_v17, %v1337_v60  ;;  %vm1622_vm12 = vcmp.eq.f32.partialorder %v1621_v63, 8.507059e+37  ;;  %v1101_v5 = vadd.f32 %v2988_v56, %v1100_v49 }
 0x16a   :  { %v1114_v19 = vsub.f32 1.0, %v1113_v2  ;;  %v1095_v21 = vsel %vm3204_vm15, %v3189_v24, %v1090_v4  ;;  %v1128_v8 = vmul.f32 %v3029_v57, %v2990_v14  ;;  %v3266_v59 = vadd.f32 1.0, %v2370_v22 }
 0x16b   :  { %v2372_v45 = vpop.eup %2371  ;;  %v1616_v33 = vadd.f32 %v2368_v16, %v1615_v62  ;;  %v2189_v1 = vmul.f32 -1.442695, %v1338_v52  ;;  %v1638_v36 = vand.u32 2147483648, %v3201_v38  ;;  %vm3269_vm7 = vcmp.eq.f32.partialorder %v1106_v11, 8.507059e+37 }
 0x16c   :  { %v2374_v6 = vpop.eup %2373  ;;  %v3237_v10 = vadd.f32 1.0, %v2372_v45  ;;  %v1636_v40 = vand.u32 2147483647, %v3201_v38  ;;  %v1105_v27 = vsel %vm3259_vm13, %v2988_v56, %v1101_v5  ;;  %v1109_v18 = vor.u32 1.1754944e-38, %v1108_v31 }
 0x16d   :  { %v1620_v12 = vsel %vm1619_vm0, %v2368_v16, %v1616_v33  ;;  %v1628_v13 = vmul.f32 %v2374_v6, %v3201_v38  ;;  %2375 = vpow2.f32 %v2189_v1  ;;  %vm1633_vm14 = vweird.f32 %v2374_v6 }
 0x16e   :  { %v1625_v15 = vsel %vm1622_vm12, %v1624_v42, %v1620_v12  ;;  %2377 = vrcp.f32 %v3237_v10  ;;  %v1115_v29 = vmul.f32 %v3012_v44, %v1114_v19  ;;  %vm1117_vm15 = vweird.f32 %v2976_v53 }
 0x16f   :  { %2379 = vpow2.f32 %v2148_v3  ;;  %2022 = vst [vmem:[%s3557_s7 + $0x28] sm:$0xff] %v1625_v15  ;;  %v1629_v20 = vsub.f32 1.0, %v1628_v13  ;;  %2174 = vmatmul.msk.f32.gmra.mxu3 %vm1199_vm4, %v1095_v21  ;;  %vm1632_vm1 = vweird.f32 %v3201_v38  ;;  %v1129_v34 = vsub.f32 1.0, %v1128_v8 }
 0x170   :  { %2381 = vrcp.f32 %v3222_v54  ;;  %v1340_v48 = vpop.f32.mrf.mxu2  ;;  %vm1634_vm2 = vmor %vm1632_vm1, %vm1633_vm14  ;;  %v1639_v0 = vor.u32 1.1754944e-38, %v1638_v36  ;;  %vm1118_vm3 = vweird.f32 %v3012_v44  ;;  %v1121_v56 = vand.u32 2147483647, %v2976_v53 }
 0x171   :  { %v1630_v24 = vmul.f32 %v2374_v6, %v1629_v20  ;;  %v1341_v26 = vadd.f32 %v2948_v17, %v1340_v48  ;;  %vm1637_vm5 = vcmp.eq.f32.partialorder %v1636_v40, 8.507059e+37  ;;  %v1116_v30 = vadd.f32 %v3012_v44, %v1115_v29  ;;  %vm3300_vm6 = vmor %vm1117_vm15, %vm1118_vm3 }
 0x172   :  { %v1123_v46 = vand.u32 2147483648, %v2976_v53  ;;  %v1130_v50 = vmul.f32 %v3029_v57, %v1129_v34  ;;  %v1653_v25 = vand.u32 2147483648, %v3237_v10  ;;  %v1110_v43 = vsel %vm3269_vm7, %v1109_v18, %v1105_v27 }
 0x173   :  { %v2376_v9 = vpop.eup %2375  ;;  %v1631_v32 = vadd.f32 %v2374_v6, %v1630_v24  ;;  %v2190_v47 = vmul.f32 -1.442695, %v1341_v26  ;;  %vm3310_vm8 = vcmp.eq.f32.partialorder %v1121_v56, 8.507059e+37  ;;  %v1651_v53 = vand.u32 2147483647, %v3237_v10 }
 0x174   :  { %v2378_v7 = vpop.eup %2377  ;;  %v3282_v16 = vadd.f32 1.0, %v2376_v9  ;;  %v1120_v62 = vsel %vm3300_vm6, %v3012_v44, %v1116_v30  ;;  %v1124_v63 = vor.u32 1.1754944e-38, %v1123_v46  ;;  %vm1132_vm9 = vweird.f32 %v2990_v14 }
 0x175   :  { %v2380_v35 = vpop.eup %2379  ;;  %v1635_v61 = vsel %vm1634_vm2, %v2374_v6, %v1631_v32  ;;  %v1643_v39 = vmul.f32 %v2378_v7, %v3237_v10  ;;  %2383 = vpow2.f32 %v2190_v47  ;;  %vm1648_vm11 = vweird.f32 %v2378_v7 }
 0x176   :  { %v3287_v41 = vpop.eup %2381  ;;  %v1640_v38 = vsel %vm1637_vm5, %v1639_v0, %v1635_v61  ;;  %2385 = vrcp.f32 %v3282_v16  ;;  %v3305_v51 = vadd.f32 1.0, %v2380_v35  ;;  %vm1647_vm10 = vweird.f32 %v3237_v10 }
 0x177   :  { %2387 = vrcp.f32 %v3266_v59  ;;  %2023 = vst [vmem:[%s3557_s7 + $0x30] sm:$0xff] %v1640_v38  ;;  %v1644_v22 = vsub.f32 1.0, %v1643_v39  ;;  %2175 = vmatmul.msk.f32.gmra.mxu3 %vm1199_vm4, %v1110_v43  ;;  %v1143_v52 = vmul.f32 %v3287_v41, %v3222_v54  ;;  %v1131_v3 = vadd.f32 %v3029_v57, %v1130_v50  ;;  %vm1649_vm0 = vmor %vm1647_vm10, %vm1648_vm11 }
 0x178   :  { %v1343_v28 = vpop.f32.mrf.mxu2  ;;  %v1654_v1 = vor.u32 1.1754944e-38, %v1653_v25  ;;  %vm1133_vm12 = vweird.f32 %v3029_v57  ;;  %v1136_v44 = vand.u32 2147483647, %v2990_v14  ;;  %vm1652_vm13 = vcmp.eq.f32.partialorder %v1651_v53, 8.507059e+37 }
 0x179   :  { %v1645_v58 = vmul.f32 %v2378_v7, %v1644_v22  ;;  %v1344_v60 = vadd.f32 %v2948_v17, %v1343_v28  ;;  %v1138_v12 = vand.u32 2147483648, %v2990_v14  ;;  %v1144_v13 = vsub.f32 1.0, %v1143_v52  ;;  %vm3339_vm7 = vmor %vm1132_vm9, %vm1133_vm12 }
 0x17a   :  { %v1668_v19 = vand.u32 2147483648, %v3282_v16  ;;  %v1125_v20 = vsel %vm3310_vm8, %v1124_v63, %v1120_v62  ;;  %v1666_v8 = vand.u32 2147483647, %v3282_v16  ;;  %v1135_v36 = vsel %vm3339_vm7, %v3029_v57, %v1131_v3 }
 0x17b   :  { %v2384_v49 = vpop.eup %2383  ;;  %v1646_v2 = vadd.f32 %v2378_v7, %v1645_v58  ;;  %v2191_v45 = vmul.f32 -1.442695, %v1344_v60  ;;  %vm3353_vm15 = vcmp.eq.f32.partialorder %v1136_v44, 8.507059e+37  ;;  %v1139_v4 = vor.u32 1.1754944e-38, %v1138_v12  ;;  %v3418_v12 = vld [vmem:[%s3556_s6] ss:$0 sm:$0xff] }
 0x17c   :  { %v2386_v33 = vpop.eup %2385  ;;  %v3325_v6 = vadd.f32 1.0, %v2384_v49  ;;  %v1145_v24 = vmul.f32 %v3287_v41, %v1144_v13  ;;  %vm1662_vm1 = vweird.f32 %v3282_v16  ;;  %vm1147_vm2 = vweird.f32 %v3222_v54 }
 0x17d   :  { %v3329_v42 = vpop.eup %2387  ;;  %v1650_v11 = vsel %vm1649_vm0, %v2378_v7, %v1646_v2  ;;  %v1658_v31 = vmul.f32 %v2386_v33, %v3282_v16  ;;  %2389 = vpow2.f32 %v2191_v45  ;;  %vm1663_vm14 = vweird.f32 %v2386_v33 }
 0x17e   :  { %v1655_v10 = vsel %vm1652_vm13, %v1654_v1, %v1650_v11  ;;  %2391 = vrcp.f32 %v3325_v6  ;;  %vm1664_vm3 = vmor %vm1662_vm1, %vm1663_vm14  ;;  %v1669_v29 = vor.u32 1.1754944e-38, %v1668_v19  ;;  %vm1148_vm5 = vweird.f32 %v3287_v41 }
 0x17f   :  { %2024 = vst [vmem:[%s3557_s7 + $0x38] sm:$0xff] %v1655_v10  ;;  %v1659_v15 = vsub.f32 1.0, %v1658_v31  ;;  %2393 = vrcp.f32 %v3305_v51  ;;  %2176 = vmatmul.msk.f32.gmra.mxu3 %vm1199_vm4, %v1125_v20  ;;  %v1158_v57 = vmul.f32 %v3329_v42, %v3266_v59  ;;  %vm1667_vm6 = vcmp.eq.f32.partialorder %v1666_v8, 8.507059e+37  ;;  %vm3376_vm8 = vmor %vm1147_vm2, %vm1148_vm5 }
 0x180   :  { %v1346_v21 = vpop.f32.mrf.mxu2  ;;  %v1146_v0 = vadd.f32 %v3287_v41, %v1145_v24  ;;  %v1151_v16 = vand.u32 2147483647, %v3222_v54  ;;  %v1153_v61 = vand.u32 2147483648, %v3222_v54  ;;  %v1683_v39 = vand.u32 2147483648, %v3325_v6 }
 0x181   :  { %v1660_v23 = vmul.f32 %v2386_v33, %v1659_v15  ;;  %v1347_v14 = vadd.f32 %v2948_v17, %v1346_v21  ;;  %v1140_v38 = vsel %vm3353_vm15, %v1139_v4, %v1135_v36  ;;  %v1159_v46 = vsub.f32 1.0, %v1158_v57 }
 0x182   :  { %v1681_v37 = vand.u32 2147483647, %v3325_v6  ;;  %v1150_v25 = vsel %vm3376_vm8, %v3287_v41, %v1146_v0  ;;  %vm3390_vm9 = vcmp.eq.f32.partialorder %v1151_v16, 8.507059e+37  ;;  %vm1162_vm10 = vweird.f32 %v3266_v59 }
 0x183   :  { %v2390_v40 = vpop.eup %2389  ;;  %v1661_v26 = vadd.f32 %v2386_v33, %v1660_v23  ;;  %v2192_v27 = vmul.f32 -1.442695, %v1347_v14  ;;  %vm1677_vm0 = vweird.f32 %v3325_v6  ;;  %v1154_v58 = vor.u32 1.1754944e-38, %v1153_v61 }
 0x184   :  { %v2392_v18 = vpop.eup %2391  ;;  %v3360_v9 = vadd.f32 1.0, %v2390_v40  ;;  %v1684_v60 = vor.u32 1.1754944e-38, %v1683_v39  ;;  %v1160_v62 = vmul.f32 %v3329_v42, %v1159_v46  ;;  %vm1682_vm13 = vcmp.eq.f32.partialorder %v1681_v37, 8.507059e+37 }
 0x185   :  { %v1665_v32 = vsel %vm1664_vm3, %v2386_v33, %v1661_v26  ;;  %v1673_v47 = vmul.f32 %v2392_v18, %v3325_v6  ;;  %2395 = vpow2.f32 %v2192_v27  ;;  %v3366_v34 = vpop.eup %2393  ;;  %vm1678_vm11 = vweird.f32 %v2392_v18 }
 0x186   :  { %v1670_v7 = vsel %vm1667_vm6, %v1669_v29, %v1665_v32  ;;  %2397 = vrcp.f32 %v3360_v9  ;;  %vm1679_vm12 = vmor %vm1677_vm0, %vm1678_vm11  ;;  %v1173_v41 = vmul.f32 %v3366_v34, %v3305_v51  ;;  %vm1163_vm7 = vweird.f32 %v3329_v42 }
 0x187   :  { %2025 = vst [vmem:[%s3557_s7 + $0x40] sm:$0xff] %v1670_v7  ;;  %v1674_v56 = vsub.f32 1.0, %v1673_v47  ;;  %2177 = vmatmul.msk.f32.gmra.mxu3 %vm1199_vm4, %v1140_v38  ;;  %v1166_v2 = vand.u32 2147483647, %v3266_v59  ;;  %v1168_v3 = vand.u32 2147483648, %v3266_v59  ;;  %v1698_v33 = vand.u32 2147483648, %v3360_v9  ;;  %vm3425_vm15 = vmor %vm1162_vm10, %vm1163_vm7 }
 0x188   :  { %v1349_v30 = vpop.f32.mrf.mxu2  ;;  %v1155_v1 = vsel %vm3390_vm9, %v1154_v58, %v1150_v25  ;;  %v1161_v44 = vadd.f32 %v3329_v42, %v1160_v62  ;;  %v1174_v11 = vsub.f32 1.0, %v1173_v41  ;;  %v1696_v10 = vand.u32 2147483647, %v3360_v9 }
 0x189   :  { %v1675_v22 = vmul.f32 %v2392_v18, %v1674_v56  ;;  %v1350_v50 = vadd.f32 %v2948_v17, %v1349_v30  ;;  %vm3429_vm1 = vcmp.eq.f32.partialorder %v1166_v2, 8.507059e+37  ;;  %vm1692_vm2 = vweird.f32 %v3360_v9 }
 0x18a   :  { %v1169_v23 = vor.u32 1.1754944e-38, %v1168_v3  ;;  %v1699_v14 = vor.u32 1.1754944e-38, %v1698_v33  ;;  %v1165_v59 = vsel %vm3425_vm15, %v3329_v42, %v1161_v44  ;;  %v1175_v48 = vmul.f32 %v3366_v34, %v1174_v11 }
 0x18b   :  { %v2396_v43 = vpop.eup %2395  ;;  %v1676_v28 = vadd.f32 %v2392_v18, %v1675_v22  ;;  %v2193_v55 = vmul.f32 -1.442695, %v1350_v50  ;;  %vm1697_vm5 = vcmp.eq.f32.partialorder %v1696_v10, 8.507059e+37  ;;  %vm1177_vm6 = vweird.f32 %v3305_v51 }
 0x18c   :  { %v2398_v53 = vpop.eup %2397  ;;  %v3396_v17 = vadd.f32 1.0, %v2396_v43  ;;  %vm1178_vm8 = vweird.f32 %v3366_v34  ;;  %v1181_v42 = vand.u32 2147483647, %v3305_v51  ;;  %v1183_v57 = vand.u32 2147483648, %v3305_v51 }
 0x18d   :  { %v1680_v63 = vsel %vm1679_vm12, %v2392_v18, %v1676_v28  ;;  %v1688_v52 = vmul.f32 %v2398_v53, %v3360_v9  ;;  %2399 = vpow2.f32 %v2193_v55  ;;  %vm1693_vm14 = vweird.f32 %v2398_v53  ;;  %vm3455_vm9 = vmor %vm1177_vm6, %vm1178_vm8 }
 0x18e   :  { %v1685_v49 = vsel %vm1682_vm13, %v1684_v60, %v1680_v63  ;;  %2401 = vrcp.f32 %v3396_v17  ;;  %vm1694_vm3 = vmor %vm1692_vm2, %vm1693_vm14  ;;  %v1713_v27 = vand.u32 2147483648, %v3396_v17  ;;  %v1170_v18 = vsel %vm3429_vm1, %v1169_v23, %v1165_v59 }
 0x18f   :  { %2026 = vst [vmem:[%s3557_s7 + $0x48] sm:$0xff] %v1685_v49  ;;  %v1689_v45 = vsub.f32 1.0, %v1688_v52  ;;  %2178 = vmatmul.msk.f32.gmra.mxu3 %vm1199_vm4, %v1155_v1  ;;  %v1176_v9 = vadd.f32 %v3366_v34, %v1175_v48  ;;  %v1711_v47 = vand.u32 2147483647, %v3396_v17  ;;  %vm1707_vm10 = vweird.f32 %v3396_v17 }
 0x190   :  { %v1352_v6 = vpop.f32.mrf.mxu2  ;;  %vm3460_vm0 = vcmp.eq.f32.partialorder %v1181_v42, 8.507059e+37  ;;  %v1714_v38 = vor.u32 1.1754944e-38, %v1713_v27  ;;  %v1184_v46 = vor.u32 1.1754944e-38, %v1183_v57 }
 0x191   :  { %v1690_v31 = vmul.f32 %v2398_v53, %v1689_v45  ;;  %v1353_v13 = vadd.f32 %v3418_v12, %v1352_v6  ;;  %v1180_v51 = vsel %vm3455_vm9, %v3366_v34, %v1176_v9  ;;  %vm1712_vm13 = vcmp.eq.f32.partialorder %v1711_v47, 8.507059e+37 }
 0x192   :  { %v1185_v43 = vsel %vm3460_vm0, %v1184_v46, %v1180_v51 }
 0x193   :  { %v2400_v19 = vpop.eup %2399  ;;  %v1691_v20 = vadd.f32 %v2398_v53, %v1690_v31  ;;  %v2194_v21 = vmul.f32 -1.442695, %v1353_v13 }
 0x194   :  { %v2402_v8 = vpop.eup %2401  ;;  %v1517_v36 = vadd.f32 1.0, %v2400_v19 }
 0x195   :  { %v1695_v4 = vsel %vm1694_vm3, %v2398_v53, %v1691_v20  ;;  %v1703_v24 = vmul.f32 %v2402_v8, %v3396_v17  ;;  %2403 = vpow2.f32 %v2194_v21  ;;  %vm1708_vm11 = vweird.f32 %v2402_v8 }
 0x196   :  { %v1700_v40 = vsel %vm1697_vm5, %v1699_v14, %v1695_v4  ;;  %2405 = vrcp.f32 %v1517_v36  ;;  %vm1709_vm12 = vmor %vm1707_vm10, %vm1708_vm11  ;;  %v1728_v54 = vand.u32 2147483648, %v1517_v36  ;;  %v1726_v34 = vand.u32 2147483647, %v1517_v36 }
 0x197   :  { %2027 = vst [vmem:[%s3557_s7 + $0x50] sm:$0xff] %v1700_v40  ;;  %v1704_v26 = vsub.f32 1.0, %v1703_v24  ;;  %2179 = vmatmul.msk.f32.gmra.mxu3 %vm1199_vm4, %v1170_v18  ;;  %vm1722_vm14 = vweird.f32 %v1517_v36 }
 0x198   :  { %v1355_v29 = vpop.f32.mrf.mxu2  ;;  %v1729_v41 = vor.u32 1.1754944e-38, %v1728_v54  ;;  %vm1727_vm1 = vcmp.eq.f32.partialorder %v1726_v34, 8.507059e+37 }
 0x199   :  { %v1705_v32 = vmul.f32 %v2402_v8, %v1704_v26  ;;  %v1356_v7 = vadd.f32 %v3418_v12, %v1355_v29 }
 0x19b   :  { %v2404_v16 = vpop.eup %2403  ;;  %v1706_v56 = vadd.f32 %v2402_v8, %v1705_v32  ;;  %v2195_v35 = vmul.f32 -1.442695, %v1356_v7 }
 0x19c   :  { %v2406_v39 = vpop.eup %2405  ;;  %v1518_v30 = vadd.f32 1.0, %v2404_v16 }
 0x19d   :  { %v1710_v22 = vsel %vm1709_vm12, %v2402_v8, %v1706_v56  ;;  %v1718_v37 = vmul.f32 %v2406_v39, %v1517_v36  ;;  %2407 = vpow2.f32 %v2195_v35  ;;  %vm1723_vm7 = vweird.f32 %v2406_v39 }
 0x19e   :  { %v1715_v50 = vsel %vm1712_vm13, %v1714_v38, %v1710_v22  ;;  %2409 = vrcp.f32 %v1518_v30  ;;  %vm1724_vm15 = vmor %vm1722_vm14, %vm1723_vm7  ;;  %v1743_v3 = vand.u32 2147483648, %v1518_v30  ;;  %v1741_v6 = vand.u32 2147483647, %v1518_v30 }
 0x19f   :  { %2028 = vst [vmem:[%s3557_s7 + $0x58] sm:$0xff] %v1715_v50  ;;  %v1719_v25 = vsub.f32 1.0, %v1718_v37  ;;  %2180 = vmatmul.msk.f32.gmra.mxu3 %vm1199_vm4, %v1185_v43  ;;  %vm1737_vm2 = vweird.f32 %v1518_v30 }
 0x1a0   :  { %v1358_v28 = vpop.f32.mrf.mxu2  ;;  %v1744_v15 = vor.u32 1.1754944e-38, %v1743_v3  ;;  %vm1742_vm5 = vcmp.eq.f32.partialorder %v1741_v6, 8.507059e+37 }
 0x1a1   :  { %v1720_v55 = vmul.f32 %v2406_v39, %v1719_v25  ;;  %v1359_v58 = vadd.f32 %v3418_v12, %v1358_v28 }
 0x1a3   :  { %v2408_v53 = vpop.eup %2407  ;;  %v1721_v60 = vadd.f32 %v2406_v39, %v1720_v55  ;;  %v2196_v17 = vmul.f32 -1.442695, %v1359_v58 }
 0x1a4   :  { %v2410_v62 = vpop.eup %2409  ;;  %v1519_v63 = vadd.f32 1.0, %v2408_v53 }
 0x1a5   :  { %v1725_v52 = vsel %vm1724_vm15, %v2406_v39, %v1721_v60  ;;  %v1733_v49 = vmul.f32 %v2410_v62, %v1518_v30  ;;  %2411 = vpow2.f32 %v2196_v17  ;;  %vm1738_vm4 = vweird.f32 %v2410_v62 }
 0x1a6   :  { %v1730_v2 = vsel %vm1727_vm1, %v1729_v41, %v1725_v52  ;;  %2413 = vrcp.f32 %v1519_v63  ;;  %vm1739_vm3 = vmor %vm1737_vm2, %vm1738_vm4  ;;  %v1758_v8 = vand.u32 2147483648, %v1519_v63  ;;  %v1756_v59 = vand.u32 2147483647, %v1519_v63 }
 0x1a7   :  { %2029 = vst [vmem:[%s3557_s7 + $0x60] sm:$0xff] %v1730_v2  ;;  %v1734_v45 = vsub.f32 1.0, %v1733_v49  ;;  %vm1752_vm8 = vweird.f32 %v1519_v63 }
 0x1a8   :  { %v1361_v33 = vpop.f32.mrf.mxu2  ;;  %v1759_v42 = vor.u32 1.1754944e-38, %v1758_v8  ;;  %vm1757_vm9 = vcmp.eq.f32.partialorder %v1756_v59, 8.507059e+37 }
 0x1a9   :  { %v1735_v1 = vmul.f32 %v2410_v62, %v1734_v45  ;;  %v1362_v44 = vadd.f32 %v3418_v12, %v1361_v33 }
 0x1ab   :  { %v2412_v11 = vpop.eup %2411  ;;  %v1736_v31 = vadd.f32 %v2410_v62, %v1735_v1  ;;  %v2197_v10 = vmul.f32 -1.442695, %v1362_v44 }
 0x1ac   :  { %v2414_v13 = vpop.eup %2413  ;;  %v1520_v5 = vadd.f32 1.0, %v2412_v11 }
 0x1ad   :  { %v1740_v19 = vsel %vm1739_vm3, %v2410_v62, %v1736_v31  ;;  %v1748_v20 = vmul.f32 %v2414_v13, %v1519_v63  ;;  %2415 = vpow2.f32 %v2197_v10  ;;  %vm1753_vm6 = vweird.f32 %v2414_v13 }
 0x1ae   :  { %v1745_v21 = vsel %vm1742_vm5, %v1744_v15, %v1740_v19  ;;  %2417 = vrcp.f32 %v1520_v5  ;;  %vm1754_vm11 = vmor %vm1752_vm8, %vm1753_vm6  ;;  %v1773_v32 = vand.u32 2147483648, %v1520_v5  ;;  %v1771_v0 = vand.u32 2147483647, %v1520_v5 }
 0x1af   :  { %2030 = vst [vmem:[%s3557_s7 + $0x68] sm:$0xff] %v1745_v21  ;;  %v1749_v23 = vsub.f32 1.0, %v1748_v20  ;;  %vm1767_vm0 = vweird.f32 %v1520_v5 }
 0x1b0   :  { %v1364_v14 = vpop.f32.mrf.mxu2  ;;  %v1774_v38 = vor.u32 1.1754944e-38, %v1773_v32  ;;  %vm1772_vm13 = vcmp.eq.f32.partialorder %v1771_v0, 8.507059e+37 }
 0x1b1   :  { %v1750_v36 = vmul.f32 %v2414_v13, %v1749_v23  ;;  %v1365_v48 = vadd.f32 %v3418_v12, %v1364_v14 }
 0x1b3   :  { %v2416_v4 = vpop.eup %2415  ;;  %v1751_v24 = vadd.f32 %v2414_v13, %v1750_v36  ;;  %v2198_v40 = vmul.f32 -1.442695, %v1365_v48 }
 0x1b4   :  { %v2418_v26 = vpop.eup %2417  ;;  %v1521_v27 = vadd.f32 1.0, %v2416_v4 }
 0x1b5   :  { %v1755_v18 = vsel %vm1754_vm11, %v2414_v13, %v1751_v24  ;;  %v1763_v29 = vmul.f32 %v2418_v26, %v1520_v5  ;;  %2419 = vpow2.f32 %v2198_v40  ;;  %vm1768_vm10 = vweird.f32 %v2418_v26 }
 0x1b6   :  { %v1760_v9 = vsel %vm1757_vm9, %v1759_v42, %v1755_v18  ;;  %2421 = vrcp.f32 %v1521_v27  ;;  %vm1769_vm12 = vmor %vm1767_vm0, %vm1768_vm10  ;;  %v1788_v50 = vand.u32 2147483648, %v1521_v27  ;;  %v1786_v43 = vand.u32 2147483647, %v1521_v27 }
 0x1b7   :  { %2031 = vst [vmem:[%s3557_s7 + $0x70] sm:$0xff] %v1760_v9  ;;  %v1764_v57 = vsub.f32 1.0, %v1763_v29  ;;  %vm1782_vm14 = vweird.f32 %v1521_v27 }
 0x1b8   :  { %v1367_v47 = vpop.f32.mrf.mxu2  ;;  %v1789_v60 = vor.u32 1.1754944e-38, %v1788_v50  ;;  %vm1787_vm1 = vcmp.eq.f32.partialorder %v1786_v43, 8.507059e+37 }
 0x1b9   :  { %v1765_v7 = vmul.f32 %v2418_v26, %v1764_v57  ;;  %v1368_v16 = vadd.f32 %v3418_v12, %v1367_v47 }
 0x1bb   :  { %v2420_v56 = vpop.eup %2419  ;;  %v1766_v35 = vadd.f32 %v2418_v26, %v1765_v7  ;;  %v2199_v61 = vmul.f32 -1.442695, %v1368_v16 }
 0x1bc   :  { %v2422_v39 = vpop.eup %2421  ;;  %v1522_v30 = vadd.f32 1.0, %v2420_v56 }
 0x1bd   :  { %v1770_v51 = vsel %vm1769_vm12, %v2418_v26, %v1766_v35  ;;  %v1778_v46 = vmul.f32 %v2422_v39, %v1521_v27  ;;  %2423 = vpow2.f32 %v2199_v61  ;;  %vm1783_vm7 = vweird.f32 %v2422_v39 }
 0x1be   :  { %v1775_v22 = vsel %vm1772_vm13, %v1774_v38, %v1770_v51  ;;  %2425 = vrcp.f32 %v1522_v30  ;;  %vm1784_vm15 = vmor %vm1782_vm14, %vm1783_vm7  ;;  %v1803_v49 = vand.u32 2147483648, %v1522_v30  ;;  %v1801_v45 = vand.u32 2147483647, %v1522_v30 }
 0x1bf   :  { %2032 = vst [vmem:[%s3557_s7 + $0x78] sm:$0xff] %v1775_v22  ;;  %v1779_v37 = vsub.f32 1.0, %v1778_v46  ;;  %vm1797_vm2 = vweird.f32 %v1522_v30 }
 0x1c0   :  { %v1370_v25 = vpop.f32.mrf.mxu2  ;;  %v1804_v6 = vor.u32 1.1754944e-38, %v1803_v49  ;;  %vm1802_vm5 = vcmp.eq.f32.partialorder %v1801_v45, 8.507059e+37 }
 0x1c1   :  { %v1780_v54 = vmul.f32 %v2422_v39, %v1779_v37  ;;  %v1371_v28 = vadd.f32 %v3418_v12, %v1370_v25 }
 0x1c3   :  { %v2424_v55 = vpop.eup %2423  ;;  %v1781_v34 = vadd.f32 %v2422_v39, %v1780_v54  ;;  %v2200_v58 = vmul.f32 -1.442695, %v1371_v28 }
 0x1c4   :  { %v2426_v53 = vpop.eup %2425  ;;  %v1523_v17 = vadd.f32 1.0, %v2424_v55 }
 0x1c5   :  { %v1785_v62 = vsel %vm1784_vm15, %v2422_v39, %v1781_v34  ;;  %v1793_v41 = vmul.f32 %v2426_v53, %v1522_v30  ;;  %2427 = vpow2.f32 %v2200_v58  ;;  %vm1798_vm4 = vweird.f32 %v2426_v53 }
 0x1c6   :  { %v1790_v63 = vsel %vm1787_vm1, %v1789_v60, %v1785_v62  ;;  %2429 = vrcp.f32 %v1523_v17  ;;  %vm1799_vm3 = vmor %vm1797_vm2, %vm1798_vm4  ;;  %v1818_v20 = vand.u32 2147483648, %v1523_v17  ;;  %v1816_v23 = vand.u32 2147483647, %v1523_v17 }
 0x1c7   :  { %2033 = vst [vmem:[%s3557_s7 + $0x80] sm:$0xff] %v1790_v63  ;;  %v1794_v52 = vsub.f32 1.0, %v1793_v41  ;;  %vm1812_vm8 = vweird.f32 %v1523_v17 }
 0x1c8   :  { %v1819_v36 = vor.u32 1.1754944e-38, %v1818_v20  ;;  %vm1817_vm9 = vcmp.eq.f32.partialorder %v1816_v23, 8.507059e+37 }
 0x1c9   :  { %v1795_v2 = vmul.f32 %v2426_v53, %v1794_v52 }
 0x1ca   :  { %v1373_v11 = vpop.f32.mrf.mxu2 }
 0x1cb   :  { %v2428_v3 = vpop.eup %2427  ;;  %v1796_v33 = vadd.f32 %v2426_v53, %v1795_v2  ;;  %v1374_v13 = vadd.f32 %v3418_v12, %v1373_v11 }
 0x1cc   :  { %v2430_v1 = vpop.eup %2429  ;;  %v1524_v44 = vadd.f32 1.0, %v2428_v3 }
 0x1cd   :  { %v1800_v31 = vsel %vm1799_vm3, %v2426_v53, %v1796_v33  ;;  %v1808_v10 = vmul.f32 %v2430_v1, %v1523_v17  ;;  %v2201_v19 = vmul.f32 -1.442695, %v1374_v13  ;;  %vm1813_vm6 = vweird.f32 %v2430_v1 }
 0x1ce   :  { %v1805_v15 = vsel %vm1802_vm5, %v1804_v6, %v1800_v31  ;;  %2431 = vrcp.f32 %v1524_v44  ;;  %vm1814_vm11 = vmor %vm1812_vm8, %vm1813_vm6  ;;  %v1833_v18 = vand.u32 2147483648, %v1524_v44  ;;  %v1831_v57 = vand.u32 2147483647, %v1524_v44 }
 0x1cf   :  { %2034 = vst [vmem:[%s3557_s7 + $0x88] sm:$0xff] %v1805_v15  ;;  %v1809_v5 = vsub.f32 1.0, %v1808_v10  ;;  %2433 = vpow2.f32 %v2201_v19  ;;  %vm1827_vm0 = vweird.f32 %v1524_v44 }
 0x1d0   :  { %v1834_v47 = vor.u32 1.1754944e-38, %v1833_v18  ;;  %vm1832_vm13 = vcmp.eq.f32.partialorder %v1831_v57, 8.507059e+37 }
 0x1d1   :  { %v1810_v21 = vmul.f32 %v2430_v1, %v1809_v5 }
 0x1d2   :  { %v1376_v59 = vpop.f32.mrf.mxu2 }
 0x1d3   :  { %v1811_v8 = vadd.f32 %v2430_v1, %v1810_v21  ;;  %v1377_v24 = vadd.f32 %v3418_v12, %v1376_v59 }
 0x1d4   :  { %v2432_v14 = vpop.eup %2431 }
 0x1d5   :  { %v1815_v48 = vsel %vm1814_vm11, %v2430_v1, %v1811_v8  ;;  %v1823_v4 = vmul.f32 %v2432_v14, %v1524_v44  ;;  %v2434_v26 = vpop.eup %2433  ;;  %v2202_v27 = vmul.f32 -1.442695, %v1377_v24  ;;  %vm1828_vm10 = vweird.f32 %v2432_v14 }
 0x1d6   :  { %v1820_v40 = vsel %vm1817_vm9, %v1819_v36, %v1815_v48  ;;  %v1525_v29 = vadd.f32 1.0, %v2434_v26  ;;  %vm1829_vm12 = vmor %vm1827_vm0, %vm1828_vm10 }
 0x1d7   :  { %2035 = vst [vmem:[%s3557_s7 + $0x90] sm:$0xff] %v1820_v40  ;;  %v1824_v42 = vsub.f32 1.0, %v1823_v4  ;;  %2435 = vpow2.f32 %v2202_v27 }
 0x1d8   :  { %2437 = vrcp.f32 %v1525_v29  ;;  %v1848_v22 = vand.u32 2147483648, %v1525_v29  ;;  %v1846_v25 = vand.u32 2147483647, %v1525_v29  ;;  %vm1842_vm14 = vweird.f32 %v1525_v29 }
 0x1d9   :  { %v1825_v9 = vmul.f32 %v2432_v14, %v1824_v42 }
 0x1da   :  { %v1379_v7 = vpop.f32.mrf.mxu2  ;;  %v1849_v34 = vor.u32 1.1754944e-38, %v1848_v22  ;;  %vm1847_vm1 = vcmp.eq.f32.partialorder %v1846_v25, 8.507059e+37 }
 0x1db   :  { %v1826_v32 = vadd.f32 %v2432_v14, %v1825_v9  ;;  %v1380_v16 = vadd.f32 %v3418_v12, %v1379_v7 }
 0x1dd   :  { %v1830_v0 = vsel %vm1829_vm12, %v2432_v14, %v1826_v32  ;;  %v2436_v35 = vpop.eup %2435  ;;  %v2203_v61 = vmul.f32 -1.442695, %v1380_v16 }
 0x1de   :  { %v1835_v56 = vsel %vm1832_vm13, %v1834_v47, %v1830_v0  ;;  %v2438_v39 = vpop.eup %2437  ;;  %v1526_v38 = vadd.f32 1.0, %v2436_v35 }
 0x1df   :  { %2036 = vst [vmem:[%s3557_s7 + $0x98] sm:$0xff] %v1835_v56  ;;  %v1838_v30 = vmul.f32 %v2438_v39, %v1525_v29  ;;  %2439 = vpow2.f32 %v2203_v61  ;;  %vm1843_vm7 = vweird.f32 %v2438_v39 }
 0x1e0   :  { %2441 = vrcp.f32 %v1526_v38  ;;  %vm1844_vm15 = vmor %vm1842_vm14, %vm1843_vm7  ;;  %v1863_v41 = vand.u32 2147483648, %v1526_v38  ;;  %v1861_v49 = vand.u32 2147483647, %v1526_v38  ;;  %vm1857_vm2 = vweird.f32 %v1526_v38 }
 0x1e1   :  { %v1839_v51 = vsub.f32 1.0, %v1838_v30  ;;  %v1382_v46 = vpop.f32.mrf.mxu3 }
 0x1e2   :  { %v1383_v37 = vadd.f32 %v3418_v12, %v1382_v46  ;;  %v1864_v44 = vor.u32 1.1754944e-38, %v1863_v41  ;;  %vm1862_vm5 = vcmp.eq.f32.partialorder %v1861_v49, 8.507059e+37 }
 0x1e3   :  { %v1840_v50 = vmul.f32 %v2438_v39, %v1839_v51 }
 0x1e4   :  { %v2204_v54 = vmul.f32 -1.442695, %v1383_v37 }
 0x1e5   :  { %v2440_v43 = vpop.eup %2439  ;;  %v1841_v28 = vadd.f32 %v2438_v39, %v1840_v50 }
 0x1e6   :  { %v2442_v55 = vpop.eup %2441  ;;  %v1527_v58 = vadd.f32 1.0, %v2440_v43  ;;  %2443 = vpow2.f32 %v2204_v54 }
 0x1e7   :  { %v1845_v53 = vsel %vm1844_vm15, %v2438_v39, %v1841_v28  ;;  %v1853_v60 = vmul.f32 %v2442_v55, %v1526_v38  ;;  %vm1858_vm4 = vweird.f32 %v2442_v55 }
 0x1e8   :  { %v1850_v17 = vsel %vm1847_vm1, %v1849_v34, %v1845_v53  ;;  %2445 = vrcp.f32 %v1527_v58  ;;  %vm1859_vm3 = vmor %vm1857_vm2, %vm1858_vm4  ;;  %v1878_v15 = vand.u32 2147483648, %v1527_v58  ;;  %v1876_v20 = vand.u32 2147483647, %v1527_v58 }
 0x1e9   :  { %2037 = vst [vmem:[%s3557_s7 + $0xa0] sm:$0xff] %v1850_v17  ;;  %v1854_v62 = vsub.f32 1.0, %v1853_v60  ;;  %vm1872_vm8 = vweird.f32 %v1527_v58 }
 0x1ea   :  { %v1385_v63 = vpop.f32.mrf.mxu3  ;;  %v1879_v36 = vor.u32 1.1754944e-38, %v1878_v15  ;;  %vm1877_vm9 = vcmp.eq.f32.partialorder %v1876_v20, 8.507059e+37 }
 0x1eb   :  { %v1855_v52 = vmul.f32 %v2442_v55, %v1854_v62  ;;  %v1386_v2 = vadd.f32 %v3418_v12, %v1385_v63 }
 0x1ec   :  { %v2444_v45 = vpop.eup %2443 }
 0x1ed   :  { %v1856_v3 = vadd.f32 %v2442_v55, %v1855_v52  ;;  %v1528_v33 = vadd.f32 1.0, %v2444_v45  ;;  %v2205_v1 = vmul.f32 -1.442695, %v1386_v2 }
 0x1ee   :  { %v2446_v6 = vpop.eup %2445 }
 0x1ef   :  { %v1860_v11 = vsel %vm1859_vm3, %v2442_v55, %v1856_v3  ;;  %v1868_v31 = vmul.f32 %v2446_v6, %v1527_v58  ;;  %2447 = vrcp.f32 %v1528_v33  ;;  %vm1873_vm6 = vweird.f32 %v2446_v6 }
 0x1f0   :  { %v1865_v10 = vsel %vm1862_vm5, %v1864_v44, %v1860_v11  ;;  %2449 = vpow2.f32 %v2205_v1  ;;  %vm1874_vm11 = vmor %vm1872_vm8, %vm1873_vm6  ;;  %v1893_v42 = vand.u32 2147483648, %v1528_v33  ;;  %v1891_v18 = vand.u32 2147483647, %v1528_v33 }
 0x1f1   :  { %2038 = vst [vmem:[%s3557_s7 + $0xa8] sm:$0xff] %v1865_v10  ;;  %v1869_v13 = vsub.f32 1.0, %v1868_v31  ;;  %vm1887_vm0 = vweird.f32 %v1528_v33 }
 0x1f2   :  { %v1388_v5 = vpop.f32.mrf.mxu3  ;;  %v1894_v47 = vor.u32 1.1754944e-38, %v1893_v42  ;;  %vm1892_vm13 = vcmp.eq.f32.partialorder %v1891_v18, 8.507059e+37 }
 0x1f3   :  { %v1870_v19 = vmul.f32 %v2446_v6, %v1869_v13  ;;  %v1389_v21 = vadd.f32 %v3418_v12, %v1388_v5 }
 0x1f5   :  { %v2448_v23 = vpop.eup %2447  ;;  %v1871_v8 = vadd.f32 %v2446_v6, %v1870_v19  ;;  %v2206_v14 = vmul.f32 -1.442695, %v1389_v21 }
 0x1f6   :  { %v1883_v59 = vmul.f32 %v2448_v23, %v1528_v33  ;;  %v2450_v48 = vpop.eup %2449  ;;  %vm1888_vm10 = vweird.f32 %v2448_v23 }
 0x1f7   :  { %v1875_v4 = vsel %vm1874_vm11, %v2446_v6, %v1871_v8  ;;  %2451 = vpow2.f32 %v2206_v14  ;;  %v1529_v26 = vadd.f32 1.0, %v2450_v48  ;;  %vm1889_vm12 = vmor %vm1887_vm0, %vm1888_vm10 }
 0x1f8   :  { %v1880_v24 = vsel %vm1877_vm9, %v1879_v36, %v1875_v4  ;;  %v1884_v40 = vsub.f32 1.0, %v1883_v59 }
 0x1f9   :  { %2039 = vst [vmem:[%s3557_s7 + $0xb0] sm:$0xff] %v1880_v24  ;;  %2453 = vrcp.f32 %v1529_v26  ;;  %v1908_v51 = vand.u32 2147483648, %v1529_v26  ;;  %v1906_v37 = vand.u32 2147483647, %v1529_v26  ;;  %vm1902_vm14 = vweird.f32 %v1529_v26 }
 0x1fa   :  { %v1885_v27 = vmul.f32 %v2448_v23, %v1884_v40  ;;  %v1391_v29 = vpop.f32.mrf.mxu3 }
 0x1fb   :  { %v1392_v9 = vadd.f32 %v3418_v12, %v1391_v29  ;;  %v1909_v55 = vor.u32 1.1754944e-38, %v1908_v51  ;;  %vm1907_vm1 = vcmp.eq.f32.partialorder %v1906_v37, 8.507059e+37 }
 0x1fc   :  { %v1886_v57 = vadd.f32 %v2448_v23, %v1885_v27 }
 0x1fd   :  { %v2452_v32 = vpop.eup %2451  ;;  %v2207_v7 = vmul.f32 -1.442695, %v1392_v9 }
 0x1fe   :  { %v1890_v0 = vsel %vm1889_vm12, %v2448_v23, %v1886_v57  ;;  %v1530_v16 = vadd.f32 1.0, %v2452_v32 }
 0x1ff   :  { %v1895_v56 = vsel %vm1892_vm13, %v1894_v47, %v1890_v0  ;;  %2455 = vpow2.f32 %v2207_v7  ;;  %v2454_v35 = vpop.eup %2453 }
 0x200   :  { %2040 = vst [vmem:[%s3557_s7 + $0xb8] sm:$0xff] %v1895_v56  ;;  %2457 = vrcp.f32 %v1530_v16  ;;  %v1898_v61 = vmul.f32 %v2454_v35, %v1529_v26  ;;  %vm1903_vm7 = vweird.f32 %v2454_v35  ;;  %v1923_v60 = vand.u32 2147483648, %v1530_v16 }
 0x201   :  { %vm1904_vm15 = vmor %vm1902_vm14, %vm1903_vm7  ;;  %v1921_v41 = vand.u32 2147483647, %v1530_v16  ;;  %vm1917_vm2 = vweird.f32 %v1530_v16 }
 0x202   :  { %v1394_v39 = vpop.f32.mrf.mxu3  ;;  %v1899_v38 = vsub.f32 1.0, %v1898_v61  ;;  %v1924_v3 = vor.u32 1.1754944e-38, %v1923_v60 }
 0x203   :  { %v1395_v30 = vadd.f32 %v3418_v12, %v1394_v39  ;;  %vm1922_vm5 = vcmp.eq.f32.partialorder %v1921_v41, 8.507059e+37 }
 0x204   :  { %v1900_v22 = vmul.f32 %v2454_v35, %v1899_v38 }
 0x205   :  { %v2456_v46 = vpop.eup %2455  ;;  %v2208_v50 = vmul.f32 -1.442695, %v1395_v30 }
 0x206   :  { %v2458_v25 = vpop.eup %2457  ;;  %v1531_v54 = vadd.f32 1.0, %v2456_v46  ;;  %v1901_v43 = vadd.f32 %v2454_v35, %v1900_v22 }
 0x207   :  { %v1913_v28 = vmul.f32 %v2458_v25, %v1530_v16  ;;  %2459 = vpow2.f32 %v2208_v50  ;;  %vm1918_vm4 = vweird.f32 %v2458_v25 }
 0x208   :  { %2461 = vrcp.f32 %v1531_v54  ;;  %v1905_v34 = vsel %vm1904_vm15, %v2454_v35, %v1901_v43  ;;  %vm1919_vm3 = vmor %vm1917_vm2, %vm1918_vm4  ;;  %v1938_v31 = vand.u32 2147483648, %v1531_v54  ;;  %v1936_v15 = vand.u32 2147483647, %v1531_v54 }
 0x209   :  { %v1914_v58 = vsub.f32 1.0, %v1913_v28  ;;  %v1910_v53 = vsel %vm1907_vm1, %v1909_v55, %v1905_v34  ;;  %vm1932_vm8 = vweird.f32 %v1531_v54 }
 0x20a   :  { %v1397_v17 = vpop.f32.mrf.mxu3  ;;  %2041 = vst [vmem:[%s3557_s7 + $0xc0] sm:$0xff] %v1910_v53  ;;  %v1939_v8 = vor.u32 1.1754944e-38, %v1938_v31  ;;  %vm1937_vm9 = vcmp.eq.f32.partialorder %v1936_v15, 8.507059e+37 }
 0x20b   :  { %v1915_v62 = vmul.f32 %v2458_v25, %v1914_v58  ;;  %v1398_v63 = vadd.f32 %v3418_v12, %v1397_v17 }
 0x20d   :  { %v2460_v52 = vpop.eup %2459  ;;  %v1916_v49 = vadd.f32 %v2458_v25, %v1915_v62  ;;  %v2209_v2 = vmul.f32 -1.442695, %v1398_v63 }
 0x20e   :  { %v2462_v45 = vpop.eup %2461  ;;  %v1532_v33 = vadd.f32 1.0, %v2460_v52 }
 0x20f   :  { %v1920_v1 = vsel %vm1919_vm3, %v2458_v25, %v1916_v49  ;;  %v1928_v6 = vmul.f32 %v2462_v45, %v1531_v54  ;;  %2463 = vpow2.f32 %v2209_v2  ;;  %vm1933_vm6 = vweird.f32 %v2462_v45 }
 0x210   :  { %v1925_v44 = vsel %vm1922_vm5, %v1924_v3, %v1920_v1  ;;  %2465 = vrcp.f32 %v1532_v33  ;;  %vm1934_vm11 = vmor %vm1932_vm8, %vm1933_vm6  ;;  %v1953_v24 = vand.u32 2147483648, %v1532_v33  ;;  %v1951_v42 = vand.u32 2147483647, %v1532_v33 }
 0x211   :  { %2042 = vst [vmem:[%s3557_s7 + $0xc8] sm:$0xff] %v1925_v44  ;;  %v1929_v11 = vsub.f32 1.0, %v1928_v6  ;;  %vm1947_vm0 = vweird.f32 %v1532_v33 }
 0x212   :  { %v1400_v10 = vpop.f32.mrf.mxu3  ;;  %v1954_v32 = vor.u32 1.1754944e-38, %v1953_v24  ;;  %vm1952_vm13 = vcmp.eq.f32.partialorder %v1951_v42, 8.507059e+37 }
 0x213   :  { %v1930_v13 = vmul.f32 %v2462_v45, %v1929_v11  ;;  %v1401_v5 = vadd.f32 %v3418_v12, %v1400_v10 }
 0x215   :  { %v2464_v19 = vpop.eup %2463  ;;  %v1931_v20 = vadd.f32 %v2462_v45, %v1930_v13  ;;  %v2210_v21 = vmul.f32 -1.442695, %v1401_v5 }
 0x216   :  { %v2466_v23 = vpop.eup %2465  ;;  %v1533_v14 = vadd.f32 1.0, %v2464_v19 }
 0x217   :  { %v1935_v36 = vsel %vm1934_vm11, %v2462_v45, %v1931_v20  ;;  %v1943_v59 = vmul.f32 %v2466_v23, %v1532_v33  ;;  %2467 = vpow2.f32 %v2210_v21  ;;  %vm1948_vm10 = vweird.f32 %v2466_v23 }
 0x218   :  { %v1940_v48 = vsel %vm1937_vm9, %v1939_v8, %v1935_v36  ;;  %2469 = vrcp.f32 %v1533_v14  ;;  %vm1949_vm12 = vmor %vm1947_vm0, %vm1948_vm10  ;;  %v1968_v35 = vand.u32 2147483648, %v1533_v14  ;;  %v1966_v38 = vand.u32 2147483647, %v1533_v14 }
 0x219   :  { %2043 = vst [vmem:[%s3557_s7 + $0xd0] sm:$0xff] %v1940_v48  ;;  %v1944_v4 = vsub.f32 1.0, %v1943_v59  ;;  %vm1962_vm14 = vweird.f32 %v1533_v14 }
 0x21a   :  { %v1403_v40 = vpop.f32.mrf.mxu3  ;;  %v1969_v50 = vor.u32 1.1754944e-38, %v1968_v35  ;;  %vm1967_vm1 = vcmp.eq.f32.partialorder %v1966_v38, 8.507059e+37 }
 0x21b   :  { %v1945_v26 = vmul.f32 %v2466_v23, %v1944_v4  ;;  %v1404_v27 = vadd.f32 %v3418_v12, %v1403_v40 }
 0x21d   :  { %v2468_v18 = vpop.eup %2467  ;;  %v1946_v29 = vadd.f32 %v2466_v23, %v1945_v26  ;;  %v2211_v9 = vmul.f32 -1.442695, %v1404_v27 }
 0x21e   :  { %v2470_v57 = vpop.eup %2469  ;;  %v1534_v47 = vadd.f32 1.0, %v2468_v18 }
 0x21f   :  { %v1950_v7 = vsel %vm1949_vm12, %v2466_v23, %v1946_v29  ;;  %v1958_v0 = vmul.f32 %v2470_v57, %v1533_v14  ;;  %2471 = vpow2.f32 %v2211_v9  ;;  %vm1963_vm7 = vweird.f32 %v2470_v57 }
 0x220   :  { %v1955_v16 = vsel %vm1952_vm13, %v1954_v32, %v1950_v7  ;;  %2473 = vrcp.f32 %v1534_v47  ;;  %vm1964_vm15 = vmor %vm1962_vm14, %vm1963_vm7  ;;  %v1981_v58 = vand.u32 2147483647, %v1534_v47  ;;  %vm1977_vm2 = vweird.f32 %v1534_v47 }
 0x221   :  { %2044 = vst [vmem:[%s3557_s7 + $0xd8] sm:$0xff] %v1955_v16  ;;  %v1959_v56 = vsub.f32 1.0, %v1958_v0 }
 0x222   :  { %v1406_v61 = vpop.f32.mrf.mxu3  ;;  %vm1982_vm5 = vcmp.eq.f32.partialorder %v1981_v58, 8.507059e+37 }
 0x223   :  { %v1960_v39 = vmul.f32 %v2470_v57, %v1959_v56  ;;  %v1407_v30 = vadd.f32 %v3418_v12, %v1406_v61  ;;  %v1983_v12 = vand.u32 2147483648, %v1534_v47 }
 0x225   :  { %v2472_v51 = vpop.eup %2471  ;;  %v1961_v46 = vadd.f32 %v2470_v57, %v1960_v39  ;;  %v2212_v22 = vmul.f32 -1.442695, %v1407_v30  ;;  %v1984_v62 = vor.u32 1.1754944e-38, %v1983_v12 }
 0x226   :  { %v2474_v37 = vpop.eup %2473  ;;  %v1535_v25 = vadd.f32 1.0, %v2472_v51 }
 0x227   :  { %v1965_v54 = vsel %vm1964_vm15, %v2470_v57, %v1961_v46  ;;  %v1973_v43 = vmul.f32 %v2474_v37, %v1534_v47  ;;  %2475 = vpow2.f32 %v2212_v22  ;;  %vm1978_vm4 = vweird.f32 %v2474_v37 }
 0x228   :  { %v1970_v28 = vsel %vm1967_vm1, %v1969_v50, %v1965_v54  ;;  %2477 = vrcp.f32 %v1535_v25  ;;  %vm1979_vm3 = vmor %vm1977_vm2, %vm1978_vm4  ;;  %v1998_v45 = vand.u32 2147483648, %v1535_v25  ;;  %v1996_v33 = vand.u32 2147483647, %v1535_v25 }
 0x229   :  { %2045 = vst [vmem:[%s3557_s7 + $0xe0] sm:$0xff] %v1970_v28  ;;  %v1974_v55 = vsub.f32 1.0, %v1973_v43  ;;  %vm1992_vm8 = vweird.f32 %v1535_v25 }
 0x22a   :  { %v1999_v44 = vor.u32 1.1754944e-38, %v1998_v45  ;;  %vm1997_vm9 = vcmp.eq.f32.partialorder %v1996_v33, 8.507059e+37 }
 0x22b   :  { %v1975_v34 = vmul.f32 %v2474_v37, %v1974_v55 }
 0x22d   :  { %v2476_v53 = vpop.eup %2475  ;;  %v1976_v60 = vadd.f32 %v2474_v37, %v1975_v34 }
 0x22e   :  { %v2478_v17 = vpop.eup %2477  ;;  %v1536_v41 = vadd.f32 1.0, %v2476_v53 }
 0x22f   :  { %v1980_v63 = vsel %vm1979_vm3, %v2474_v37, %v1976_v60  ;;  %v1988_v52 = vmul.f32 %v2478_v17, %v1535_v25  ;;  %vm1993_vm6 = vweird.f32 %v2478_v17 }
 0x230   :  { %v1985_v49 = vsel %vm1982_vm5, %v1984_v62, %v1980_v63  ;;  %2479 = vrcp.f32 %v1536_v41  ;;  %vm1994_vm11 = vmor %vm1992_vm8, %vm1993_vm6  ;;  %v2013_v15 = vand.u32 2147483648, %v1536_v41  ;;  %v2011_v19 = vand.u32 2147483647, %v1536_v41 }
 0x231   :  { %2046 = vst [vmem:[%s3557_s7 + $0xe8] sm:$0xff] %v1985_v49  ;;  %v1989_v2 = vsub.f32 1.0, %v1988_v52  ;;  %vm2007_vm0 = vweird.f32 %v1536_v41 }
 0x232   :  { %v2014_v21 = vor.u32 1.1754944e-38, %v2013_v15  ;;  %vm2012_vm13 = vcmp.eq.f32.partialorder %v2011_v19, 8.507059e+37 }
 0x233   :  { %v1990_v3 = vmul.f32 %v2478_v17, %v1989_v2 }
 0x235   :  { %v1991_v1 = vadd.f32 %v2478_v17, %v1990_v3 }
 0x236   :  { %v2480_v6 = vpop.eup %2479 }
 0x237   :  { %v1995_v11 = vsel %vm1994_vm11, %v2478_v17, %v1991_v1  ;;  %v2003_v31 = vmul.f32 %v2480_v6, %v1536_v41  ;;  %vm2008_vm10 = vweird.f32 %v2480_v6 }
 0x238   :  { %v2000_v10 = vsel %vm1997_vm9, %v1999_v44, %v1995_v11  ;;  %vm2009_vm12 = vmor %vm2007_vm0, %vm2008_vm10 }
 0x239   :  { %2047 = vst [vmem:[%s3557_s7 + $0xf0] sm:$0xff] %v2000_v10  ;;  %v2004_v13 = vsub.f32 1.0, %v2003_v31 }
 0x23b   :  { %v2005_v5 = vmul.f32 %v2480_v6, %v2004_v13 }
 0x23d   :  { %v2006_v20 = vadd.f32 %v2480_v6, %v2005_v5 }
 0x23f   :  { %v2010_v23 = vsel %vm2009_vm12, %v2480_v6, %v2006_v20 }
 0x240   :  { %v2015_v8 = vsel %vm2012_vm13, %v2014_v21, %v2010_v23 }
 0x241   :  { %2048 = vst [vmem:[%s3557_s7 + $0xf8] sm:$0xff] %v2015_v8 }

// kernel: gnn_forward.13
= control target key start
LH: loop header
LB: loop body
LE: loop exit
PB: predicated region body
PF: predicated region fallthrough
CT: control target
= control target key end

     0   :  { %s2105_s3 = inlined_call_operand.vmem [shape: f32[128,128], index: 3, kind: input, shape index: {}]   ;;  %s2106_s2 = inlined_call_operand.vmem [shape: f32[128,128], index: 2, kind: input, shape index: {}]   ;;  %s2107_s0 = inlined_call_operand.vmem [shape: f32[256,128], index: 0, kind: input, shape index: {}]   ;;  %s2108_s1 = inlined_call_operand.vmem [shape: f32[256,128], index: 1, kind: input, shape index: {}]   ;;  %s2109_s4 = inlined_call_operand.vmem [shape: f32[1,128], index: 4, kind: input, shape index: {}]   ;;  %s2110_s5 = inlined_call_operand.vmem [shape: f32[256,128], index: 5, kind: output, shape index: {}]  }
   0x1   :  { %v147_v0 = vld [vmem:[%s2105_s3 + $0x78] sm:$0xff]  ;;  %v146_v2 = vld [vmem:[%s2105_s3 + $0x70] sm:$0xff]  ;;  %v145_v4 = vld [vmem:[%s2105_s3 + $0x68] sm:$0xff] }
   0x2   :  { %v99_v1 = vld [vmem:[%s2106_s2 + $0x78] sm:$0xff]  ;;  %148 = vmatpush.msra.mxu0 %v147_v0  ;;  %1086 = vmatpush.msra.mxu2 %v147_v0  ;;  %v98_v3 = vld [vmem:[%s2106_s2 + $0x70] sm:$0xff]  ;;  %v97_v5 = vld [vmem:[%s2106_s2 + $0x68] sm:$0xff] }
   0x3   :  { %261 = vmatpush.msra.mxu1 %v99_v1  ;;  %1102 = vmatpush.msra.mxu3 %v99_v1  ;;  %v144_v6 = vld [vmem:[%s2105_s3 + $0x60] sm:$0xff]  ;;  %v143_v8 = vld [vmem:[%s2105_s3 + $0x58] sm:$0xff]  ;;  %v142_v10 = vld [vmem:[%s2105_s3 + $0x50] sm:$0xff] }
   0x4   :  { %149 = vmatpush.msra.mxu0 %v146_v2  ;;  %1087 = vmatpush.msra.mxu2 %v146_v2  ;;  %v96_v7 = vld [vmem:[%s2106_s2 + $0x60] sm:$0xff]  ;;  %v95_v9 = vld [vmem:[%s2106_s2 + $0x58] sm:$0xff]  ;;  %v94_v11 = vld [vmem:[%s2106_s2 + $0x50] sm:$0xff] }
   0x5   :  { %262 = vmatpush.msra.mxu1 %v98_v3  ;;  %1103 = vmatpush.msra.mxu3 %v98_v3  ;;  %v141_v12 = vld [vmem:[%s2105_s3 + $0x48] sm:$0xff]  ;;  %v140_v14 = vld [vmem:[%s2105_s3 + $0x40] sm:$0xff]  ;;  %v139_v16 = vld [vmem:[%s2105_s3 + $0x38] sm:$0xff] }
   0x6   :  { %150 = vmatpush.msra.mxu0 %v145_v4  ;;  %1088 = vmatpush.msra.mxu2 %v145_v4  ;;  %v93_v13 = vld [vmem:[%s2106_s2 + $0x48] sm:$0xff]  ;;  %v92_v15 = vld [vmem:[%s2106_s2 + $0x40] sm:$0xff]  ;;  %v91_v17 = vld [vmem:[%s2106_s2 + $0x38] sm:$0xff] }
   0x7   :  { %263 = vmatpush.msra.mxu1 %v97_v5  ;;  %1104 = vmatpush.msra.mxu3 %v97_v5  ;;  %v138_v18 = vld [vmem:[%s2105_s3 + $0x30] sm:$0xff]  ;;  %v137_v20 = vld [vmem:[%s2105_s3 + $0x28] sm:$0xff]  ;;  %v136_v22 = vld [vmem:[%s2105_s3 + $0x20] sm:$0xff] }
   0x8   :  { %151 = vmatpush.msra.mxu0 %v144_v6  ;;  %1089 = vmatpush.msra.mxu2 %v144_v6  ;;  %v90_v19 = vld [vmem:[%s2106_s2 + $0x30] sm:$0xff]  ;;  %v89_v21 = vld [vmem:[%s2106_s2 + $0x28] sm:$0xff]  ;;  %v88_v23 = vld [vmem:[%s2106_s2 + $0x20] sm:$0xff] }
   0x9   :  { %264 = vmatpush.msra.mxu1 %v96_v7  ;;  %1105 = vmatpush.msra.mxu3 %v96_v7  ;;  %v135_v24 = vld [vmem:[%s2105_s3 + $0x18] sm:$0xff]  ;;  %v134_v26 = vld [vmem:[%s2105_s3 + $0x10] sm:$0xff]  ;;  %v133_v28 = vld [vmem:[%s2105_s3 + $0x8] sm:$0xff] }
   0xa   :  { %152 = vmatpush.msra.mxu0 %v143_v8  ;;  %1090 = vmatpush.msra.mxu2 %v143_v8  ;;  %v87_v25 = vld [vmem:[%s2106_s2 + $0x18] sm:$0xff]  ;;  %v86_v27 = vld [vmem:[%s2106_s2 + $0x10] sm:$0xff]  ;;  %v20_v29 = vld [vmem:[%s2107_s0] sm:$0xff] }
   0xb   :  { %265 = vmatpush.msra.mxu1 %v95_v9  ;;  %1106 = vmatpush.msra.mxu3 %v95_v9  ;;  %v52_v30 = vld [vmem:[%s2108_s1] sm:$0xff]  ;;  %v85_v33 = vld [vmem:[%s2106_s2 + $0x8] sm:$0xff]  ;;  %v22_v44 = vld [vmem:[%s2107_s0 + $0x10] sm:$0xff] }
   0xc   :  { %153 = vmatpush.msra.mxu0 %v142_v10  ;;  %1091 = vmatpush.msra.mxu2 %v142_v10  ;;  %v36_v31 = vld [vmem:[%s2107_s0 + $0x80] sm:$0xff]  ;;  %v100_v36 = vsub.f32 %v52_v30, %v20_v29  ;;  %v21_v38 = vld [vmem:[%s2107_s0 + $0x8] sm:$0xff]  ;;  %v54_v45 = vld [vmem:[%s2108_s1 + $0x10] sm:$0xff] }
   0xd   :  { %266 = vmatpush.msra.mxu1 %v94_v11  ;;  %1107 = vmatpush.msra.mxu3 %v94_v11  ;;  %v68_v32 = vld [vmem:[%s2108_s1 + $0x80] sm:$0xff]  ;;  %v53_v39 = vld [vmem:[%s2108_s1 + $0x8] sm:$0xff]  ;;  %v38_v46 = vld [vmem:[%s2107_s0 + $0x90] sm:$0xff]  ;;  %v102_v48 = vsub.f32 %v54_v45, %v22_v44 }
   0xe   :  { %154 = vmatpush.msra.mxu0 %v141_v12  ;;  %1092 = vmatpush.msra.mxu2 %v141_v12  ;;  %v132_v34 = vld [vmem:[%s2105_s3] sm:$0xff]  ;;  %v116_v37 = vsub.f32 %v68_v32, %v36_v31  ;;  %v37_v40 = vld [vmem:[%s2107_s0 + $0x88] sm:$0xff]  ;;  %v101_v42 = vsub.f32 %v53_v39, %v21_v38  ;;  %v70_v47 = vld [vmem:[%s2108_s1 + $0x90] sm:$0xff] }
   0xf   :  { %267 = vmatpush.msra.mxu1 %v93_v13  ;;  %1108 = vmatpush.msra.mxu3 %v93_v13  ;;  %v84_v35 = vld [vmem:[%s2106_s2] sm:$0xff]  ;;  %v69_v41 = vld [vmem:[%s2108_s1 + $0x88] sm:$0xff]  ;;  %v118_v49 = vsub.f32 %v70_v47, %v38_v46  ;;  %v23_v50 = vld [vmem:[%s2107_s0 + $0x18] sm:$0xff] }
  0x10   :  { %155 = vmatpush.msra.mxu0 %v140_v14  ;;  %1093 = vmatpush.msra.mxu2 %v140_v14  ;;  %v117_v43 = vsub.f32 %v69_v41, %v37_v40  ;;  %v55_v51 = vld [vmem:[%s2108_s1 + $0x18] sm:$0xff]  ;;  %v24_v56 = vld [vmem:[%s2107_s0 + $0x20] sm:$0xff]  ;;  %v25_v62 = vld [vmem:[%s2107_s0 + $0x28] sm:$0xff] }
  0x11   :  { %268 = vmatpush.msra.mxu1 %v92_v15  ;;  %1109 = vmatpush.msra.mxu3 %v92_v15  ;;  %v39_v52 = vld [vmem:[%s2107_s0 + $0x98] sm:$0xff]  ;;  %v103_v54 = vsub.f32 %v55_v51, %v23_v50  ;;  %v56_v57 = vld [vmem:[%s2108_s1 + $0x20] sm:$0xff]  ;;  %v57_v63 = vld [vmem:[%s2108_s1 + $0x28] sm:$0xff] }
  0x12   :  { %156 = vmatpush.msra.mxu0 %v139_v16  ;;  %1094 = vmatpush.msra.mxu2 %v139_v16  ;;  %v71_v53 = vld [vmem:[%s2108_s1 + $0x98] sm:$0xff]  ;;  %v40_v58 = vld [vmem:[%s2107_s0 + $0xa0] sm:$0xff]  ;;  %v104_v60 = vsub.f32 %v56_v57, %v24_v56  ;;  %v41_v0 = vld [vmem:[%s2107_s0 + $0xa8] sm:$0xff]  ;;  %v105_v2 = vsub.f32 %v57_v63, %v25_v62 }
  0x13   :  { %269 = vmatpush.msra.mxu1 %v91_v17  ;;  %1110 = vmatpush.msra.mxu3 %v91_v17  ;;  %v119_v55 = vsub.f32 %v71_v53, %v39_v52  ;;  %v72_v59 = vld [vmem:[%s2108_s1 + $0xa0] sm:$0xff]  ;;  %v73_v1 = vld [vmem:[%s2108_s1 + $0xa8] sm:$0xff]  ;;  %v26_v4 = vld [vmem:[%s2107_s0 + $0x30] sm:$0xff] }
  0x14   :  { %157 = vmatpush.msra.mxu0 %v138_v18  ;;  %1095 = vmatpush.msra.mxu2 %v138_v18  ;;  %v120_v61 = vsub.f32 %v72_v59, %v40_v58  ;;  %v121_v3 = vsub.f32 %v73_v1, %v41_v0  ;;  %v58_v5 = vld [vmem:[%s2108_s1 + $0x30] sm:$0xff]  ;;  %v27_v10 = vld [vmem:[%s2107_s0 + $0x38] sm:$0xff]  ;;  %v28_v16 = vld [vmem:[%s2107_s0 + $0x40] sm:$0xff] }
  0x15   :  { %270 = vmatpush.msra.mxu1 %v90_v19  ;;  %1111 = vmatpush.msra.mxu3 %v90_v19  ;;  %v42_v6 = vld [vmem:[%s2107_s0 + $0xb0] sm:$0xff]  ;;  %v106_v8 = vsub.f32 %v58_v5, %v26_v4  ;;  %v59_v11 = vld [vmem:[%s2108_s1 + $0x38] sm:$0xff]  ;;  %v60_v17 = vld [vmem:[%s2108_s1 + $0x40] sm:$0xff] }
  0x16   :  { %158 = vmatpush.msra.mxu0 %v137_v20  ;;  %1096 = vmatpush.msra.mxu2 %v137_v20  ;;  %v74_v7 = vld [vmem:[%s2108_s1 + $0xb0] sm:$0xff]  ;;  %v43_v12 = vld [vmem:[%s2107_s0 + $0xb8] sm:$0xff]  ;;  %v107_v14 = vsub.f32 %v59_v11, %v27_v10  ;;  %v44_v18 = vld [vmem:[%s2107_s0 + $0xc0] sm:$0xff]  ;;  %v108_v20 = vsub.f32 %v60_v17, %v28_v16 }
  0x17   :  { %271 = vmatpush.msra.mxu1 %v89_v21  ;;  %1112 = vmatpush.msra.mxu3 %v89_v21  ;;  %v122_v9 = vsub.f32 %v74_v7, %v42_v6  ;;  %v75_v13 = vld [vmem:[%s2108_s1 + $0xb8] sm:$0xff]  ;;  %v76_v19 = vld [vmem:[%s2108_s1 + $0xc0] sm:$0xff]  ;;  %v46_v30 = vld [vmem:[%s2107_s0 + $0xd0] sm:$0xff] }
  0x18   :  { %159 = vmatpush.msra.mxu0 %v136_v22  ;;  %1097 = vmatpush.msra.mxu2 %v136_v22  ;;  %v123_v15 = vsub.f32 %v75_v13, %v43_v12  ;;  %v124_v21 = vsub.f32 %v76_v19, %v44_v18  ;;  %v29_v22 = vld [vmem:[%s2107_s0 + $0x48] sm:$0xff]  ;;  %v64_v41 = vld [vmem:[%s2108_s1 + $0x60] sm:$0xff]  ;;  %v66_v53 = vld [vmem:[%s2108_s1 + $0x70] sm:$0xff] }
  0x19   :  { %272 = vmatpush.msra.mxu1 %v88_v23  ;;  %1113 = vmatpush.msra.mxu3 %v88_v23  ;;  %v61_v23 = vld [vmem:[%s2108_s1 + $0x48] sm:$0xff]  ;;  %v67_v59 = vld [vmem:[%s2108_s1 + $0x78] sm:$0xff]  ;;  %v1569_v1 = vld [vmem:[%s2109_s4] ss:$0 sm:$0xff] }
  0x1a   :  { %160 = vmatpush.msra.mxu0 %v135_v24  ;;  %1098 = vmatpush.msra.mxu2 %v135_v24  ;;  %v45_v24 = vld [vmem:[%s2107_s0 + $0xc8] sm:$0xff] }
  0x1b   :  { %273 = vmatpush.msra.mxu1 %v87_v25  ;;  %1114 = vmatpush.msra.mxu3 %v87_v25  ;;  %v77_v25 = vld [vmem:[%s2108_s1 + $0xc8] sm:$0xff] }
  0x1c   :  { %161 = vmatpush.msra.mxu0 %v134_v26  ;;  %1099 = vmatpush.msra.mxu2 %v134_v26  ;;  %v109_v26 = vsub.f32 %v61_v23, %v29_v22  ;;  %v65_v47 = vld [vmem:[%s2108_s1 + $0x68] sm:$0xff] }
  0x1d   :  { %274 = vmatpush.msra.mxu1 %v86_v27  ;;  %1115 = vmatpush.msra.mxu3 %v86_v27  ;;  %v125_v27 = vsub.f32 %v77_v25, %v45_v24 }
  0x1e   :  { %162 = vmatpush.msra.mxu0 %v133_v28  ;;  %1100 = vmatpush.msra.mxu2 %v133_v28  ;;  %v30_v28 = vld [vmem:[%s2107_s0 + $0x50] sm:$0xff] }
  0x1f   :  { %275 = vmatpush.msra.mxu1 %v85_v33  ;;  %1116 = vmatpush.msra.mxu3 %v85_v33 }
  0x20   :  { %163 = vmatpush.msra.mxu0 %v132_v34  ;;  %1101 = vmatpush.msra.mxu2 %v132_v34  ;;  %v31_v34 = vld [vmem:[%s2107_s0 + $0x58] sm:$0xff] }
  0x21   :  { %276 = vmatpush.msra.mxu1 %v84_v35  ;;  %1117 = vmatpush.msra.mxu3 %v84_v35  ;;  %v63_v35 = vld [vmem:[%s2108_s1 + $0x58] sm:$0xff] }
  0x22   :  { %164 = vmatmul.f32.vlgmr.msra.gmra.mxu0 %v100_v36  ;;  %212 = vmatmul.f32.vlgmr.msra.gmra.mxu2 %v116_v37  ;;  %v47_v36 = vld [vmem:[%s2107_s0 + $0xd8] sm:$0xff] }
  0x23   :  { %277 = vmatmul.f32.vlgmr.msra.gmra.mxu1 %v20_v29  ;;  %325 = vmatmul.f32.vlgmr.msra.gmra.mxu3 %v36_v31  ;;  %v62_v29 = vld [vmem:[%s2108_s1 + $0x50] sm:$0xff]  ;;  %v79_v37 = vld [vmem:[%s2108_s1 + $0xd8] sm:$0xff] }
  0x24   :  { %v78_v31 = vld [vmem:[%s2108_s1 + $0xd0] sm:$0xff]  ;;  %v110_v32 = vsub.f32 %v62_v29, %v30_v28  ;;  %v127_v39 = vsub.f32 %v79_v37, %v47_v36 }
  0x25   :  { %v126_v33 = vsub.f32 %v78_v31, %v46_v30 }
  0x2a   :  { %167 = vmatmul.f32.gmra.mxu0 %v101_v42  ;;  %215 = vmatmul.f32.gmra.mxu2 %v117_v43  ;;  %v48_v42 = vld [vmem:[%s2107_s0 + $0xe0] sm:$0xff] }
  0x2b   :  { %280 = vmatmul.f32.gmra.mxu1 %v21_v38  ;;  %328 = vmatmul.f32.gmra.mxu3 %v37_v40  ;;  %v111_v38 = vsub.f32 %v63_v35, %v31_v34  ;;  %v32_v40 = vld [vmem:[%s2107_s0 + $0x60] sm:$0xff] }
  0x2c   :  { %v80_v43 = vld [vmem:[%s2108_s1 + $0xe0] sm:$0xff] }
  0x2d   :  { %v128_v45 = vsub.f32 %v80_v43, %v48_v42 }
  0x32   :  { %170 = vmatmul.f32.gmra.mxu0 %v102_v48  ;;  %218 = vmatmul.f32.gmra.mxu2 %v118_v49  ;;  %v49_v48 = vld [vmem:[%s2107_s0 + $0xe8] sm:$0xff] }
  0x33   :  { %283 = vmatmul.f32.gmra.mxu1 %v22_v44  ;;  %331 = vmatmul.f32.gmra.mxu3 %v38_v46  ;;  %v112_v44 = vsub.f32 %v64_v41, %v32_v40  ;;  %v33_v46 = vld [vmem:[%s2107_s0 + $0x68] sm:$0xff] }
  0x34   :  { %v81_v49 = vld [vmem:[%s2108_s1 + $0xe8] sm:$0xff] }
  0x35   :  { %v129_v51 = vsub.f32 %v81_v49, %v49_v48 }
  0x3a   :  { %173 = vmatmul.f32.gmra.mxu0 %v103_v54  ;;  %221 = vmatmul.f32.gmra.mxu2 %v119_v55  ;;  %v50_v54 = vld [vmem:[%s2107_s0 + $0xf0] sm:$0xff] }
  0x3b   :  { %286 = vmatmul.f32.gmra.mxu1 %v23_v50  ;;  %334 = vmatmul.f32.gmra.mxu3 %v39_v52  ;;  %v113_v50 = vsub.f32 %v65_v47, %v33_v46  ;;  %v34_v52 = vld [vmem:[%s2107_s0 + $0x70] sm:$0xff] }
  0x3c   :  { %v82_v55 = vld [vmem:[%s2108_s1 + $0xf0] sm:$0xff] }
  0x3d   :  { %v130_v57 = vsub.f32 %v82_v55, %v50_v54 }
  0x42   :  { %176 = vmatmul.f32.gmra.mxu0 %v104_v60  ;;  %224 = vmatmul.f32.gmra.mxu2 %v120_v61  ;;  %v51_v60 = vld [vmem:[%s2107_s0 + $0xf8] sm:$0xff] }
  0x43   :  { %289 = vmatmul.f32.gmra.mxu1 %v24_v56  ;;  %337 = vmatmul.f32.gmra.mxu3 %v40_v58  ;;  %v114_v56 = vsub.f32 %v66_v53, %v34_v52  ;;  %v35_v58 = vld [vmem:[%s2107_s0 + $0x78] sm:$0xff] }
  0x44   :  { %v83_v61 = vld [vmem:[%s2108_s1 + $0xf8] sm:$0xff] }
  0x45   :  { %v131_v63 = vsub.f32 %v83_v61, %v51_v60 }
  0x4a   :  { %179 = vmatmul.f32.gmra.mxu0 %v105_v2  ;;  %227 = vmatmul.f32.gmra.mxu2 %v121_v3 }
  0x4b   :  { %292 = vmatmul.f32.gmra.mxu1 %v25_v62  ;;  %340 = vmatmul.f32.gmra.mxu3 %v41_v0  ;;  %v115_v62 = vsub.f32 %v67_v59, %v35_v58 }
  0x52   :  { %182 = vmatmul.f32.gmra.mxu0 %v106_v8  ;;  %230 = vmatmul.f32.gmra.mxu2 %v122_v9 }
  0x53   :  { %295 = vmatmul.f32.gmra.mxu1 %v26_v4  ;;  %343 = vmatmul.f32.gmra.mxu3 %v42_v6 }
  0x5a   :  { %185 = vmatmul.f32.gmra.mxu0 %v107_v14  ;;  %233 = vmatmul.f32.gmra.mxu2 %v123_v15 }
  0x5b   :  { %298 = vmatmul.f32.gmra.mxu1 %v27_v10  ;;  %346 = vmatmul.f32.gmra.mxu3 %v43_v12 }
  0x62   :  { %188 = vmatmul.f32.gmra.mxu0 %v108_v20  ;;  %236 = vmatmul.f32.gmra.mxu2 %v124_v21 }
  0x63   :  { %301 = vmatmul.f32.gmra.mxu1 %v28_v16  ;;  %349 = vmatmul.f32.gmra.mxu3 %v44_v18 }
  0x6a   :  { %191 = vmatmul.f32.gmra.mxu0 %v109_v26  ;;  %239 = vmatmul.f32.gmra.mxu2 %v125_v27 }
  0x6b   :  { %304 = vmatmul.f32.gmra.mxu1 %v29_v22  ;;  %352 = vmatmul.f32.gmra.mxu3 %v45_v24 }
  0x72   :  { %194 = vmatmul.f32.gmra.mxu0 %v110_v32  ;;  %242 = vmatmul.f32.gmra.mxu2 %v126_v33 }
  0x73   :  { %307 = vmatmul.f32.gmra.mxu1 %v30_v28  ;;  %355 = vmatmul.f32.gmra.mxu3 %v46_v30 }
  0x7a   :  { %197 = vmatmul.f32.gmra.mxu0 %v111_v38  ;;  %245 = vmatmul.f32.gmra.mxu2 %v127_v39 }
  0x7b   :  { %310 = vmatmul.f32.gmra.mxu1 %v31_v34  ;;  %358 = vmatmul.f32.gmra.mxu3 %v47_v36 }
  0x82   :  { %200 = vmatmul.f32.gmra.mxu0 %v112_v44  ;;  %248 = vmatmul.f32.gmra.mxu2 %v128_v45 }
  0x83   :  { %313 = vmatmul.f32.gmra.mxu1 %v32_v40  ;;  %361 = vmatmul.f32.gmra.mxu3 %v48_v42 }
  0x8a   :  { %203 = vmatmul.f32.gmra.mxu0 %v113_v50  ;;  %251 = vmatmul.f32.gmra.mxu2 %v129_v51 }
  0x8b   :  { %316 = vmatmul.f32.gmra.mxu1 %v33_v46  ;;  %364 = vmatmul.f32.gmra.mxu3 %v49_v48 }
  0x92   :  { %206 = vmatmul.f32.gmra.mxu0 %v114_v56  ;;  %254 = vmatmul.f32.gmra.mxu2 %v130_v57 }
  0x93   :  { %319 = vmatmul.f32.gmra.mxu1 %v34_v52  ;;  %367 = vmatmul.f32.gmra.mxu3 %v50_v54 }
  0x9a   :  { %209 = vmatmul.f32.gmra.mxu0 %v115_v62  ;;  %257 = vmatmul.f32.gmra.mxu2 %v131_v63 }
  0x9b   :  { %322 = vmatmul.f32.gmra.mxu1 %v35_v58  ;;  %370 = vmatmul.f32.gmra.mxu3 %v51_v60 }
  0x9f   :  { %v165_v0 = vpop.f32.mrf.mxu0 }
  0xa0   :  { %v278_v2 = vpop.f32.mrf.mxu1 }
  0xa1   :  { %v279_v3 = vadd.f32 %v278_v2, %v165_v0 }
  0xa3   :  { %v378_v4 = vadd.f32 %v1569_v1, %v279_v3 }
  0xa5   :  { %v1054_v5 = vmul.f32 -1.442695, %v378_v4  ;;  %v213_v6 = vpop.f32.mrf.mxu2 }
  0xa6   :  { %v326_v7 = vpop.f32.mrf.mxu3 }
  0xa7   :  { %1119 = vpow2.f32 %v1054_v5  ;;  %v327_v8 = vadd.f32 %v326_v7, %v213_v6  ;;  %v168_v9 = vpop.f32.mrf.mxu0 }
  0xa8   :  { %v281_v10 = vpop.f32.mrf.mxu1 }
  0xa9   :  { %v394_v11 = vadd.f32 %v1569_v1, %v327_v8  ;;  %v282_v12 = vadd.f32 %v281_v10, %v168_v9 }
  0xab   :  { %v1070_v13 = vmul.f32 -1.442695, %v394_v11  ;;  %v379_v14 = vadd.f32 %v1569_v1, %v282_v12 }
  0xad   :  { %v1120_v15 = vpop.eup %1119  ;;  %1121 = vpow2.f32 %v1070_v13  ;;  %v1055_v16 = vmul.f32 -1.442695, %v379_v14  ;;  %v216_v17 = vpop.f32.mrf.mxu2 }
  0xae   :  { %v506_v18 = vadd.f32 1.0, %v1120_v15  ;;  %v329_v19 = vpop.f32.mrf.mxu3 }
  0xaf   :  { %1123 = vpow2.f32 %v1055_v16  ;;  %v330_v20 = vadd.f32 %v329_v19, %v216_v17  ;;  %v171_v21 = vpop.f32.mrf.mxu0 }
  0xb0   :  { %1125 = vrcp.f32 %v506_v18  ;;  %v284_v22 = vpop.f32.mrf.mxu1  ;;  %v547_v37 = vand.u32 2147483647, %v506_v18  ;;  %v549_v41 = vand.u32 2147483648, %v506_v18  ;;  %vm543_vm0 = vweird.f32 %v506_v18 }
  0xb1   :  { %v395_v23 = vadd.f32 %v1569_v1, %v330_v20  ;;  %v285_v24 = vadd.f32 %v284_v22, %v171_v21 }
  0xb2   :  { %vm1583_vm2 = vcmp.eq.f32.partialorder %v547_v37, 8.507059e+37  ;;  %v550_v53 = vor.u32 1.1754944e-38, %v549_v41 }
  0xb3   :  { %v1122_v25 = vpop.eup %1121  ;;  %v1071_v26 = vmul.f32 -1.442695, %v395_v23  ;;  %v380_v27 = vadd.f32 %v1569_v1, %v285_v24 }
  0xb4   :  { %v1576_v28 = vadd.f32 1.0, %v1122_v25 }
  0xb5   :  { %v1124_v29 = vpop.eup %1123  ;;  %1127 = vpow2.f32 %v1071_v26  ;;  %v1056_v30 = vmul.f32 -1.442695, %v380_v27  ;;  %v219_v31 = vpop.f32.mrf.mxu2 }
  0xb6   :  { %v1126_v32 = vpop.eup %1125  ;;  %1129 = vrcp.f32 %v1576_v28  ;;  %v332_v33 = vpop.f32.mrf.mxu3  ;;  %v1579_v35 = vadd.f32 1.0, %v1124_v29  ;;  %v787_v48 = vand.u32 2147483647, %v1576_v28  ;;  %v789_v55 = vand.u32 2147483648, %v1576_v28 }
  0xb7   :  { %v539_v34 = vmul.f32 %v1126_v32, %v506_v18  ;;  %1131 = vpow2.f32 %v1056_v30  ;;  %v174_v36 = vpop.f32.mrf.mxu0  ;;  %v333_v38 = vadd.f32 %v332_v33, %v219_v31  ;;  %vm544_vm1 = vweird.f32 %v1126_v32 }
  0xb8   :  { %v287_v39 = vpop.f32.mrf.mxu1  ;;  %1133 = vrcp.f32 %v1579_v35  ;;  %vm545_vm3 = vmor %vm543_vm0, %vm544_vm1  ;;  %v562_v57 = vand.u32 2147483647, %v1579_v35  ;;  %v564_v58 = vand.u32 2147483648, %v1579_v35  ;;  %vm783_vm4 = vweird.f32 %v1576_v28 }
  0xb9   :  { %v540_v40 = vsub.f32 1.0, %v539_v34  ;;  %v396_v42 = vadd.f32 %v1569_v1, %v333_v38  ;;  %v288_v43 = vadd.f32 %v287_v39, %v174_v36  ;;  %vm1601_vm5 = vcmp.eq.f32.partialorder %v787_v48, 8.507059e+37 }
  0xba   :  { %v790_v8 = vor.u32 1.1754944e-38, %v789_v55  ;;  %vm558_vm7 = vweird.f32 %v1579_v35  ;;  %vm1611_vm8 = vcmp.eq.f32.partialorder %v562_v57, 8.507059e+37  ;;  %v565_v13 = vor.u32 1.1754944e-38, %v564_v58 }
  0xbb   :  { %v1128_v44 = vpop.eup %1127  ;;  %v541_v45 = vmul.f32 %v1126_v32, %v540_v40  ;;  %v1072_v50 = vmul.f32 -1.442695, %v396_v42  ;;  %v381_v59 = vadd.f32 %v1569_v1, %v288_v43 }
  0xbc   :  { %v1130_v46 = vpop.eup %1129  ;;  %v1588_v49 = vadd.f32 1.0, %v1128_v44 }
  0xbd   :  { %v1132_v51 = vpop.eup %1131  ;;  %v542_v52 = vadd.f32 %v1126_v32, %v541_v45  ;;  %v779_v54 = vmul.f32 %v1130_v46, %v1576_v28  ;;  %v222_v56 = vpop.f32.mrf.mxu2  ;;  %vm784_vm6 = vweird.f32 %v1130_v46  ;;  %v1057_v11 = vmul.f32 -1.442695, %v381_v59 }
  0xbe   :  { %1135 = vrcp.f32 %v1588_v49  ;;  %v335_v60 = vpop.f32.mrf.mxu3  ;;  %v1134_v61 = vpop.eup %1133  ;;  %v1596_v0 = vadd.f32 1.0, %v1132_v51  ;;  %vm785_vm9 = vmor %vm783_vm4, %vm784_vm6  ;;  %v804_v18 = vand.u32 2147483648, %v1588_v49  ;;  %vm798_vm11 = vweird.f32 %v1588_v49 }
  0xbf   :  { %v546_v62 = vsel %vm545_vm3, %v1126_v32, %v542_v52  ;;  %v780_v63 = vsub.f32 1.0, %v779_v54  ;;  %1137 = vpow2.f32 %v1072_v50  ;;  %v177_v2 = vpop.f32.mrf.mxu0  ;;  %v554_v5 = vmul.f32 %v1134_v61, %v1579_v35 }
  0xc0   :  { %v551_v3 = vsel %vm1583_vm2, %v550_v53, %v546_v62  ;;  %v290_v6 = vpop.f32.mrf.mxu1  ;;  %1139 = vrcp.f32 %v1596_v0  ;;  %v336_v14 = vadd.f32 %v335_v60, %v222_v56  ;;  %vm559_vm10 = vweird.f32 %v1134_v61 }
  0xc1   :  { %1018 = vst [vmem:[%s2110_s5] sm:$0xff] %v551_v3  ;;  %v781_v7 = vmul.f32 %v1130_v46, %v780_v63  ;;  %v555_v9 = vsub.f32 1.0, %v554_v5  ;;  %v291_v15 = vadd.f32 %v290_v6, %v177_v2  ;;  %1141 = vpow2.f32 %v1057_v11  ;;  %vm560_vm12 = vmor %vm558_vm7, %vm559_vm10 }
  0xc2   :  { %v397_v22 = vadd.f32 %v1569_v1, %v336_v14  ;;  %v802_v31 = vand.u32 2147483647, %v1588_v49  ;;  %v805_v37 = vor.u32 1.1754944e-38, %v804_v18  ;;  %vm573_vm14 = vweird.f32 %v1596_v0 }
  0xc3   :  { %v782_v12 = vadd.f32 %v1130_v46, %v781_v7  ;;  %v556_v17 = vmul.f32 %v1134_v61, %v555_v9  ;;  %v382_v27 = vadd.f32 %v1569_v1, %v291_v15  ;;  %v577_v43 = vand.u32 2147483647, %v1596_v0 }
  0xc4   :  { %v1136_v16 = vpop.eup %1135  ;;  %v1073_v32 = vmul.f32 -1.442695, %v397_v22  ;;  %vm803_vm1 = vcmp.eq.f32.partialorder %v802_v31, 8.507059e+37 }
  0xc5   :  { %v1138_v19 = vpop.eup %1137  ;;  %v786_v20 = vsel %vm785_vm9, %v1130_v46, %v782_v12  ;;  %v794_v21 = vmul.f32 %v1136_v16, %v1588_v49  ;;  %v225_v23 = vpop.f32.mrf.mxu2  ;;  %v557_v25 = vadd.f32 %v1134_v61, %v556_v17  ;;  %vm799_vm13 = vweird.f32 %v1136_v16 }
  0xc6   :  { %v791_v24 = vsel %vm1601_vm5, %v790_v8, %v786_v20  ;;  %v1623_v26 = vadd.f32 1.0, %v1138_v19  ;;  %v338_v28 = vpop.f32.mrf.mxu3  ;;  %v1140_v29 = vpop.eup %1139  ;;  %v1058_v44 = vmul.f32 -1.442695, %v382_v27  ;;  %v579_v46 = vand.u32 2147483648, %v1596_v0  ;;  %vm800_vm15 = vmor %vm798_vm11, %vm799_vm13 }
  0xc7   :  { %1034 = vst [vmem:[%s2110_s5 + $0x80] sm:$0xff] %v791_v24  ;;  %v795_v30 = vsub.f32 1.0, %v794_v21  ;;  %v339_v33 = vadd.f32 %v338_v28, %v225_v23  ;;  %v180_v34 = vpop.f32.mrf.mxu0  ;;  %v561_v36 = vsel %vm560_vm12, %v1134_v61, %v557_v25  ;;  %v569_v38 = vmul.f32 %v1140_v29, %v1596_v0  ;;  %v1142_v35 = vpop.eup %1141 }
  0xc8   :  { %1143 = vrcp.f32 %v1623_v26  ;;  %v293_v39 = vpop.f32.mrf.mxu1  ;;  %v566_v40 = vsel %vm1611_vm8, %v565_v13, %v561_v36  ;;  %v1643_v47 = vadd.f32 1.0, %v1142_v35  ;;  %vm574_vm0 = vweird.f32 %v1140_v29 }
  0xc9   :  { %v796_v41 = vmul.f32 %v1136_v16, %v795_v30  ;;  %1019 = vst [vmem:[%s2110_s5 + $0x8] sm:$0xff] %v566_v40  ;;  %v570_v42 = vsub.f32 1.0, %v569_v38  ;;  %1145 = vpow2.f32 %v1073_v32  ;;  %v398_v48 = vadd.f32 %v1569_v1, %v339_v33  ;;  %vm575_vm2 = vmor %vm573_vm14, %vm574_vm0 }
  0xca   :  { %1147 = vpow2.f32 %v1058_v44  ;;  %v294_v51 = vadd.f32 %v293_v39, %v180_v34  ;;  %v817_v57 = vand.u32 2147483647, %v1623_v26  ;;  %v580_v49 = vor.u32 1.1754944e-38, %v579_v46 }
  0xcb   :  { %v797_v45 = vadd.f32 %v1136_v16, %v796_v41  ;;  %v571_v50 = vmul.f32 %v1140_v29, %v570_v42  ;;  %1149 = vrcp.f32 %v1643_v47  ;;  %v1074_v58 = vmul.f32 -1.442695, %v398_v48 }
  0xcc   :  { %v819_v61 = vand.u32 2147483648, %v1623_v26  ;;  %v383_v62 = vadd.f32 %v1569_v1, %v294_v51  ;;  %vm578_vm3 = vcmp.eq.f32.partialorder %v577_v43, 8.507059e+37  ;;  %vm813_vm4 = vweird.f32 %v1623_v26 }
  0xcd   :  { %v801_v52 = vsel %vm800_vm15, %v1136_v16, %v797_v45  ;;  %v228_v53 = vpop.f32.mrf.mxu2  ;;  %v572_v56 = vadd.f32 %v1140_v29, %v571_v50  ;;  %1151 = vpow2.f32 %v1074_v58  ;;  %vm1664_vm5 = vcmp.eq.f32.partialorder %v817_v57, 8.507059e+37 }
  0xce   :  { %v1144_v54 = vpop.eup %1143  ;;  %v806_v55 = vsel %vm803_vm1, %v805_v37, %v801_v52  ;;  %v341_v59 = vpop.f32.mrf.mxu3  ;;  %v1059_v0 = vmul.f32 -1.442695, %v383_v62  ;;  %v820_v14 = vor.u32 1.1754944e-38, %v819_v61  ;;  %vm588_vm7 = vweird.f32 %v1643_v47 }
  0xcf   :  { %1035 = vst [vmem:[%s2110_s5 + $0x88] sm:$0xff] %v806_v55  ;;  %v809_v60 = vmul.f32 %v1144_v54, %v1623_v26  ;;  %v183_v63 = vpop.f32.mrf.mxu0  ;;  %v1146_v2 = vpop.eup %1145  ;;  %v576_v3 = vsel %vm575_vm2, %v1140_v29, %v572_v56  ;;  %v342_v4 = vadd.f32 %v341_v59, %v228_v53  ;;  %vm814_vm6 = vweird.f32 %v1144_v54 }
  0xd0   :  { %v296_v5 = vpop.f32.mrf.mxu1  ;;  %v581_v6 = vsel %vm578_vm3, %v580_v49, %v576_v3  ;;  %v1658_v8 = vadd.f32 1.0, %v1146_v2  ;;  %v1148_v9 = vpop.eup %1147  ;;  %v592_v19 = vand.u32 2147483647, %v1643_v47  ;;  %vm815_vm8 = vmor %vm813_vm4, %vm814_vm6  ;;  %v594_v24 = vand.u32 2147483648, %v1643_v47 }
  0xd1   :  { %v810_v7 = vsub.f32 1.0, %v809_v60  ;;  %1020 = vst [vmem:[%s2110_s5 + $0x10] sm:$0xff] %v581_v6  ;;  %v399_v11 = vadd.f32 %v1569_v1, %v342_v4  ;;  %v1150_v12 = vpop.eup %1149  ;;  %v1672_v16 = vadd.f32 1.0, %v1148_v9  ;;  %v297_v17 = vadd.f32 %v296_v5, %v183_v63 }
  0xd2   :  { %1153 = vrcp.f32 %v1658_v8  ;;  %v584_v15 = vmul.f32 %v1150_v12, %v1643_v47  ;;  %v832_v25 = vand.u32 2147483647, %v1658_v8  ;;  %vm589_vm9 = vweird.f32 %v1150_v12 }
  0xd3   :  { %v811_v13 = vmul.f32 %v1144_v54, %v810_v7  ;;  %1155 = vpow2.f32 %v1059_v0  ;;  %v1075_v20 = vmul.f32 -1.442695, %v399_v11  ;;  %v1152_v22 = vpop.eup %1151  ;;  %v834_v29 = vand.u32 2147483648, %v1658_v8  ;;  %vm590_vm12 = vmor %vm588_vm7, %vm589_vm9 }
  0xd4   :  { %v585_v23 = vsub.f32 1.0, %v584_v15  ;;  %1157 = vrcp.f32 %v1672_v16  ;;  %v1681_v30 = vadd.f32 1.0, %v1152_v22  ;;  %v384_v33 = vadd.f32 %v1569_v1, %v297_v17 }
  0xd5   :  { %v812_v18 = vadd.f32 %v1144_v54, %v811_v13  ;;  %v231_v21 = vpop.f32.mrf.mxu2  ;;  %1159 = vpow2.f32 %v1075_v20  ;;  %vm1689_vm10 = vcmp.eq.f32.partialorder %v592_v19, 8.507059e+37  ;;  %v607_v38 = vand.u32 2147483647, %v1672_v16 }
  0xd6   :  { %v344_v27 = vpop.f32.mrf.mxu3  ;;  %v586_v26 = vmul.f32 %v1150_v12, %v585_v23  ;;  %1161 = vrcp.f32 %v1681_v30  ;;  %v595_v40 = vor.u32 1.1754944e-38, %v594_v24  ;;  %vm828_vm11 = vweird.f32 %v1658_v8 }
  0xd7   :  { %v816_v28 = vsel %vm815_vm8, %v1144_v54, %v812_v18  ;;  %v186_v31 = vpop.f32.mrf.mxu0  ;;  %vm1700_vm13 = vcmp.eq.f32.partialorder %v832_v25, 8.507059e+37  ;;  %v835_v43 = vor.u32 1.1754944e-38, %v834_v29  ;;  %vm603_vm14 = vweird.f32 %v1672_v16 }
  0xd8   :  { %v821_v32 = vsel %vm1664_vm5, %v820_v14, %v816_v28  ;;  %v299_v34 = vpop.f32.mrf.mxu1  ;;  %v1154_v36 = vpop.eup %1153  ;;  %v587_v39 = vadd.f32 %v1150_v12, %v586_v26  ;;  %v1060_v44 = vmul.f32 -1.442695, %v384_v33  ;;  %v609_v50 = vand.u32 2147483648, %v1672_v16 }
  0xd9   :  { %1036 = vst [vmem:[%s2110_s5 + $0x90] sm:$0xff] %v821_v32  ;;  %v824_v41 = vmul.f32 %v1154_v36, %v1658_v8  ;;  %v1156_v35 = vpop.eup %1155  ;;  %vm829_vm15 = vweird.f32 %v1154_v36  ;;  %vm1711_vm0 = vcmp.eq.f32.partialorder %v607_v38, 8.507059e+37  ;;  %v847_v54 = vand.u32 2147483647, %v1681_v30 }
  0xda   :  { %v1158_v45 = vpop.eup %1157  ;;  %v591_v46 = vsel %vm590_vm12, %v1150_v12, %v587_v39  ;;  %v1706_v51 = vadd.f32 1.0, %v1156_v35  ;;  %v849_v58 = vand.u32 2147483648, %v1681_v30  ;;  %v345_v59 = vadd.f32 %v344_v27, %v231_v21  ;;  %vm830_vm2 = vmor %vm828_vm11, %vm829_vm15 }
  0xdb   :  { %v825_v48 = vsub.f32 1.0, %v824_v41  ;;  %v596_v52 = vsel %vm1689_vm10, %v595_v40, %v591_v46  ;;  %v599_v47 = vmul.f32 %v1158_v45, %v1672_v16  ;;  %v1160_v56 = vpop.eup %1159  ;;  %v300_v63 = vadd.f32 %v299_v34, %v186_v31 }
  0xdc   :  { %1021 = vst [vmem:[%s2110_s5 + $0x18] sm:$0xff] %v596_v52  ;;  %1163 = vrcp.f32 %v1706_v51  ;;  %v1162_v60 = vpop.eup %1161  ;;  %v1721_v62 = vadd.f32 1.0, %v1160_v56  ;;  %v610_v4 = vor.u32 1.1754944e-38, %v609_v50  ;;  %vm843_vm1 = vweird.f32 %v1681_v30 }
  0xdd   :  { %v234_v55 = vpop.f32.mrf.mxu2  ;;  %v826_v57 = vmul.f32 %v1154_v36, %v825_v48  ;;  %v600_v61 = vsub.f32 1.0, %v599_v47  ;;  %1165 = vpow2.f32 %v1060_v44  ;;  %v839_v5 = vmul.f32 %v1162_v60, %v1681_v30 }
  0xde   :  { %v347_v49 = vpop.f32.mrf.mxu3  ;;  %vm604_vm3 = vweird.f32 %v1158_v45  ;;  %vm1728_vm4 = vcmp.eq.f32.partialorder %v847_v54, 8.507059e+37  ;;  %1167 = vrcp.f32 %v1721_v62  ;;  %v850_v11 = vor.u32 1.1754944e-38, %v849_v58 }
  0xdf   :  { %v189_v2 = vpop.f32.mrf.mxu0  ;;  %v827_v3 = vadd.f32 %v1154_v36, %v826_v57  ;;  %v601_v7 = vmul.f32 %v1158_v45, %v600_v61  ;;  %v840_v10 = vsub.f32 1.0, %v839_v5  ;;  %vm618_vm5 = vweird.f32 %v1706_v51  ;;  %vm605_vm6 = vmor %vm603_vm14, %vm604_vm3 }
  0xe0   :  { %v302_v6 = vpop.f32.mrf.mxu1  ;;  %v400_v8 = vadd.f32 %v1569_v1, %v345_v59  ;;  %v385_v14 = vadd.f32 %v1569_v1, %v300_v63  ;;  %vm844_vm7 = vweird.f32 %v1162_v60  ;;  %v622_v18 = vand.u32 2147483647, %v1706_v51 }
  0xe1   :  { %v831_v9 = vsel %vm830_vm2, %v1154_v36, %v827_v3  ;;  %v602_v13 = vadd.f32 %v1158_v45, %v601_v7  ;;  %v841_v17 = vmul.f32 %v1162_v60, %v840_v10  ;;  %v348_v19 = vadd.f32 %v347_v49, %v234_v55  ;;  %vm845_vm8 = vmor %vm843_vm1, %vm844_vm7 }
  0xe2   :  { %v836_v12 = vsel %vm1700_vm13, %v835_v43, %v831_v9  ;;  %v1164_v15 = vpop.eup %1163  ;;  %v624_v23 = vand.u32 2147483648, %v1706_v51  ;;  %v1076_v24 = vmul.f32 -1.442695, %v400_v8  ;;  %v1061_v16 = vmul.f32 -1.442695, %v385_v14 }
  0xe3   :  { %1037 = vst [vmem:[%s2110_s5 + $0x98] sm:$0xff] %v836_v12  ;;  %v1166_v20 = vpop.eup %1165  ;;  %v606_v21 = vsel %vm605_vm6, %v1158_v45, %v602_v13  ;;  %v614_v22 = vmul.f32 %v1164_v15, %v1706_v51  ;;  %v842_v28 = vadd.f32 %v1162_v60, %v841_v17  ;;  %v401_v33 = vadd.f32 %v1569_v1, %v348_v19 }
  0xe4   :  { %v611_v27 = vsel %vm1711_vm0, %v610_v4, %v606_v21  ;;  %v1748_v29 = vadd.f32 1.0, %v1166_v20  ;;  %v1168_v32 = vpop.eup %1167  ;;  %1169 = vpow2.f32 %v1076_v24  ;;  %v303_v34 = vadd.f32 %v302_v6, %v189_v2 }
  0xe5   :  { %v237_v25 = vpop.f32.mrf.mxu2  ;;  %1022 = vst [vmem:[%s2110_s5 + $0x20] sm:$0xff] %v611_v27  ;;  %v615_v26 = vsub.f32 1.0, %v614_v22  ;;  %v846_v37 = vsel %vm845_vm8, %v1162_v60, %v842_v28  ;;  %vm1757_vm9 = vcmp.eq.f32.partialorder %v622_v18, 8.507059e+37  ;;  %v854_v39 = vmul.f32 %v1168_v32, %v1721_v62 }
  0xe6   :  { %v350_v31 = vpop.f32.mrf.mxu3  ;;  %1171 = vrcp.f32 %v1748_v29  ;;  %v851_v30 = vsel %vm1728_vm4, %v850_v11, %v846_v37  ;;  %vm619_vm10 = vweird.f32 %v1164_v15  ;;  %v625_v35 = vor.u32 1.1754944e-38, %v624_v23 }
  0xe7   :  { %v192_v36 = vpop.f32.mrf.mxu0  ;;  %v616_v41 = vmul.f32 %v1164_v15, %v615_v26  ;;  %1038 = vst [vmem:[%s2110_s5 + $0xa0] sm:$0xff] %v851_v30  ;;  %v855_v42 = vsub.f32 1.0, %v854_v39  ;;  %v862_v43 = vand.u32 2147483647, %v1721_v62  ;;  %1173 = vpow2.f32 %v1061_v16  ;;  %vm620_vm11 = vmor %vm618_vm5, %vm619_vm10 }
  0xe8   :  { %v305_v40 = vpop.f32.mrf.mxu1  ;;  %v1077_v44 = vmul.f32 -1.442695, %v401_v33  ;;  %v864_v46 = vand.u32 2147483648, %v1721_v62  ;;  %v386_v48 = vadd.f32 %v1569_v1, %v303_v34  ;;  %v351_v50 = vadd.f32 %v350_v31, %v237_v25 }
  0xe9   :  { %v617_v45 = vadd.f32 %v1164_v15, %v616_v41  ;;  %v856_v52 = vmul.f32 %v1168_v32, %v855_v42  ;;  %vm859_vm12 = vweird.f32 %v1168_v32  ;;  %v306_v47 = vadd.f32 %v305_v40, %v192_v36 }
  0xea   :  { %1175 = vpow2.f32 %v1077_v44  ;;  %v1170_v53 = vpop.eup %1169  ;;  %vm858_vm13 = vweird.f32 %v1721_v62  ;;  %v1062_v55 = vmul.f32 -1.442695, %v386_v48  ;;  %v402_v56 = vadd.f32 %v1569_v1, %v351_v50 }
  0xeb   :  { %v621_v54 = vsel %vm620_vm11, %v1164_v15, %v617_v45  ;;  %v857_v49 = vadd.f32 %v1168_v32, %v856_v52  ;;  %v1777_v60 = vadd.f32 1.0, %v1170_v53  ;;  %v387_v51 = vadd.f32 %v1569_v1, %v306_v47  ;;  %vm860_vm14 = vmor %vm858_vm13, %vm859_vm12 }
  0xec   :  { %v1172_v58 = vpop.eup %1171  ;;  %v626_v59 = vsel %vm1757_vm9, %v625_v35, %v621_v54  ;;  %v865_v62 = vor.u32 1.1754944e-38, %v864_v46  ;;  %1177 = vpow2.f32 %v1062_v55  ;;  %v1078_v2 = vmul.f32 -1.442695, %v402_v56 }
  0xed   :  { %v240_v57 = vpop.f32.mrf.mxu2  ;;  %1023 = vst [vmem:[%s2110_s5 + $0x28] sm:$0xff] %v626_v59  ;;  %v629_v63 = vmul.f32 %v1172_v58, %v1748_v29  ;;  %v1174_v3 = vpop.eup %1173  ;;  %v861_v4 = vsel %vm860_vm14, %v1168_v32, %v857_v49  ;;  %vm863_vm15 = vcmp.eq.f32.partialorder %v862_v43, 8.507059e+37  ;;  %vm633_vm0 = vweird.f32 %v1748_v29 }
  0xee   :  { %v353_v61 = vpop.f32.mrf.mxu3  ;;  %1179 = vrcp.f32 %v1777_v60  ;;  %v866_v7 = vsel %vm863_vm15, %v865_v62, %v861_v4  ;;  %v637_v9 = vand.u32 2147483647, %v1748_v29  ;;  %v1788_v10 = vadd.f32 1.0, %v1174_v3 }
  0xef   :  { %v195_v5 = vpop.f32.mrf.mxu0  ;;  %v630_v0 = vsub.f32 1.0, %v629_v63  ;;  %1039 = vst [vmem:[%s2110_s5 + $0xa8] sm:$0xff] %v866_v7  ;;  %vm634_vm1 = vweird.f32 %v1172_v58  ;;  %v639_v12 = vand.u32 2147483648, %v1748_v29  ;;  %1181 = vpow2.f32 %v1078_v2 }
  0xf0   :  { %v308_v6 = vpop.f32.mrf.mxu1  ;;  %v1176_v11 = vpop.eup %1175  ;;  %v1063_v13 = vmul.f32 -1.442695, %v387_v51  ;;  %v877_v14 = vand.u32 2147483647, %v1777_v60  ;;  %1183 = vrcp.f32 %v1788_v10  ;;  %v354_v15 = vadd.f32 %v353_v61, %v240_v57  ;;  %vm635_vm3 = vmor %vm633_vm0, %vm634_vm1 }
  0xf1   :  { %v631_v8 = vmul.f32 %v1172_v58, %v630_v0  ;;  %v879_v17 = vand.u32 2147483648, %v1777_v60  ;;  %v1797_v18 = vadd.f32 1.0, %v1176_v11  ;;  %vm1799_vm2 = vcmp.eq.f32.partialorder %v637_v9, 8.507059e+37 }
  0xf2   :  { %v1178_v19 = vpop.eup %1177  ;;  %1185 = vpow2.f32 %v1063_v13  ;;  %v640_v24 = vor.u32 1.1754944e-38, %v639_v12  ;;  %vm873_vm4 = vweird.f32 %v1777_v60  ;;  %v652_v25 = vand.u32 2147483647, %v1788_v10 }
  0xf3   :  { %v632_v20 = vadd.f32 %v1172_v58, %v631_v8  ;;  %1187 = vrcp.f32 %v1797_v18  ;;  %vm1814_vm5 = vcmp.eq.f32.partialorder %v877_v14, 8.507059e+37  ;;  %v654_v32 = vand.u32 2147483648, %v1788_v10 }
  0xf4   :  { %v1180_v23 = vpop.eup %1179  ;;  %v403_v29 = vadd.f32 %v1569_v1, %v354_v15  ;;  %v880_v34 = vor.u32 1.1754944e-38, %v879_v17  ;;  %v1822_v36 = vadd.f32 1.0, %v1178_v19  ;;  %v309_v37 = vadd.f32 %v308_v6, %v195_v5 }
  0xf5   :  { %v1803_v22 = vpop.f32.mrf.mxu2  ;;  %v636_v28 = vsel %vm635_vm3, %v1172_v58, %v632_v20  ;;  %v869_v16 = vmul.f32 %v1180_v23, %v1777_v60  ;;  %v1182_v26 = vpop.eup %1181  ;;  %v892_v40 = vand.u32 2147483647, %v1797_v18  ;;  %v894_v30 = vand.u32 2147483648, %v1797_v18 }
  0xf6   :  { %v1811_v27 = vpop.f32.mrf.mxu3  ;;  %v641_v33 = vsel %vm1799_vm2, %v640_v24, %v636_v28  ;;  %v1184_v38 = vpop.eup %1183  ;;  %v1829_v41 = vadd.f32 1.0, %v1182_v26  ;;  %vm648_vm6 = vweird.f32 %v1788_v10  ;;  %vm1833_vm7 = vcmp.eq.f32.partialorder %v652_v25, 8.507059e+37 }
  0xf7   :  { %1024 = vst [vmem:[%s2110_s5 + $0x30] sm:$0xff] %v641_v33  ;;  %v870_v39 = vsub.f32 1.0, %v869_v16  ;;  %v644_v35 = vmul.f32 %v1184_v38, %v1788_v10  ;;  %1189 = vrcp.f32 %v1822_v36  ;;  %v1838_v43 = vpop.f32.mrf.mxu0  ;;  %vm874_vm8 = vweird.f32 %v1180_v23 }
  0xf8   :  { %v1840_v44 = vpop.f32.mrf.mxu1  ;;  %v1186_v45 = vpop.eup %1185  ;;  %v655_v48 = vor.u32 1.1754944e-38, %v654_v32  ;;  %v1079_v50 = vmul.f32 -1.442695, %v403_v29  ;;  %vm888_vm9 = vweird.f32 %v1797_v18  ;;  %1191 = vrcp.f32 %v1829_v41  ;;  %vm875_vm12 = vmor %vm873_vm4, %vm874_vm8 }
  0xf9   :  { %v871_v46 = vmul.f32 %v1180_v23, %v870_v39  ;;  %v1188_v52 = vpop.eup %1187  ;;  %v645_v47 = vsub.f32 1.0, %v644_v35  ;;  %v388_v53 = vadd.f32 %v1569_v1, %v309_v37  ;;  %vm649_vm10 = vweird.f32 %v1184_v38 }
  0xfa   :  { %v884_v55 = vmul.f32 %v1188_v52, %v1797_v18  ;;  %vm1846_vm11 = vcmp.eq.f32.partialorder %v892_v40, 8.507059e+37  ;;  %v895_v57 = vor.u32 1.1754944e-38, %v894_v30  ;;  %vm663_vm13 = vweird.f32 %v1822_v36  ;;  %vm650_vm14 = vmor %vm648_vm6, %vm649_vm10 }
  0xfb   :  { %v872_v54 = vadd.f32 %v1180_v23, %v871_v46  ;;  %v646_v59 = vmul.f32 %v1184_v38, %v645_v47  ;;  %v667_v49 = vand.u32 2147483647, %v1822_v36  ;;  %v669_v51 = vand.u32 2147483648, %v1822_v36 }
  0xfc   :  { %v885_v63 = vsub.f32 1.0, %v884_v55  ;;  %v1857_v2 = vadd.f32 1.0, %v1186_v45  ;;  %1193 = vpow2.f32 %v1079_v50  ;;  %v907_v60 = vand.u32 2147483647, %v1829_v41 }
  0xfd   :  { %v1850_v58 = vpop.f32.mrf.mxu2  ;;  %v876_v62 = vsel %vm875_vm12, %v1180_v23, %v872_v54  ;;  %v1190_v3 = vpop.eup %1189  ;;  %v647_v5 = vadd.f32 %v1184_v38, %v646_v59  ;;  %v1064_v6 = vmul.f32 -1.442695, %v388_v53  ;;  %vm889_vm15 = vweird.f32 %v1188_v52 }
  0xfe   :  { %v359_v61 = vpop.f32.mrf.mxu3  ;;  %v881_v4 = vsel %vm1814_vm5, %v880_v34, %v876_v62  ;;  %v886_v7 = vmul.f32 %v1188_v52, %v885_v63  ;;  %v659_v0 = vmul.f32 %v1190_v3, %v1822_v36  ;;  %1195 = vrcp.f32 %v1857_v2  ;;  %v1192_v9 = vpop.eup %1191  ;;  %vm890_vm2 = vmor %vm888_vm9, %vm889_vm15 }
  0xff   :  { %1040 = vst [vmem:[%s2110_s5 + $0xb0] sm:$0xff] %v881_v4  ;;  %v651_v11 = vsel %vm650_vm14, %v1184_v38, %v647_v5  ;;  %vm1870_vm0 = vcmp.eq.f32.partialorder %v667_v49, 8.507059e+37  ;;  %vm903_vm1 = vweird.f32 %v1829_v41  ;;  %v909_v13 = vand.u32 2147483648, %v1829_v41  ;;  %v201_v20 = vpop.f32.mrf.mxu0 }
 0x100   :  { %v656_v10 = vsel %vm1833_vm7, %v655_v48, %v651_v11  ;;  %v887_v8 = vadd.f32 %v1188_v52, %v886_v7  ;;  %v660_v14 = vsub.f32 1.0, %v659_v0  ;;  %v899_v15 = vmul.f32 %v1192_v9, %v1829_v41  ;;  %v314_v21 = vpop.f32.mrf.mxu1 }
 0x101   :  { %1025 = vst [vmem:[%s2110_s5 + $0x38] sm:$0xff] %v656_v10  ;;  %vm664_vm3 = vweird.f32 %v1190_v3  ;;  %v670_v17 = vor.u32 1.1754944e-38, %v669_v51  ;;  %vm1884_vm4 = vcmp.eq.f32.partialorder %v907_v60, 8.507059e+37  ;;  %1197 = vpow2.f32 %v1064_v6 }
 0x102   :  { %v1194_v23 = vpop.eup %1193  ;;  %v891_v24 = vsel %vm890_vm2, %v1188_v52, %v887_v8  ;;  %v661_v25 = vmul.f32 %v1190_v3, %v660_v14  ;;  %v900_v28 = vsub.f32 1.0, %v899_v15  ;;  %v357_v16 = vadd.f32 %v1811_v27, %v1803_v22  ;;  %vm665_vm6 = vmor %vm663_vm13, %vm664_vm3 }
 0x103   :  { %v896_v18 = vsel %vm1846_vm11, %v895_v57, %v891_v24  ;;  %v910_v31 = vor.u32 1.1754944e-38, %v909_v13  ;;  %v1892_v32 = vadd.f32 1.0, %v1194_v23  ;;  %v312_v29 = vadd.f32 %v1840_v44, %v1838_v43 }
 0x104   :  { %v1196_v26 = vpop.eup %1195  ;;  %1041 = vst [vmem:[%s2110_s5 + $0xb8] sm:$0xff] %v896_v18  ;;  %v662_v33 = vadd.f32 %v1190_v3, %v661_v25  ;;  %v901_v34 = vmul.f32 %v1192_v9, %v900_v28  ;;  %vm904_vm5 = vweird.f32 %v1192_v9  ;;  %v404_v37 = vadd.f32 %v1569_v1, %v357_v16 }
 0x105   :  { %v249_v22 = vpop.f32.mrf.mxu2  ;;  %v674_v38 = vmul.f32 %v1196_v26, %v1857_v2  ;;  %vm678_vm7 = vweird.f32 %v1857_v2  ;;  %v682_v39 = vand.u32 2147483647, %v1857_v2  ;;  %1199 = vrcp.f32 %v1892_v32  ;;  %vm905_vm8 = vmor %vm903_vm1, %vm904_vm5 }
 0x106   :  { %v362_v27 = vpop.f32.mrf.mxu3  ;;  %v666_v40 = vsel %vm665_vm6, %v1190_v3, %v662_v33  ;;  %v902_v30 = vadd.f32 %v1192_v9, %v901_v34  ;;  %v360_v35 = vadd.f32 %v359_v61, %v1850_v58  ;;  %v315_v42 = vadd.f32 %v314_v21, %v201_v20 }
 0x107   :  { %v1198_v43 = vpop.eup %1197  ;;  %v671_v44 = vsel %vm1870_vm0, %v670_v17, %v666_v40  ;;  %v675_v36 = vsub.f32 1.0, %v674_v38  ;;  %v1080_v45 = vmul.f32 -1.442695, %v404_v37  ;;  %v389_v46 = vadd.f32 %v1569_v1, %v312_v29  ;;  %v204_v58 = vpop.f32.mrf.mxu0 }
 0x108   :  { %1026 = vst [vmem:[%s2110_s5 + $0x40] sm:$0xff] %v671_v44  ;;  %v906_v48 = vsel %vm905_vm8, %v1192_v9, %v902_v30  ;;  %vm679_vm9 = vweird.f32 %v1196_v26  ;;  %v684_v50 = vand.u32 2147483648, %v1857_v2  ;;  %v1918_v52 = vadd.f32 1.0, %v1198_v43  ;;  %v317_v59 = vpop.f32.mrf.mxu1  ;;  %v1941_v2 = vld [vmem:[%s2109_s4] ss:$0 sm:$0xff] }
 0x109   :  { %v911_v47 = vsel %vm1884_vm4, %v910_v31, %v906_v48  ;;  %v676_v53 = vmul.f32 %v1196_v26, %v675_v36  ;;  %1201 = vpow2.f32 %v1080_v45  ;;  %v1065_v41 = vmul.f32 -1.442695, %v389_v46  ;;  %vm680_vm10 = vmor %vm678_vm7, %vm679_vm9 }
 0x10a   :  { %1042 = vst [vmem:[%s2110_s5 + $0xc0] sm:$0xff] %v911_v47  ;;  %1203 = vrcp.f32 %v1918_v52  ;;  %v405_v56 = vadd.f32 %v1569_v1, %v360_v35  ;;  %v390_v57 = vadd.f32 %v1569_v1, %v315_v42  ;;  %vm683_vm11 = vcmp.eq.f32.partialorder %v682_v39, 8.507059e+37 }
 0x10b   :  { %v1200_v54 = vpop.eup %1199  ;;  %v677_v55 = vadd.f32 %v1196_v26, %v676_v53  ;;  %1205 = vpow2.f32 %v1065_v41  ;;  %v685_v49 = vor.u32 1.1754944e-38, %v684_v50  ;;  %v922_v61 = vand.u32 2147483647, %v1892_v32 }
 0x10c   :  { %v914_v51 = vmul.f32 %v1200_v54, %v1892_v32  ;;  %v1081_v63 = vmul.f32 -1.442695, %v405_v56  ;;  %v1066_v3 = vmul.f32 -1.442695, %v390_v57  ;;  %v363_v4 = vadd.f32 %v362_v27, %v249_v22 }
 0x10d   :  { %v681_v62 = vsel %vm680_vm10, %v1196_v26, %v677_v55  ;;  %v924_v1 = vand.u32 2147483648, %v1892_v32  ;;  %v318_v6 = vadd.f32 %v317_v59, %v204_v58  ;;  %v252_v7 = vpop.f32.mrf.mxu2  ;;  %vm918_vm12 = vweird.f32 %v1892_v32 }
 0x10e   :  { %v686_v5 = vsel %vm683_vm11, %v685_v49, %v681_v62  ;;  %v915_v60 = vsub.f32 1.0, %v914_v51  ;;  %v365_v0 = vpop.f32.mrf.mxu3  ;;  %vm919_vm13 = vweird.f32 %v1200_v54  ;;  %1207 = vpow2.f32 %v1081_v63 }
 0x10f   :  { %v1202_v9 = vpop.eup %1201  ;;  %1027 = vst [vmem:[%s2110_s5 + $0x48] sm:$0xff] %v686_v5  ;;  %v406_v11 = vadd.f32 %v1941_v2, %v363_v4  ;;  %1209 = vpow2.f32 %v1066_v3  ;;  %v391_v8 = vadd.f32 %v1941_v2, %v318_v6  ;;  %vm1947_vm14 = vcmp.eq.f32.partialorder %v922_v61, 8.507059e+37  ;;  %vm920_vm15 = vmor %vm918_vm12, %vm919_vm13  ;;  %v207_v34 = vpop.f32.mrf.mxu0 }
 0x110   :  { %v1204_v12 = vpop.eup %1203  ;;  %v916_v13 = vmul.f32 %v1200_v54, %v915_v60  ;;  %v1944_v10 = vadd.f32 1.0, %v1202_v9  ;;  %v366_v20 = vadd.f32 %v365_v0, %v252_v7  ;;  %v925_v23 = vor.u32 1.1754944e-38, %v924_v1  ;;  %v320_v37 = vpop.f32.mrf.mxu1 }
 0x111   :  { %v1206_v14 = vpop.eup %1205  ;;  %v689_v17 = vmul.f32 %v1204_v12, %v1918_v52  ;;  %v1082_v19 = vmul.f32 -1.442695, %v406_v11  ;;  %v697_v24 = vand.u32 2147483647, %v1918_v52  ;;  %vm693_vm0 = vweird.f32 %v1918_v52 }
 0x112   :  { %v917_v21 = vadd.f32 %v1200_v54, %v916_v13  ;;  %1211 = vrcp.f32 %v1944_v10  ;;  %v1958_v28 = vadd.f32 1.0, %v1206_v14  ;;  %vm694_vm1 = vweird.f32 %v1204_v12 }
 0x113   :  { %v690_v25 = vsub.f32 1.0, %v689_v17  ;;  %1213 = vpow2.f32 %v1082_v19  ;;  %v699_v18 = vand.u32 2147483648, %v1918_v52  ;;  %v1067_v31 = vmul.f32 -1.442695, %v391_v8  ;;  %vm695_vm3 = vmor %vm693_vm0, %vm694_vm1 }
 0x114   :  { %v921_v16 = vsel %vm920_vm15, %v1200_v54, %v917_v21  ;;  %v1208_v29 = vpop.eup %1207  ;;  %1215 = vrcp.f32 %v1958_v28  ;;  %v407_v32 = vadd.f32 %v1941_v2, %v366_v20  ;;  %vm1968_vm2 = vcmp.eq.f32.partialorder %v697_v24, 8.507059e+37 }
 0x115   :  { %v926_v26 = vsel %vm1947_vm14, %v925_v23, %v921_v16  ;;  %v691_v33 = vmul.f32 %v1204_v12, %v690_v25  ;;  %v1210_v22 = vpop.eup %1209  ;;  %v937_v38 = vand.u32 2147483647, %v1944_v10  ;;  %v1973_v39 = vadd.f32 1.0, %v1208_v29  ;;  %v255_v6 = vpop.f32.mrf.mxu2 }
 0x116   :  { %1043 = vst [vmem:[%s2110_s5 + $0xc8] sm:$0xff] %v926_v26  ;;  %v939_v30 = vand.u32 2147483648, %v1944_v10  ;;  %v1976_v35 = vadd.f32 1.0, %v1210_v22  ;;  %1217 = vpow2.f32 %v1067_v31  ;;  %v700_v43 = vor.u32 1.1754944e-38, %v699_v18  ;;  %v368_v7 = vpop.f32.mrf.mxu3 }
 0x117   :  { %v692_v40 = vadd.f32 %v1204_v12, %v691_v33  ;;  %v712_v44 = vand.u32 2147483647, %v1958_v28  ;;  %1219 = vrcp.f32 %v1973_v39  ;;  %v321_v36 = vadd.f32 %v320_v37, %v207_v34 }
 0x118   :  { %v1212_v42 = vpop.eup %1211  ;;  %v714_v50 = vand.u32 2147483648, %v1958_v28  ;;  %v1083_v47 = vmul.f32 -1.442695, %v407_v32  ;;  %vm933_vm4 = vweird.f32 %v1944_v10  ;;  %vm1988_vm5 = vcmp.eq.f32.partialorder %v937_v38, 8.507059e+37 }
 0x119   :  { %v1214_v45 = vpop.eup %1213  ;;  %v696_v46 = vsel %vm695_vm3, %v1204_v12, %v692_v40  ;;  %v929_v48 = vmul.f32 %v1212_v42, %v1944_v10  ;;  %1221 = vrcp.f32 %v1976_v35  ;;  %v940_v55 = vor.u32 1.1754944e-38, %v939_v30 }
 0x11a   :  { %v701_v53 = vsel %vm1968_vm2, %v700_v43, %v696_v46  ;;  %v1216_v41 = vpop.eup %1215  ;;  %vm708_vm6 = vweird.f32 %v1958_v28  ;;  %v952_v56 = vand.u32 2147483647, %v1973_v39  ;;  %vm1999_vm7 = vcmp.eq.f32.partialorder %v712_v44, 8.507059e+37  ;;  %v210_v43 = vpop.f32.mrf.mxu0 }
 0x11b   :  { %1028 = vst [vmem:[%s2110_s5 + $0x50] sm:$0xff] %v701_v53  ;;  %v930_v54 = vsub.f32 1.0, %v929_v48  ;;  %v704_v57 = vmul.f32 %v1216_v41, %v1958_v28  ;;  %v2003_v59 = vadd.f32 1.0, %v1214_v45  ;;  %v392_v49 = vadd.f32 %v1941_v2, %v321_v36  ;;  %v323_v44 = vpop.f32.mrf.mxu1 }
 0x11c   :  { %v1218_v51 = vpop.eup %1217  ;;  %vm934_vm8 = vweird.f32 %v1212_v42  ;;  %v715_v62 = vor.u32 1.1754944e-38, %v714_v50  ;;  %1223 = vpow2.f32 %v1083_v47  ;;  %vm948_vm9 = vweird.f32 %v1973_v39 }
 0x11d   :  { %v931_v61 = vmul.f32 %v1212_v42, %v930_v54  ;;  %v1220_v63 = vpop.eup %1219  ;;  %v705_v3 = vsub.f32 1.0, %v704_v57  ;;  %v954_v4 = vand.u32 2147483648, %v1973_v39  ;;  %1225 = vrcp.f32 %v2003_v59  ;;  %vm935_vm12 = vmor %vm933_vm4, %vm934_vm8 }
 0x11e   :  { %v944_v60 = vmul.f32 %v1220_v63, %v1973_v39  ;;  %vm2010_vm10 = vcmp.eq.f32.partialorder %v952_v56, 8.507059e+37  ;;  %vm723_vm11 = vweird.f32 %v1976_v35  ;;  %vm709_vm13 = vweird.f32 %v1216_v41  ;;  %v371_v48 = vpop.f32.mrf.mxu3 }
 0x11f   :  { %v932_v5 = vadd.f32 %v1212_v42, %v931_v61  ;;  %v1222_v0 = vpop.eup %1221  ;;  %v706_v9 = vmul.f32 %v1216_v41, %v705_v3  ;;  %v2018_v11 = vadd.f32 1.0, %v1218_v51  ;;  %v1068_v12 = vmul.f32 -1.442695, %v392_v49  ;;  %vm710_vm14 = vmor %vm708_vm6, %vm709_vm13 }
 0x120   :  { %v945_v8 = vsub.f32 1.0, %v944_v60  ;;  %v719_v14 = vmul.f32 %v1222_v0, %v1976_v35  ;;  %v727_v15 = vand.u32 2147483647, %v1976_v35  ;;  %v729_v20 = vand.u32 2147483648, %v1976_v35  ;;  %v258_v35 = vpop.f32.mrf.mxu2 }
 0x121   :  { %v936_v13 = vsel %vm935_vm12, %v1212_v42, %v932_v5  ;;  %v707_v19 = vadd.f32 %v1216_v41, %v706_v9  ;;  %1227 = vrcp.f32 %v2018_v11  ;;  %vm949_vm15 = vweird.f32 %v1220_v63 }
 0x122   :  { %v941_v17 = vsel %vm1988_vm5, %v940_v55, %v936_v13  ;;  %v1224_v10 = vpop.eup %1223  ;;  %v946_v21 = vmul.f32 %v1220_v63, %v945_v8  ;;  %v720_v23 = vsub.f32 1.0, %v719_v14  ;;  %v967_v24 = vand.u32 2147483647, %v2003_v59  ;;  %vm950_vm1 = vmor %vm948_vm9, %vm949_vm15 }
 0x123   :  { %1044 = vst [vmem:[%s2110_s5 + $0xd0] sm:$0xff] %v941_v17  ;;  %v1226_v25 = vpop.eup %1225  ;;  %v711_v16 = vsel %vm710_vm14, %v1216_v41, %v707_v19  ;;  %vm724_vm0 = vweird.f32 %v1222_v0  ;;  %v2032_v18 = vadd.f32 1.0, %v1224_v10  ;;  %1229 = vpow2.f32 %v1068_v12 }
 0x124   :  { %v716_v31 = vsel %vm1999_vm7, %v715_v62, %v711_v16  ;;  %v947_v29 = vadd.f32 %v1220_v63, %v946_v21  ;;  %v721_v26 = vmul.f32 %v1222_v0, %v720_v23  ;;  %v959_v33 = vmul.f32 %v1226_v25, %v2003_v59  ;;  %vm725_vm3 = vmor %vm723_vm11, %vm724_vm0 }
 0x125   :  { %1029 = vst [vmem:[%s2110_s5 + $0x58] sm:$0xff] %v716_v31  ;;  %v955_v28 = vor.u32 1.1754944e-38, %v954_v4  ;;  %vm2042_vm2 = vcmp.eq.f32.partialorder %v727_v15, 8.507059e+37  ;;  %v969_v34 = vand.u32 2147483648, %v2003_v59  ;;  %1231 = vrcp.f32 %v2032_v18 }
 0x126   :  { %v951_v37 = vsel %vm950_vm1, %v1220_v63, %v947_v29  ;;  %v722_v22 = vadd.f32 %v1222_v0, %v721_v26  ;;  %v730_v27 = vor.u32 1.1754944e-38, %v729_v20  ;;  %v960_v38 = vsub.f32 1.0, %v959_v33 }
 0x127   :  { %v1228_v40 = vpop.eup %1227  ;;  %v956_v30 = vsel %vm2010_vm10, %v955_v28, %v951_v37  ;;  %vm963_vm4 = vweird.f32 %v2003_v59  ;;  %vm2054_vm5 = vcmp.eq.f32.partialorder %v967_v24, 8.507059e+37  ;;  %v369_v42 = vadd.f32 %v368_v7, %v255_v6 }
 0x128   :  { %1045 = vst [vmem:[%s2110_s5 + $0xd8] sm:$0xff] %v956_v30  ;;  %v726_v36 = vsel %vm725_vm3, %v1222_v0, %v722_v22  ;;  %v961_v45 = vmul.f32 %v1226_v25, %v960_v38  ;;  %vm964_vm6 = vweird.f32 %v1226_v25  ;;  %v734_v46 = vmul.f32 %v1228_v40, %v2018_v11 }
 0x129   :  { %v1230_v50 = vpop.eup %1229  ;;  %v731_v47 = vsel %vm2042_vm2, %v730_v27, %v726_v36  ;;  %v970_v53 = vor.u32 1.1754944e-38, %v969_v34  ;;  %vm738_vm7 = vweird.f32 %v2018_v11  ;;  %v408_v52 = vadd.f32 %v1941_v2, %v369_v42  ;;  %vm965_vm8 = vmor %vm963_vm4, %vm964_vm6 }
 0x12a   :  { %1030 = vst [vmem:[%s2110_s5 + $0x60] sm:$0xff] %v731_v47  ;;  %v962_v41 = vadd.f32 %v1226_v25, %v961_v45  ;;  %v735_v54 = vsub.f32 1.0, %v734_v46  ;;  %v742_v55 = vand.u32 2147483647, %v2018_v11  ;;  %v520_v56 = vadd.f32 1.0, %v1230_v50 }
 0x12b   :  { %v1232_v57 = vpop.eup %1231  ;;  %v744_v58 = vand.u32 2147483648, %v2018_v11  ;;  %v1084_v49 = vmul.f32 -1.442695, %v408_v52  ;;  %v324_v51 = vadd.f32 %v323_v44, %v210_v43  ;;  %v372_v61 = vadd.f32 %v371_v48, %v258_v35 }
 0x12c   :  { %v966_v62 = vsel %vm965_vm8, %v1226_v25, %v962_v41  ;;  %v736_v63 = vmul.f32 %v1228_v40, %v735_v54  ;;  %vm739_vm9 = vweird.f32 %v1228_v40  ;;  %v974_v3 = vmul.f32 %v1232_v57, %v2032_v18 }
 0x12d   :  { %v971_v4 = vsel %vm2054_vm5, %v970_v53, %v966_v62  ;;  %1233 = vrcp.f32 %v520_v56  ;;  %vm743_vm10 = vcmp.eq.f32.partialorder %v742_v55, 8.507059e+37  ;;  %vm740_vm11 = vmor %vm738_vm7, %vm739_vm9  ;;  %v745_v60 = vor.u32 1.1754944e-38, %v744_v58 }
 0x12e   :  { %1046 = vst [vmem:[%s2110_s5 + $0xe0] sm:$0xff] %v971_v4  ;;  %v737_v59 = vadd.f32 %v1228_v40, %v736_v63  ;;  %v975_v5 = vsub.f32 1.0, %v974_v3  ;;  %1235 = vpow2.f32 %v1084_v49  ;;  %v984_v1 = vand.u32 2147483648, %v2032_v18 }
 0x12f   :  { %v393_v6 = vadd.f32 %v1941_v2, %v324_v51  ;;  %v409_v7 = vadd.f32 %v1941_v2, %v372_v61  ;;  %vm979_vm12 = vweird.f32 %v1232_v57  ;;  %v982_v12 = vand.u32 2147483647, %v2032_v18 }
 0x130   :  { %v741_v0 = vsel %vm740_vm11, %v1228_v40, %v737_v59  ;;  %v976_v9 = vmul.f32 %v1232_v57, %v975_v5  ;;  %vm978_vm13 = vweird.f32 %v2032_v18  ;;  %v985_v17 = vor.u32 1.1754944e-38, %v984_v1 }
 0x131   :  { %v746_v13 = vsel %vm743_vm10, %v745_v60, %v741_v0  ;;  %v1069_v8 = vmul.f32 -1.442695, %v393_v6  ;;  %v1085_v14 = vmul.f32 -1.442695, %v409_v7  ;;  %vm980_vm14 = vmor %vm978_vm13, %vm979_vm12  ;;  %vm983_vm15 = vcmp.eq.f32.partialorder %v982_v12, 8.507059e+37 }
 0x132   :  { %1031 = vst [vmem:[%s2110_s5 + $0x68] sm:$0xff] %v746_v13  ;;  %v977_v11 = vadd.f32 %v1232_v57, %v976_v9  ;;  %v759_v24 = vand.u32 2147483648, %v520_v56  ;;  %vm753_vm0 = vweird.f32 %v520_v56  ;;  %v757_v16 = vand.u32 2147483647, %v520_v56 }
 0x133   :  { %v1234_v15 = vpop.eup %1233  ;;  %1237 = vpow2.f32 %v1069_v8 }
 0x134   :  { %v1236_v2 = vpop.eup %1235  ;;  %v981_v19 = vsel %vm980_vm14, %v1232_v57, %v977_v11  ;;  %v749_v20 = vmul.f32 %v1234_v15, %v520_v56  ;;  %1239 = vpow2.f32 %v1085_v14  ;;  %vm754_vm1 = vweird.f32 %v1234_v15 }
 0x135   :  { %v986_v10 = vsel %vm983_vm15, %v985_v17, %v981_v19  ;;  %v536_v21 = vadd.f32 1.0, %v1236_v2  ;;  %vm755_vm2 = vmor %vm753_vm0, %vm754_vm1  ;;  %v760_v33 = vor.u32 1.1754944e-38, %v759_v24  ;;  %vm758_vm3 = vcmp.eq.f32.partialorder %v757_v16, 8.507059e+37 }
 0x136   :  { %1047 = vst [vmem:[%s2110_s5 + $0xe8] sm:$0xff] %v986_v10  ;;  %v750_v23 = vsub.f32 1.0, %v749_v20 }
 0x137   :  { %1241 = vrcp.f32 %v536_v21  ;;  %v997_v38 = vand.u32 2147483647, %v536_v21  ;;  %v999_v40 = vand.u32 2147483648, %v536_v21  ;;  %vm993_vm5 = vweird.f32 %v536_v21 }
 0x138   :  { %v751_v25 = vmul.f32 %v1234_v15, %v750_v23 }
 0x139   :  { %v1238_v18 = vpop.eup %1237  ;;  %vm998_vm7 = vcmp.eq.f32.partialorder %v997_v38, 8.507059e+37  ;;  %v1000_v45 = vor.u32 1.1754944e-38, %v999_v40 }
 0x13a   :  { %v1240_v31 = vpop.eup %1239  ;;  %v752_v29 = vadd.f32 %v1234_v15, %v751_v25  ;;  %v521_v26 = vadd.f32 1.0, %v1238_v18 }
 0x13b   :  { %v537_v28 = vadd.f32 1.0, %v1240_v31 }
 0x13c   :  { %v756_v32 = vsel %vm755_vm2, %v1234_v15, %v752_v29  ;;  %1243 = vrcp.f32 %v521_v26  ;;  %vm768_vm8 = vweird.f32 %v521_v26  ;;  %v772_v48 = vand.u32 2147483647, %v521_v26 }
 0x13d   :  { %v1242_v34 = vpop.eup %1241  ;;  %v761_v37 = vsel %vm758_vm3, %v760_v33, %v756_v32  ;;  %1245 = vrcp.f32 %v537_v28  ;;  %v774_v50 = vand.u32 2147483648, %v521_v26  ;;  %v1014_v41 = vand.u32 2147483648, %v537_v28 }
 0x13e   :  { %1032 = vst [vmem:[%s2110_s5 + $0x70] sm:$0xff] %v761_v37  ;;  %v989_v22 = vmul.f32 %v1242_v34, %v536_v21  ;;  %vm994_vm4 = vweird.f32 %v1242_v34  ;;  %v1012_v55 = vand.u32 2147483647, %v537_v28  ;;  %vm1008_vm12 = vweird.f32 %v537_v28 }
 0x13f   :  { %vm995_vm6 = vmor %vm993_vm5, %vm994_vm4  ;;  %v775_v57 = vor.u32 1.1754944e-38, %v774_v50  ;;  %vm773_vm13 = vcmp.eq.f32.partialorder %v772_v48, 8.507059e+37  ;;  %v1015_v51 = vor.u32 1.1754944e-38, %v1014_v41 }
 0x140   :  { %v990_v27 = vsub.f32 1.0, %v989_v22  ;;  %vm1013_vm15 = vcmp.eq.f32.partialorder %v1012_v55, 8.507059e+37 }
 0x142   :  { %v1244_v30 = vpop.eup %1243  ;;  %v991_v39 = vmul.f32 %v1242_v34, %v990_v27 }
 0x143   :  { %v1246_v42 = vpop.eup %1245  ;;  %v764_v43 = vmul.f32 %v1244_v30, %v521_v26  ;;  %vm769_vm9 = vweird.f32 %v1244_v30 }
 0x144   :  { %v992_v44 = vadd.f32 %v1242_v34, %v991_v39  ;;  %v1004_v36 = vmul.f32 %v1246_v42, %v537_v28  ;;  %vm1009_vm10 = vweird.f32 %v1246_v42  ;;  %vm770_vm11 = vmor %vm768_vm8, %vm769_vm9 }
 0x145   :  { %v765_v46 = vsub.f32 1.0, %v764_v43  ;;  %vm1010_vm14 = vmor %vm1008_vm12, %vm1009_vm10 }
 0x146   :  { %v996_v35 = vsel %vm995_vm6, %v1242_v34, %v992_v44  ;;  %v1005_v47 = vsub.f32 1.0, %v1004_v36 }
 0x147   :  { %v1001_v53 = vsel %vm998_vm7, %v1000_v45, %v996_v35  ;;  %v766_v52 = vmul.f32 %v1244_v30, %v765_v46 }
 0x148   :  { %1048 = vst [vmem:[%s2110_s5 + $0xf0] sm:$0xff] %v1001_v53  ;;  %v1006_v54 = vmul.f32 %v1246_v42, %v1005_v47 }
 0x149   :  { %v767_v56 = vadd.f32 %v1244_v30, %v766_v52 }
 0x14a   :  { %v1007_v58 = vadd.f32 %v1246_v42, %v1006_v54 }
 0x14b   :  { %v771_v49 = vsel %vm770_vm11, %v1244_v30, %v767_v56 }
 0x14c   :  { %v776_v61 = vsel %vm773_vm13, %v775_v57, %v771_v49  ;;  %v1011_v62 = vsel %vm1010_vm14, %v1246_v42, %v1007_v58 }
 0x14d   :  { %1033 = vst [vmem:[%s2110_s5 + $0x78] sm:$0xff] %v776_v61  ;;  %v1016_v63 = vsel %vm1013_vm15, %v1015_v51, %v1011_v62 }
 0x14e   :  { %1049 = vst [vmem:[%s2110_s5 + $0xf8] sm:$0xff] %v1016_v63 }

// kernel: gnn_forward.17
= control target key start
LH: loop header
LB: loop body
LE: loop exit
PB: predicated region body
PF: predicated region fallthrough
CT: control target
= control target key end

     0   :  { %v444_v0 = vmov 0.0   ;;  %s644_s14 = smov 0   ;;  %s887_s0 = inlined_call_operand.vmem [shape: f32[128,128], index: 0, kind: input, shape index: {}]   ;;  %s888_s2 = inlined_call_operand.vmem [shape: f32[128,256], index: 2, kind: input, shape index: {}]   ;;  %s889_s3 = inlined_call_operand.vmem [shape: f32[1,256], index: 3, kind: input, shape index: {}]   ;;  %s890_s4 = inlined_call_operand.vmem [shape: f32[256,128], index: 4, kind: input, shape index: {}]   ;;  %s891_s5 = inlined_call_operand.vmem [shape: f32[1,128], index: 5, kind: input, shape index: {}]   ;;  %s892_s6 = inlined_call_operand.vmem [shape: f32[8,128], index: 6, kind: output, shape index: {}]   ;;  %s893_s1 = inlined_call_operand.vmem [shape: s32[128,1], index: 1, kind: input, shape index: {}]  }
   0x1   :  { %27 = vst [vmem:[#allocation2] sm:$0xff] %v444_v0  ;;  %v484_v1 = vld [vmem:[%s887_s0] sm:$0xff]  ;;  %v489_v2 = vld [vmem:[%s887_s0 + $0x8] sm:$0xff]  ;;  %v494_v3 = vld [vmem:[%s887_s0 + $0x10] sm:$0xff] }
   0x2   :  { %28 = vst [vmem:[%s892_s6] sm:$0xff] %v444_v0  ;;  %v502_v4 = vld [vmem:[%s887_s0 + $0x18] sm:$0xff]  ;;  %v507_v5 = vld [vmem:[%s887_s0 + $0x20] sm:$0xff]  ;;  %v512_v6 = vld [vmem:[%s887_s0 + $0x28] sm:$0xff] }
   0x3   :  { %v517_v7 = vld [vmem:[%s887_s0 + $0x30] sm:$0xff]  ;;  %v522_v8 = vld [vmem:[%s887_s0 + $0x38] sm:$0xff]  ;;  %v527_v9 = vld [vmem:[%s887_s0 + $0x40] sm:$0xff] }
   0x4   :  { %v532_v10 = vld [vmem:[%s887_s0 + $0x48] sm:$0xff]  ;;  %v537_v11 = vld [vmem:[%s887_s0 + $0x50] sm:$0xff]  ;;  %v542_v12 = vld [vmem:[%s887_s0 + $0x58] sm:$0xff] }
   0x5   :  { %v547_v13 = vld [vmem:[%s887_s0 + $0x60] sm:$0xff]  ;;  %v552_v14 = vld [vmem:[%s887_s0 + $0x68] sm:$0xff]  ;;  %v557_v15 = vld [vmem:[%s887_s0 + $0x70] sm:$0xff] }
   0x6   :  { %v562_v16 = vld [vmem:[%s887_s0 + $0x78] sm:$0xff]  ;;  %v567_v17 = vld [vmem:[%s893_s1] sm:$0xff]  ;;  %v572_v18 = vld [vmem:[%s893_s1 + $0x8] sm:$0xff] }
   0x7   :  { %v577_v19 = vld [vmem:[%s893_s1 + $0x10] sm:$0xff]  ;;  %v582_v20 = vld [vmem:[%s893_s1 + $0x18] sm:$0xff]  ;;  %v587_v21 = vld [vmem:[%s893_s1 + $0x20] sm:$0xff] }
   0x8   :  { %v592_v22 = vld [vmem:[%s893_s1 + $0x28] sm:$0xff]  ;;  %v597_v23 = vld [vmem:[%s893_s1 + $0x30] sm:$0xff]  ;;  %v602_v24 = vld [vmem:[%s893_s1 + $0x38] sm:$0xff] }
   0x9   :  { %v607_v25 = vld [vmem:[%s893_s1 + $0x40] sm:$0xff]  ;;  %v612_v26 = vld [vmem:[%s893_s1 + $0x48] sm:$0xff]  ;;  %v617_v27 = vld [vmem:[%s893_s1 + $0x50] sm:$0xff] }
   0xa   :  { %v622_v28 = vld [vmem:[%s893_s1 + $0x58] sm:$0xff]  ;;  %v627_v29 = vld [vmem:[%s893_s1 + $0x60] sm:$0xff]  ;;  %v632_v30 = vld [vmem:[%s893_s1 + $0x68] sm:$0xff] }
   0xb   :  { %v637_v31 = vld [vmem:[%s893_s1 + $0x70] sm:$0xff]  ;;  %v642_v32 = vld [vmem:[%s893_s1 + $0x78] sm:$0xff] }
   0xc LB: > { %v445_v33 = vmov 0   ;;  %v67_v34 = vstv %s442_s14  ;;  %s201_s1 = scalar_lea.vmem [#allocation2], %s442_s14  ;;  %s66_s14 = sadd.s32 1, %s442_s14   ;;  %s442_s14 = sphi %s644_s14, %s66_s14  }
   0xd   : > { %426 = vset.pattern.permute.xlu2 %v445_v33  ;;  %425 = vset.pattern.permute.xlu1 %v445_v33  ;;  %vm72_vm0 = vcmp.eq.s32.totalorder %v587_v21, %v67_v34  ;;  %vm70_vm1 = vcmp.eq.s32.totalorder %v577_v19, %v67_v34  ;;  %vm68_vm2 = vcmp.eq.s32.totalorder %v567_v17, %v67_v34  ;;  %p63_p0 = scmp.ge.s32.totalorder %s66_s14, 8  }
   0xe   : > { %424 = vset.pattern.permute.xlu0 %v445_v33  ;;  %v88_v35 = vsel %vm72_vm0, 1, %v445_v33  ;;  %v86_v36 = vsel %vm70_vm1, 1, %v445_v33  ;;  %v84_v37 = vsel %vm68_vm2, 1, %v445_v33  ;;  %vm73_vm3 = vcmp.eq.s32.totalorder %v592_v22, %v67_v34  ;;  %v219_v17 = vld [vmem:[%s888_s2 + $0x50] sm:$0xff] (%p63_p0)  ;;  %v217_v19 = vld [vmem:[%s888_s2 + $0x40] sm:$0xff] (%p63_p0)  ;;  %v216_v22 = vld [vmem:[%s888_s2 + $0x38] sm:$0xff] (%p63_p0) }
   0xf   : > { %113 = vperm.xlu2 %426, %v88_v35   ;;  %107 = vperm.xlu1 %425, %v86_v36   ;;  %vm71_vm4 = vcmp.eq.s32.totalorder %v582_v20, %v67_v34  ;;  %vm69_vm5 = vcmp.eq.s32.totalorder %v572_v18, %v67_v34  ;;  %v89_v38 = vsel %vm73_vm3, 1, %v445_v33  ;;  %vm76_vm6 = vcmp.eq.s32.totalorder %v607_v25, %v67_v34  ;;  %v220_v18 = vld [vmem:[%s888_s2 + $0x58] sm:$0xff] (%p63_p0)  ;;  %v218_v20 = vld [vmem:[%s888_s2 + $0x48] sm:$0xff] (%p63_p0)  ;;  %v215_v21 = vld [vmem:[%s888_s2 + $0x30] sm:$0xff] (%p63_p0) }
  0x10   : > { %101 = vperm.xlu0 %424, %v84_v37   ;;  %v87_v39 = vsel %vm71_vm4, 1, %v445_v33  ;;  %v85_v40 = vsel %vm69_vm5, 1, %v445_v33  ;;  %vm75_vm7 = vcmp.eq.s32.totalorder %v602_v24, %v67_v34  ;;  %vm74_vm8 = vcmp.eq.s32.totalorder %v597_v23, %v67_v34  ;;  %v213_v23 = vld [vmem:[%s888_s2 + $0x20] sm:$0xff] (%p63_p0)  ;;  %v214_v24 = vld [vmem:[%s888_s2 + $0x28] sm:$0xff] (%p63_p0)  ;;  %v211_v25 = vld [vmem:[%s888_s2 + $0x10] sm:$0xff] (%p63_p0) }
  0x11   : > { %v92_v41 = vsel %vm76_vm6, 1, %v445_v33  ;;  %v91_v42 = vsel %vm75_vm7, 1, %v445_v33  ;;  %v90_v43 = vsel %vm74_vm8, 1, %v445_v33  ;;  %vm79_vm9 = vcmp.eq.s32.totalorder %v622_v28, %v67_v34  ;;  %v210_v28 = vld [vmem:[%s888_s2 + $0x8] sm:$0xff] (%p63_p0) }
  0x12   : > { %vm78_vm10 = vcmp.eq.s32.totalorder %v617_v27, %v67_v34  ;;  %vm77_vm11 = vcmp.eq.s32.totalorder %v612_v26, %v67_v34  ;;  %v95_v44 = vsel %vm79_vm9, 1, %v445_v33  ;;  %vm82_vm12 = vcmp.eq.s32.totalorder %v637_v31, %v67_v34  ;;  %v212_v26 = vld [vmem:[%s888_s2 + $0x18] sm:$0xff] (%p63_p0)  ;;  %v209_v27 = vld [vmem:[%s888_s2] sm:$0xff] (%p63_p0) }
  0x13   : > { %v94_v45 = vsel %vm78_vm10, 1, %v445_v33  ;;  %v93_v46 = vsel %vm77_vm11, 1, %v445_v33  ;;  %vm81_vm13 = vcmp.eq.s32.totalorder %v632_v30, %v67_v34  ;;  %vm80_vm14 = vcmp.eq.s32.totalorder %v627_v29, %v67_v34  ;;  %v340_v30 = vld [vmem:[%s890_s4 + $0x78] sm:$0xff] (%p63_p0) }
  0x14   : > { %v98_v47 = vsel %vm82_vm12, 1, %v445_v33  ;;  %v97_v48 = vsel %vm81_vm13, 1, %v445_v33  ;;  %v96_v49 = vsel %vm80_vm14, 1, %v445_v33  ;;  %vm83_vm15 = vcmp.eq.s32.totalorder %v642_v32, %v67_v34  ;;  %v356_v31 = vld [vmem:[%s890_s4 + $0xf8] sm:$0xff] (%p63_p0)  ;;  %361 = vmatpush.msra.mxu2 (%p63_p0), %v340_v30  ;;  %v339_v32 = vld [vmem:[%s890_s4 + $0x70] sm:$0xff] (%p63_p0) }
  0x15   : > { %v99_v50 = vsel %vm83_vm15, 1, %v445_v33  ;;  %381 = vmatpush.msra.mxu3 (%p63_p0), %v356_v31  ;;  %v427_v31 = vld [vmem:[%s891_s5] ss:$0 sm:$0xff] (%p63_p0) }
  0x16   :  { %362 = vmatpush.msra.mxu2 (%p63_p0), %v339_v32 }
  0x17   : > { %116 = vperm.xlu2 %426, %v89_v38   ;;  %110 = vperm.xlu1 %425, %v87_v39  }
  0x18   : > { %104 = vperm.xlu0 %424, %v85_v40  }
  0x1f   : > { %125 = vperm.xlu2 %426, %v92_v41   ;;  %122 = vperm.xlu1 %425, %v91_v42  }
  0x20   : > { %119 = vperm.xlu0 %424, %v90_v43  }
  0x27   : > { %134 = vperm.xlu2 %426, %v95_v44   ;;  %131 = vperm.xlu1 %425, %v94_v45  }
  0x28   : > { %128 = vperm.xlu0 %424, %v93_v46  }
  0x2f   : > { %143 = vperm.xlu2 %426, %v98_v47   ;;  %140 = vperm.xlu1 %425, %v97_v48  }
  0x30   : > { %137 = vperm.xlu0 %424, %v96_v49  }
  0x38   : > { %146 = vperm.xlu0 %424, %v99_v50  }
  0x69   : > { %v114_v51 = vpop.permute.xlu2 %113 }
  0x6a   : > { %vm152_vm0 = vcmp.eq.s32.totalorder %v114_v51, 1 }
  0x6b   : > { %v168_v63 = vsel %vm152_vm0, %v507_v5, 0.0  ;;  %v231_v5 = vld [vmem:[%s888_s2 + $0xb0] sm:$0xff] (%p63_p0) }
  0x71   : > { %v117_v54 = vpop.permute.xlu2 %116 }
  0x72   : > { %vm153_vm2 = vcmp.eq.s32.totalorder %v117_v54, 1 }
  0x73   : > { %v169_v35 = vsel %vm153_vm2, %v512_v6, 0.0  ;;  %v232_v6 = vld [vmem:[%s888_s2 + $0xb8] sm:$0xff] (%p63_p0) }
  0x79   : > { %v126_v58 = vpop.permute.xlu2 %125 }
  0x7a   : > { %vm156_vm6 = vcmp.eq.s32.totalorder %v126_v58, 1 }
  0x7b   : > { %v172_v39 = vsel %vm156_vm6, %v527_v9, 0.0  ;;  %v227_v9 = vld [vmem:[%s888_s2 + $0x90] sm:$0xff] (%p63_p0) }
  0x81   : > { %v108_v52 = vpop.permute.xlu1 %107  ;;  %v135_v62 = vpop.permute.xlu2 %134 }
  0x82   : > { %v102_v53 = vpop.permute.xlu0 %101  ;;  %vm150_vm7 = vcmp.eq.s32.totalorder %v108_v52, 1  ;;  %vm159_vm13 = vcmp.eq.s32.totalorder %v135_v62, 1 }
  0x83   : > { %vm148_vm1 = vcmp.eq.s32.totalorder %v102_v53, 1  ;;  %v166_v41 = vsel %vm150_vm7, %v494_v3, 0.0  ;;  %v175_v54 = vsel %vm159_vm13, %v542_v12, 0.0  ;;  %v233_v3 = vld [vmem:[%s888_s2 + $0xc0] sm:$0xff] (%p63_p0)  ;;  %v226_v12 = vld [vmem:[%s888_s2 + $0x88] sm:$0xff] (%p63_p0) }
  0x84   : > { %v164_v0 = vsel %vm148_vm1, %v484_v1, 0.0  ;;  %v235_v1 = vld [vmem:[%s888_s2 + $0xd0] sm:$0xff] (%p63_p0) }
  0x85   : > { %v180_v40 = vmax.f32 %v164_v0, %v168_v63 }
  0x87   : > { %v184_v53 = vmax.f32 %v180_v40, %v172_v39  ;;  %v202_v39 = vld [vmem:[%s201_s1] sm:$0x1] }
  0x89   : > { %v111_v55 = vpop.permute.xlu1 %110  ;;  %v144_v42 = vpop.permute.xlu2 %143 }
  0x8a   : > { %v105_v56 = vpop.permute.xlu0 %104  ;;  %vm151_vm8 = vcmp.eq.s32.totalorder %v111_v55, 1  ;;  %vm162_vm14 = vcmp.eq.s32.totalorder %v144_v42, 1  ;;  %v239_v42 = vld [vmem:[%s888_s2 + $0xf0] sm:$0xff] (%p63_p0) }
  0x8b   : > { %vm149_vm3 = vcmp.eq.s32.totalorder %v105_v56, 1  ;;  %v167_v43 = vsel %vm151_vm8, %v502_v4, 0.0  ;;  %247 = vmatpush.msra.mxu0 (%p63_p0), %v239_v42  ;;  %v234_v4 = vld [vmem:[%s888_s2 + $0xc8] sm:$0xff] (%p63_p0)  ;;  %v325_v42 = vld [vmem:[%s890_s4] sm:$0xff] (%p63_p0) }
  0x8c   : > { %v165_v36 = vsel %vm149_vm3, %v489_v2, 0.0  ;;  %v236_v2 = vld [vmem:[%s888_s2 + $0xd8] sm:$0xff] (%p63_p0) }
  0x8d   : > { %v181_v46 = vmax.f32 %v165_v36, %v169_v35 }
  0x91   : > { %v123_v57 = vpop.permute.xlu1 %122 }
  0x92   : > { %v120_v59 = vpop.permute.xlu0 %119  ;;  %vm155_vm4 = vcmp.eq.s32.totalorder %v123_v57, 1 }
  0x93   : > { %vm154_vm5 = vcmp.eq.s32.totalorder %v120_v59, 1  ;;  %v171_v37 = vsel %vm155_vm4, %v522_v8, 0.0  ;;  %v178_v59 = vsel %vm162_vm14, %v557_v15, 0.0  ;;  %v230_v8 = vld [vmem:[%s888_s2 + $0xa8] sm:$0xff] (%p63_p0)  ;;  %v221_v15 = vld [vmem:[%s888_s2 + $0x60] sm:$0xff] (%p63_p0) }
  0x94   : > { %v170_v38 = vsel %vm154_vm5, %v517_v7, 0.0  ;;  %v183_v47 = vmax.f32 %v167_v43, %v171_v37  ;;  %v240_v43 = vld [vmem:[%s888_s2 + $0xf8] sm:$0xff] (%p63_p0)  ;;  %v229_v7 = vld [vmem:[%s888_s2 + $0xa0] sm:$0xff] (%p63_p0) }
  0x95   : > { %v182_v48 = vmax.f32 %v166_v41, %v170_v38  ;;  %267 = vmatpush.msra.mxu1 (%p63_p0), %v240_v43  ;;  %v341_v43 = vld [vmem:[%s890_s4 + $0x80] sm:$0xff] (%p63_p0) }
  0x96   : > { %v187_v58 = vmax.f32 %v183_v47, %v175_v54  ;;  %v338_v47 = vld [vmem:[%s890_s4 + $0x68] sm:$0xff] (%p63_p0)  ;;  %v351_v54 = vld [vmem:[%s890_s4 + $0xd0] sm:$0xff] (%p63_p0) }
  0x97   :  { %363 = vmatpush.msra.mxu2 (%p63_p0), %v338_v47 }
  0x99   : > { %v132_v60 = vpop.permute.xlu1 %131 }
  0x9a   : > { %v129_v61 = vpop.permute.xlu0 %128  ;;  %vm158_vm9 = vcmp.eq.s32.totalorder %v132_v60, 1 }
  0x9b   : > { %vm157_vm10 = vcmp.eq.s32.totalorder %v129_v61, 1  ;;  %v174_v44 = vsel %vm158_vm9, %v537_v11, 0.0  ;;  %v225_v11 = vld [vmem:[%s888_s2 + $0x80] sm:$0xff] (%p63_p0) }
  0x9c   : > { %v173_v45 = vsel %vm157_vm10, %v532_v10, 0.0  ;;  %v186_v51 = vmax.f32 %v182_v48, %v174_v44  ;;  %v237_v44 = vld [vmem:[%s888_s2 + $0xe0] sm:$0xff] (%p63_p0)  ;;  %v228_v10 = vld [vmem:[%s888_s2 + $0x98] sm:$0xff] (%p63_p0)  ;;  %v354_v48 = vld [vmem:[%s890_s4 + $0xe8] sm:$0xff] (%p63_p0) }
  0x9d   : > { %v185_v52 = vmax.f32 %v181_v46, %v173_v45  ;;  %v238_v45 = vld [vmem:[%s888_s2 + $0xe8] sm:$0xff] (%p63_p0)  ;;  %248 = vmatpush.msra.mxu0 (%p63_p0), %v237_v44  ;;  %v355_v46 = vld [vmem:[%s890_s4 + $0xf0] sm:$0xff] (%p63_p0) }
  0x9e   : > { %v190_v61 = vmax.f32 %v186_v51, %v178_v59  ;;  %268 = vmatpush.msra.mxu1 (%p63_p0), %v238_v45  ;;  %382 = vmatpush.msra.mxu3 (%p63_p0), %v355_v46  ;;  %v336_v51 = vld [vmem:[%s890_s4 + $0x58] sm:$0xff] (%p63_p0) }
  0x9f   :  { %249 = vmatpush.msra.mxu0 (%p63_p0), %v235_v1  ;;  %v332_v59 = vld [vmem:[%s890_s4 + $0x38] sm:$0xff] (%p63_p0) }
  0xa0   :  { %269 = vmatpush.msra.mxu1 (%p63_p0), %v236_v2  ;;  %383 = vmatpush.msra.mxu3 (%p63_p0), %v354_v48 }
  0xa1   : > { %v141_v33 = vpop.permute.xlu1 %140  ;;  %250 = vmatpush.msra.mxu0 (%p63_p0), %v233_v3 }
  0xa2   : > { %v138_v34 = vpop.permute.xlu0 %137  ;;  %vm161_vm11 = vcmp.eq.s32.totalorder %v141_v33, 1  ;;  %270 = vmatpush.msra.mxu1 (%p63_p0), %v234_v4 }
  0xa3   : > { %vm160_vm12 = vcmp.eq.s32.totalorder %v138_v34, 1  ;;  %v177_v49 = vsel %vm161_vm11, %v552_v14, 0.0  ;;  %251 = vmatpush.msra.mxu0 (%p63_p0), %v231_v5  ;;  %v224_v14 = vld [vmem:[%s888_s2 + $0x78] sm:$0xff] (%p63_p0) }
  0xa4   : > { %v176_v50 = vsel %vm160_vm12, %v547_v13, 0.0  ;;  %v189_v56 = vmax.f32 %v185_v52, %v177_v49  ;;  %271 = vmatpush.msra.mxu1 (%p63_p0), %v232_v6  ;;  %v223_v13 = vld [vmem:[%s888_s2 + $0x70] sm:$0xff] (%p63_p0)  ;;  %v337_v49 = vld [vmem:[%s890_s4 + $0x60] sm:$0xff] (%p63_p0)  ;;  %v352_v52 = vld [vmem:[%s890_s4 + $0xd8] sm:$0xff] (%p63_p0) }
  0xa5   : > { %v188_v57 = vmax.f32 %v184_v53, %v176_v50  ;;  %252 = vmatpush.msra.mxu0 (%p63_p0), %v229_v7  ;;  %v353_v50 = vld [vmem:[%s890_s4 + $0xe0] sm:$0xff] (%p63_p0)  ;;  %364 = vmatpush.msra.mxu2 (%p63_p0), %v337_v49  ;;  %v335_v53 = vld [vmem:[%s890_s4 + $0x50] sm:$0xff] (%p63_p0) }
  0xa6   :  { %272 = vmatpush.msra.mxu1 (%p63_p0), %v230_v8  ;;  %384 = vmatpush.msra.mxu3 (%p63_p0), %v353_v50 }
  0xa7   : > { %v192_v63 = vmax.f32 %v188_v57, %v189_v56  ;;  %253 = vmatpush.msra.mxu0 (%p63_p0), %v227_v9  ;;  %365 = vmatpush.msra.mxu2 (%p63_p0), %v336_v51  ;;  %v350_v56 = vld [vmem:[%s890_s4 + $0xc8] sm:$0xff] (%p63_p0)  ;;  %v333_v57 = vld [vmem:[%s890_s4 + $0x40] sm:$0xff] (%p63_p0) }
  0xa8   :  { %273 = vmatpush.msra.mxu1 (%p63_p0), %v228_v10  ;;  %385 = vmatpush.msra.mxu3 (%p63_p0), %v352_v52 }
  0xa9   :  { %254 = vmatpush.msra.mxu0 (%p63_p0), %v225_v11  ;;  %366 = vmatpush.msra.mxu2 (%p63_p0), %v335_v53 }
  0xaa   : > { %v147_v55 = vpop.permute.xlu0 %146  ;;  %274 = vmatpush.msra.mxu1 (%p63_p0), %v226_v12  ;;  %386 = vmatpush.msra.mxu3 (%p63_p0), %v351_v54 }
  0xab   : > { %vm163_vm15 = vcmp.eq.s32.totalorder %v147_v55, 1  ;;  %255 = vmatpush.msra.mxu0 (%p63_p0), %v223_v13  ;;  %v334_v55 = vld [vmem:[%s890_s4 + $0x48] sm:$0xff] (%p63_p0) }
  0xac   : > { %v179_v60 = vsel %vm163_vm15, %v562_v16, 0.0  ;;  %v222_v16 = vld [vmem:[%s888_s2 + $0x68] sm:$0xff] (%p63_p0)  ;;  %275 = vmatpush.msra.mxu1 (%p63_p0), %v224_v14  ;;  %367 = vmatpush.msra.mxu2 (%p63_p0), %v334_v55 }
  0xad   : > { %v191_v62 = vmax.f32 %v187_v58, %v179_v60  ;;  %256 = vmatpush.msra.mxu0 (%p63_p0), %v221_v15  ;;  %387 = vmatpush.msra.mxu3 (%p63_p0), %v350_v56  ;;  %v349_v58 = vld [vmem:[%s890_s4 + $0xc0] sm:$0xff] (%p63_p0)  ;;  %v348_v60 = vld [vmem:[%s890_s4 + $0xb8] sm:$0xff] (%p63_p0) }
  0xae   :  { %276 = vmatpush.msra.mxu1 (%p63_p0), %v222_v16  ;;  %368 = vmatpush.msra.mxu2 (%p63_p0), %v333_v57 }
  0xaf   : > { %v193_v0 = vmax.f32 %v190_v61, %v191_v62  ;;  %257 = vmatpush.msra.mxu0 (%p63_p0), %v219_v17  ;;  %388 = vmatpush.msra.mxu3 (%p63_p0), %v349_v58  ;;  %v331_v61 = vld [vmem:[%s890_s4 + $0x30] sm:$0xff] (%p63_p0) }
  0xb0   :  { %277 = vmatpush.msra.mxu1 (%p63_p0), %v220_v18  ;;  %v347_v62 = vld [vmem:[%s890_s4 + $0xb0] sm:$0xff] (%p63_p0)  ;;  %369 = vmatpush.msra.mxu2 (%p63_p0), %v332_v59 }
  0xb1   : > { %v194_v33 = vmax.f32 %v192_v63, %v193_v0  ;;  %258 = vmatpush.msra.mxu0 (%p63_p0), %v217_v19  ;;  %389 = vmatpush.msra.mxu3 (%p63_p0), %v348_v60  ;;  %v330_v63 = vld [vmem:[%s890_s4 + $0x28] sm:$0xff] (%p63_p0) }
  0xb2   :  { %278 = vmatpush.msra.mxu1 (%p63_p0), %v218_v20  ;;  %v346_v0 = vld [vmem:[%s890_s4 + $0xa8] sm:$0xff] (%p63_p0)  ;;  %370 = vmatpush.msra.mxu2 (%p63_p0), %v331_v61 }
  0xb3   : > { %v195_v34 = vrot.slane %v194_v33, 4  ;;  %259 = vmatpush.msra.mxu0 (%p63_p0), %v215_v21  ;;  %390 = vmatpush.msra.mxu3 (%p63_p0), %v347_v62 }
  0xb4   :  { %279 = vmatpush.msra.mxu1 (%p63_p0), %v216_v22  ;;  %371 = vmatpush.msra.mxu2 (%p63_p0), %v330_v63 }
  0xb5   : > { %v196_v35 = vmax.f32 %v194_v33, %v195_v34  ;;  %260 = vmatpush.msra.mxu0 (%p63_p0), %v213_v23  ;;  %v329_v33 = vld [vmem:[%s890_s4 + $0x20] sm:$0xff] (%p63_p0)  ;;  %391 = vmatpush.msra.mxu3 (%p63_p0), %v346_v0 }
  0xb6   :  { %280 = vmatpush.msra.mxu1 (%p63_p0), %v214_v24  ;;  %v345_v34 = vld [vmem:[%s890_s4 + $0xa0] sm:$0xff] (%p63_p0)  ;;  %372 = vmatpush.msra.mxu2 (%p63_p0), %v329_v33 }
  0xb7   : > { %v197_v36 = vrot.slane %v196_v35, 2  ;;  %261 = vmatpush.msra.mxu0 (%p63_p0), %v211_v25  ;;  %392 = vmatpush.msra.mxu3 (%p63_p0), %v345_v34 }
  0xb8   :  { %281 = vmatpush.msra.mxu1 (%p63_p0), %v212_v26 }
  0xb9   : > { %v198_v37 = vmax.f32 %v196_v35, %v197_v36  ;;  %262 = vmatpush.msra.mxu0 (%p63_p0), %v209_v27  ;;  %v328_v35 = vld [vmem:[%s890_s4 + $0x18] sm:$0xff] (%p63_p0) }
  0xba   :  { %282 = vmatpush.msra.mxu1 (%p63_p0), %v210_v28  ;;  %v344_v36 = vld [vmem:[%s890_s4 + $0x98] sm:$0xff] (%p63_p0)  ;;  %373 = vmatpush.msra.mxu2 (%p63_p0), %v328_v35 }
  0xbb   : > { %v199_v38 = vrot.slane %v198_v37, 1  ;;  %393 = vmatpush.msra.mxu3 (%p63_p0), %v344_v36 }
  0xbd   : > { %v200_v40 = vmax.f32 %v198_v37, %v199_v38  ;;  %65 = sbr.rel (!%p63_p0) target bundleno = 12 (0xc), region = 60  ;;  %v327_v37 = vld [vmem:[%s890_s4 + $0x10] sm:$0xff] (%p63_p0) }
  0xbe   :  { %v343_v38 = vld [vmem:[%s890_s4 + $0x90] sm:$0xff] (%p63_p0)  ;;  %374 = vmatpush.msra.mxu2 (%p63_p0), %v327_v37 }
  0xbf   : > { %v203_v41 = vmax.f32 %v202_v39, %v200_v40  ;;  %v241_v39 = vld [vmem:[%s889_s3] sm:$0x3] (%p63_p0)  ;;  %v326_v40 = vld [vmem:[%s890_s4 + $0x8] sm:$0xff] (%p63_p0)  ;;  %394 = vmatpush.msra.mxu3 (%p63_p0), %v343_v38 }
  0xc0   :  { %v243_v44 = vperm.slane (%p63_p0), %v241_v39, 0  ;;  %v244_v45 = vperm.slane (%p63_p0), %v241_v39, 1  ;;  %375 = vmatpush.msra.mxu2 (%p63_p0), %v326_v40 }
  0xc1   : > { %204 = vst [vmem:[%s201_s1] sm:$0x1] %v203_v41  ;;  %v342_v41 = vld [vmem:[%s890_s4 + $0x88] sm:$0xff] (%p63_p0) }
  0xc2   :  { %395 = vmatpush.msra.mxu3 %v342_v41  ;;  %376 = vmatpush.msra.mxu2 %v325_v42 }
  0xc4   :  { %396 = vmatpush.msra.mxu3 %v341_v43 }
  0xc8   :  { %v208_v29 = vld [vmem:[#allocation2] sm:$0xff] }
  0xc9   :  { %263 = vmatmul.f32.vlgmr.msra.gmra.mxu0 %v208_v29  ;;  %283 = vmatmul.f32.vlgmr.msra.gmra.mxu1 %v208_v29 }
 0x146   :  { %v264_v1 = vpop.f32.mrf.mxu0  ;;  %v284_v2 = vpop.f32.mrf.mxu1 }
 0x147   :  { %v265_v3 = vadd.f32 %v264_v1, %v243_v44  ;;  %v285_v4 = vadd.f32 %v284_v2, %v244_v45 }
 0x149   :  { %v412_v5 = vmul.f32 -1.442695, %v265_v3  ;;  %v413_v6 = vmul.f32 -1.442695, %v285_v4 }
 0x14b   :  { %428 = vpow2.f32 %v412_v5 }
 0x14c   :  { %430 = vpow2.f32 %v413_v6 }
 0x151   :  { %v429_v7 = vpop.eup %428 }
 0x152   :  { %v431_v8 = vpop.eup %430  ;;  %v293_v9 = vadd.f32 1.0, %v429_v7 }
 0x153   :  { %v294_v10 = vadd.f32 1.0, %v431_v8 }
 0x154   :  { %432 = vrcp.f32 %v293_v9  ;;  %v306_v16 = vand.u32 2147483648, %v293_v9  ;;  %v304_v19 = vand.u32 2147483647, %v293_v9  ;;  %vm300_vm2 = vweird.f32 %v293_v9 }
 0x155   :  { %434 = vrcp.f32 %v294_v10  ;;  %v321_v20 = vand.u32 2147483648, %v294_v10  ;;  %v319_v22 = vand.u32 2147483647, %v294_v10  ;;  %vm315_vm4 = vweird.f32 %v294_v10 }
 0x156   :  { %v307_v24 = vor.u32 1.1754944e-38, %v306_v16  ;;  %vm305_vm5 = vcmp.eq.f32.partialorder %v304_v19, 8.507059e+37 }
 0x157   :  { %v322_v27 = vor.u32 1.1754944e-38, %v321_v20  ;;  %vm320_vm7 = vcmp.eq.f32.partialorder %v319_v22, 8.507059e+37 }
 0x15a   :  { %v433_v11 = vpop.eup %432 }
 0x15b   :  { %v435_v12 = vpop.eup %434  ;;  %v296_v13 = vmul.f32 %v433_v11, %v293_v9  ;;  %vm301_vm0 = vweird.f32 %v433_v11 }
 0x15c   :  { %v311_v14 = vmul.f32 %v435_v12, %v294_v10  ;;  %vm316_vm1 = vweird.f32 %v435_v12  ;;  %vm302_vm3 = vmor %vm300_vm2, %vm301_vm0 }
 0x15d   :  { %v297_v15 = vsub.f32 1.0, %v296_v13  ;;  %vm317_vm6 = vmor %vm315_vm4, %vm316_vm1 }
 0x15e   :  { %v312_v17 = vsub.f32 1.0, %v311_v14 }
 0x15f   :  { %v298_v18 = vmul.f32 %v433_v11, %v297_v15 }
 0x160   :  { %v313_v21 = vmul.f32 %v435_v12, %v312_v17 }
 0x161   :  { %v299_v23 = vadd.f32 %v433_v11, %v298_v18 }
 0x162   :  { %v314_v25 = vadd.f32 %v435_v12, %v313_v21 }
 0x163   :  { %v303_v26 = vsel %vm302_vm3, %v433_v11, %v299_v23 }
 0x164   :  { %v308_v28 = vsel %vm305_vm5, %v307_v24, %v303_v26  ;;  %v318_v29 = vsel %vm317_vm6, %v435_v12, %v314_v25 }
 0x165   :  { %377 = vmatmul.f32.vlgmr.msra.gmra.mxu2 %v308_v28  ;;  %v323_v30 = vsel %vm320_vm7, %v322_v27, %v318_v29 }
 0x166   :  { %397 = vmatmul.f32.vlgmr.msra.gmra.mxu3 %v323_v30 }
 0x1e8   :  { %v378_v32 = vpop.f32.mrf.mxu2 }
 0x1e9   :  { %v379_v46 = vadd.f32 %v427_v31, %v378_v32  ;;  %v398_v47 = vpop.f32.mrf.mxu3 }
 0x1eb   :  { %v399_v48 = vadd.f32 %v398_v47, %v379_v46 }
 0x1ed   :  { %401 = vst [vmem:[%s892_s6] sm:$0xff] %v399_v48 }

</bundles_post_ra>
